<compile_context>
chip_gen: v7x
topology: tpu7x:2x2x1
jax: 0.10.0
libtpu: 0.0.40
codegen_flags: <defaults>
</compile_context>

<pallas_src>
import jax
import jax.numpy as jnp
from jax.experimental import pallas as pl
from jax.experimental.pallas import tpu as pltpu

# Model hyper-parameters (PyTorch RAMLP defaults).
INPUT_DIM = 11
HIDDEN_DIM = 256
OUTPUT_DIM = 4
NUM_LAYERS = 4
N_BLOCKS = NUM_LAYERS - 1            # 3 x (hidden linear + SE block)
REDUCTION = 16
SE_DIM = HIDDEN_DIM // REDUCTION     # 16
OUT_PAD = 128                        # lane-dense padded output width

# Rows of the packed bias slab [N_BIAS_ROWS, HIDDEN_DIM] (always f32).
ROW_B_IN = 0
ROW_BH = 1
ROW_BS1 = ROW_BH + N_BLOCKS
ROW_BS2 = ROW_BS1 + N_BLOCKS
ROW_B_OUT = ROW_BS2 + N_BLOCKS
N_BIAS_ROWS = ROW_B_OUT + 1          # 11

BATCH = 256                          # demo batch


def _silu(v):
    return v * jax.nn.sigmoid(v)


def ramlp_kernel(x_ref, w_in_ref, wh_ref, ws1_ref, ws2_ref, w_out_ref, b_ref,
                 o_ref):
    # Hoist the bias slab: one [11, 256] load, rows sliced from the value
    # (avoids re-emitting per-use ref slices; review item).
    b = b_ref[...]
    # Matmul operand dtype: bf16 on the fast path, f32 on the validation path.
    wdt = w_in_ref.dtype

    # Input layer + SiLU.  Activations are cast to the weight dtype right
    # before each MXU matmul; accumulation and elementwise math stay f32.
    x = x_ref[...].astype(wdt)
    h = _silu(jnp.dot(x, w_in_ref[...], preferred_element_type=jnp.float32)
              + b[ROW_B_IN:ROW_B_IN + 1, :])

    # 3 x {hidden linear + SE attention + residual}; static Python unroll.
    for l in range(N_BLOCKS):
        residual = h
        h = _silu(
            jnp.dot(h.astype(wdt), wh_ref[l],
                    preferred_element_type=jnp.float32)
            + b[ROW_BH + l:ROW_BH + l + 1, :])
        # SE block (AdaptiveAvgPool1d(1) over a length-1 trailing dim = id).
        se = _silu(
            jnp.dot(h.astype(wdt), ws1_ref[l],
                    preferred_element_type=jnp.float32)
            + b[ROW_BS1 + l:ROW_BS1 + l + 1, :SE_DIM])
        attn = jax.nn.sigmoid(
            jnp.dot(se.astype(wdt), ws2_ref[l],
                    preferred_element_type=jnp.float32)
            + b[ROW_BS2 + l:ROW_BS2 + l + 1, :])
        h = h * attn + residual

    # Output layer (no activation); lane-dense padded to OUT_PAD columns.
    out = (jnp.dot(h.astype(wdt), w_out_ref[...],
                   preferred_element_type=jnp.float32)
           + b[ROW_B_OUT:ROW_B_OUT + 1, :OUT_PAD])
    o_ref[...] = out.astype(o_ref.dtype)


def _rep_spec(shape):
    """Whole-array block, replicated across grid steps."""
    zeros = (0,) * len(shape)
    return pl.BlockSpec(shape, lambda i, _z=zeros: _z)


def _default_num_tiles():
    """2 on dual-TensorCore chips (v7x) so the 'parallel' batch axis is
    sharded across both cores; 1 on single-TC v5e/v6e (splitting the grid
    there only adds per-step overhead with no parallelism to gain)."""
    try:
        kind = jax.devices()[0].device_kind.lower()
    except Exception:
        return 1
    return 2 if "v7" in kind else 1


def ramlp_forward(x, packed, *, num_tiles=1):
    """x: [B, INPUT_DIM] f32.  packed: output of pack_params()."""
    B = x.shape[0]
    assert B % num_tiles == 0, "batch must divide evenly across tiles"
    tile_b = B // num_tiles
    assert tile_b % 8 == 0, "batch tile must be sublane-aligned"

    w_in, wh, ws1, ws2, w_out, biases = packed

    in_specs = [pl.BlockSpec((tile_b, INPUT_DIM), lambda i: (i, 0))]
    in_specs += [_rep_spec(p.shape) for p in (w_in, wh, ws1, ws2, w_out, biases)]
    out_spec = pl.BlockSpec((tile_b, OUT_PAD), lambda i: (i, 0))

    out_padded = pl.pallas_call(
        ramlp_kernel,
        out_shape=jax.ShapeDtypeStruct((B, OUT_PAD), jnp.float32),
        grid_spec=pltpu.PrefetchScalarGridSpec(
            num_scalar_prefetch=0,
            grid=(num_tiles,),
            in_specs=in_specs,
            out_specs=out_spec,
        ),
        compiler_params=pltpu.CompilerParams(
            dimension_semantics=("parallel",)),
    )(x, w_in, wh, ws1, ws2, w_out, biases)

    # Slice the lane-padded output back to the real OUTPUT_DIM.
    # (Call this function under jax.jit so this slice fuses.)
    return out_padded[:, :OUTPUT_DIM]


def init_params(key):
    """Deterministic 'logical' parameters (all Linear weights as [in, out])."""
    keys = iter(jax.random.split(key, 64))

    def lin(d_in, d_out):
        scale = d_in ** -0.5
        w = jax.random.normal(next(keys), (d_in, d_out), jnp.float32) * scale
        b = jax.random.normal(next(keys), (d_out,), jnp.float32) * 0.01
        return w, b

    p = {"wh": [], "bh": [], "ws1": [], "bs1": [], "ws2": [], "bs2": []}
    p["w_in"], p["b_in"] = lin(INPUT_DIM, HIDDEN_DIM)
    for _ in range(N_BLOCKS):
        w, b = lin(HIDDEN_DIM, HIDDEN_DIM)
        p["wh"].append(w); p["bh"].append(b)
        w, b = lin(HIDDEN_DIM, SE_DIM)
        p["ws1"].append(w); p["bs1"].append(b)
        w, b = lin(SE_DIM, HIDDEN_DIM)
        p["ws2"].append(w); p["bs2"].append(b)
    p["w_out"], p["b_out"] = lin(HIDDEN_DIM, OUTPUT_DIM)
    return p


def pack_params(p, matmul_dtype=jnp.bfloat16):
    """Pack the 22 logical tensors into 6 arrays (few large DMAs).

    Weights are stored in `matmul_dtype` (bf16 fast path / f32 validation
    path); biases stay f32 since they feed the f32 accumulator directly.
    """
    wdt = matmul_dtype
    w_in = p["w_in"].astype(wdt)                  # [IN, H]
    wh = jnp.stack(p["wh"]).astype(wdt)           # [3, H, H]
    ws1 = jnp.stack(p["ws1"]).astype(wdt)         # [3, H, SE]
    ws2 = jnp.stack(p["ws2"]).astype(wdt)         # [3, SE, H]
    w_out = jnp.zeros((HIDDEN_DIM, OUT_PAD), wdt)
    w_out = w_out.at[:, :OUTPUT_DIM].set(p["w_out"].astype(wdt))
    biases = jnp.zeros((N_BIAS_ROWS, HIDDEN_DIM), jnp.float32)
    biases = biases.at[ROW_B_IN].set(p["b_in"])
    for l in range(N_BLOCKS):
        biases = biases.at[ROW_BH + l].set(p["bh"][l])
        biases = biases.at[ROW_BS1 + l, :SE_DIM].set(p["bs1"][l])
        biases = biases.at[ROW_BS2 + l].set(p["bs2"][l])
    biases = biases.at[ROW_B_OUT, :OUTPUT_DIM].set(p["b_out"])
    return (w_in, wh, ws1, ws2, w_out, biases)


def ramlp_reference(x, p):
    """Pure-JAX f32 reference of the PyTorch RAMLP forward, for validation."""
    h = _silu(x @ p["w_in"] + p["b_in"])
    for l in range(N_BLOCKS):
        residual = h
        h = _silu(h @ p["wh"][l] + p["bh"][l])
        attn = jax.nn.sigmoid(
            _silu(h @ p["ws1"][l] + p["bs1"][l]) @ p["ws2"][l] + p["bs2"][l])
        h = h * attn + residual
    return h @ p["w_out"] + p["b_out"]


if __name__ == "__main__":
    key = jax.random.PRNGKey(0)
    k_x, k_p = jax.random.split(key)

    x = jax.random.normal(k_x, (BATCH, INPUT_DIM), jnp.float32)
    params = init_params(k_p)

    num_tiles = _default_num_tiles()
    if BATCH % (num_tiles * 8) != 0:
        num_tiles = 1

    # jit the wrapper so the [:, :OUTPUT_DIM] slice fuses with the kernel.
    fwd = jax.jit(lambda xx, pk: ramlp_forward(xx, pk, num_tiles=num_tiles))

    ref = ramlp_reference(x, params)

    # 1) Structural correctness: f32 matmul path against tight tolerance.
    out_f32 = jax.block_until_ready(fwd(x, pack_params(params, jnp.float32)))
    assert out_f32.shape == (BATCH, OUTPUT_DIM)
    err_f32 = jnp.max(jnp.abs(out_f32 - ref))
    assert jnp.allclose(out_f32, ref, atol=2e-3, rtol=2e-3), \
        f"f32 path max abs err = {err_f32}"

    # 2) Fast path: bf16 matmul operands, f32 accumulation/elementwise.
    #    bf16 rounding through 11 chained matmuls → looser tolerance.
    out_bf16 = jax.block_until_ready(fwd(x, pack_params(params, jnp.bfloat16)))
    assert out_bf16.shape == (BATCH, OUTPUT_DIM)
    err_bf16 = jnp.max(jnp.abs(out_bf16 - ref))
    assert jnp.allclose(out_bf16, ref, atol=5e-2, rtol=5e-2), \
        f"bf16 path max abs err = {err_bf16}"

    print("KERNEL_OK")
</pallas_src>

<mosaic_0001>
module attributes {stable_mosaic.version = 11 : i64} {
  func.func @ramlp_kernel(%arg0: i32, %arg1: memref<256x11xf32, #tpu.memory_space<vmem>>, %arg2: memref<11x256xf32, #tpu.memory_space<vmem>>, %arg3: memref<3x256x256xf32, #tpu.memory_space<vmem>>, %arg4: memref<3x256x16xf32, #tpu.memory_space<vmem>>, %arg5: memref<3x16x256xf32, #tpu.memory_space<vmem>>, %arg6: memref<256x128xf32, #tpu.memory_space<vmem>>, %arg7: memref<11x256xf32, #tpu.memory_space<vmem>>, %arg8: memref<256x128xf32, #tpu.memory_space<vmem>>) attributes {dimension_semantics = [#tpu.dimension_semantics<parallel>], iteration_bounds = array<i64: 1>, scalar_prefetch = 0 : i64, scratch_operands = 0 : i64, tpu.core_type = #tpu.core_type<tc>, window_params = [{transform_indices = @transform_0, window_bounds = array<i64: 256, 11>}, {pipeline_mode = #tpu.pipeline_mode<synchronous>, transform_indices = @transform_1, window_bounds = array<i64: 11, 256>}, {pipeline_mode = #tpu.pipeline_mode<synchronous>, transform_indices = @transform_2, window_bounds = array<i64: 3, 256, 256>}, {pipeline_mode = #tpu.pipeline_mode<synchronous>, transform_indices = @transform_3, window_bounds = array<i64: 3, 256, 16>}, {pipeline_mode = #tpu.pipeline_mode<synchronous>, transform_indices = @transform_4, window_bounds = array<i64: 3, 16, 256>}, {pipeline_mode = #tpu.pipeline_mode<synchronous>, transform_indices = @transform_5, window_bounds = array<i64: 256, 128>}, {pipeline_mode = #tpu.pipeline_mode<synchronous>, transform_indices = @transform_6, window_bounds = array<i64: 11, 256>}, {transform_indices = @transform_7, window_bounds = array<i64: 256, 128>}]} {
    %c0 = arith.constant 0 : index
    %c0_0 = arith.constant 0 : index
    %0 = vector.load %arg7[%c0, %c0_0] : memref<11x256xf32, #tpu.memory_space<vmem>>, vector<11x256xf32>
    %c0_1 = arith.constant 0 : index
    %c0_2 = arith.constant 0 : index
    %1 = vector.load %arg1[%c0_1, %c0_2] : memref<256x11xf32, #tpu.memory_space<vmem>>, vector<256x11xf32>
    %c0_3 = arith.constant 0 : index
    %c0_4 = arith.constant 0 : index
    %2 = vector.load %arg2[%c0_3, %c0_4] : memref<11x256xf32, #tpu.memory_space<vmem>>, vector<11x256xf32>
    %cst = arith.constant dense<0.000000e+00> : vector<256x256xf32>
    %3 = tpu.matmul %1, %2, %cst {dimension_numbers = #tpu.dot_dimension_numbers<[1], [0], [0], [1], [0, 0, 1, 1], [], []>} : vector<256x11xf32>, vector<11x256xf32>, vector<256x256xf32> -> vector<256x256xf32>
    %4 = vector.extract_strided_slice %0 {offsets = [0, 0], sizes = [1, 256], strides = [1, 1]} : vector<11x256xf32> to vector<1x256xf32>
    %5 = vector.broadcast %4 : vector<1x256xf32> to vector<256x256xf32>
    %6 = arith.addf %3, %5 : vector<256x256xf32>
    %7 = arith.negf %6 : vector<256x256xf32>
    %8 = math.exp %7 : vector<256x256xf32>
    %cst_5 = arith.constant 1.000000e+00 : f32
    %9 = vector.broadcast %cst_5 : f32 to vector<256x256xf32>
    %10 = arith.addf %9, %8 : vector<256x256xf32>
    %11 = arith.divf %9, %10 : vector<256x256xf32>
    %12 = arith.mulf %6, %11 : vector<256x256xf32>
    %c0_6 = arith.constant 0 : index
    %c0_7 = arith.constant 0 : index
    %c0_8 = arith.constant 0 : index
    %13 = vector.load %arg3[%c0_6, %c0_7, %c0_8] : memref<3x256x256xf32, #tpu.memory_space<vmem>>, vector<1x256x256xf32>
    %14 = vector.shape_cast %13 : vector<1x256x256xf32> to vector<256x256xf32>
    %cst_9 = arith.constant dense<0.000000e+00> : vector<256x256xf32>
    %15 = tpu.matmul %12, %14, %cst_9 {dimension_numbers = #tpu.dot_dimension_numbers<[1], [0], [0], [1], [0, 0, 1, 1], [], []>} : vector<256x256xf32>, vector<256x256xf32>, vector<256x256xf32> -> vector<256x256xf32>
    %16 = vector.extract_strided_slice %0 {offsets = [1, 0], sizes = [1, 256], strides = [1, 1]} : vector<11x256xf32> to vector<1x256xf32>
    %17 = vector.broadcast %16 : vector<1x256xf32> to vector<256x256xf32>
    %18 = arith.addf %15, %17 : vector<256x256xf32>
    %19 = arith.negf %18 : vector<256x256xf32>
    %20 = math.exp %19 : vector<256x256xf32>
    %cst_10 = arith.constant 1.000000e+00 : f32
    %21 = vector.broadcast %cst_10 : f32 to vector<256x256xf32>
    %22 = arith.addf %21, %20 : vector<256x256xf32>
    %23 = arith.divf %21, %22 : vector<256x256xf32>
    %24 = arith.mulf %18, %23 : vector<256x256xf32>
    %c0_11 = arith.constant 0 : index
    %c0_12 = arith.constant 0 : index
    %c0_13 = arith.constant 0 : index
    %25 = vector.load %arg4[%c0_11, %c0_12, %c0_13] : memref<3x256x16xf32, #tpu.memory_space<vmem>>, vector<1x256x16xf32>
    %26 = vector.shape_cast %25 : vector<1x256x16xf32> to vector<256x16xf32>
    %cst_14 = arith.constant dense<0.000000e+00> : vector<256x16xf32>
    %27 = tpu.matmul %24, %26, %cst_14 {dimension_numbers = #tpu.dot_dimension_numbers<[1], [0], [0], [1], [0, 0, 1, 1], [], []>} : vector<256x256xf32>, vector<256x16xf32>, vector<256x16xf32> -> vector<256x16xf32>
    %28 = vector.extract_strided_slice %0 {offsets = [4, 0], sizes = [1, 16], strides = [1, 1]} : vector<11x256xf32> to vector<1x16xf32>
    %29 = vector.broadcast %28 : vector<1x16xf32> to vector<256x16xf32>
    %30 = arith.addf %27, %29 : vector<256x16xf32>
    %31 = arith.negf %30 : vector<256x16xf32>
    %32 = math.exp %31 : vector<256x16xf32>
    %cst_15 = arith.constant 1.000000e+00 : f32
    %33 = vector.broadcast %cst_15 : f32 to vector<256x16xf32>
    %34 = arith.addf %33, %32 : vector<256x16xf32>
    %35 = arith.divf %33, %34 : vector<256x16xf32>
    %36 = arith.mulf %30, %35 : vector<256x16xf32>
    %c0_16 = arith.constant 0 : index
    %c0_17 = arith.constant 0 : index
    %c0_18 = arith.constant 0 : index
    %37 = vector.load %arg5[%c0_16, %c0_17, %c0_18] : memref<3x16x256xf32, #tpu.memory_space<vmem>>, vector<1x16x256xf32>
    %38 = vector.shape_cast %37 : vector<1x16x256xf32> to vector<16x256xf32>
    %cst_19 = arith.constant dense<0.000000e+00> : vector<256x256xf32>
    %39 = tpu.matmul %36, %38, %cst_19 {dimension_numbers = #tpu.dot_dimension_numbers<[1], [0], [0], [1], [0, 0, 1, 1], [], []>} : vector<256x16xf32>, vector<16x256xf32>, vector<256x256xf32> -> vector<256x256xf32>
    %40 = vector.extract_strided_slice %0 {offsets = [7, 0], sizes = [1, 256], strides = [1, 1]} : vector<11x256xf32> to vector<1x256xf32>
    %41 = vector.broadcast %40 : vector<1x256xf32> to vector<256x256xf32>
    %42 = arith.addf %39, %41 : vector<256x256xf32>
    %43 = arith.negf %42 : vector<256x256xf32>
    %44 = math.exp %43 : vector<256x256xf32>
    %cst_20 = arith.constant 1.000000e+00 : f32
    %45 = vector.broadcast %cst_20 : f32 to vector<256x256xf32>
    %46 = arith.addf %45, %44 : vector<256x256xf32>
    %47 = arith.divf %45, %46 : vector<256x256xf32>
    %48 = arith.mulf %24, %47 : vector<256x256xf32>
    %49 = arith.addf %48, %12 : vector<256x256xf32>
    %c1 = arith.constant 1 : index
    %c0_21 = arith.constant 0 : index
    %c0_22 = arith.constant 0 : index
    %50 = vector.load %arg3[%c1, %c0_21, %c0_22] : memref<3x256x256xf32, #tpu.memory_space<vmem>>, vector<1x256x256xf32>
    %51 = vector.shape_cast %50 : vector<1x256x256xf32> to vector<256x256xf32>
    %cst_23 = arith.constant dense<0.000000e+00> : vector<256x256xf32>
    %52 = tpu.matmul %49, %51, %cst_23 {dimension_numbers = #tpu.dot_dimension_numbers<[1], [0], [0], [1], [0, 0, 1, 1], [], []>} : vector<256x256xf32>, vector<256x256xf32>, vector<256x256xf32> -> vector<256x256xf32>
    %53 = vector.extract_strided_slice %0 {offsets = [2, 0], sizes = [1, 256], strides = [1, 1]} : vector<11x256xf32> to vector<1x256xf32>
    %54 = vector.broadcast %53 : vector<1x256xf32> to vector<256x256xf32>
    %55 = arith.addf %52, %54 : vector<256x256xf32>
    %56 = arith.negf %55 : vector<256x256xf32>
    %57 = math.exp %56 : vector<256x256xf32>
    %cst_24 = arith.constant 1.000000e+00 : f32
    %58 = vector.broadcast %cst_24 : f32 to vector<256x256xf32>
    %59 = arith.addf %58, %57 : vector<256x256xf32>
    %60 = arith.divf %58, %59 : vector<256x256xf32>
    %61 = arith.mulf %55, %60 : vector<256x256xf32>
    %c1_25 = arith.constant 1 : index
    %c0_26 = arith.constant 0 : index
    %c0_27 = arith.constant 0 : index
    %62 = vector.load %arg4[%c1_25, %c0_26, %c0_27] : memref<3x256x16xf32, #tpu.memory_space<vmem>>, vector<1x256x16xf32>
    %63 = vector.shape_cast %62 : vector<1x256x16xf32> to vector<256x16xf32>
    %cst_28 = arith.constant dense<0.000000e+00> : vector<256x16xf32>
    %64 = tpu.matmul %61, %63, %cst_28 {dimension_numbers = #tpu.dot_dimension_numbers<[1], [0], [0], [1], [0, 0, 1, 1], [], []>} : vector<256x256xf32>, vector<256x16xf32>, vector<256x16xf32> -> vector<256x16xf32>
    %65 = vector.extract_strided_slice %0 {offsets = [5, 0], sizes = [1, 16], strides = [1, 1]} : vector<11x256xf32> to vector<1x16xf32>
    %66 = vector.broadcast %65 : vector<1x16xf32> to vector<256x16xf32>
    %67 = arith.addf %64, %66 : vector<256x16xf32>
    %68 = arith.negf %67 : vector<256x16xf32>
    %69 = math.exp %68 : vector<256x16xf32>
    %cst_29 = arith.constant 1.000000e+00 : f32
    %70 = vector.broadcast %cst_29 : f32 to vector<256x16xf32>
    %71 = arith.addf %70, %69 : vector<256x16xf32>
    %72 = arith.divf %70, %71 : vector<256x16xf32>
    %73 = arith.mulf %67, %72 : vector<256x16xf32>
    %c1_30 = arith.constant 1 : index
    %c0_31 = arith.constant 0 : index
    %c0_32 = arith.constant 0 : index
    %74 = vector.load %arg5[%c1_30, %c0_31, %c0_32] : memref<3x16x256xf32, #tpu.memory_space<vmem>>, vector<1x16x256xf32>
    %75 = vector.shape_cast %74 : vector<1x16x256xf32> to vector<16x256xf32>
    %cst_33 = arith.constant dense<0.000000e+00> : vector<256x256xf32>
    %76 = tpu.matmul %73, %75, %cst_33 {dimension_numbers = #tpu.dot_dimension_numbers<[1], [0], [0], [1], [0, 0, 1, 1], [], []>} : vector<256x16xf32>, vector<16x256xf32>, vector<256x256xf32> -> vector<256x256xf32>
    %77 = vector.extract_strided_slice %0 {offsets = [8, 0], sizes = [1, 256], strides = [1, 1]} : vector<11x256xf32> to vector<1x256xf32>
    %78 = vector.broadcast %77 : vector<1x256xf32> to vector<256x256xf32>
    %79 = arith.addf %76, %78 : vector<256x256xf32>
    %80 = arith.negf %79 : vector<256x256xf32>
    %81 = math.exp %80 : vector<256x256xf32>
    %cst_34 = arith.constant 1.000000e+00 : f32
    %82 = vector.broadcast %cst_34 : f32 to vector<256x256xf32>
    %83 = arith.addf %82, %81 : vector<256x256xf32>
    %84 = arith.divf %82, %83 : vector<256x256xf32>
    %85 = arith.mulf %61, %84 : vector<256x256xf32>
    %86 = arith.addf %85, %49 : vector<256x256xf32>
    %c2 = arith.constant 2 : index
    %c0_35 = arith.constant 0 : index
    %c0_36 = arith.constant 0 : index
    %87 = vector.load %arg3[%c2, %c0_35, %c0_36] : memref<3x256x256xf32, #tpu.memory_space<vmem>>, vector<1x256x256xf32>
    %88 = vector.shape_cast %87 : vector<1x256x256xf32> to vector<256x256xf32>
    %cst_37 = arith.constant dense<0.000000e+00> : vector<256x256xf32>
    %89 = tpu.matmul %86, %88, %cst_37 {dimension_numbers = #tpu.dot_dimension_numbers<[1], [0], [0], [1], [0, 0, 1, 1], [], []>} : vector<256x256xf32>, vector<256x256xf32>, vector<256x256xf32> -> vector<256x256xf32>
    %90 = vector.extract_strided_slice %0 {offsets = [3, 0], sizes = [1, 256], strides = [1, 1]} : vector<11x256xf32> to vector<1x256xf32>
    %91 = vector.broadcast %90 : vector<1x256xf32> to vector<256x256xf32>
    %92 = arith.addf %89, %91 : vector<256x256xf32>
    %93 = arith.negf %92 : vector<256x256xf32>
    %94 = math.exp %93 : vector<256x256xf32>
    %cst_38 = arith.constant 1.000000e+00 : f32
    %95 = vector.broadcast %cst_38 : f32 to vector<256x256xf32>
    %96 = arith.addf %95, %94 : vector<256x256xf32>
    %97 = arith.divf %95, %96 : vector<256x256xf32>
    %98 = arith.mulf %92, %97 : vector<256x256xf32>
    %c2_39 = arith.constant 2 : index
    %c0_40 = arith.constant 0 : index
    %c0_41 = arith.constant 0 : index
    %99 = vector.load %arg4[%c2_39, %c0_40, %c0_41] : memref<3x256x16xf32, #tpu.memory_space<vmem>>, vector<1x256x16xf32>
    %100 = vector.shape_cast %99 : vector<1x256x16xf32> to vector<256x16xf32>
    %cst_42 = arith.constant dense<0.000000e+00> : vector<256x16xf32>
    %101 = tpu.matmul %98, %100, %cst_42 {dimension_numbers = #tpu.dot_dimension_numbers<[1], [0], [0], [1], [0, 0, 1, 1], [], []>} : vector<256x256xf32>, vector<256x16xf32>, vector<256x16xf32> -> vector<256x16xf32>
    %102 = vector.extract_strided_slice %0 {offsets = [6, 0], sizes = [1, 16], strides = [1, 1]} : vector<11x256xf32> to vector<1x16xf32>
    %103 = vector.broadcast %102 : vector<1x16xf32> to vector<256x16xf32>
    %104 = arith.addf %101, %103 : vector<256x16xf32>
    %105 = arith.negf %104 : vector<256x16xf32>
    %106 = math.exp %105 : vector<256x16xf32>
    %cst_43 = arith.constant 1.000000e+00 : f32
    %107 = vector.broadcast %cst_43 : f32 to vector<256x16xf32>
    %108 = arith.addf %107, %106 : vector<256x16xf32>
    %109 = arith.divf %107, %108 : vector<256x16xf32>
    %110 = arith.mulf %104, %109 : vector<256x16xf32>
    %c2_44 = arith.constant 2 : index
    %c0_45 = arith.constant 0 : index
    %c0_46 = arith.constant 0 : index
    %111 = vector.load %arg5[%c2_44, %c0_45, %c0_46] : memref<3x16x256xf32, #tpu.memory_space<vmem>>, vector<1x16x256xf32>
    %112 = vector.shape_cast %111 : vector<1x16x256xf32> to vector<16x256xf32>
    %cst_47 = arith.constant dense<0.000000e+00> : vector<256x256xf32>
    %113 = tpu.matmul %110, %112, %cst_47 {dimension_numbers = #tpu.dot_dimension_numbers<[1], [0], [0], [1], [0, 0, 1, 1], [], []>} : vector<256x16xf32>, vector<16x256xf32>, vector<256x256xf32> -> vector<256x256xf32>
    %114 = vector.extract_strided_slice %0 {offsets = [9, 0], sizes = [1, 256], strides = [1, 1]} : vector<11x256xf32> to vector<1x256xf32>
    %115 = vector.broadcast %114 : vector<1x256xf32> to vector<256x256xf32>
    %116 = arith.addf %113, %115 : vector<256x256xf32>
    %117 = arith.negf %116 : vector<256x256xf32>
    %118 = math.exp %117 : vector<256x256xf32>
    %cst_48 = arith.constant 1.000000e+00 : f32
    %119 = vector.broadcast %cst_48 : f32 to vector<256x256xf32>
    %120 = arith.addf %119, %118 : vector<256x256xf32>
    %121 = arith.divf %119, %120 : vector<256x256xf32>
    %122 = arith.mulf %98, %121 : vector<256x256xf32>
    %123 = arith.addf %122, %86 : vector<256x256xf32>
    %c0_49 = arith.constant 0 : index
    %c0_50 = arith.constant 0 : index
    %124 = vector.load %arg6[%c0_49, %c0_50] : memref<256x128xf32, #tpu.memory_space<vmem>>, vector<256x128xf32>
    %cst_51 = arith.constant dense<0.000000e+00> : vector<256x128xf32>
    %125 = tpu.matmul %123, %124, %cst_51 {dimension_numbers = #tpu.dot_dimension_numbers<[1], [0], [0], [1], [0, 0, 1, 1], [], []>} : vector<256x256xf32>, vector<256x128xf32>, vector<256x128xf32> -> vector<256x128xf32>
    %126 = vector.extract_strided_slice %0 {offsets = [10, 0], sizes = [1, 128], strides = [1, 1]} : vector<11x256xf32> to vector<1x128xf32>
    %127 = vector.broadcast %126 : vector<1x128xf32> to vector<256x128xf32>
    %128 = arith.addf %125, %127 : vector<256x128xf32>
    %c0_52 = arith.constant 0 : index
    %c0_53 = arith.constant 0 : index
    %129 = vector.load %arg8[%c0_52, %c0_53] : memref<256x128xf32, #tpu.memory_space<vmem>>, vector<256x128xf32>
    tpu.vector_store %arg8[%c0_52, %c0_53], %128 {strides = array<i32>} : memref<256x128xf32, #tpu.memory_space<vmem>>, vector<256x128xf32>,
    return
  }
  func.func @transform_0(%arg0: i32) -> (i32, i32) {
    %c0_i32 = arith.constant 0 : i32
    %c0_i32_0 = arith.constant 0 : i32
    return %arg0, %c0_i32 : i32, i32
  }
  func.func @transform_1(%arg0: i32) -> (i32, i32) {
    %c0_i32 = arith.constant 0 : i32
    %c0_i32_0 = arith.constant 0 : i32
    %c0_i32_1 = arith.constant 0 : i32
    return %c0_i32, %c0_i32_0 : i32, i32
  }
  func.func @transform_2(%arg0: i32) -> (i32, i32, i32) {
    %c0_i32 = arith.constant 0 : i32
    %c0_i32_0 = arith.constant 0 : i32
    %c0_i32_1 = arith.constant 0 : i32
    %c0_i32_2 = arith.constant 0 : i32
    return %c0_i32, %c0_i32_0, %c0_i32_1 : i32, i32, i32
  }
  func.func @transform_3(%arg0: i32) -> (i32, i32, i32) {
    %c0_i32 = arith.constant 0 : i32
    %c0_i32_0 = arith.constant 0 : i32
    %c0_i32_1 = arith.constant 0 : i32
    %c0_i32_2 = arith.constant 0 : i32
    return %c0_i32, %c0_i32_0, %c0_i32_1 : i32, i32, i32
  }
  func.func @transform_4(%arg0: i32) -> (i32, i32, i32) {
    %c0_i32 = arith.constant 0 : i32
    %c0_i32_0 = arith.constant 0 : i32
    %c0_i32_1 = arith.constant 0 : i32
    %c0_i32_2 = arith.constant 0 : i32
    return %c0_i32, %c0_i32_0, %c0_i32_1 : i32, i32, i32
  }
  func.func @transform_5(%arg0: i32) -> (i32, i32) {
    %c0_i32 = arith.constant 0 : i32
    %c0_i32_0 = arith.constant 0 : i32
    %c0_i32_1 = arith.constant 0 : i32
    return %c0_i32, %c0_i32_0 : i32, i32
  }
  func.func @transform_6(%arg0: i32) -> (i32, i32) {
    %c0_i32 = arith.constant 0 : i32
    %c0_i32_0 = arith.constant 0 : i32
    %c0_i32_1 = arith.constant 0 : i32
    return %c0_i32, %c0_i32_0 : i32, i32
  }
  func.func @transform_7(%arg0: i32) -> (i32, i32) {
    %c0_i32 = arith.constant 0 : i32
    %c0_i32_0 = arith.constant 0 : i32
    return %arg0, %c0_i32 : i32, i32
  }
}

</mosaic_0001>

<bundles_post_ra>
// kernel: _lambda_.1
= control target key start
LH: loop header
LB: loop body
LE: loop exit
PB: predicated region body
PF: predicated region fallthrough
CT: control target
= control target key end

     0   :  { %12 = vsyncpa [#allocation3], 0  ;;  %s10989_s24 = smov [#allocation2]   ;;  %s15564_s0 = inlined_call_operand.vmem [shape: f32[256,11], index: 0, kind: input, shape index: {}]   ;;  %s15565_s1 = inlined_call_operand.vmem [shape: f32[11,256], index: 1, kind: input, shape index: {}]   ;;  %s15566_s2 = inlined_call_operand.hbm [shape: f32[3,256,256], index: 2, kind: input, shape index: {}]   ;;  %s15567_s3 = inlined_call_operand.vmem [shape: f32[3,256,16], index: 3, kind: input, shape index: {}]   ;;  %s15568_s4 = inlined_call_operand.vmem [shape: f32[3,16,256], index: 4, kind: input, shape index: {}]   ;;  %s15569_s5 = inlined_call_operand.vmem [shape: f32[256,128], index: 5, kind: input, shape index: {}]   ;;  %s15570_s6 = inlined_call_operand.vmem [shape: f32[11,256], index: 6, kind: input, shape index: {}]   ;;  %s15571_s7 = inlined_call_operand.vmem [shape: f32[256,128], index: 7, kind: output, shape index: {}]  }
   0x1   :  { %s22_s25 = sshll.u32 %s10989_s24, 4  ;;  %s10965_s28 = scalar_lea.hbm %s15566_s2, 24576  ;;  %s23_s25 = int_to_ptr.vmem [resolvable:$true] %s22_s25 }
   0x2   :  { %p10966_p0 = scmp.ne.s32.totalorder %s15566_s2, %s10965_s28  ;;  %p10969_p1 = scmp.lt.u32.totalorder %s10965_s28, %s15566_s2 }
   0x4   :  { %p10971_p2 = pnand %p10969_p1, %p10966_p0 }
   0x6   :  { %10974 = shalt.err (!%p10971_p2)
}
   0x7   :  { %s10975_s10 = scalar_lea.vmem %s23_s25, 24576  ;;  %p10980_p4 = scmp.lt.s32.totalorder %s23_s25, %s23_s25 }
   0x8   :  { %p10976_p3 = scmp.ne.s32.totalorder %s23_s25, %s10975_s10  ;;  %p10981_p5 = scmp.lt.s32.totalorder %s10975_s10, %s10975_s10 }
   0xa   :  { %p10982_p6 = por %p10981_p5, %p10980_p4 }
   0xc   :  { %p10983_p7 = pnand %p10982_p6, %p10976_p3 }
   0xe   :  { %10986 = shalt.err (!%p10983_p7)
}
   0xf   :  { %s10990_s11 = smov 256   ;;  %s10991_s12 = smov 16  }
  0x10   :  { %28 = dma.hbm_to_vmem [thread:$0]  %s15566_s2, 24576, %s23_s25, [#allocation3], %s10990_s11, %s10990_s11, %s10991_s12  }
  0x11   :  { %10987 = dma.done.wait [#allocation3], 24576  }
  0x12   :  { %10988 = vsyncadd [#allocation3], 4294942720  ;;  %v15572_v0 = vmov 0.0   ;;  %vm185_vm0 = vcmask 1042432   ;;  %vm10993_vm1 = vmmov 1   ;;  %v77_v1 = vld [vmem:[%s15565_s1 + $0x8] sm:$0xff] }
  0x13   :  { %256 = vmatprep.mubr.f32.mxu0 %v15572_v0  ;;  %352 = vmatprep.mubr.f32.mxu1 %v15572_v0  ;;  %vm8366_vm2 = vmpackc.low %vm185_vm0, %vm10993_vm1  ;;  %v79_v2 = vld [vmem:[%s15565_s1 + $0x18] sm:$0x7]  ;;  %v76_v3 = vld [vmem:[%s15565_s1] sm:$0xff]  ;;  %vm88_vm3 = vcmask 89088   ;;  %vm2171_vm4 = vcmask 130048  }
  0x14   :  { %v8365_v4 = vpack.c.bf16 %v79_v2, %v77_v1  ;;  %v78_v5 = vld [vmem:[%s15565_s1 + $0x10] sm:$0x7]  ;;  %v44_v7 = vld [vmem:[%s15564_s0] sm:$0xff]  ;;  %v45_v9 = vld [vmem:[%s15564_s0 + $0x8] sm:$0xff] }
  0x15   :  { %v8368_v6 = vpack.c.bf16 %v78_v5, %v76_v3  ;;  %v60_v8 = vld [vmem:[%s15564_s0 + $0x80] sm:$0xff]  ;;  %v61_v10 = vld [vmem:[%s15564_s0 + $0x88] sm:$0xff]  ;;  %v46_v11 = vld [vmem:[%s15564_s0 + $0x10] sm:$0xff] }
  0x16   :  { %8367 = vmatprep.subr.msk.bf16.mxu0 %vm8366_vm2, %v8365_v4  ;;  %8767 = vmatprep.subr.msk.bf16.mxu1 %vm8366_vm2, %v8365_v4  ;;  %v62_v12 = vld [vmem:[%s15564_s0 + $0x90] sm:$0xff]  ;;  %v898_v13 = vld [vmem:[#allocation2 + $0x8] sm:$0xff]  ;;  %v900_v14 = vld [vmem:[#allocation2 + $0x18] sm:$0xff] }
  0x17   :  { %8370 = vmatpush1.bf16.msk.msra.mxu0 %vm8366_vm2, %v8368_v6  ;;  %8768 = vmatpush1.bf16.msk.msra.mxu1 %vm8366_vm2, %v8368_v6  ;;  %v897_v15 = vld [vmem:[#allocation2] sm:$0xff]  ;;  %v8371_v16 = vpack.c.bf16 %v900_v14, %v898_v13  ;;  %v899_v17 = vld [vmem:[#allocation2 + $0x10] sm:$0xff]  ;;  %v902_v19 = vld [vmem:[#allocation2 + $0x28] sm:$0xff] }
  0x18   :  { %v8373_v18 = vpack.c.bf16 %v899_v17, %v897_v15  ;;  %v904_v20 = vld [vmem:[#allocation2 + $0x38] sm:$0xff]  ;;  %v901_v21 = vld [vmem:[#allocation2 + $0x20] sm:$0xff]  ;;  %v903_v22 = vld [vmem:[#allocation2 + $0x30] sm:$0xff] }
  0x19   :  { %v47_v23 = vld [vmem:[%s15564_s0 + $0x18] sm:$0xff]  ;;  %8372 = vmatprep.subr.bf16.mxu1 %v8371_v16  ;;  %v8375_v25 = vpack.c.bf16 %v904_v20, %v902_v19  ;;  %v8377_v26 = vpack.c.bf16 %v903_v22, %v901_v21  ;;  %v906_v27 = vld [vmem:[#allocation2 + $0x48] sm:$0xff]  ;;  %v905_v29 = vld [vmem:[#allocation2 + $0x40] sm:$0xff] }
  0x1a   :  { %7621 = vmatmul.mubr.msk.f32.vlgmr.msra.gmra.mrb[0].mxu0 %vm88_vm3, %v44_v7  ;;  %7637 = vmatmul.mubr.msk.f32.vlgmr.msra.gmra.mrb[0].mxu1 %vm88_vm3, %v60_v8  ;;  %v63_v24 = vld [vmem:[%s15564_s0 + $0x98] sm:$0xff]  ;;  %v907_v30 = vld [vmem:[#allocation2 + $0x50] sm:$0xff]  ;;  %v48_v31 = vld [vmem:[%s15564_s0 + $0x20] sm:$0xff] }
  0x1b   :  { %262 = vmatprep.mubr.f32.mxu0 %v15572_v0  ;;  %358 = vmatprep.mubr.f32.mxu1 %v15572_v0  ;;  %v908_v28 = vld [vmem:[#allocation2 + $0x58] sm:$0xff]  ;;  %v64_v32 = vld [vmem:[%s15564_s0 + $0xa0] sm:$0xff]  ;;  %v8381_v34 = vpack.c.bf16 %v907_v30, %v905_v29  ;;  %v910_v35 = vld [vmem:[#allocation2 + $0x68] sm:$0xff] }
  0x1c   :  { %8374 = vmatpush1.bf16.msra.mxu1 %v8373_v18  ;;  %v8379_v33 = vpack.c.bf16 %v908_v28, %v906_v27  ;;  %v912_v36 = vld [vmem:[#allocation2 + $0x78] sm:$0xff]  ;;  %v909_v37 = vld [vmem:[#allocation2 + $0x60] sm:$0xff]  ;;  %v911_v38 = vld [vmem:[#allocation2 + $0x70] sm:$0xff] }
  0x1d   :  { %8376 = vmatprep.subr.bf16.mxu1 %v8375_v25  ;;  %v49_v39 = vld [vmem:[%s15564_s0 + $0x28] sm:$0xff]  ;;  %v8383_v41 = vpack.c.bf16 %v912_v36, %v910_v35  ;;  %v8385_v42 = vpack.c.bf16 %v911_v38, %v909_v37  ;;  %v916_v44 = vld [vmem:[#allocation2 + $0x98] sm:$0xff]  ;;  %v913_v45 = vld [vmem:[#allocation2 + $0x80] sm:$0xff] }
  0x1e   :  { %7622 = vmatmul.mubr.msk.f32.gmra.mrb[2].mxu0 %vm88_vm3, %v45_v9  ;;  %7638 = vmatmul.mubr.msk.f32.gmra.mrb[2].mxu1 %vm88_vm3, %v61_v10  ;;  %v65_v40 = vld [vmem:[%s15564_s0 + $0xa8] sm:$0xff]  ;;  %v915_v46 = vld [vmem:[#allocation2 + $0x90] sm:$0xff]  ;;  %v920_v52 = vld [vmem:[#allocation2 + $0xb8] sm:$0xff] }
  0x1f   :  { %268 = vmatprep.mubr.f32.mxu0 %v15572_v0  ;;  %364 = vmatprep.mubr.f32.mxu1 %v15572_v0  ;;  %v914_v43 = vld [vmem:[#allocation2 + $0x88] sm:$0xff]  ;;  %v50_v47 = vld [vmem:[%s15564_s0 + $0x30] sm:$0xff]  ;;  %v8389_v50 = vpack.c.bf16 %v915_v46, %v913_v45  ;;  %v917_v53 = vld [vmem:[#allocation2 + $0xa0] sm:$0xff] }
  0x20   :  { %8378 = vmatpush1.bf16.msra.mxu1 %v8377_v26  ;;  %v66_v48 = vld [vmem:[%s15564_s0 + $0xb0] sm:$0xff]  ;;  %v8387_v49 = vpack.c.bf16 %v916_v44, %v914_v43  ;;  %v918_v51 = vld [vmem:[#allocation2 + $0xa8] sm:$0xff]  ;;  %v51_v55 = vld [vmem:[%s15564_s0 + $0x38] sm:$0xff] }
  0x21   :  { %8380 = vmatprep.subr.bf16.mxu1 %v8379_v33  ;;  %v919_v54 = vld [vmem:[#allocation2 + $0xb0] sm:$0xff]  ;;  %v67_v56 = vld [vmem:[%s15564_s0 + $0xb8] sm:$0xff]  ;;  %v8391_v57 = vpack.c.bf16 %v920_v52, %v918_v51  ;;  %v922_v59 = vld [vmem:[#allocation2 + $0xc8] sm:$0xff] }
  0x22   :  { %7623 = vmatmul.mubr.msk.f32.gmra.mrb[4].mxu0 %vm88_vm3, %v46_v11  ;;  %7639 = vmatmul.mubr.msk.f32.gmra.mrb[4].mxu1 %vm88_vm3, %v62_v12  ;;  %v8393_v58 = vpack.c.bf16 %v919_v54, %v917_v53  ;;  %v924_v60 = vld [vmem:[#allocation2 + $0xd8] sm:$0xff]  ;;  %v921_v61 = vld [vmem:[#allocation2 + $0xc0] sm:$0xff]  ;;  %v923_v62 = vld [vmem:[#allocation2 + $0xd0] sm:$0xff] }
  0x23   :  { %274 = vmatprep.mubr.f32.mxu0 %v15572_v0  ;;  %370 = vmatprep.mubr.f32.mxu1 %v15572_v0  ;;  %v52_v63 = vld [vmem:[%s15564_s0 + $0x40] sm:$0xff]  ;;  %v8395_v2 = vpack.c.bf16 %v924_v60, %v922_v59  ;;  %v8397_v3 = vpack.c.bf16 %v923_v62, %v921_v61  ;;  %v926_v4 = vld [vmem:[#allocation2 + $0xe8] sm:$0xff]  ;;  %v928_v5 = vld [vmem:[#allocation2 + $0xf8] sm:$0xff] }
  0x24   :  { %8382 = vmatpush1.bf16.msra.mxu1 %v8381_v34  ;;  %v68_v1 = vld [vmem:[%s15564_s0 + $0xc0] sm:$0xff]  ;;  %v927_v7 = vld [vmem:[#allocation2 + $0xf0] sm:$0xff]  ;;  %v53_v8 = vld [vmem:[%s15564_s0 + $0x48] sm:$0xff]  ;;  %v8399_v10 = vpack.c.bf16 %v928_v5, %v926_v4 }
  0x25   :  { %8384 = vmatprep.subr.bf16.mxu1 %v8383_v41  ;;  %v925_v6 = vld [vmem:[#allocation2 + $0xe0] sm:$0xff]  ;;  %v69_v9 = vld [vmem:[%s15564_s0 + $0xc8] sm:$0xff]  ;;  %v54_v12 = vld [vmem:[%s15564_s0 + $0x50] sm:$0xff] }
  0x26   :  { %7624 = vmatmul.mubr.msk.f32.gmra.mrb[6].mxu0 %vm88_vm3, %v47_v23  ;;  %7640 = vmatmul.mubr.msk.f32.gmra.mrb[6].mxu1 %vm88_vm3, %v63_v24  ;;  %v8401_v11 = vpack.c.bf16 %v927_v7, %v925_v6  ;;  %v70_v13 = vld [vmem:[%s15564_s0 + $0xd0] sm:$0xff]  ;;  %v55_v14 = vld [vmem:[%s15564_s0 + $0x58] sm:$0xff]  ;;  %v56_v16 = vld [vmem:[%s15564_s0 + $0x60] sm:$0xff] }
  0x27   :  { %280 = vmatprep.mubr.f32.mxu0 %v15572_v0  ;;  %376 = vmatprep.mubr.f32.mxu1 %v15572_v0  ;;  %v71_v15 = vld [vmem:[%s15564_s0 + $0xd8] sm:$0xff]  ;;  %v72_v17 = vld [vmem:[%s15564_s0 + $0xe0] sm:$0xff]  ;;  %v57_v18 = vld [vmem:[%s15564_s0 + $0x68] sm:$0xff] }
  0x28   :  { %8386 = vmatpush1.bf16.msra.mxu1 %v8385_v42  ;;  %v73_v19 = vld [vmem:[%s15564_s0 + $0xe8] sm:$0xff]  ;;  %v58_v20 = vld [vmem:[%s15564_s0 + $0x70] sm:$0xff]  ;;  %v59_v22 = vld [vmem:[%s15564_s0 + $0x78] sm:$0xff] }
  0x29   :  { %8388 = vmatprep.subr.bf16.mxu1 %v8387_v49  ;;  %v74_v21 = vld [vmem:[%s15564_s0 + $0xf0] sm:$0xff]  ;;  %v75_v23 = vld [vmem:[%s15564_s0 + $0xf8] sm:$0xff]  ;;  %v930_v24 = vld [vmem:[#allocation2 + $0x108] sm:$0xff] }
  0x2a   :  { %7625 = vmatmul.mubr.msk.f32.gmra.mrb[8].mxu0 %vm88_vm3, %v48_v31  ;;  %7641 = vmatmul.mubr.msk.f32.gmra.mrb[8].mxu1 %vm88_vm3, %v64_v32  ;;  %v932_v25 = vld [vmem:[#allocation2 + $0x118] sm:$0xff]  ;;  %v929_v27 = vld [vmem:[#allocation2 + $0x100] sm:$0xff]  ;;  %v931_v28 = vld [vmem:[#allocation2 + $0x110] sm:$0xff] }
  0x2b   :  { %286 = vmatprep.mubr.f32.mxu0 %v15572_v0  ;;  %382 = vmatprep.mubr.f32.mxu1 %v15572_v0  ;;  %v8403_v26 = vpack.c.bf16 %v932_v25, %v930_v24  ;;  %v8405_v29 = vpack.c.bf16 %v931_v28, %v929_v27  ;;  %v934_v30 = vld [vmem:[#allocation2 + $0x128] sm:$0xff]  ;;  %v936_v31 = vld [vmem:[#allocation2 + $0x138] sm:$0xff]  ;;  %v933_v33 = vld [vmem:[#allocation2 + $0x120] sm:$0xff] }
  0x2c   :  { %8390 = vmatpush1.bf16.msra.mxu1 %v8389_v50  ;;  %v8407_v32 = vpack.c.bf16 %v936_v31, %v934_v30  ;;  %v935_v34 = vld [vmem:[#allocation2 + $0x130] sm:$0xff]  ;;  %v938_v36 = vld [vmem:[#allocation2 + $0x148] sm:$0xff]  ;;  %v940_v37 = vld [vmem:[#allocation2 + $0x158] sm:$0xff] }
  0x2d   :  { %8392 = vmatprep.subr.bf16.mxu1 %v8391_v57  ;;  %v8409_v35 = vpack.c.bf16 %v935_v34, %v933_v33  ;;  %v8411_v38 = vpack.c.bf16 %v940_v37, %v938_v36  ;;  %v942_v42 = vld [vmem:[#allocation2 + $0x168] sm:$0xff]  ;;  %v944_v43 = vld [vmem:[#allocation2 + $0x178] sm:$0xff]  ;;  %v941_v45 = vld [vmem:[#allocation2 + $0x160] sm:$0xff] }
  0x2e   :  { %7626 = vmatmul.mubr.msk.f32.gmra.mrb[10].mxu0 %vm88_vm3, %v49_v39  ;;  %7642 = vmatmul.mubr.msk.f32.gmra.mrb[10].mxu1 %vm88_vm3, %v65_v40  ;;  %v937_v39 = vld [vmem:[#allocation2 + $0x140] sm:$0xff]  ;;  %v939_v40 = vld [vmem:[#allocation2 + $0x150] sm:$0xff]  ;;  %v8415_v44 = vpack.c.bf16 %v944_v43, %v942_v42  ;;  %v948_v49 = vld [vmem:[#allocation2 + $0x198] sm:$0xff] }
  0x2f   :  { %292 = vmatprep.mubr.f32.mxu0 %v15572_v0  ;;  %388 = vmatprep.mubr.f32.mxu1 %v15572_v0  ;;  %v8413_v41 = vpack.c.bf16 %v939_v40, %v937_v39  ;;  %v943_v46 = vld [vmem:[#allocation2 + $0x170] sm:$0xff]  ;;  %v945_v51 = vld [vmem:[#allocation2 + $0x180] sm:$0xff]  ;;  %v950_v54 = vld [vmem:[#allocation2 + $0x1a8] sm:$0xff] }
  0x30   :  { %8394 = vmatpush1.bf16.msra.mxu1 %v8393_v58  ;;  %v947_v52 = vld [vmem:[#allocation2 + $0x190] sm:$0xff]  ;;  %v949_v57 = vld [vmem:[#allocation2 + $0x1a0] sm:$0xff]  ;;  %v954_v60 = vld [vmem:[#allocation2 + $0x1c8] sm:$0xff] }
  0x31   :  { %8396 = vmatprep.subr.bf16.mxu1 %v8395_v2  ;;  %v8421_v53 = vpack.c.bf16 %v947_v52, %v945_v51  ;;  %v951_v58 = vld [vmem:[#allocation2 + $0x1b0] sm:$0xff]  ;;  %v956_v61 = vld [vmem:[#allocation2 + $0x1d8] sm:$0xff]  ;;  %v957_v6 = vld [vmem:[#allocation2 + $0x1e0] sm:$0xff] }
  0x32   :  { %7627 = vmatmul.mubr.msk.f32.gmra.mrb[12].mxu0 %vm88_vm3, %v50_v47  ;;  %7643 = vmatmul.mubr.msk.f32.gmra.mrb[12].mxu1 %vm88_vm3, %v66_v48  ;;  %v8417_v47 = vpack.c.bf16 %v943_v46, %v941_v45  ;;  %v946_v48 = vld [vmem:[#allocation2 + $0x188] sm:$0xff]  ;;  %v8425_v59 = vpack.c.bf16 %v951_v58, %v949_v57  ;;  %v8427_v62 = vpack.c.bf16 %v956_v61, %v954_v60  ;;  %v960_v4 = vld [vmem:[#allocation2 + $0x1f8] sm:$0xff]  ;;  %v959_v7 = vld [vmem:[#allocation2 + $0x1f0] sm:$0xff] }
  0x33   :  { %298 = vmatprep.mubr.f32.mxu0 %v15572_v0  ;;  %394 = vmatprep.mubr.f32.mxu1 %v15572_v0  ;;  %v8419_v50 = vpack.c.bf16 %v948_v49, %v946_v48 }
  0x34   :  { %8398 = vmatpush1.bf16.msra.mxu1 %v8397_v3  ;;  %v958_v3 = vld [vmem:[#allocation2 + $0x1e8] sm:$0xff] }
  0x35   :  { %8400 = vmatprep.subr.bf16.mxu1 %v8399_v10  ;;  %v8431_v5 = vpack.c.bf16 %v960_v4, %v958_v3 }
  0x36   :  { %7628 = vmatmul.mubr.msk.f32.gmra.mrb[14].mxu0 %vm88_vm3, %v51_v55  ;;  %7644 = vmatmul.mubr.msk.f32.gmra.mrb[14].mxu1 %vm88_vm3, %v67_v56  ;;  %v952_v55 = vld [vmem:[#allocation2 + $0x1b8] sm:$0xff] }
  0x37   :  { %304 = vmatprep.mubr.f32.mxu0 %v15572_v0  ;;  %400 = vmatprep.mubr.f32.mxu1 %v15572_v0  ;;  %v8423_v56 = vpack.c.bf16 %v952_v55, %v950_v54 }
  0x38   :  { %8402 = vmatpush1.bf16.msra.mxu1 %v8401_v11 }
  0x39   :  { %8404 = vmatprep.subr.bf16.mxu1 %v8403_v26 }
  0x3a   :  { %7629 = vmatmul.mubr.msk.f32.gmra.mrb[16].mxu0 %vm88_vm3, %v52_v63  ;;  %7645 = vmatmul.mubr.msk.f32.gmra.mrb[16].mxu1 %vm88_vm3, %v68_v1  ;;  %v953_v63 = vld [vmem:[#allocation2 + $0x1c0] sm:$0xff]  ;;  %v955_v1 = vld [vmem:[#allocation2 + $0x1d0] sm:$0xff] }
  0x3b   :  { %310 = vmatprep.mubr.f32.mxu0 %v15572_v0  ;;  %406 = vmatprep.mubr.f32.mxu1 %v15572_v0  ;;  %v8429_v2 = vpack.c.bf16 %v955_v1, %v953_v63 }
  0x3c   :  { %8406 = vmatpush1.bf16.msra.mxu1 %v8405_v29 }
  0x3d   :  { %8408 = vmatprep.subr.bf16.mxu1 %v8407_v32 }
  0x3e   :  { %7630 = vmatmul.mubr.msk.f32.gmra.mrb[18].mxu0 %vm88_vm3, %v53_v8  ;;  %7646 = vmatmul.mubr.msk.f32.gmra.mrb[18].mxu1 %vm88_vm3, %v69_v9  ;;  %v8433_v8 = vpack.c.bf16 %v959_v7, %v957_v6  ;;  %v80_v9 = vlaneseq }
  0x3f   :  { %316 = vmatprep.mubr.f32.mxu0 %v15572_v0  ;;  %412 = vmatprep.mubr.f32.mxu1 %v15572_v0 }
  0x40   :  { %8410 = vmatpush1.bf16.msra.mxu1 %v8409_v35  ;;  %v11219_v10 = vshrl.u32 %v80_v9, 7 }
  0x41   :  { %8412 = vmatprep.subr.bf16.mxu1 %v8411_v38 }
  0x42   :  { %7631 = vmatmul.mubr.msk.f32.gmra.mrb[20].mxu0 %vm88_vm3, %v54_v12  ;;  %7647 = vmatmul.mubr.msk.f32.gmra.mrb[20].mxu1 %vm88_vm3, %v70_v13  ;;  %15857 = vst [vmem:[#allocation5_spill] sm:$0xff] %v11219_v10  ;;  %v11222_v11 = vsub.s32 0, %v11219_v10  ;;  %v40_v12 = vld [vmem:[%s15570_s6] sm:$0xff]  ;;  %v41_v13 = vld [vmem:[%s15570_s6 + $0x8] sm:$0xff] }
  0x43   :  { %322 = vmatprep.mubr.f32.mxu0 %v15572_v0  ;;  %418 = vmatprep.mubr.f32.mxu1 %v15572_v0 }
  0x44   :  { %8414 = vmatpush1.bf16.msra.mxu1 %v8413_v41  ;;  %15858 = vst [vmem:[#allocation6_spill] sm:$0xff] %v11222_v11 }
  0x45   :  { %8416 = vmatprep.subr.bf16.mxu1 %v8415_v44 }
  0x46   :  { %7632 = vmatmul.mubr.msk.f32.gmra.mrb[22].mxu0 %vm88_vm3, %v55_v14  ;;  %7648 = vmatmul.mubr.msk.f32.gmra.mrb[22].mxu1 %vm88_vm3, %v71_v15  ;;  %v11231_v14 = vrot.slane %v40_v12, %v11222_v11  ;;  %v11234_v15 = vrot.slane %v41_v13, %v11222_v11 }
  0x47   :  { %328 = vmatprep.mubr.f32.mxu0 %v15572_v0  ;;  %424 = vmatprep.mubr.f32.mxu1 %v15572_v0 }
  0x48   :  { %8418 = vmatpush1.bf16.msra.mxu1 %v8417_v47 }
  0x49   :  { %8420 = vmatprep.subr.bf16.mxu1 %v8419_v50 }
  0x4a   :  { %7633 = vmatmul.mubr.msk.f32.gmra.mrb[24].mxu0 %vm88_vm3, %v56_v16  ;;  %7649 = vmatmul.mubr.msk.f32.gmra.mrb[24].mxu1 %vm88_vm3, %v72_v17 }
  0x4b   :  { %334 = vmatprep.mubr.f32.mxu0 %v15572_v0  ;;  %430 = vmatprep.mubr.f32.mxu1 %v15572_v0 }
  0x4c   :  { %8422 = vmatpush1.bf16.msra.mxu1 %v8421_v53 }
  0x4d   :  { %8424 = vmatprep.subr.bf16.mxu1 %v8423_v56 }
  0x4e   :  { %7634 = vmatmul.mubr.msk.f32.gmra.mrb[26].mxu0 %vm88_vm3, %v57_v18  ;;  %7650 = vmatmul.mubr.msk.f32.gmra.mrb[26].mxu1 %vm88_vm3, %v73_v19 }
  0x4f   :  { %340 = vmatprep.mubr.f32.mxu0 %v15572_v0  ;;  %436 = vmatprep.mubr.f32.mxu1 %v15572_v0 }
  0x50   :  { %8426 = vmatpush1.bf16.msra.mxu1 %v8425_v59 }
  0x51   :  { %8428 = vmatprep.subr.bf16.mxu1 %v8427_v62 }
  0x52   :  { %7635 = vmatmul.mubr.msk.f32.gmra.mrb[28].mxu0 %vm88_vm3, %v58_v20  ;;  %7651 = vmatmul.mubr.msk.f32.gmra.mrb[28].mxu1 %vm88_vm3, %v74_v21 }
  0x53   :  { %346 = vmatprep.mubr.f32.mxu0 %v15572_v0  ;;  %442 = vmatprep.mubr.f32.mxu1 %v15572_v0 }
  0x54   :  { %8430 = vmatpush1.bf16.msra.mxu1 %v8429_v2 }
  0x55   :  { %8432 = vmatprep.subr.bf16.mxu1 %v8431_v5 }
  0x56   :  { %7636 = vmatmul.mubr.msk.f32.gmra.mrb[30].mxu0 %vm88_vm3, %v59_v22  ;;  %7652 = vmatmul.mubr.msk.f32.gmra.mrb[30].mxu1 %vm88_vm3, %v75_v23 }
  0x58   :  { %8434 = vmatpush1.bf16.msra.mxu1 %v8433_v8 }
  0xed   :  { %v258_v16 = vpop.f32.mrb[0].mxu0  ;;  %v354_v17 = vpop.f32.mrb[0].mxu1 }
  0xee   :  { %v11237_v18 = vadd.f32 %v258_v16, %v11231_v14  ;;  %v260_v19 = vpop.f32.mrb[1].mxu0  ;;  %v11240_v20 = vadd.f32 %v354_v17, %v11231_v14  ;;  %v356_v21 = vpop.f32.mrb[1].mxu1 }
  0xef   :  { %v11243_v22 = vadd.f32 %v260_v19, %v11234_v15  ;;  %v11246_v23 = vadd.f32 %v356_v21, %v11234_v15 }
  0xf0   :  { %v7653_v24 = vmul.f32 -1.442695, %v11237_v18 }
  0xf1   :  { %v7654_v25 = vmul.f32 -1.442695, %v11243_v22  ;;  %v264_v26 = vpop.f32.mrb[2].mxu0  ;;  %v360_v27 = vpop.f32.mrb[2].mxu1 }
  0xf2   :  { %8775 = vpow2.f32 %v7653_v24  ;;  %v11251_v28 = vadd.f32 %v264_v26, %v11231_v14  ;;  %v266_v29 = vpop.f32.mrb[3].mxu0  ;;  %v11254_v30 = vadd.f32 %v360_v27, %v11231_v14  ;;  %v362_v31 = vpop.f32.mrb[3].mxu1 }
  0xf3   :  { %8777 = vpow2.f32 %v7654_v25  ;;  %v11257_v32 = vadd.f32 %v266_v29, %v11234_v15  ;;  %v11260_v33 = vadd.f32 %v362_v31, %v11234_v15 }
  0xf4   :  { %v7655_v34 = vmul.f32 -1.442695, %v11251_v28 }
  0xf5   :  { %v7656_v35 = vmul.f32 -1.442695, %v11257_v32  ;;  %v270_v36 = vpop.f32.mrb[4].mxu0  ;;  %v366_v37 = vpop.f32.mrb[4].mxu1 }
  0xf6   :  { %8779 = vpow2.f32 %v7655_v34  ;;  %v11265_v38 = vadd.f32 %v270_v36, %v11231_v14  ;;  %v272_v39 = vpop.f32.mrb[5].mxu0  ;;  %v11268_v40 = vadd.f32 %v366_v37, %v11231_v14  ;;  %v368_v41 = vpop.f32.mrb[5].mxu1 }
  0xf7   :  { %8781 = vpow2.f32 %v7656_v35  ;;  %v11271_v42 = vadd.f32 %v272_v39, %v11234_v15  ;;  %v11274_v43 = vadd.f32 %v368_v41, %v11234_v15 }
  0xf8   :  { %v7657_v44 = vmul.f32 -1.442695, %v11265_v38 }
  0xf9   :  { %v7658_v45 = vmul.f32 -1.442695, %v11271_v42  ;;  %v276_v46 = vpop.f32.mrb[6].mxu0  ;;  %v372_v47 = vpop.f32.mrb[6].mxu1 }
  0xfa   :  { %8783 = vpow2.f32 %v7657_v44  ;;  %v11279_v48 = vadd.f32 %v276_v46, %v11231_v14  ;;  %v278_v49 = vpop.f32.mrb[7].mxu0  ;;  %v11282_v50 = vadd.f32 %v372_v47, %v11231_v14  ;;  %v374_v51 = vpop.f32.mrb[7].mxu1 }
  0xfb   :  { %8785 = vpow2.f32 %v7658_v45  ;;  %v11285_v52 = vadd.f32 %v278_v49, %v11234_v15  ;;  %v11288_v53 = vadd.f32 %v374_v51, %v11234_v15 }
  0xfc   :  { %v8776_v54 = vpop.eup %8775  ;;  %v7659_v55 = vmul.f32 -1.442695, %v11279_v48 }
  0xfd   :  { %v8778_v56 = vpop.eup %8777  ;;  %v641_v57 = vadd.f32 1.0, %v8776_v54  ;;  %v7660_v58 = vmul.f32 -1.442695, %v11285_v52  ;;  %v282_v59 = vpop.f32.mrb[8].mxu0 }
  0xfe   :  { %v642_v60 = vadd.f32 1.0, %v8778_v56  ;;  %8787 = vpow2.f32 %v7659_v55  ;;  %v11293_v61 = vadd.f32 %v282_v59, %v11231_v14  ;;  %v284_v62 = vpop.f32.mrb[9].mxu0  ;;  %v378_v63 = vpop.f32.mrb[8].mxu1 }
  0xff   :  { %8789 = vrcp.f32 %v641_v57  ;;  %v11296_v1 = vadd.f32 %v284_v62, %v11234_v15  ;;  %v11299_v2 = vadd.f32 %v378_v63, %v11231_v14  ;;  %v380_v3 = vpop.f32.mrb[9].mxu1 }
 0x100   :  { %v8780_v4 = vpop.eup %8779  ;;  %8791 = vrcp.f32 %v642_v60  ;;  %v7661_v5 = vmul.f32 -1.442695, %v11293_v61  ;;  %v11303_v6 = vadd.f32 %v380_v3, %v11234_v15 }
 0x101   :  { %v8782_v7 = vpop.eup %8781  ;;  %v643_v8 = vadd.f32 1.0, %v8780_v4  ;;  %8793 = vpow2.f32 %v7660_v58  ;;  %v7662_v9 = vmul.f32 -1.442695, %v11296_v1  ;;  %v288_v12 = vpop.f32.mrb[10].mxu0 }
 0x102   :  { %v644_v13 = vadd.f32 1.0, %v8782_v7  ;;  %8795 = vpow2.f32 %v7661_v5  ;;  %v11307_v16 = vadd.f32 %v288_v12, %v11231_v14  ;;  %v290_v17 = vpop.f32.mrb[11].mxu0  ;;  %v384_v19 = vpop.f32.mrb[10].mxu1 }
 0x103   :  { %8797 = vrcp.f32 %v643_v8  ;;  %v11310_v21 = vadd.f32 %v290_v17, %v11234_v15  ;;  %v11313_v24 = vadd.f32 %v384_v19, %v11231_v14  ;;  %v386_v25 = vpop.f32.mrb[11].mxu1 }
 0x104   :  { %v8784_v26 = vpop.eup %8783  ;;  %8799 = vrcp.f32 %v644_v13  ;;  %v7663_v27 = vmul.f32 -1.442695, %v11307_v16  ;;  %v11317_v29 = vadd.f32 %v386_v25, %v11234_v15 }
 0x105   :  { %v8786_v31 = vpop.eup %8785  ;;  %v645_v34 = vadd.f32 1.0, %v8784_v26  ;;  %8801 = vpow2.f32 %v7662_v9  ;;  %v7664_v35 = vmul.f32 -1.442695, %v11310_v21  ;;  %v294_v36 = vpop.f32.mrb[12].mxu0 }
 0x106   :  { %v646_v37 = vadd.f32 1.0, %v8786_v31  ;;  %8803 = vpow2.f32 %v7663_v27  ;;  %v11321_v39 = vadd.f32 %v294_v36, %v11231_v14  ;;  %v296_v41 = vpop.f32.mrb[13].mxu0  ;;  %v390_v44 = vpop.f32.mrb[12].mxu1 }
 0x107   :  { %8805 = vrcp.f32 %v645_v34  ;;  %v11324_v45 = vadd.f32 %v296_v41, %v11234_v15  ;;  %v11327_v46 = vadd.f32 %v390_v44, %v11231_v14  ;;  %v392_v47 = vpop.f32.mrb[13].mxu1 }
 0x108   :  { %v8788_v49 = vpop.eup %8787  ;;  %8807 = vrcp.f32 %v646_v37  ;;  %v7665_v51 = vmul.f32 -1.442695, %v11321_v39  ;;  %v11331_v54 = vadd.f32 %v392_v47, %v11234_v15 }
 0x109   :  { %v8790_v55 = vpop.eup %8789  ;;  %v647_v56 = vadd.f32 1.0, %v8788_v49  ;;  %8809 = vpow2.f32 %v7664_v35  ;;  %v7666_v57 = vmul.f32 -1.442695, %v11324_v45  ;;  %v300_v58 = vpop.f32.mrb[14].mxu0 }
 0x10a   :  { %v8792_v59 = vpop.eup %8791  ;;  %8811 = vpow2.f32 %v7665_v51  ;;  %v11335_v60 = vadd.f32 %v300_v58, %v11231_v14  ;;  %v302_v62 = vpop.f32.mrb[15].mxu0  ;;  %v11338_v4 = vmul.f32 %v8790_v55, %v11237_v18 }
 0x10b   :  { %v396_v63 = vpop.f32.mrb[14].mxu1  ;;  %v8794_v3 = vpop.eup %8793  ;;  %v11341_v5 = vadd.f32 %v302_v62, %v11234_v15  ;;  %v11344_v7 = vmul.f32 %v8792_v59, %v11243_v22  ;;  %8813 = vpow2.f32 %v7666_v57 }
 0x10c   :  { %15859 = vst [vmem:[#allocation7_spill] sm:$0xff] %v11338_v4  ;;  %v11347_v8 = vadd.f32 %v396_v63, %v11231_v14  ;;  %v398_v9 = vpop.f32.mrb[15].mxu1  ;;  %v8796_v12 = vpop.eup %8795  ;;  %v648_v13 = vadd.f32 1.0, %v8794_v3  ;;  %v7667_v17 = vmul.f32 -1.442695, %v11335_v60  ;;  %8815 = vrcp.f32 %v647_v56 }
 0x10d   :  { %15860 = vst [vmem:[#allocation8_spill] sm:$0xff] %v11344_v7  ;;  %v11351_v19 = vadd.f32 %v398_v9, %v11234_v15  ;;  %v8798_v18 = vpop.eup %8797  ;;  %v649_v25 = vadd.f32 1.0, %v8796_v12  ;;  %v7668_v26 = vmul.f32 -1.442695, %v11341_v5  ;;  %v306_v27 = vpop.f32.mrb[16].mxu0  ;;  %1033 = vmatprep.mubr.f32.mxu1 %v11344_v7 }
 0x10e   :  { %v8800_v22 = vpop.eup %8799  ;;  %8817 = vrcp.f32 %v648_v13  ;;  %v11356_v31 = vadd.f32 %v306_v27, %v11231_v14  ;;  %v308_v34 = vpop.f32.mrb[17].mxu0  ;;  %1034 = vmatmul.mubr.f32.vlgmr.msra.gmra.mrb[32].mxu1 %v11338_v4  ;;  %v11360_v35 = vmul.f32 %v8798_v18, %v11251_v28 }
 0x10f   :  { %v402_v36 = vpop.f32.mrb[16].mxu1  ;;  %v8802_v37 = vpop.eup %8801  ;;  %8819 = vrcp.f32 %v649_v25  ;;  %v11363_v41 = vadd.f32 %v308_v34, %v11234_v15  ;;  %v11366_v44 = vmul.f32 %v8800_v22, %v11257_v32 }
 0x110   :  { %15861 = vst [vmem:[#allocation9_spill] sm:$0xff] %v11360_v35  ;;  %v11369_v47 = vadd.f32 %v402_v36, %v11231_v14  ;;  %v404_v49 = vpop.f32.mrb[17].mxu1  ;;  %v8804_v51 = vpop.eup %8803  ;;  %v650_v55 = vadd.f32 1.0, %v8802_v37  ;;  %8821 = vpow2.f32 %v7667_v17  ;;  %v7669_v56 = vmul.f32 -1.442695, %v11356_v31 }
 0x111   :  { %15862 = vst [vmem:[#allocation10_spill] sm:$0xff] %v11366_v44  ;;  %v11373_v28 = vadd.f32 %v404_v49, %v11234_v15  ;;  %v8806_v57 = vpop.eup %8805  ;;  %v651_v58 = vadd.f32 1.0, %v8804_v51  ;;  %8823 = vpow2.f32 %v7668_v26  ;;  %v7670_v59 = vmul.f32 -1.442695, %v11363_v41  ;;  %v312_v62 = vpop.f32.mrb[18].mxu0  ;;  %1039 = vmatprep.mubr.f32.mxu1 %v11366_v44 }
 0x112   :  { %v8808_v32 = vpop.eup %8807  ;;  %8825 = vrcp.f32 %v650_v55  ;;  %v11378_v63 = vadd.f32 %v312_v62, %v11231_v14  ;;  %v314_v3 = vpop.f32.mrb[19].mxu0  ;;  %1040 = vmatmul.mubr.f32.gmra.mrb[34].mxu1 %v11360_v35  ;;  %v11382_v9 = vmul.f32 %v8806_v57, %v11265_v38 }
 0x113   :  { %v408_v12 = vpop.f32.mrb[18].mxu1  ;;  %v8810_v13 = vpop.eup %8809  ;;  %8827 = vrcp.f32 %v651_v58  ;;  %v11385_v17 = vadd.f32 %v314_v3, %v11234_v15  ;;  %v11388_v18 = vmul.f32 %v8808_v32, %v11271_v42 }
 0x114   :  { %15863 = vst [vmem:[#allocation11_spill] sm:$0xff] %v11382_v9  ;;  %v11391_v25 = vadd.f32 %v408_v12, %v11231_v14  ;;  %v410_v26 = vpop.f32.mrb[19].mxu1  ;;  %v8812_v27 = vpop.eup %8811  ;;  %v652_v22 = vadd.f32 1.0, %v8810_v13  ;;  %8829 = vpow2.f32 %v7669_v56  ;;  %v7671_v34 = vmul.f32 -1.442695, %v11378_v63 }
 0x115   :  { %15864 = vst [vmem:[#allocation12_spill] sm:$0xff] %v11388_v18  ;;  %v11395_v38 = vadd.f32 %v410_v26, %v11234_v15  ;;  %v653_v36 = vadd.f32 1.0, %v8812_v27  ;;  %8831 = vpow2.f32 %v7670_v59  ;;  %v318_v37 = vpop.f32.mrb[20].mxu0  ;;  %1045 = vmatprep.mubr.f32.mxu1 %v11388_v18  ;;  %v8814_v49 = vpop.eup %8813  ;;  %v7672_v42 = vmul.f32 -1.442695, %v11385_v17 }
 0x116   :  { %8833 = vrcp.f32 %v652_v22  ;;  %v11400_v51 = vadd.f32 %v318_v37, %v11231_v14  ;;  %v320_v55 = vpop.f32.mrb[21].mxu0  ;;  %1046 = vmatmul.mubr.f32.gmra.mrb[36].mxu1 %v11382_v9  ;;  %v414_v56 = vpop.f32.mrb[20].mxu1  ;;  %v654_v58 = vadd.f32 1.0, %v8814_v49 }
 0x117   :  { %v8816_v57 = vpop.eup %8815  ;;  %8835 = vrcp.f32 %v653_v36  ;;  %v11404_v62 = vadd.f32 %v320_v55, %v11234_v15  ;;  %v11407_v59 = vadd.f32 %v414_v56, %v11231_v14  ;;  %v416_v32 = vpop.f32.mrb[21].mxu1 }
 0x118   :  { %v8818_v3 = vpop.eup %8817  ;;  %8837 = vpow2.f32 %v7671_v34  ;;  %v7673_v12 = vmul.f32 -1.442695, %v11400_v51  ;;  %v11411_v13 = vadd.f32 %v416_v32, %v11234_v15  ;;  %v11417_v55 = vmul.f32 %v8816_v57, %v11279_v48 }
 0x119   :  { %v8820_v26 = vpop.eup %8819  ;;  %8839 = vrcp.f32 %v654_v58  ;;  %v324_v27 = vpop.f32.mrb[22].mxu0  ;;  %v11414_v22 = vmul.f32 %v8818_v3, %v11285_v52  ;;  %v7674_v11 = vmul.f32 -1.442695, %v11404_v62 }
 0x11a   :  { %v420_v36 = vpop.f32.mrb[22].mxu1  ;;  %v8822_v37 = vpop.eup %8821  ;;  %8841 = vpow2.f32 %v7672_v42  ;;  %15866 = vst [vmem:[#allocation14_spill] sm:$0xff] %v11417_v55  ;;  %v11425_v3 = vadd.f32 %v324_v27, %v11231_v14  ;;  %v11438_v27 = vmul.f32 %v8820_v26, %v11293_v61 }
 0x11b   :  { %15865 = vst [vmem:[#allocation13_spill] sm:$0xff] %v11414_v22  ;;  %v326_v49 = vpop.f32.mrb[23].mxu0  ;;  %v422_v56 = vpop.f32.mrb[23].mxu1  ;;  %v655_v0 = vadd.f32 1.0, %v8822_v37  ;;  %1051 = vmatprep.mubr.f32.mxu1 %v11414_v22  ;;  %v11422_v58 = vadd.f32 %v420_v36, %v11231_v14  ;;  %8843 = vpow2.f32 %v7673_v12 }
 0x11c   :  { %v8824_v34 = vpop.eup %8823  ;;  %1052 = vmatmul.mubr.f32.gmra.mrb[38].mxu1 %v11417_v55  ;;  %v11429_v48 = vadd.f32 %v422_v56, %v11234_v15  ;;  %v11432_v57 = vadd.f32 %v326_v49, %v11234_v15  ;;  %15868 = vst [vmem:[#allocation16_spill] sm:$0xff] %v11438_v27 }
 0x11d   :  { %v8826_v32 = vpop.eup %8825  ;;  %v656_v52 = vadd.f32 1.0, %v8824_v34  ;;  %8845 = vrcp.f32 %v655_v0  ;;  %v330_v37 = vpop.f32.mrb[24].mxu0 }
 0x11e   :  { %v8828_v42 = vpop.eup %8827  ;;  %v11435_v36 = vmul.f32 %v8826_v32, %v11296_v1  ;;  %v426_v22 = vpop.f32.mrb[24].mxu1  ;;  %v7675_v1 = vmul.f32 -1.442695, %v11425_v3  ;;  %v7676_v26 = vmul.f32 -1.442695, %v11432_v57 }
 0x11f   :  { %v8830_v34 = vpop.eup %8829  ;;  %8847 = vrcp.f32 %v656_v52  ;;  %v332_v12 = vpop.f32.mrb[25].mxu0  ;;  %v11442_v0 = vadd.f32 %v426_v22, %v11231_v14 }
 0x120   :  { %15867 = vst [vmem:[#allocation15_spill] sm:$0xff] %v11435_v36  ;;  %v428_v55 = vpop.f32.mrb[25].mxu1  ;;  %v8832_v9 = vpop.eup %8831  ;;  %v657_v56 = vadd.f32 1.0, %v8830_v34  ;;  %8849 = vpow2.f32 %v7674_v11  ;;  %1057 = vmatprep.mubr.f32.mxu1 %v11435_v36 }
 0x121   :  { %v8834_v49 = vpop.eup %8833  ;;  %v658_v18 = vadd.f32 1.0, %v8832_v9  ;;  %1058 = vmatmul.mubr.f32.gmra.mrb[40].mxu1 %v11438_v27  ;;  %v11447_v32 = vadd.f32 %v428_v55, %v11234_v15  ;;  %v336_v52 = vpop.f32.mrb[26].mxu0  ;;  %v11454_v9 = vadd.f32 %v330_v37, %v11231_v14  ;;  %v11460_v55 = vmul.f32 %v8828_v42, %v11307_v16 }
 0x122   :  { %v8836_v61 = vpop.eup %8835  ;;  %8851 = vrcp.f32 %v657_v56  ;;  %v11451_v11 = vmul.f32 %v8834_v49, %v11310_v21  ;;  %v432_v34 = vpop.f32.mrb[26].mxu1  ;;  %v11457_v36 = vadd.f32 %v336_v52, %v11231_v14  ;;  %v11477_v52 = vadd.f32 %v332_v12, %v11234_v15 }
 0x123   :  { %v8838_v22 = vpop.eup %8837  ;;  %8853 = vrcp.f32 %v658_v18  ;;  %v338_v27 = vpop.f32.mrb[27].mxu0  ;;  %15870 = vst [vmem:[#allocation18_spill] sm:$0xff] %v11460_v55  ;;  %v11467_v18 = vadd.f32 %v432_v34, %v11231_v14  ;;  %v7677_v34 = vmul.f32 -1.442695, %v11454_v9 }
 0x124   :  { %15869 = vst [vmem:[#allocation17_spill] sm:$0xff] %v11451_v11  ;;  %v434_v56 = vpop.f32.mrb[27].mxu1  ;;  %v8840_v35 = vpop.eup %8839  ;;  %v659_v44 = vadd.f32 1.0, %v8838_v22  ;;  %1063 = vmatprep.mubr.f32.mxu1 %v11451_v11  ;;  %v11464_v21 = vadd.f32 %v338_v27, %v11234_v15  ;;  %8855 = vpow2.f32 %v7675_v1 }
 0x125   :  { %v8842_v37 = vpop.eup %8841  ;;  %1064 = vmatmul.mubr.f32.gmra.mrb[42].mxu1 %v11460_v55  ;;  %v11471_v49 = vmul.f32 %v8840_v35, %v11324_v45  ;;  %v11474_v16 = vadd.f32 %v434_v56, %v11234_v15  ;;  %v342_v27 = vpop.f32.mrb[28].mxu0  ;;  %v11485_v35 = vmul.f32 %v8836_v61, %v11321_v39  ;;  %v7678_v39 = vmul.f32 -1.442695, %v11477_v52 }
 0x126   :  { %8857 = vrcp.f32 %v659_v44  ;;  %v660_v42 = vadd.f32 1.0, %v8842_v37  ;;  %v8844_v22 = vpop.eup %8843  ;;  %v11481_v1 = vadd.f32 %v342_v27, %v11231_v14  ;;  %v344_v45 = vpop.f32.mrb[29].mxu0 }
 0x127   :  { %15871 = vst [vmem:[#allocation19_spill] sm:$0xff] %v11471_v49  ;;  %8859 = vpow2.f32 %v7676_v26  ;;  %1069 = vmatprep.mubr.f32.mxu1 %v11471_v49  ;;  %15872 = vst [vmem:[#allocation20_spill] sm:$0xff] %v11485_v35  ;;  %v438_v56 = vpop.f32.mrb[28].mxu1  ;;  %v8846_v44 = vpop.eup %8845  ;;  %v661_v37 = vadd.f32 1.0, %v8844_v22  ;;  %v11488_v12 = vadd.f32 %v344_v45, %v11234_v15 }
 0x128   :  { %8861 = vrcp.f32 %v660_v42  ;;  %v11491_v26 = vadd.f32 %v438_v56, %v11231_v14  ;;  %v440_v55 = vpop.f32.mrb[29].mxu1  ;;  %v11505_v7 = vmul.f32 %v8846_v44, %v11335_v60  ;;  %v1674_v60 = vld [vmem:[%s15567_s3] sm:$0xff]  ;;  %v1676_v44 = vld [vmem:[%s15567_s3 + $0x10] sm:$0xff] }
 0x129   :  { %v8848_v11 = vpop.eup %8847  ;;  %1070 = vmatmul.mubr.f32.gmra.mrb[44].mxu1 %v11485_v35  ;;  %v11495_v27 = vadd.f32 %v440_v55, %v11234_v15  ;;  %v348_v61 = vpop.f32.mrb[30].mxu0  ;;  %8863 = vrcp.f32 %v661_v37  ;;  %v7679_v37 = vmul.f32 -1.442695, %v11457_v36 }
 0x12a   :  { %v8850_v49 = vpop.eup %8849  ;;  %v11499_v42 = vmul.f32 %v8848_v11, %v11341_v5  ;;  %v444_v22 = vpop.f32.mrb[30].mxu1  ;;  %v11502_v56 = vadd.f32 %v348_v61, %v11231_v14  ;;  %15874 = vst [vmem:[#allocation22_spill] sm:$0xff] %v11505_v7  ;;  %8865 = vpow2.f32 %v7677_v34  ;;  %v7680_v34 = vmul.f32 -1.442695, %v11464_v21  ;;  %v1677_v61 = vld [vmem:[%s15567_s3 + $0x18] sm:$0xff] }
 0x12b   :  { %v662_v45 = vadd.f32 1.0, %v8850_v49  ;;  %v350_v4 = vpop.f32.mrb[31].mxu0  ;;  %v446_v35 = vpop.f32.mrb[31].mxu1  ;;  %v11512_v5 = vadd.f32 %v444_v22, %v11231_v14 }
 0x12c   :  { %15873 = vst [vmem:[#allocation21_spill] sm:$0xff] %v11499_v42  ;;  %v8852_v55 = vpop.eup %8851  ;;  %1075 = vmatprep.mubr.f32.mxu1 %v11499_v42  ;;  %v11509_v10 = vadd.f32 %v350_v4, %v11234_v15  ;;  %v11515_v11 = vadd.f32 %v446_v35, %v11234_v15  ;;  %v1675_v4 = vld [vmem:[%s15567_s3 + $0x8] sm:$0xff]  ;;  %v7681_v42 = vmul.f32 -1.442695, %v11481_v1 }
 0x12d   :  { %v8854_v49 = vpop.eup %8853  ;;  %8867 = vrcp.f32 %v662_v45  ;;  %1076 = vmatmul.mubr.f32.gmra.mrb[46].mxu1 %v11505_v7  ;;  %v11530_v35 = vmul.f32 %v8852_v55, %v11356_v31  ;;  %v8439_v7 = vpack.c.bf16 %v1677_v61, %v1676_v44 }
 0x12e   :  { %8869 = vpow2.f32 %v7678_v39  ;;  %v11526_v14 = vmul.f32 %v8854_v49, %v11363_v41  ;;  %v8856_v15 = vpop.eup %8855  ;;  %v15596_v41 = vmov 0.0|0.0   ;;  %v8436_v39 = vpack.c.bf16 %v1675_v4, %v1674_v60  ;;  %v1678_v60 = vld [vmem:[%s15567_s3 + $0x20] sm:$0xff] }
 0x12f   :  { %v663_v45 = vadd.f32 1.0, %v8856_v15  ;;  %8435 = vmatprep.subr.bf16.mxu0 %v15596_v41  ;;  %8871 = vpow2.f32 %v7679_v37  ;;  %v1679_v37 = vld [vmem:[%s15567_s3 + $0x28] sm:$0xff]  ;;  %v7682_v4 = vmul.f32 -1.442695, %v11488_v12 }
 0x130   :  { %v8858_v22 = vpop.eup %8857  ;;  %1081 = vmatprep.mubr.f32.mxu1 %v11526_v14  ;;  %8437 = vmatpush1.bf16.msra.mxu0 %v8436_v39  ;;  %v8442_v61 = vpack.c.bf16 %v1679_v37, %v1678_v60 }
 0x131   :  { %v8860_v49 = vpop.eup %8859  ;;  %1082 = vmatmul.mubr.f32.gmra.mrb[48].mxu1 %v11530_v35  ;;  %8873 = vrcp.f32 %v663_v45  ;;  %8438 = vmatprep.subr.bf16.mxu0 %v15596_v41 }
 0x132   :  { %v8862_v31 = vpop.eup %8861  ;;  %v664_v55 = vadd.f32 1.0, %v8860_v49  ;;  %8875 = vpow2.f32 %v7680_v34  ;;  %v11554_v34 = vmul.f32 %v8858_v22, %v11378_v63  ;;  %v1680_v49 = vld [vmem:[%s15567_s3 + $0x30] sm:$0xff]  ;;  %v1681_v63 = vld [vmem:[%s15567_s3 + $0x38] sm:$0xff] }
 0x133   :  { %v11543_v15 = vmul.f32 %v8862_v31, %v11385_v17  ;;  %v8864_v44 = vpop.eup %8863  ;;  %v8445_v60 = vpack.c.bf16 %v1681_v63, %v1680_v49 }
 0x134   :  { %8877 = vrcp.f32 %v664_v55  ;;  %v8866_v17 = vpop.eup %8865  ;;  %8440 = vmatpush1.bf16.msra.mxu0 %v8439_v7  ;;  %v7686_v7 = vmul.f32 -1.442695, %v11246_v23 }
 0x135   :  { %1087 = vmatprep.mubr.f32.mxu1 %v11543_v15  ;;  %v665_v39 = vadd.f32 1.0, %v8866_v17  ;;  %8879 = vpow2.f32 %v7681_v42  ;;  %8441 = vmatprep.subr.bf16.mxu0 %v15596_v41  ;;  %v11570_v42 = vmul.f32 %v8864_v44, %v11400_v51  ;;  %v1683_v51 = vld [vmem:[%s15567_s3 + $0x48] sm:$0xff] }
 0x136   :  { %1088 = vmatmul.mubr.f32.gmra.mrb[50].mxu1 %v11554_v34  ;;  %8881 = vpow2.f32 %v7682_v4 }
 0x137   :  { %v8868_v45 = vpop.eup %8867  ;;  %15875 = vst [vmem:[#allocation23_spill] sm:$0xff] %v11570_v42  ;;  %8883 = vrcp.f32 %v665_v39  ;;  %v7685_v39 = vmul.f32 -1.442695, %v11240_v20 }
 0x138   :  { %v8870_v22 = vpop.eup %8869  ;;  %v11566_v31 = vmul.f32 %v8868_v45, %v11404_v62  ;;  %8443 = vmatpush1.bf16.msra.mxu0 %v8442_v61  ;;  %v1682_v62 = vld [vmem:[%s15567_s3 + $0x40] sm:$0xff]  ;;  %v7683_v61 = vmul.f32 -1.442695, %v11502_v56 }
 0x139   :  { %v666_v55 = vadd.f32 1.0, %v8870_v22  ;;  %v8872_v37 = vpop.eup %8871  ;;  %8444 = vmatprep.subr.bf16.mxu0 %v15596_v41  ;;  %v8448_v63 = vpack.c.bf16 %v1683_v51, %v1682_v62  ;;  %v7688_v22 = vmul.f32 -1.442695, %v11260_v33 }
 0x13a   :  { %1093 = vmatprep.mubr.f32.mxu1 %v11566_v31  ;;  %v667_v44 = vadd.f32 1.0, %v8872_v37  ;;  %v1685_v37 = vld [vmem:[%s15567_s3 + $0x58] sm:$0xff] }
 0x13b   :  { %8885 = vrcp.f32 %v666_v55  ;;  %1094 = vmatmul.mubr.f32.gmra.mrb[52].mxu1 %v11570_v42  ;;  %v8874_v4 = vpop.eup %8873 }
 0x13c   :  { %v8876_v17 = vpop.eup %8875  ;;  %8887 = vpow2.f32 %v7686_v7  ;;  %8446 = vmatpush1.bf16.msra.mxu0 %v8445_v60  ;;  %v1684_v7 = vld [vmem:[%s15567_s3 + $0x50] sm:$0xff]  ;;  %v11595_v60 = vmul.f32 %v8874_v4, %v11425_v3  ;;  %v1686_v3 = vld [vmem:[%s15567_s3 + $0x60] sm:$0xff]  ;;  %v1687_v4 = vld [vmem:[%s15567_s3 + $0x68] sm:$0xff] }
 0x13d   :  { %v668_v49 = vadd.f32 1.0, %v8876_v17  ;;  %8889 = vrcp.f32 %v667_v44  ;;  %8447 = vmatprep.subr.bf16.mxu0 %v15596_v41  ;;  %v7684_v44 = vmul.f32 -1.442695, %v11509_v10  ;;  %v8451_v17 = vpack.c.bf16 %v1685_v37, %v1684_v7 }
 0x13e   :  { %v8878_v45 = vpop.eup %8877  ;;  %15877 = vst [vmem:[#allocation25_spill] sm:$0xff] %v11595_v60  ;;  %v7690_v7 = vmul.f32 -1.442695, %v11274_v43  ;;  %v8454_v37 = vpack.c.bf16 %v1687_v4, %v1686_v3  ;;  %v7691_v4 = vmul.f32 -1.442695, %v11282_v50 }
 0x13f   :  { %v11585_v55 = vmul.f32 %v8878_v45, %v11432_v57  ;;  %8891 = vrcp.f32 %v668_v49  ;;  %v8880_v62 = vpop.eup %8879  ;;  %v7687_v45 = vmul.f32 -1.442695, %v11254_v30 }
 0x140   :  { %8893 = vpow2.f32 %v7683_v61  ;;  %v8882_v57 = vpop.eup %8881  ;;  %v669_v51 = vadd.f32 1.0, %v8880_v62  ;;  %8449 = vmatpush1.bf16.msra.mxu0 %v8448_v63 }
 0x141   :  { %15876 = vst [vmem:[#allocation24_spill] sm:$0xff] %v11585_v55  ;;  %1099 = vmatprep.mubr.f32.mxu1 %v11585_v55  ;;  %8895 = vpow2.f32 %v7685_v39  ;;  %v670_v49 = vadd.f32 1.0, %v8882_v57  ;;  %8450 = vmatprep.subr.bf16.mxu0 %v15596_v41  ;;  %v8884_v61 = vpop.eup %8883  ;;  %v7689_v39 = vmul.f32 -1.442695, %v11268_v40 }
 0x142   :  { %1100 = vmatmul.mubr.f32.gmra.mrb[54].mxu1 %v11595_v60  ;;  %8897 = vpow2.f32 %v7688_v22  ;;  %v11614_v57 = vmul.f32 %v8884_v61, %v11454_v9 }
 0x143   :  { %8899 = vrcp.f32 %v669_v51  ;;  %v1688_v51 = vld [vmem:[%s15567_s3 + $0x70] sm:$0xff] }
 0x144   :  { %8901 = vrcp.f32 %v670_v49  ;;  %8452 = vmatpush1.bf16.msra.mxu0 %v8451_v17  ;;  %15879 = vst [vmem:[#allocation27_spill] sm:$0xff] %v11614_v57 }
 0x145   :  { %v8886_v63 = vpop.eup %8885  ;;  %8903 = vpow2.f32 %v7684_v44  ;;  %8453 = vmatprep.subr.bf16.mxu0 %v15596_v41  ;;  %v1689_v44 = vld [vmem:[%s15567_s3 + $0x78] sm:$0xff] }
 0x146   :  { %v11611_v22 = vmul.f32 %v8886_v63, %v11477_v52  ;;  %v8888_v62 = vpop.eup %8887  ;;  %8905 = vpow2.f32 %v7687_v45  ;;  %v7692_v52 = vmul.f32 -1.442695, %v11288_v53  ;;  %v8457_v49 = vpack.c.bf16 %v1689_v44, %v1688_v51 }
 0x147   :  { %8907 = vpow2.f32 %v7689_v39  ;;  %v8890_v17 = vpop.eup %8889  ;;  %v674_v45 = vadd.f32 1.0, %v8888_v62  ;;  %v7694_v63 = vmul.f32 -1.442695, %v11303_v6 }
 0x148   :  { %15878 = vst [vmem:[#allocation26_spill] sm:$0xff] %v11611_v22  ;;  %1105 = vmatprep.mubr.f32.mxu1 %v11611_v22  ;;  %8909 = vpow2.f32 %v7690_v7  ;;  %8455 = vmatpush1.bf16.msra.mxu0 %v8454_v37  ;;  %v11633_v22 = vmul.f32 %v8890_v17, %v11457_v36  ;;  %v7693_v7 = vmul.f32 -1.442695, %v11299_v2  ;;  %v7696_v36 = vmul.f32 -1.442695, %v11317_v29 }
 0x149   :  { %1106 = vmatmul.mubr.f32.gmra.mrb[56].mxu1 %v11614_v57  ;;  %v8892_v9 = vpop.eup %8891  ;;  %8456 = vmatprep.subr.bf16.mxu0 %v15596_v41  ;;  %8911 = vpow2.f32 %v7692_v52 }
 0x14a   :  { %v8894_v3 = vpop.eup %8893  ;;  %v11628_v61 = vmul.f32 %v8892_v9, %v11464_v21  ;;  %15881 = vst [vmem:[#allocation29_spill] sm:$0xff] %v11633_v22  ;;  %8913 = vrcp.f32 %v674_v45 }
 0x14b   :  { %v8896_v39 = vpop.eup %8895  ;;  %v671_v62 = vadd.f32 1.0, %v8894_v3  ;;  %8915 = vpow2.f32 %v7691_v4  ;;  %v7695_v4 = vmul.f32 -1.442695, %v11313_v24 }
 0x14c   :  { %15880 = vst [vmem:[#allocation28_spill] sm:$0xff] %v11628_v61  ;;  %v8898_v57 = vpop.eup %8897  ;;  %1111 = vmatprep.mubr.f32.mxu1 %v11628_v61  ;;  %8458 = vmatpush1.bf16.msra.mxu0 %v8457_v49  ;;  %8917 = vpow2.f32 %v7694_v63  ;;  %v673_v17 = vadd.f32 1.0, %v8896_v39 }
 0x14d   :  { %v8900_v37 = vpop.eup %8899  ;;  %1112 = vmatmul.mubr.f32.gmra.mrb[58].mxu1 %v11633_v22  ;;  %8459 = vmatprep.subr.bf16.mxu0 %v15596_v41  ;;  %8919 = vpow2.f32 %v7693_v7  ;;  %v676_v49 = vadd.f32 1.0, %v8898_v57  ;;  %v7702_v41 = vmul.f32 -1.442695, %v11373_v28 }
 0x14e   :  { %v8902_v21 = vpop.eup %8901  ;;  %v11644_v45 = vmul.f32 %v8900_v37, %v11481_v1  ;;  %8921 = vrcp.f32 %v671_v62  ;;  %v7698_v1 = vmul.f32 -1.442695, %v11331_v54  ;;  %v7697_v62 = vmul.f32 -1.442695, %v11327_v46 }
 0x14f   :  { %v8904_v51 = vpop.eup %8903  ;;  %v11641_v44 = vmul.f32 %v8902_v21, %v11488_v12 }
 0x150   :  { %v8906_v52 = vpop.eup %8905  ;;  %v672_v9 = vadd.f32 1.0, %v8904_v51  ;;  %15883 = vst [vmem:[#allocation31_spill] sm:$0xff] %v11644_v45 }
 0x151   :  { %15882 = vst [vmem:[#allocation30_spill] sm:$0xff] %v11641_v44  ;;  %v8908_v3 = vpop.eup %8907  ;;  %1117 = vmatprep.mubr.f32.mxu1 %v11641_v44  ;;  %v675_v12 = vadd.f32 1.0, %v8906_v52  ;;  %v7700_v52 = vmul.f32 -1.442695, %v11351_v19 }
 0x152   :  { %8923 = vrcp.f32 %v672_v9  ;;  %1118 = vmatmul.mubr.f32.gmra.mrb[60].mxu1 %v11644_v45  ;;  %v8910_v63 = vpop.eup %8909  ;;  %v677_v39 = vadd.f32 1.0, %v8908_v3 }
 0x153   :  { %8925 = vpow2.f32 %v7696_v36  ;;  %v8912_v7 = vpop.eup %8911  ;;  %v678_v37 = vadd.f32 1.0, %v8910_v63 }
 0x154   :  { %8927 = vrcp.f32 %v673_v17  ;;  %v8914_v57 = vpop.eup %8913  ;;  %v680_v51 = vadd.f32 1.0, %v8912_v7  ;;  %v7699_v17 = vmul.f32 -1.442695, %v11347_v8 }
 0x155   :  { %8929 = vrcp.f32 %v676_v49  ;;  %v8916_v21 = vpop.eup %8915 }
 0x156   :  { %8931 = vpow2.f32 %v7695_v4  ;;  %v8918_v9 = vpop.eup %8917  ;;  %v679_v49 = vadd.f32 1.0, %v8916_v21  ;;  %v11663_v21 = vmul.f32 %v8914_v57, %v11246_v23 }
 0x157   :  { %8933 = vrcp.f32 %v675_v12  ;;  %v8920_v36 = vpop.eup %8919  ;;  %v682_v4 = vadd.f32 1.0, %v8918_v9 }
 0x158   :  { %8935 = vrcp.f32 %v677_v39  ;;  %v8922_v3 = vpop.eup %8921  ;;  %15886 = vst [vmem:[#allocation34_spill] sm:$0xff] %v11663_v21 }
 0x159   :  { %8937 = vpow2.f32 %v7698_v1  ;;  %v7701_v1 = vmul.f32 -1.442695, %v11369_v47 }
 0x15a   :  { %8939 = vrcp.f32 %v678_v37  ;;  %v11659_v37 = vmul.f32 %v8922_v3, %v11502_v56 }
 0x15b   :  { %8941 = vpow2.f32 %v7697_v62  ;;  %v681_v62 = vadd.f32 1.0, %v8920_v36  ;;  %v7703_v36 = vmul.f32 -1.442695, %v11391_v25 }
 0x15c   :  { %v8924_v63 = vpop.eup %8923  ;;  %8943 = vrcp.f32 %v680_v51  ;;  %15885 = vst [vmem:[#allocation33_spill] sm:$0xff] %v11659_v37 }
 0x15d   :  { %v8926_v12 = vpop.eup %8925  ;;  %8945 = vpow2.f32 %v7700_v52  ;;  %v11655_v39 = vmul.f32 %v8924_v63, %v11509_v10  ;;  %v7704_v52 = vmul.f32 -1.442695, %v11395_v38 }
 0x15e   :  { %v8928_v7 = vpop.eup %8927  ;;  %8947 = vpow2.f32 %v7699_v17  ;;  %v684_v9 = vadd.f32 1.0, %v8926_v12 }
 0x15f   :  { %15884 = vst [vmem:[#allocation32_spill] sm:$0xff] %v11655_v39  ;;  %v8930_v45 = vpop.eup %8929  ;;  %8949 = vrcp.f32 %v679_v49  ;;  %1123 = vmatprep.mubr.f32.mxu1 %v11655_v39  ;;  %v11670_v17 = vmul.f32 %v8928_v7, %v11240_v20 }
 0x160   :  { %v8932_v51 = vpop.eup %8931  ;;  %8951 = vrcp.f32 %v682_v4  ;;  %1124 = vmatmul.mubr.f32.gmra.mrb[62].mxu1 %v11659_v37  ;;  %v11673_v3 = vmul.f32 %v8930_v45, %v11260_v33  ;;  %v7706_v4 = vmul.f32 -1.442695, %v11411_v13 }
 0x161   :  { %v8934_v10 = vpop.eup %8933  ;;  %8953 = vpow2.f32 %v7702_v41  ;;  %1129 = vmatprep.mubr.f32.mxu1 %v11663_v21  ;;  %15887 = vst [vmem:[#allocation35_spill] sm:$0xff] %v11670_v17  ;;  %v683_v57 = vadd.f32 1.0, %v8932_v51  ;;  %v7705_v41 = vmul.f32 -1.442695, %v11407_v59 }
 0x162   :  { %v8936_v56 = vpop.eup %8935  ;;  %8955 = vpow2.f32 %v7701_v1  ;;  %15888 = vst [vmem:[#allocation36_spill] sm:$0xff] %v11673_v3  ;;  %v11680_v7 = vmul.f32 %v8934_v10, %v11254_v30 }
 0x163   :  { %v8938_v23 = vpop.eup %8937  ;;  %8957 = vrcp.f32 %v681_v62  ;;  %v11689_v10 = vmul.f32 %v8936_v56, %v11268_v40 }
 0x164   :  { %v8940_v49 = vpop.eup %8939  ;;  %8959 = vrcp.f32 %v684_v9  ;;  %1130 = vmatmul.mubr.f32.gmra.mrb[64].mxu1 %v11670_v17  ;;  %v686_v12 = vadd.f32 1.0, %v8938_v23  ;;  %15889 = vst [vmem:[#allocation37_spill] sm:$0xff] %v11680_v7  ;;  %v7708_v9 = vmul.f32 -1.442695, %v11429_v48 }
 0x165   :  { %v8942_v63 = vpop.eup %8941  ;;  %8961 = vpow2.f32 %v7704_v52  ;;  %1135 = vmatprep.mubr.f32.mxu1 %v11673_v3  ;;  %v11683_v45 = vmul.f32 %v8940_v49, %v11274_v43  ;;  %15891 = vst [vmem:[#allocation39_spill] sm:$0xff] %v11689_v10  ;;  %v7707_v49 = vmul.f32 -1.442695, %v11422_v58 }
 0x166   :  { %v8944_v20 = vpop.eup %8943  ;;  %8963 = vpow2.f32 %v7703_v36  ;;  %v685_v62 = vadd.f32 1.0, %v8942_v63  ;;  %v7710_v63 = vmul.f32 -1.442695, %v11447_v32 }
 0x167   :  { %v8946_v33 = vpop.eup %8945  ;;  %8965 = vrcp.f32 %v683_v57  ;;  %15890 = vst [vmem:[#allocation38_spill] sm:$0xff] %v11683_v45  ;;  %v11692_v23 = vmul.f32 %v8944_v20, %v11288_v53 }
 0x168   :  { %v8948_v1 = vpop.eup %8947  ;;  %8967 = vpow2.f32 %v7705_v41  ;;  %1136 = vmatmul.mubr.f32.gmra.mrb[66].mxu1 %v11680_v7  ;;  %v688_v30 = vadd.f32 1.0, %v8946_v33 }
 0x169   :  { %v8950_v51 = vpop.eup %8949  ;;  %8969 = vpow2.f32 %v7706_v4  ;;  %1141 = vmatprep.mubr.f32.mxu1 %v11683_v45  ;;  %v687_v43 = vadd.f32 1.0, %v8948_v1  ;;  %15892 = vst [vmem:[#allocation40_spill] sm:$0xff] %v11692_v23  ;;  %v7709_v1 = vmul.f32 -1.442695, %v11442_v0 }
 0x16a   :  { %v8952_v52 = vpop.eup %8951  ;;  %8971 = vrcp.f32 %v686_v12  ;;  %v11699_v56 = vmul.f32 %v8950_v51, %v11282_v50 }
 0x16b   :  { %v8954_v36 = vpop.eup %8953  ;;  %8973 = vrcp.f32 %v685_v62  ;;  %v11702_v12 = vmul.f32 %v8952_v52, %v11303_v6 }
 0x16c   :  { %v8956_v57 = vpop.eup %8955  ;;  %1142 = vmatmul.mubr.f32.gmra.mrb[68].mxu1 %v11689_v10  ;;  %8975 = vpow2.f32 %v7708_v9  ;;  %v690_v40 = vadd.f32 1.0, %v8954_v36  ;;  %15893 = vst [vmem:[#allocation41_spill] sm:$0xff] %v11699_v56  ;;  %v7712_v9 = vmul.f32 -1.442695, %v11474_v16 }
 0x16d   :  { %v8958_v41 = vpop.eup %8957  ;;  %1147 = vmatprep.mubr.f32.mxu1 %v11692_v23  ;;  %8977 = vrcp.f32 %v688_v30  ;;  %v689_v20 = vadd.f32 1.0, %v8956_v57  ;;  %15894 = vst [vmem:[#allocation42_spill] sm:$0xff] %v11702_v12  ;;  %v7711_v57 = vmul.f32 -1.442695, %v11467_v18 }
 0x16e   :  { %v8960_v4 = vpop.eup %8959  ;;  %8979 = vrcp.f32 %v687_v43  ;;  %v11709_v30 = vmul.f32 %v8958_v41, %v11299_v2 }
 0x16f   :  { %v8962_v53 = vpop.eup %8961  ;;  %8981 = vpow2.f32 %v7707_v49  ;;  %v11712_v36 = vmul.f32 %v8960_v4, %v11317_v29  ;;  %v7714_v49 = vmul.f32 -1.442695, %v11495_v27 }
 0x170   :  { %v8964_v33 = vpop.eup %8963  ;;  %1148 = vmatmul.mubr.f32.gmra.mrb[70].mxu1 %v11699_v56  ;;  %8983 = vpow2.f32 %v7710_v63  ;;  %v692_v51 = vadd.f32 1.0, %v8962_v53  ;;  %15895 = vst [vmem:[#allocation43_spill] sm:$0xff] %v11709_v30 }
 0x171   :  { %v8966_v62 = vpop.eup %8965  ;;  %1153 = vmatprep.mubr.f32.mxu1 %v11702_v12  ;;  %8985 = vrcp.f32 %v690_v40  ;;  %v691_v52 = vadd.f32 1.0, %v8964_v33  ;;  %15896 = vst [vmem:[#allocation44_spill] sm:$0xff] %v11712_v36 }
 0x172   :  { %v8968_v50 = vpop.eup %8967  ;;  %8987 = vrcp.f32 %v689_v20  ;;  %v11719_v41 = vmul.f32 %v8966_v62, %v11313_v24  ;;  %v7713_v20 = vmul.f32 -1.442695, %v11491_v26  ;;  %v1690_v24 = vld [vmem:[%s15567_s3 + $0x80] sm:$0xff] }
 0x173   :  { %v8970_v6 = vpop.eup %8969  ;;  %8989 = vpow2.f32 %v7709_v1  ;;  %v693_v29 = vadd.f32 1.0, %v8968_v50  ;;  %v7716_v1 = vmul.f32 -1.442695, %v11515_v11 }
 0x174   :  { %v8972_v43 = vpop.eup %8971  ;;  %1154 = vmatmul.mubr.f32.gmra.mrb[72].mxu1 %v11709_v30  ;;  %8991 = vpow2.f32 %v7712_v9  ;;  %v694_v2 = vadd.f32 1.0, %v8970_v6  ;;  %15897 = vst [vmem:[#allocation45_spill] sm:$0xff] %v11719_v41 }
 0x175   :  { %1159 = vmatprep.mubr.f32.mxu1 %v11712_v36  ;;  %v8974_v63 = vpop.eup %8973  ;;  %8993 = vrcp.f32 %v692_v51  ;;  %v11722_v4 = vmul.f32 %v8972_v43, %v11331_v54  ;;  %v1691_v54 = vld [vmem:[%s15567_s3 + $0x88] sm:$0xff] }
 0x176   :  { %v8976_v40 = vpop.eup %8975  ;;  %8995 = vrcp.f32 %v691_v52  ;;  %v11735_v50 = vmul.f32 %v8974_v63, %v11327_v46  ;;  %v8460_v51 = vpack.c.bf16 %v1691_v54, %v1690_v24  ;;  %v15901_v46 = vmov 0.0|0.0   ;;  %v1692_v63 = vld [vmem:[%s15567_s3 + $0x90] sm:$0xff] }
 0x177   :  { %15898 = vst [vmem:[#allocation46_spill] sm:$0xff] %v11722_v4  ;;  %v8978_v53 = vpop.eup %8977  ;;  %8997 = vpow2.f32 %v7711_v57  ;;  %v696_v9 = vadd.f32 1.0, %v8976_v40  ;;  %v7715_v57 = vmul.f32 -1.442695, %v11512_v5 }
 0x178   :  { %1160 = vmatmul.mubr.f32.gmra.mrb[74].mxu1 %v11719_v41  ;;  %v8980_v33 = vpop.eup %8979  ;;  %8999 = vpow2.f32 %v7714_v49  ;;  %15899 = vst [vmem:[#allocation47_spill] sm:$0xff] %v11735_v50  ;;  %v11738_v52 = vmul.f32 %v8978_v53, %v11351_v19  ;;  %8461 = vmatpush1.bf16.msra.mxu0 %v8460_v51  ;;  %v1693_v19 = vld [vmem:[%s15567_s3 + $0x98] sm:$0xff] }
 0x179   :  { %1165 = vmatprep.mubr.f32.mxu1 %v11722_v4  ;;  %v8982_v62 = vpop.eup %8981  ;;  %9001 = vrcp.f32 %v694_v2  ;;  %8462 = vmatprep.subr.bf16.mxu0 %v15901_v46  ;;  %v8463_v53 = vpack.c.bf16 %v1693_v19, %v1692_v63 }
 0x17a   :  { %v8984_v6 = vpop.eup %8983  ;;  %9003 = vrcp.f32 %v693_v29  ;;  %15900 = vst [vmem:[#allocation48_spill] sm:$0xff] %v11738_v52  ;;  %v695_v4 = vadd.f32 1.0, %v8982_v62  ;;  %v11751_v29 = vmul.f32 %v8980_v33, %v11347_v8 }
 0x17b   :  { %v8986_v43 = vpop.eup %8985  ;;  %9005 = vpow2.f32 %v7713_v20  ;;  %v698_v40 = vadd.f32 1.0, %v8984_v6  ;;  %v1694_v20 = vld [vmem:[%s15567_s3 + $0xa0] sm:$0xff] }
 0x17c   :  { %1166 = vmatmul.mubr.f32.gmra.mrb[76].mxu1 %v11735_v50  ;;  %v8988_v49 = vpop.eup %8987  ;;  %9007 = vpow2.f32 %v7716_v1  ;;  %15902 = vst [vmem:[#allocation49_spill] sm:$0xff] %v11751_v29  ;;  %v1695_v1 = vld [vmem:[%s15567_s3 + $0xa8] sm:$0xff]  ;;  %v11760_v54 = vmul.f32 %v8986_v43, %v11373_v28  ;;  %8464 = vmatpush1.bf16.msra.mxu0 %v8463_v53 }
 0x17d   :  { %1171 = vmatprep.mubr.f32.mxu1 %v11738_v52  ;;  %v8990_v2 = vpop.eup %8989  ;;  %9009 = vrcp.f32 %v696_v9  ;;  %v8466_v8 = vpack.c.bf16 %v1695_v1, %v1694_v20  ;;  %8465 = vmatprep.subr.bf16.mxu0 %v15901_v46  ;;  %v11766_v63 = vmul.f32 %v8988_v49, %v11369_v47 }
 0x17e   :  { %v8992_v24 = vpop.eup %8991  ;;  %15903 = vst [vmem:[#allocation50_spill] sm:$0xff] %v11760_v54  ;;  %9011 = vpow2.f32 %v7715_v57  ;;  %v697_v9 = vadd.f32 1.0, %v8990_v2  ;;  %v1696_v57 = vld [vmem:[%s15567_s3 + $0xb0] sm:$0xff] }
 0x17f   :  { %v8994_v62 = vpop.eup %8993  ;;  %9013 = vrcp.f32 %v695_v4  ;;  %v700_v6 = vadd.f32 1.0, %v8992_v24  ;;  %15904 = vst [vmem:[#allocation51_spill] sm:$0xff] %v11766_v63  ;;  %v1697_v4 = vld [vmem:[%s15567_s3 + $0xb8] sm:$0xff]  ;;  %v1698_v24 = vld [vmem:[%s15567_s3 + $0xc0] sm:$0xff] }
 0x180   :  { %1172 = vmatmul.mubr.f32.gmra.mrb[78].mxu1 %v11751_v29  ;;  %v8996_v33 = vpop.eup %8995  ;;  %9015 = vrcp.f32 %v698_v40  ;;  %v11769_v43 = vmul.f32 %v8994_v62, %v11395_v38  ;;  %8467 = vmatpush1.bf16.msra.mxu0 %v8466_v8  ;;  %v8469_v2 = vpack.c.bf16 %v1697_v4, %v1696_v57  ;;  %v1699_v62 = vld [vmem:[%s15567_s3 + $0xc8] sm:$0xff]  ;;  %v1700_v57 = vld [vmem:[%s15567_s3 + $0xd0] sm:$0xff]  ;;  %v1701_v4 = vld [vmem:[%s15567_s3 + $0xd8] sm:$0xff] }
 0x181   :  { %1177 = vmatprep.mubr.f32.mxu1 %v11760_v54  ;;  %v8998_v51 = vpop.eup %8997  ;;  %9017 = vrcp.f32 %v697_v9  ;;  %8468 = vmatprep.subr.bf16.mxu0 %v15901_v46  ;;  %v11781_v53 = vmul.f32 %v8996_v33, %v11391_v25  ;;  %v8472_v9 = vpack.c.bf16 %v1699_v62, %v1698_v24  ;;  %v1704_v62 = vld [vmem:[%s15567_s3 + $0xf0] sm:$0xff] }
 0x182   :  { %v9000_v28 = vpop.eup %8999  ;;  %15905 = vst [vmem:[#allocation52_spill] sm:$0xff] %v11769_v43  ;;  %v699_v47 = vadd.f32 1.0, %v8998_v51  ;;  %9019 = vrcp.f32 %v700_v6 }
 0x183   :  { %v9002_v19 = vpop.eup %9001  ;;  %v702_v49 = vadd.f32 1.0, %v9000_v28  ;;  %15906 = vst [vmem:[#allocation53_spill] sm:$0xff] %v11781_v53 }
 0x184   :  { %1178 = vmatmul.mubr.f32.gmra.mrb[80].mxu1 %v11766_v63  ;;  %v9004_v40 = vpop.eup %9003  ;;  %v11784_v1 = vmul.f32 %v9002_v19, %v11411_v13  ;;  %8470 = vmatpush1.bf16.msra.mxu0 %v8469_v2  ;;  %9021 = vrcp.f32 %v699_v47  ;;  %v8475_v2 = vpack.c.bf16 %v1701_v4, %v1700_v57  ;;  %v1703_v47 = vld [vmem:[%s15567_s3 + $0xe8] sm:$0xff] }
 0x185   :  { %1183 = vmatprep.mubr.f32.mxu1 %v11769_v43  ;;  %v9006_v38 = vpop.eup %9005  ;;  %8471 = vmatprep.subr.bf16.mxu0 %v15901_v46  ;;  %9023 = vrcp.f32 %v702_v49  ;;  %v11796_v51 = vmul.f32 %v9004_v40, %v11407_v59  ;;  %v1702_v40 = vld [vmem:[%s15567_s3 + $0xe0] sm:$0xff] }
 0x186   :  { %v9008_v20 = vpop.eup %9007  ;;  %15907 = vst [vmem:[#allocation54_spill] sm:$0xff] %v11784_v1  ;;  %v701_v25 = vadd.f32 1.0, %v9006_v38  ;;  %v8478_v24 = vpack.c.bf16 %v1703_v47, %v1702_v40  ;;  %v10952_v40 = vld [vmem:[%s15570_s6 + $0x8] sm:$0xff] }
 0x187   :  { %v9010_v8 = vpop.eup %9009  ;;  %v704_v33 = vadd.f32 1.0, %v9008_v20  ;;  %15908 = vst [vmem:[#allocation55_spill] sm:$0xff] %v11796_v51 }
 0x188   :  { %1184 = vmatmul.mubr.f32.gmra.mrb[82].mxu1 %v11781_v53  ;;  %v9012_v13 = vpop.eup %9011  ;;  %v11799_v28 = vmul.f32 %v9010_v8, %v11429_v48  ;;  %8473 = vmatpush1.bf16.msra.mxu0 %v8472_v9  ;;  %9025 = vrcp.f32 %v701_v25 }
 0x189   :  { %1189 = vmatprep.mubr.f32.mxu1 %v11784_v1  ;;  %v9014_v6 = vpop.eup %9013  ;;  %v703_v59 = vadd.f32 1.0, %v9012_v13  ;;  %8474 = vmatprep.subr.bf16.mxu0 %v15901_v46  ;;  %9027 = vrcp.f32 %v704_v33 }
 0x18a   :  { %15909 = vst [vmem:[#allocation56_spill] sm:$0xff] %v11799_v28  ;;  %v9016_v19 = vpop.eup %9015  ;;  %v11811_v48 = vmul.f32 %v9014_v6, %v11422_v58 }
 0x18b   :  { %v9018_v38 = vpop.eup %9017  ;;  %v11820_v49 = vmul.f32 %v9016_v19, %v11447_v32  ;;  %9029 = vrcp.f32 %v703_v59  ;;  %v1705_v32 = vld [vmem:[%s15567_s3 + $0xf8] sm:$0xff] }
 0x18c   :  { %1190 = vmatmul.mubr.f32.gmra.mrb[84].mxu1 %v11796_v51  ;;  %15910 = vst [vmem:[#allocation57_spill] sm:$0xff] %v11811_v48  ;;  %v9020_v20 = vpop.eup %9019  ;;  %8476 = vmatpush1.bf16.msra.mxu0 %v8475_v2  ;;  %v11826_v58 = vmul.f32 %v9018_v38, %v11442_v0  ;;  %v8481_v13 = vpack.c.bf16 %v1705_v32, %v1704_v62  ;;  %v15920_v2 = vld [vmem:[#allocation5_spill] sm:$0xff] }
 0x18d   :  { %1195 = vmatprep.mubr.f32.mxu1 %v11799_v28  ;;  %15911 = vst [vmem:[#allocation58_spill] sm:$0xff] %v11820_v49  ;;  %8477 = vmatprep.subr.bf16.mxu0 %v15901_v46  ;;  %v11835_v9 = vmul.f32 %v9020_v20, %v11474_v16  ;;  %v11862_v59 = vsub.s32 1, %v15920_v2 }
 0x18e   :  { %15912 = vst [vmem:[#allocation59_spill] sm:$0xff] %v11826_v58  ;;  %v9022_v8 = vpop.eup %9021 }
 0x18f   :  { %15913 = vst [vmem:[#allocation60_spill] sm:$0xff] %v11835_v9  ;;  %v9024_v25 = vpop.eup %9023  ;;  %v11841_v0 = vmul.f32 %v9022_v8, %v11467_v18  ;;  %15921 = vst [vmem:[#allocation66_spill] sm:$0xff] %v11862_v59 }
 0x190   :  { %1196 = vmatmul.mubr.f32.gmra.mrb[86].mxu1 %v11811_v48  ;;  %8479 = vmatpush1.bf16.msra.mxu0 %v8478_v24  ;;  %v11844_v6 = vmul.f32 %v9024_v25, %v11495_v27  ;;  %v15919_v27 = vmov 0.0  }
 0x191   :  { %1201 = vmatprep.mubr.f32.mxu1 %v11820_v49  ;;  %8480 = vmatprep.subr.bf16.mxu0 %v15901_v46  ;;  %15914 = vst [vmem:[#allocation61_spill] sm:$0xff] %v11841_v0 }
 0x192   :  { %v9026_v33 = vpop.eup %9025  ;;  %15915 = vst [vmem:[#allocation62_spill] sm:$0xff] %v11844_v6 }
 0x193   :  { %v9028_v57 = vpop.eup %9027  ;;  %v11849_v16 = vmul.f32 %v9026_v33, %v11491_v26  ;;  %v10951_v26 = vld [vmem:[%s15570_s6] sm:$0xff] }
 0x194   :  { %1202 = vmatmul.mubr.f32.gmra.mrb[88].mxu1 %v11826_v58  ;;  %8482 = vmatpush1.bf16.msra.mxu0 %v8481_v13  ;;  %v11852_v19 = vmul.f32 %v9028_v57, %v11515_v11  ;;  %v11868_v11 = vrot.slane %v10951_v26, %v11862_v59 }
 0x195   :  { %1207 = vmatprep.mubr.f32.mxu1 %v11835_v9  ;;  %15916 = vst [vmem:[#allocation63_spill] sm:$0xff] %v11849_v16  ;;  %v9030_v4 = vpop.eup %9029 }
 0x196   :  { %15917 = vst [vmem:[#allocation64_spill] sm:$0xff] %v11852_v19  ;;  %v11857_v18 = vmul.f32 %v9030_v4, %v11512_v5  ;;  %v11874_v5 = vrot.slane %v10952_v40, %v11862_v59 }
 0x198   :  { %1208 = vmatmul.mubr.f32.gmra.mrb[90].mxu1 %v11841_v0  ;;  %15918 = vst [vmem:[#allocation65_spill] sm:$0xff] %v11857_v18 }
 0x199   :  { %1213 = vmatprep.mubr.f32.mxu1 %v11844_v6 }
 0x19c   :  { %1214 = vmatmul.mubr.f32.gmra.mrb[92].mxu1 %v11849_v16 }
 0x19d   :  { %1219 = vmatprep.mubr.f32.mxu1 %v11852_v19 }
 0x1a0   :  { %1220 = vmatmul.mubr.f32.gmra.mrb[94].mxu1 %v11857_v18 }
 0x1a1   :  { %2332 = vmatprep.mubr.f32.mxu1 %v15919_v27 }
 0x1e1   :  { %v1035_v47 = vpop.f32.mrb[32].mxu1 }
 0x1e2   :  { %v11877_v38 = vadd.f32 %v1035_v47, %v11868_v11  ;;  %v1037_v20 = vpop.f32.mrb[33].mxu1 }
 0x1e3   :  { %v11880_v24 = vadd.f32 %v1037_v20, %v11874_v5 }
 0x1e4   :  { %v7717_v62 = vmul.f32 -1.442695, %v11877_v38 }
 0x1e5   :  { %v7718_v32 = vmul.f32 -1.442695, %v11880_v24  ;;  %v1041_v8 = vpop.f32.mrb[34].mxu1 }
 0x1e6   :  { %9031 = vpow2.f32 %v7717_v62  ;;  %v11885_v25 = vadd.f32 %v1041_v8, %v11868_v11  ;;  %v1043_v13 = vpop.f32.mrb[35].mxu1 }
 0x1e7   :  { %9033 = vpow2.f32 %v7718_v32  ;;  %v11888_v33 = vadd.f32 %v1043_v13, %v11874_v5 }
 0x1e8   :  { %v7719_v57 = vmul.f32 -1.442695, %v11885_v25 }
 0x1e9   :  { %v7720_v4 = vmul.f32 -1.442695, %v11888_v33  ;;  %v1047_v26 = vpop.f32.mrb[36].mxu1 }
 0x1ea   :  { %9035 = vpow2.f32 %v7719_v57  ;;  %v11893_v40 = vadd.f32 %v1047_v26, %v11868_v11  ;;  %v1049_v47 = vpop.f32.mrb[37].mxu1 }
 0x1eb   :  { %9037 = vpow2.f32 %v7720_v4  ;;  %v11896_v20 = vadd.f32 %v1049_v47, %v11874_v5 }
 0x1ec   :  { %v7721_v62 = vmul.f32 -1.442695, %v11893_v40 }
 0x1ed   :  { %v7722_v32 = vmul.f32 -1.442695, %v11896_v20 }
 0x1ee   :  { %9039 = vpow2.f32 %v7721_v62 }
 0x1ef   :  { %9041 = vpow2.f32 %v7722_v32  ;;  %v1053_v8 = vpop.f32.mrb[38].mxu1 }
 0x1f0   :  { %v9032_v13 = vpop.eup %9031  ;;  %v11901_v59 = vadd.f32 %v1053_v8, %v11868_v11  ;;  %v1055_v57 = vpop.f32.mrb[39].mxu1 }
 0x1f1   :  { %v9034_v18 = vpop.eup %9033  ;;  %v1418_v26 = vadd.f32 1.0, %v9032_v13  ;;  %v11904_v19 = vadd.f32 %v1055_v57, %v11874_v5 }
 0x1f2   :  { %v1419_v4 = vadd.f32 1.0, %v9034_v18  ;;  %v7723_v47 = vmul.f32 -1.442695, %v11901_v59 }
 0x1f3   :  { %9043 = vrcp.f32 %v1418_v26  ;;  %v7724_v16 = vmul.f32 -1.442695, %v11904_v19 }
 0x1f4   :  { %v1059_v6 = vpop.f32.mrb[40].mxu1  ;;  %v9036_v62 = vpop.eup %9035  ;;  %9045 = vrcp.f32 %v1419_v4 }
 0x1f5   :  { %v11909_v32 = vadd.f32 %v1059_v6, %v11868_v11  ;;  %v1061_v8 = vpop.f32.mrb[41].mxu1  ;;  %v9038_v0 = vpop.eup %9037  ;;  %v1420_v9 = vadd.f32 1.0, %v9036_v62  ;;  %9047 = vpow2.f32 %v7723_v47 }
 0x1f6   :  { %v11912_v13 = vadd.f32 %v1061_v8, %v11874_v5  ;;  %v1421_v57 = vadd.f32 1.0, %v9038_v0  ;;  %9049 = vpow2.f32 %v7724_v16 }
 0x1f7   :  { %v7725_v18 = vmul.f32 -1.442695, %v11909_v32  ;;  %9051 = vrcp.f32 %v1420_v9 }
 0x1f8   :  { %v7726_v26 = vmul.f32 -1.442695, %v11912_v13  ;;  %v1065_v58 = vpop.f32.mrb[42].mxu1  ;;  %v9040_v49 = vpop.eup %9039  ;;  %9053 = vrcp.f32 %v1421_v57 }
 0x1f9   :  { %v11917_v6 = vadd.f32 %v1065_v58, %v11868_v11  ;;  %v1067_v4 = vpop.f32.mrb[43].mxu1  ;;  %v9042_v48 = vpop.eup %9041  ;;  %v1422_v62 = vadd.f32 1.0, %v9040_v49  ;;  %9055 = vpow2.f32 %v7725_v18 }
 0x1fa   :  { %v11920_v47 = vadd.f32 %v1067_v4, %v11874_v5  ;;  %v1423_v0 = vadd.f32 1.0, %v9042_v48  ;;  %9057 = vpow2.f32 %v7726_v26 }
 0x1fb   :  { %v7727_v16 = vmul.f32 -1.442695, %v11917_v6  ;;  %9059 = vrcp.f32 %v1422_v62 }
 0x1fc   :  { %v7728_v9 = vmul.f32 -1.442695, %v11920_v47  ;;  %v1071_v8 = vpop.f32.mrb[44].mxu1  ;;  %9061 = vrcp.f32 %v1423_v0 }
 0x1fd   :  { %v11925_v57 = vadd.f32 %v1071_v8, %v11868_v11  ;;  %v1073_v58 = vpop.f32.mrb[45].mxu1  ;;  %v9044_v28 = vpop.eup %9043  ;;  %9063 = vpow2.f32 %v7727_v16 }
 0x1fe   :  { %v11928_v49 = vadd.f32 %v1073_v58, %v11874_v5  ;;  %v9046_v18 = vpop.eup %9045  ;;  %9065 = vpow2.f32 %v7728_v9  ;;  %v11936_v8 = vmul.f32 %v9044_v28, %v11877_v38 }
 0x1ff   :  { %v7729_v48 = vmul.f32 -1.442695, %v11925_v57  ;;  %v9048_v26 = vpop.eup %9047  ;;  %v11933_v51 = vmul.f32 %v9046_v18, %v11880_v24 }
 0x200   :  { %v7730_v4 = vmul.f32 -1.442695, %v11928_v49  ;;  %v1077_v62 = vpop.f32.mrb[46].mxu1  ;;  %v9050_v0 = vpop.eup %9049  ;;  %v1424_v1 = vadd.f32 1.0, %v9048_v26 }
 0x201   :  { %9067 = vpow2.f32 %v7729_v48  ;;  %v11939_v16 = vadd.f32 %v1077_v62, %v11868_v11  ;;  %v1079_v58 = vpop.f32.mrb[47].mxu1  ;;  %v9052_v9 = vpop.eup %9051  ;;  %v1425_v53 = vadd.f32 1.0, %v9050_v0  ;;  %1774 = vmatprep.mubr.f32.mxu0 %v11933_v51 }
 0x202   :  { %9069 = vpow2.f32 %v7730_v4  ;;  %v11942_v43 = vadd.f32 %v1079_v58, %v11874_v5  ;;  %v9054_v24 = vpop.eup %9053  ;;  %1775 = vmatmul.mubr.f32.vlgmr.msra.gmra.mrb[32].mxu0 %v11936_v8 }
 0x203   :  { %9071 = vrcp.f32 %v1424_v1  ;;  %v7731_v18 = vmul.f32 -1.442695, %v11939_v16  ;;  %v9056_v28 = vpop.eup %9055  ;;  %v11949_v26 = vmul.f32 %v9054_v24, %v11888_v33  ;;  %v11955_v1 = vmul.f32 %v9052_v9, %v11885_v25 }
 0x204   :  { %9073 = vrcp.f32 %v1425_v53  ;;  %v7732_v38 = vmul.f32 -1.442695, %v11942_v43  ;;  %v1083_v48 = vpop.f32.mrb[48].mxu1  ;;  %v9058_v4 = vpop.eup %9057  ;;  %v1426_v62 = vadd.f32 1.0, %v9056_v28 }
 0x205   :  { %9075 = vpow2.f32 %v7731_v18  ;;  %v11952_v0 = vadd.f32 %v1083_v48, %v11868_v11  ;;  %v1085_v58 = vpop.f32.mrb[49].mxu1  ;;  %v9060_v63 = vpop.eup %9059  ;;  %v1427_v54 = vadd.f32 1.0, %v9058_v4  ;;  %1779 = vmatprep.mubr.f32.mxu0 %v11949_v26 }
 0x206   :  { %9077 = vpow2.f32 %v7732_v38  ;;  %v11958_v53 = vadd.f32 %v1085_v58, %v11874_v5  ;;  %v9062_v33 = vpop.eup %9061  ;;  %1780 = vmatmul.mubr.f32.gmra.mrb[34].mxu0 %v11955_v1  ;;  %v11968_v4 = vmul.f32 %v9060_v63, %v11893_v40  ;;  %v2160_v40 = vld [vmem:[%s15568_s4 + $0x8] sm:$0xff] }
 0x207   :  { %9079 = vrcp.f32 %v1426_v62  ;;  %v7733_v24 = vmul.f32 -1.442695, %v11952_v0  ;;  %v9064_v18 = vpop.eup %9063  ;;  %v11965_v25 = vmul.f32 %v9062_v33, %v11896_v20 }
 0x208   :  { %9081 = vrcp.f32 %v1427_v54  ;;  %v7734_v28 = vmul.f32 -1.442695, %v11958_v53  ;;  %v9066_v9 = vpop.eup %9065  ;;  %v1428_v38 = vadd.f32 1.0, %v9064_v18  ;;  %v2162_v18 = vld [vmem:[%s15568_s4 + $0x18] sm:$0xff] }
 0x209   :  { %9083 = vpow2.f32 %v7733_v24  ;;  %v1089_v48 = vpop.f32.mrb[50].mxu1  ;;  %v1429_v58 = vadd.f32 1.0, %v9066_v9  ;;  %1784 = vmatprep.mubr.f32.mxu0 %v11965_v25 }
 0x20a   :  { %9085 = vpow2.f32 %v7734_v28  ;;  %v11971_v62 = vadd.f32 %v1089_v48, %v11868_v11  ;;  %v1091_v29 = vpop.f32.mrb[51].mxu1  ;;  %1785 = vmatmul.mubr.f32.gmra.mrb[36].mxu0 %v11968_v4  ;;  %v8483_v48 = vpack.c.bf16 %v2162_v18, %v2160_v40 }
 0x20b   :  { %v9068_v54 = vpop.eup %9067  ;;  %9087 = vrcp.f32 %v1428_v38  ;;  %v11975_v20 = vadd.f32 %v1091_v29, %v11874_v5  ;;  %v2159_v29 = vld [vmem:[%s15568_s4] sm:$0xff] }
 0x20c   :  { %v9070_v33 = vpop.eup %9069  ;;  %9089 = vrcp.f32 %v1429_v58  ;;  %v1430_v24 = vadd.f32 1.0, %v9068_v54  ;;  %v7735_v63 = vmul.f32 -1.442695, %v11971_v62  ;;  %v2161_v58 = vld [vmem:[%s15568_s4 + $0x10] sm:$0xff]  ;;  %8484 = vmatprep.subr.bf16.mxu1 %v8483_v48 }
 0x20d   :  { %v9072_v28 = vpop.eup %9071  ;;  %v1431_v9 = vadd.f32 1.0, %v9070_v33  ;;  %v7736_v38 = vmul.f32 -1.442695, %v11975_v20  ;;  %v8485_v50 = vpack.c.bf16 %v2161_v58, %v2159_v29 }
 0x20e   :  { %v9074_v54 = vpop.eup %9073  ;;  %9091 = vrcp.f32 %v1430_v24  ;;  %v1095_v52 = vpop.f32.mrb[52].mxu1  ;;  %v12002_v24 = vmul.f32 %v9072_v28, %v11901_v59 }
 0x20f   :  { %v9076_v41 = vpop.eup %9075  ;;  %9093 = vrcp.f32 %v1431_v9  ;;  %v11993_v36 = vadd.f32 %v1095_v52, %v11868_v11  ;;  %v1097_v30 = vpop.f32.mrb[53].mxu1  ;;  %v11996_v12 = vmul.f32 %v9074_v54, %v11904_v19  ;;  %8486 = vmatpush1.bf16.msra.mxu1 %v8485_v50 }
 0x210   :  { %v9078_v33 = vpop.eup %9077  ;;  %v1432_v40 = vadd.f32 1.0, %v9076_v41  ;;  %9095 = vpow2.f32 %v7735_v63  ;;  %v11999_v18 = vadd.f32 %v1097_v30, %v11874_v5  ;;  %8551 = vmatprep.subr.bf16.mxu1 %v15901_v46 }
 0x211   :  { %v9080_v29 = vpop.eup %9079  ;;  %v1433_v9 = vadd.f32 1.0, %v9078_v33  ;;  %9097 = vpow2.f32 %v7736_v38  ;;  %v7737_v52 = vmul.f32 -1.442695, %v11993_v36  ;;  %1789 = vmatprep.mubr.f32.mxu0 %v11996_v12 }
 0x212   :  { %v9082_v19 = vpop.eup %9081  ;;  %9099 = vrcp.f32 %v1432_v40  ;;  %v7738_v41 = vmul.f32 -1.442695, %v11999_v18  ;;  %1790 = vmatmul.mubr.f32.gmra.mrb[38].mxu0 %v12002_v24  ;;  %v12013_v28 = vmul.f32 %v9080_v29, %v11909_v32 }
 0x213   :  { %v9084_v30 = vpop.eup %9083  ;;  %9101 = vrcp.f32 %v1433_v9  ;;  %v12010_v59 = vmul.f32 %v9082_v19, %v11912_v13 }
 0x214   :  { %v9086_v50 = vpop.eup %9085  ;;  %v1434_v63 = vadd.f32 1.0, %v9084_v30  ;;  %9103 = vpow2.f32 %v7737_v52 }
 0x215   :  { %v9088_v38 = vpop.eup %9087  ;;  %v1435_v48 = vadd.f32 1.0, %v9086_v50  ;;  %9105 = vpow2.f32 %v7738_v41  ;;  %v1101_v58 = vpop.f32.mrb[54].mxu1  ;;  %1794 = vmatprep.mubr.f32.mxu0 %v12010_v59 }
 0x216   :  { %v9090_v54 = vpop.eup %9089  ;;  %9107 = vrcp.f32 %v1434_v63  ;;  %v12017_v33 = vadd.f32 %v1101_v58, %v11868_v11  ;;  %v1103_v40 = vpop.f32.mrb[55].mxu1  ;;  %1795 = vmatmul.mubr.f32.gmra.mrb[40].mxu0 %v12013_v28  ;;  %v12028_v52 = vmul.f32 %v9088_v38, %v11917_v6 }
 0x217   :  { %9109 = vrcp.f32 %v1435_v48  ;;  %v12021_v13 = vadd.f32 %v1103_v40, %v11874_v5  ;;  %v12024_v32 = vmul.f32 %v9090_v54, %v11920_v47 }
 0x218   :  { %v9092_v29 = vpop.eup %9091  ;;  %v7739_v9 = vmul.f32 -1.442695, %v12017_v33 }
 0x219   :  { %v9094_v19 = vpop.eup %9093  ;;  %v7740_v41 = vmul.f32 -1.442695, %v12021_v13  ;;  %1799 = vmatprep.mubr.f32.mxu0 %v12024_v32  ;;  %v12038_v6 = vmul.f32 %v9092_v29, %v11925_v57 }
 0x21a   :  { %v9096_v30 = vpop.eup %9095  ;;  %9111 = vpow2.f32 %v7739_v9  ;;  %1800 = vmatmul.mubr.f32.gmra.mrb[42].mxu0 %v12028_v52  ;;  %v12034_v50 = vmul.f32 %v9094_v19, %v11928_v49 }
 0x21b   :  { %v9098_v47 = vpop.eup %9097  ;;  %v1436_v63 = vadd.f32 1.0, %v9096_v30  ;;  %9113 = vpow2.f32 %v7740_v41 }
 0x21c   :  { %v9100_v48 = vpop.eup %9099  ;;  %v1437_v58 = vadd.f32 1.0, %v9098_v47  ;;  %v1107_v54 = vpop.f32.mrb[56].mxu1  ;;  %1804 = vmatprep.mubr.f32.mxu0 %v12034_v50 }
 0x21d   :  { %v9102_v38 = vpop.eup %9101  ;;  %9115 = vrcp.f32 %v1436_v63  ;;  %v12041_v40 = vadd.f32 %v1107_v54, %v11868_v11  ;;  %v1109_v9 = vpop.f32.mrb[57].mxu1 }
 0x21e   :  { %v9104_v56 = vpop.eup %9103  ;;  %9117 = vrcp.f32 %v1437_v58  ;;  %v12044_v49 = vadd.f32 %v1109_v9, %v11874_v5  ;;  %1805 = vmatmul.mubr.f32.gmra.mrb[44].mxu0 %v12038_v6  ;;  %v12048_v19 = vmul.f32 %v9102_v38, %v11942_v43  ;;  %v12054_v58 = vmul.f32 %v9100_v48, %v11939_v16 }
 0x21f   :  { %v9106_v41 = vpop.eup %9105  ;;  %v1438_v30 = vadd.f32 1.0, %v9104_v56  ;;  %v7741_v57 = vmul.f32 -1.442695, %v12041_v40 }
 0x220   :  { %v9108_v29 = vpop.eup %9107  ;;  %v1439_v47 = vadd.f32 1.0, %v9106_v41  ;;  %v7742_v63 = vmul.f32 -1.442695, %v12044_v49  ;;  %1809 = vmatprep.mubr.f32.mxu0 %v12048_v19  ;;  %v1113_v9 = vpop.f32.mrb[58].mxu1 }
 0x221   :  { %v9110_v54 = vpop.eup %9109  ;;  %9119 = vrcp.f32 %v1438_v30  ;;  %v12057_v43 = vadd.f32 %v1113_v9, %v11868_v11  ;;  %v1115_v38 = vpop.f32.mrb[59].mxu1  ;;  %v12069_v48 = vmul.f32 %v9108_v29, %v11952_v0 }
 0x222   :  { %9121 = vrcp.f32 %v1439_v47  ;;  %1810 = vmatmul.mubr.f32.gmra.mrb[46].mxu0 %v12054_v58  ;;  %v12061_v56 = vmul.f32 %v9110_v54, %v11958_v53  ;;  %v12064_v41 = vadd.f32 %v1115_v38, %v11874_v5 }
 0x223   :  { %9123 = vpow2.f32 %v7741_v57  ;;  %v7743_v16 = vmul.f32 -1.442695, %v12057_v43 }
 0x224   :  { %v9112_v23 = vpop.eup %9111  ;;  %9125 = vpow2.f32 %v7742_v63  ;;  %1814 = vmatprep.mubr.f32.mxu0 %v12061_v56  ;;  %v7744_v9 = vmul.f32 -1.442695, %v12064_v41 }
 0x225   :  { %v9114_v30 = vpop.eup %9113  ;;  %v1440_v47 = vadd.f32 1.0, %v9112_v23  ;;  %9127 = vpow2.f32 %v7743_v16  ;;  %v1119_v53 = vpop.f32.mrb[60].mxu1 }
 0x226   :  { %v1441_v10 = vadd.f32 1.0, %v9114_v30  ;;  %1815 = vmatmul.mubr.f32.gmra.mrb[48].mxu0 %v12069_v48  ;;  %v12074_v63 = vadd.f32 %v1119_v53, %v11868_v11  ;;  %v1121_v54 = vpop.f32.mrb[61].mxu1 }
 0x227   :  { %v9116_v57 = vpop.eup %9115  ;;  %9129 = vrcp.f32 %v1440_v47  ;;  %v12077_v0 = vadd.f32 %v1121_v54, %v11874_v5 }
 0x228   :  { %v9118_v38 = vpop.eup %9117  ;;  %9131 = vrcp.f32 %v1441_v10  ;;  %v7745_v23 = vmul.f32 -1.442695, %v12074_v63  ;;  %v12085_v30 = vmul.f32 %v9116_v57, %v11971_v62 }
 0x229   :  { %9133 = vpow2.f32 %v7744_v9  ;;  %v12081_v29 = vmul.f32 %v9118_v38, %v11975_v20  ;;  %v7746_v16 = vmul.f32 -1.442695, %v12077_v0 }
 0x22a   :  { %9135 = vpow2.f32 %v7745_v23 }
 0x22b   :  { %v9120_v47 = vpop.eup %9119  ;;  %1819 = vmatprep.mubr.f32.mxu0 %v12081_v29  ;;  %9137 = vpow2.f32 %v7746_v16 }
 0x22c   :  { %v9122_v53 = vpop.eup %9121  ;;  %1820 = vmatmul.mubr.f32.gmra.mrb[50].mxu0 %v12085_v30  ;;  %v12093_v38 = vmul.f32 %v9120_v47, %v11993_v36 }
 0x22d   :  { %v9124_v10 = vpop.eup %9123  ;;  %v12090_v9 = vmul.f32 %v9122_v53, %v11999_v18 }
 0x22e   :  { %v9126_v54 = vpop.eup %9125  ;;  %v1442_v20 = vadd.f32 1.0, %v9124_v10 }
 0x22f   :  { %v1443_v45 = vadd.f32 1.0, %v9126_v54  ;;  %1824 = vmatprep.mubr.f32.mxu0 %v12090_v9  ;;  %v9128_v62 = vpop.eup %9127 }
 0x230   :  { %9139 = vrcp.f32 %v1442_v20  ;;  %1825 = vmatmul.mubr.f32.gmra.mrb[52].mxu0 %v12093_v38  ;;  %v1444_v23 = vadd.f32 1.0, %v9128_v62 }
 0x231   :  { %v9130_v57 = vpop.eup %9129  ;;  %9141 = vrcp.f32 %v1443_v45 }
 0x232   :  { %v9132_v16 = vpop.eup %9131  ;;  %v12101_v36 = vmul.f32 %v9130_v57, %v12017_v33  ;;  %9143 = vrcp.f32 %v1444_v23 }
 0x233   :  { %v9134_v7 = vpop.eup %9133  ;;  %v12098_v18 = vmul.f32 %v9132_v16, %v12021_v13  ;;  %v1125_v10 = vpop.f32.mrb[62].mxu1 }
 0x234   :  { %v1445_v53 = vadd.f32 1.0, %v9134_v7  ;;  %15923 = vst [vmem:[#allocation68_spill] sm:$0xff] %v12101_v36  ;;  %v9136_v47 = vpop.eup %9135  ;;  %v12104_v54 = vadd.f32 %v1125_v10, %v11868_v11  ;;  %v1127_v20 = vpop.f32.mrb[63].mxu1 }
 0x235   :  { %15922 = vst [vmem:[#allocation67_spill] sm:$0xff] %v12098_v18  ;;  %1829 = vmatprep.mubr.f32.mxu0 %v12098_v18  ;;  %v9138_v45 = vpop.eup %9137  ;;  %v1446_v62 = vadd.f32 1.0, %v9136_v47  ;;  %v12108_v3 = vadd.f32 %v1127_v20, %v11874_v5 }
 0x236   :  { %9145 = vrcp.f32 %v1445_v53  ;;  %1830 = vmatmul.mubr.f32.gmra.mrb[54].mxu0 %v12101_v36  ;;  %v1447_v7 = vadd.f32 1.0, %v9138_v45  ;;  %v7747_v33 = vmul.f32 -1.442695, %v12104_v54 }
 0x237   :  { %9147 = vrcp.f32 %v1446_v62  ;;  %v7748_v13 = vmul.f32 -1.442695, %v12108_v3  ;;  %v1131_v57 = vpop.f32.mrb[64].mxu1 }
 0x238   :  { %9149 = vrcp.f32 %v1447_v7  ;;  %v12114_v23 = vadd.f32 %v1131_v57, %v11868_v11  ;;  %v1133_v16 = vpop.f32.mrb[65].mxu1 }
 0x239   :  { %9151 = vpow2.f32 %v7747_v33  ;;  %v12117_v53 = vadd.f32 %v1133_v16, %v11874_v5 }
 0x23a   :  { %v9140_v10 = vpop.eup %9139  ;;  %9153 = vpow2.f32 %v7748_v13  ;;  %v7749_v20 = vmul.f32 -1.442695, %v12114_v23 }
 0x23b   :  { %v9142_v47 = vpop.eup %9141  ;;  %v7750_v45 = vmul.f32 -1.442695, %v12117_v53  ;;  %v1137_v62 = vpop.f32.mrb[66].mxu1  ;;  %v12128_v33 = vmul.f32 %v9140_v10, %v12041_v40 }
 0x23c   :  { %v12122_v17 = vmul.f32 %v9142_v47, %v12044_v49  ;;  %9155 = vpow2.f32 %v7749_v20  ;;  %v12125_v7 = vadd.f32 %v1137_v62, %v11868_v11  ;;  %v1139_v57 = vpop.f32.mrb[67].mxu1  ;;  %v9144_v13 = vpop.eup %9143 }
 0x23d   :  { %15925 = vst [vmem:[#allocation70_spill] sm:$0xff] %v12128_v33  ;;  %9157 = vpow2.f32 %v7750_v45  ;;  %v12131_v16 = vadd.f32 %v1139_v57, %v11874_v5  ;;  %v12147_v37 = vmul.f32 %v9144_v13, %v12057_v43 }
 0x23e   :  { %15924 = vst [vmem:[#allocation69_spill] sm:$0xff] %v12122_v17  ;;  %1834 = vmatprep.mubr.f32.mxu0 %v12122_v17  ;;  %v7751_v21 = vmul.f32 -1.442695, %v12125_v7 }
 0x23f   :  { %1835 = vmatmul.mubr.f32.gmra.mrb[56].mxu0 %v12128_v33  ;;  %v7752_v47 = vmul.f32 -1.442695, %v12131_v16  ;;  %v1143_v20 = vpop.f32.mrb[68].mxu1  ;;  %15927 = vst [vmem:[#allocation72_spill] sm:$0xff] %v12147_v37 }
 0x240   :  { %v9146_v49 = vpop.eup %9145  ;;  %9159 = vpow2.f32 %v7751_v21  ;;  %v12138_v62 = vadd.f32 %v1143_v20, %v11868_v11  ;;  %v1145_v40 = vpop.f32.mrb[69].mxu1 }
 0x241   :  { %v12141_v10 = vmul.f32 %v9146_v49, %v12064_v41  ;;  %v9148_v45 = vpop.eup %9147  ;;  %9161 = vpow2.f32 %v7752_v47  ;;  %v12144_v57 = vadd.f32 %v1145_v40, %v11874_v5 }
 0x242   :  { %v9150_v39 = vpop.eup %9149  ;;  %v7753_v44 = vmul.f32 -1.442695, %v12138_v62 }
 0x243   :  { %15926 = vst [vmem:[#allocation71_spill] sm:$0xff] %v12141_v10  ;;  %1839 = vmatprep.mubr.f32.mxu0 %v12141_v10  ;;  %v9152_v21 = vpop.eup %9151  ;;  %v7754_v20 = vmul.f32 -1.442695, %v12144_v57  ;;  %v1149_v22 = vpop.f32.mrb[70].mxu1  ;;  %v12154_v41 = vmul.f32 %v9150_v39, %v12077_v0  ;;  %v12164_v10 = vmul.f32 %v9148_v45, %v12074_v63 }
 0x244   :  { %1840 = vmatmul.mubr.f32.gmra.mrb[58].mxu0 %v12147_v37  ;;  %v9154_v49 = vpop.eup %9153  ;;  %v1448_v47 = vadd.f32 1.0, %v9152_v21  ;;  %9163 = vpow2.f32 %v7753_v44  ;;  %v12157_v43 = vadd.f32 %v1149_v22, %v11868_v11  ;;  %v1151_v13 = vpop.f32.mrb[71].mxu1 }
 0x245   :  { %15928 = vst [vmem:[#allocation73_spill] sm:$0xff] %v12154_v41  ;;  %v1449_v40 = vadd.f32 1.0, %v9154_v49  ;;  %9165 = vpow2.f32 %v7754_v20  ;;  %v12160_v61 = vadd.f32 %v1151_v13, %v11874_v5  ;;  %1844 = vmatprep.mubr.f32.mxu0 %v12154_v41  ;;  %15929 = vst [vmem:[#allocation74_spill] sm:$0xff] %v12164_v10 }
 0x246   :  { %v9156_v37 = vpop.eup %9155  ;;  %9167 = vrcp.f32 %v1448_v47  ;;  %v7755_v39 = vmul.f32 -1.442695, %v12157_v43 }
 0x247   :  { %v9158_v0 = vpop.eup %9157  ;;  %9169 = vrcp.f32 %v1449_v40  ;;  %v1450_v44 = vadd.f32 1.0, %v9156_v37  ;;  %v7756_v22 = vmul.f32 -1.442695, %v12160_v61  ;;  %v1155_v21 = vpop.f32.mrb[72].mxu1 }
 0x248   :  { %1845 = vmatmul.mubr.f32.gmra.mrb[60].mxu0 %v12164_v10  ;;  %v1451_v20 = vadd.f32 1.0, %v9158_v0  ;;  %9171 = vpow2.f32 %v7755_v39  ;;  %v12170_v49 = vadd.f32 %v1155_v21, %v11868_v11  ;;  %v1157_v13 = vpop.f32.mrb[73].mxu1 }
 0x249   :  { %9173 = vrcp.f32 %v1450_v44  ;;  %v12173_v63 = vadd.f32 %v1157_v13, %v11874_v5 }
 0x24a   :  { %v9160_v45 = vpop.eup %9159  ;;  %9175 = vrcp.f32 %v1451_v20  ;;  %v7757_v47 = vmul.f32 -1.442695, %v12170_v49 }
 0x24b   :  { %v9162_v37 = vpop.eup %9161  ;;  %v1452_v40 = vadd.f32 1.0, %v9160_v45  ;;  %9177 = vpow2.f32 %v7756_v22  ;;  %v7758_v41 = vmul.f32 -1.442695, %v12173_v63  ;;  %v1161_v10 = vpop.f32.mrb[74].mxu1 }
 0x24c   :  { %v1453_v0 = vadd.f32 1.0, %v9162_v37  ;;  %9179 = vpow2.f32 %v7757_v47  ;;  %v12178_v39 = vadd.f32 %v1161_v10, %v11868_v11  ;;  %v1163_v21 = vpop.f32.mrb[75].mxu1 }
 0x24d   :  { %9181 = vrcp.f32 %v1452_v40  ;;  %v12181_v44 = vadd.f32 %v1163_v21, %v11874_v5 }
 0x24e   :  { %v9164_v13 = vpop.eup %9163  ;;  %9183 = vrcp.f32 %v1453_v0  ;;  %v7759_v20 = vmul.f32 -1.442695, %v12178_v39 }
 0x24f   :  { %v9166_v17 = vpop.eup %9165  ;;  %v1454_v45 = vadd.f32 1.0, %v9164_v13  ;;  %9185 = vpow2.f32 %v7758_v41  ;;  %v7760_v22 = vmul.f32 -1.442695, %v12181_v44  ;;  %v1167_v33 = vpop.f32.mrb[76].mxu1 }
 0x250   :  { %v9168_v37 = vpop.eup %9167  ;;  %v1455_v47 = vadd.f32 1.0, %v9166_v17  ;;  %9187 = vpow2.f32 %v7759_v20  ;;  %v12186_v10 = vadd.f32 %v1167_v33, %v11868_v11  ;;  %v1169_v40 = vpop.f32.mrb[77].mxu1 }
 0x251   :  { %v9170_v60 = vpop.eup %9169  ;;  %9189 = vrcp.f32 %v1454_v45  ;;  %v12189_v21 = vadd.f32 %v1169_v40, %v11874_v5  ;;  %v12197_v20 = vmul.f32 %v9168_v37, %v12104_v54 }
 0x252   :  { %v9172_v0 = vpop.eup %9171  ;;  %9191 = vrcp.f32 %v1455_v47  ;;  %v7761_v13 = vmul.f32 -1.442695, %v12186_v10  ;;  %v12193_v41 = vmul.f32 %v9170_v60, %v12108_v3 }
 0x253   :  { %v9174_v55 = vpop.eup %9173  ;;  %v1456_v18 = vadd.f32 1.0, %v9172_v0  ;;  %9193 = vpow2.f32 %v7760_v22  ;;  %v7762_v17 = vmul.f32 -1.442695, %v12189_v21  ;;  %v1173_v33 = vpop.f32.mrb[78].mxu1  ;;  %15931 = vst [vmem:[#allocation76_spill] sm:$0xff] %v12197_v20 }
 0x254   :  { %15930 = vst [vmem:[#allocation75_spill] sm:$0xff] %v12193_v41  ;;  %v9176_v45 = vpop.eup %9175  ;;  %9195 = vpow2.f32 %v7761_v13  ;;  %v12200_v40 = vadd.f32 %v1173_v33, %v11868_v11  ;;  %1849 = vmatprep.mubr.f32.mxu0 %v12193_v41  ;;  %v1175_v47 = vpop.f32.mrb[79].mxu1 }
 0x255   :  { %v9178_v36 = vpop.eup %9177  ;;  %v12204_v60 = vadd.f32 %v1175_v47, %v11874_v5  ;;  %1850 = vmatmul.mubr.f32.gmra.mrb[62].mxu0 %v12197_v20  ;;  %v12208_v3 = vmul.f32 %v9176_v45, %v12117_v53  ;;  %9197 = vpow2.f32 %v7762_v17  ;;  %v12214_v47 = vmul.f32 %v9174_v55, %v12114_v23 }
 0x256   :  { %v9180_v22 = vpop.eup %9179  ;;  %v1457_v54 = vadd.f32 1.0, %v9178_v36  ;;  %v7763_v37 = vmul.f32 -1.442695, %v12200_v40  ;;  %9199 = vrcp.f32 %v1456_v18 }
 0x257   :  { %15932 = vst [vmem:[#allocation77_spill] sm:$0xff] %v12208_v3  ;;  %v9182_v0 = vpop.eup %9181  ;;  %v1458_v13 = vadd.f32 1.0, %v9180_v22  ;;  %v7764_v33 = vmul.f32 -1.442695, %v12204_v60  ;;  %v1179_v41 = vpop.f32.mrb[80].mxu1  ;;  %1854 = vmatprep.mubr.f32.mxu0 %v12208_v3  ;;  %15933 = vst [vmem:[#allocation78_spill] sm:$0xff] %v12214_v47 }
 0x258   :  { %v9184_v20 = vpop.eup %9183  ;;  %9201 = vrcp.f32 %v1457_v54  ;;  %v12217_v53 = vadd.f32 %v1179_v41, %v11868_v11  ;;  %v1181_v36 = vpop.f32.mrb[81].mxu1 }
 0x259   :  { %v9186_v17 = vpop.eup %9185  ;;  %9203 = vrcp.f32 %v1458_v13  ;;  %v12220_v45 = vadd.f32 %v1181_v36, %v11874_v5  ;;  %1855 = vmatmul.mubr.f32.gmra.mrb[64].mxu0 %v12214_v47  ;;  %v12224_v18 = vmul.f32 %v9184_v20, %v12131_v16  ;;  %v12230_v13 = vmul.f32 %v9182_v0, %v12125_v7 }
 0x25a   :  { %v9188_v22 = vpop.eup %9187  ;;  %v1459_v3 = vadd.f32 1.0, %v9186_v17  ;;  %9205 = vpow2.f32 %v7763_v37  ;;  %v7765_v55 = vmul.f32 -1.442695, %v12217_v53 }
 0x25b   :  { %15934 = vst [vmem:[#allocation79_spill] sm:$0xff] %v12224_v18  ;;  %v9190_v23 = vpop.eup %9189  ;;  %v1460_v54 = vadd.f32 1.0, %v9188_v22  ;;  %9207 = vpow2.f32 %v7764_v33  ;;  %v7766_v41 = vmul.f32 -1.442695, %v12220_v45  ;;  %v1185_v42 = vpop.f32.mrb[82].mxu1  ;;  %1859 = vmatprep.mubr.f32.mxu0 %v12224_v18  ;;  %15935 = vst [vmem:[#allocation80_spill] sm:$0xff] %v12230_v13 }
 0x25c   :  { %v9192_v36 = vpop.eup %9191  ;;  %9209 = vrcp.f32 %v1459_v3  ;;  %v12233_v16 = vadd.f32 %v1185_v42, %v11868_v11  ;;  %v1187_v20 = vpop.f32.mrb[83].mxu1  ;;  %v12245_v0 = vmul.f32 %v9190_v23, %v12138_v62 }
 0x25d   :  { %v9194_v37 = vpop.eup %9193  ;;  %9211 = vrcp.f32 %v1460_v54  ;;  %v12236_v17 = vadd.f32 %v1187_v20, %v11874_v5  ;;  %1860 = vmatmul.mubr.f32.gmra.mrb[66].mxu0 %v12230_v13  ;;  %v12240_v33 = vmul.f32 %v9192_v36, %v12144_v57 }
 0x25e   :  { %v9196_v22 = vpop.eup %9195  ;;  %v1461_v18 = vadd.f32 1.0, %v9194_v37  ;;  %9213 = vpow2.f32 %v7765_v55  ;;  %v7767_v7 = vmul.f32 -1.442695, %v12233_v16  ;;  %15937 = vst [vmem:[#allocation82_spill] sm:$0xff] %v12245_v0 }
 0x25f   :  { %15936 = vst [vmem:[#allocation81_spill] sm:$0xff] %v12240_v33  ;;  %v1462_v3 = vadd.f32 1.0, %v9196_v22  ;;  %9215 = vpow2.f32 %v7766_v41  ;;  %v1191_v42 = vpop.f32.mrb[84].mxu1  ;;  %1864 = vmatprep.mubr.f32.mxu0 %v12240_v33  ;;  %v9198_v54 = vpop.eup %9197  ;;  %v7768_v20 = vmul.f32 -1.442695, %v12236_v17 }
 0x260   :  { %9217 = vrcp.f32 %v1461_v18  ;;  %v12249_v57 = vadd.f32 %v1191_v42, %v11868_v11  ;;  %v1193_v36 = vpop.f32.mrb[85].mxu1  ;;  %v9200_v37 = vpop.eup %9199  ;;  %v1463_v55 = vadd.f32 1.0, %v9198_v54 }
 0x261   :  { %9219 = vrcp.f32 %v1462_v3  ;;  %v12252_v22 = vadd.f32 %v1193_v36, %v11874_v5  ;;  %1865 = vmatmul.mubr.f32.gmra.mrb[68].mxu0 %v12245_v0  ;;  %v12264_v36 = vmul.f32 %v9200_v37, %v12157_v43 }
 0x262   :  { %v9202_v41 = vpop.eup %9201  ;;  %9221 = vpow2.f32 %v7767_v7  ;;  %v7769_v62 = vmul.f32 -1.442695, %v12249_v57 }
 0x263   :  { %v9204_v23 = vpop.eup %9203  ;;  %9223 = vrcp.f32 %v1463_v55  ;;  %v7770_v18 = vmul.f32 -1.442695, %v12252_v22  ;;  %v1197_v33 = vpop.f32.mrb[86].mxu1  ;;  %v12258_v42 = vmul.f32 %v9202_v41, %v12160_v61  ;;  %15939 = vst [vmem:[#allocation84_spill] sm:$0xff] %v12264_v36 }
 0x264   :  { %v9206_v13 = vpop.eup %9205  ;;  %9225 = vpow2.f32 %v7768_v20  ;;  %v12261_v3 = vadd.f32 %v1197_v33, %v11868_v11  ;;  %v1199_v54 = vpop.f32.mrb[87].mxu1 }
 0x265   :  { %15938 = vst [vmem:[#allocation83_spill] sm:$0xff] %v12258_v42  ;;  %v9208_v7 = vpop.eup %9207  ;;  %v1464_v0 = vadd.f32 1.0, %v9206_v13  ;;  %9227 = vpow2.f32 %v7769_v62  ;;  %1869 = vmatprep.mubr.f32.mxu0 %v12258_v42  ;;  %v12268_v55 = vadd.f32 %v1199_v54, %v11874_v5 }
 0x266   :  { %v9210_v47 = vpop.eup %9209  ;;  %v1465_v61 = vadd.f32 1.0, %v9208_v7  ;;  %9229 = vpow2.f32 %v7770_v18  ;;  %v7771_v20 = vmul.f32 -1.442695, %v12261_v3  ;;  %1870 = vmatmul.mubr.f32.gmra.mrb[70].mxu0 %v12264_v36  ;;  %v12280_v18 = vmul.f32 %v9204_v23, %v12170_v49 }
 0x267   :  { %v9212_v33 = vpop.eup %9211  ;;  %9231 = vrcp.f32 %v1464_v0  ;;  %v7772_v43 = vmul.f32 -1.442695, %v12268_v55  ;;  %v1203_v37 = vpop.f32.mrb[88].mxu1  ;;  %v12274_v13 = vmul.f32 %v9210_v47, %v12173_v63 }
 0x268   :  { %v9214_v41 = vpop.eup %9213  ;;  %9233 = vrcp.f32 %v1465_v61  ;;  %v12277_v62 = vadd.f32 %v1203_v37, %v11868_v11  ;;  %v1205_v54 = vpop.f32.mrb[89].mxu1  ;;  %15941 = vst [vmem:[#allocation86_spill] sm:$0xff] %v12280_v18 }
 0x269   :  { %15940 = vst [vmem:[#allocation85_spill] sm:$0xff] %v12274_v13  ;;  %v9216_v7 = vpop.eup %9215  ;;  %v1466_v42 = vadd.f32 1.0, %v9214_v41  ;;  %9235 = vpow2.f32 %v7771_v20  ;;  %1874 = vmatprep.mubr.f32.mxu0 %v12274_v13  ;;  %v12284_v0 = vadd.f32 %v1205_v54, %v11874_v5 }
 0x26a   :  { %v9218_v36 = vpop.eup %9217  ;;  %v1467_v63 = vadd.f32 1.0, %v9216_v7  ;;  %9237 = vpow2.f32 %v7772_v43  ;;  %v7773_v47 = vmul.f32 -1.442695, %v12277_v62  ;;  %1875 = vmatmul.mubr.f32.gmra.mrb[72].mxu0 %v12280_v18  ;;  %v12296_v43 = vmul.f32 %v9212_v33, %v12178_v39 }
 0x26b   :  { %v9220_v61 = vpop.eup %9219  ;;  %9239 = vrcp.f32 %v1466_v42  ;;  %v7774_v49 = vmul.f32 -1.442695, %v12284_v0  ;;  %v1209_v23 = vpop.f32.mrb[90].mxu1  ;;  %v12290_v37 = vmul.f32 %v9218_v36, %v12181_v44 }
 0x26c   :  { %v9222_v20 = vpop.eup %9221  ;;  %9241 = vrcp.f32 %v1467_v63  ;;  %v12293_v41 = vadd.f32 %v1209_v23, %v11868_v11  ;;  %v1211_v54 = vpop.f32.mrb[91].mxu1  ;;  %15943 = vst [vmem:[#allocation88_spill] sm:$0xff] %v12296_v43 }
 0x26d   :  { %15942 = vst [vmem:[#allocation87_spill] sm:$0xff] %v12290_v37  ;;  %v9224_v7 = vpop.eup %9223  ;;  %v1468_v13 = vadd.f32 1.0, %v9222_v20  ;;  %9243 = vpow2.f32 %v7773_v47  ;;  %1879 = vmatprep.mubr.f32.mxu0 %v12290_v37  ;;  %v12300_v42 = vadd.f32 %v1211_v54, %v11874_v5  ;;  %v12308_v47 = vmul.f32 %v9220_v61, %v12186_v10 }
 0x26e   :  { %v9226_v18 = vpop.eup %9225  ;;  %9245 = vpow2.f32 %v7774_v49  ;;  %v7775_v44 = vmul.f32 -1.442695, %v12293_v41  ;;  %1880 = vmatmul.mubr.f32.gmra.mrb[74].mxu0 %v12296_v43  ;;  %v12305_v36 = vmul.f32 %v9224_v7, %v12189_v21 }
 0x26f   :  { %v9228_v63 = vpop.eup %9227  ;;  %9247 = vrcp.f32 %v1468_v13  ;;  %v1469_v39 = vadd.f32 1.0, %v9226_v18  ;;  %v1215_v33 = vpop.f32.mrb[92].mxu1  ;;  %15945 = vst [vmem:[#allocation90_spill] sm:$0xff] %v12308_v47  ;;  %v7776_v54 = vmul.f32 -1.442695, %v12300_v42 }
 0x270   :  { %15944 = vst [vmem:[#allocation89_spill] sm:$0xff] %v12305_v36  ;;  %v9230_v23 = vpop.eup %9229  ;;  %v1470_v20 = vadd.f32 1.0, %v9228_v63  ;;  %9249 = vpow2.f32 %v7775_v44  ;;  %v12312_v49 = vadd.f32 %v1215_v33, %v11868_v11  ;;  %1884 = vmatprep.mubr.f32.mxu0 %v12305_v36  ;;  %v1217_v37 = vpop.f32.mrb[93].mxu1 }
 0x271   :  { %v9232_v21 = vpop.eup %9231  ;;  %9251 = vrcp.f32 %v1469_v39  ;;  %v1471_v7 = vadd.f32 1.0, %v9230_v23  ;;  %v12316_v13 = vadd.f32 %v1217_v37, %v11874_v5 }
 0x272   :  { %v9234_v18 = vpop.eup %9233  ;;  %9253 = vrcp.f32 %v1470_v20  ;;  %v7777_v10 = vmul.f32 -1.442695, %v12312_v49  ;;  %1885 = vmatmul.mubr.f32.gmra.mrb[76].mxu0 %v12308_v47  ;;  %v12324_v33 = vmul.f32 %v9232_v21, %v12200_v40 }
 0x273   :  { %v9236_v61 = vpop.eup %9235  ;;  %9255 = vrcp.f32 %v1471_v7  ;;  %v1221_v44 = vpop.f32.mrb[94].mxu1  ;;  %v12321_v63 = vmul.f32 %v9234_v18, %v12204_v60  ;;  %v7778_v37 = vmul.f32 -1.442695, %v12316_v13 }
 0x274   :  { %v9238_v39 = vpop.eup %9237  ;;  %v1472_v23 = vadd.f32 1.0, %v9236_v61  ;;  %9257 = vpow2.f32 %v7776_v54  ;;  %v12328_v20 = vadd.f32 %v1221_v44, %v11868_v11  ;;  %v1223_v36 = vpop.f32.mrb[95].mxu1 }
 0x275   :  { %v9240_v43 = vpop.eup %9239  ;;  %v1473_v47 = vadd.f32 1.0, %v9238_v39  ;;  %9259 = vpow2.f32 %v7777_v10  ;;  %1889 = vmatprep.mubr.f32.mxu0 %v12321_v63  ;;  %v12332_v60 = vadd.f32 %v1223_v36, %v11874_v5 }
 0x276   :  { %v9242_v7 = vpop.eup %9241  ;;  %9261 = vrcp.f32 %v1472_v23  ;;  %v7779_v40 = vmul.f32 -1.442695, %v12328_v20  ;;  %1890 = vmatmul.mubr.f32.gmra.mrb[78].mxu0 %v12324_v33  ;;  %v12341_v61 = vmul.f32 %v9240_v43, %v12217_v53 }
 0x277   :  { %v9244_v54 = vpop.eup %9243  ;;  %9263 = vrcp.f32 %v1473_v47  ;;  %v12337_v11 = vmul.f32 %v9242_v7, %v12220_v45  ;;  %v7780_v10 = vmul.f32 -1.442695, %v12332_v60 }
 0x278   :  { %v9246_v21 = vpop.eup %9245  ;;  %v1474_v18 = vadd.f32 1.0, %v9244_v54  ;;  %9265 = vpow2.f32 %v7778_v37 }
 0x279   :  { %v9248_v5 = vpop.eup %9247  ;;  %v1475_v36 = vadd.f32 1.0, %v9246_v21  ;;  %9267 = vpow2.f32 %v7779_v40  ;;  %1894 = vmatprep.mubr.f32.mxu0 %v12337_v11 }
 0x27a   :  { %v9250_v44 = vpop.eup %9249  ;;  %9269 = vrcp.f32 %v1474_v18  ;;  %1895 = vmatmul.mubr.f32.gmra.mrb[80].mxu0 %v12341_v61  ;;  %v12349_v53 = vmul.f32 %v9248_v5, %v12233_v16 }
 0x27b   :  { %v9252_v47 = vpop.eup %9251  ;;  %9271 = vrcp.f32 %v1475_v36  ;;  %v1476_v39 = vadd.f32 1.0, %v9250_v44 }
 0x27c   :  { %v9254_v45 = vpop.eup %9253  ;;  %9273 = vpow2.f32 %v7780_v10  ;;  %v12346_v23 = vmul.f32 %v9252_v47, %v12236_v17 }
 0x27d   :  { %v9256_v37 = vpop.eup %9255  ;;  %9275 = vrcp.f32 %v1476_v39  ;;  %v12358_v16 = vmul.f32 %v9254_v45, %v12249_v57 }
 0x27e   :  { %v9258_v43 = vpop.eup %9257  ;;  %1899 = vmatprep.mubr.f32.mxu0 %v12346_v23  ;;  %v12353_v7 = vmul.f32 %v9256_v37, %v12252_v22 }
 0x27f   :  { %v9260_v40 = vpop.eup %9259  ;;  %v1477_v54 = vadd.f32 1.0, %v9258_v43  ;;  %1900 = vmatmul.mubr.f32.gmra.mrb[82].mxu0 %v12349_v53 }
 0x280   :  { %v9262_v21 = vpop.eup %9261  ;;  %v1478_v18 = vadd.f32 1.0, %v9260_v40  ;;  %1904 = vmatprep.mubr.f32.mxu0 %v12353_v7 }
 0x281   :  { %v9264_v17 = vpop.eup %9263  ;;  %9277 = vrcp.f32 %v1477_v54  ;;  %v12366_v37 = vmul.f32 %v9262_v21, %v12261_v3 }
 0x282   :  { %v9266_v10 = vpop.eup %9265  ;;  %v12361_v5 = vmul.f32 %v9264_v17, %v12268_v55  ;;  %9279 = vrcp.f32 %v1478_v18 }
 0x283   :  { %v9268_v22 = vpop.eup %9267  ;;  %v1479_v36 = vadd.f32 1.0, %v9266_v10  ;;  %1905 = vmatmul.mubr.f32.gmra.mrb[84].mxu0 %v12358_v16  ;;  %15947 = vst [vmem:[#allocation92_spill] sm:$0xff] %v12366_v37 }
 0x284   :  { %15946 = vst [vmem:[#allocation91_spill] sm:$0xff] %v12361_v5  ;;  %v9270_v44 = vpop.eup %9269  ;;  %v1480_v47 = vadd.f32 1.0, %v9268_v22  ;;  %1909 = vmatprep.mubr.f32.mxu0 %v12361_v5  ;;  %v3049_v5 = vld [vmem:[#allocation2 + $0x258] sm:$0xff] }
 0x285   :  { %v9272_v39 = vpop.eup %9271  ;;  %9281 = vrcp.f32 %v1479_v36  ;;  %v12374_v43 = vmul.f32 %v9270_v44, %v12277_v62 }
 0x286   :  { %v9274_v57 = vpop.eup %9273  ;;  %v12369_v45 = vmul.f32 %v9272_v39, %v12284_v0  ;;  %9283 = vrcp.f32 %v1480_v47 }
 0x287   :  { %v1481_v55 = vadd.f32 1.0, %v9274_v57  ;;  %1910 = vmatmul.mubr.f32.gmra.mrb[86].mxu0 %v12366_v37  ;;  %15949 = vst [vmem:[#allocation94_spill] sm:$0xff] %v12374_v43  ;;  %v9276_v40 = vpop.eup %9275  ;;  %v3053_v37 = vld [vmem:[#allocation2 + $0x278] sm:$0xff] }
 0x288   :  { %15948 = vst [vmem:[#allocation93_spill] sm:$0xff] %v12369_v45  ;;  %1914 = vmatprep.mubr.f32.mxu0 %v12369_v45  ;;  %v12381_v0 = vmul.f32 %v9276_v40, %v12293_v41 }
 0x289   :  { %9285 = vrcp.f32 %v1481_v55 }
 0x28a   :  { %15951 = vst [vmem:[#allocation96_spill] sm:$0xff] %v12381_v0 }
 0x28b   :  { %v9278_v54 = vpop.eup %9277  ;;  %1915 = vmatmul.mubr.f32.gmra.mrb[88].mxu0 %v12374_v43  ;;  %v3042_v43 = vld [vmem:[#allocation2 + $0x220] sm:$0xff] }
 0x28c   :  { %v12378_v3 = vmul.f32 %v9278_v54, %v12300_v42  ;;  %v9280_v21 = vpop.eup %9279 }
 0x28d   :  { %v12389_v62 = vmul.f32 %v9280_v21, %v12312_v49  ;;  %v10953_v49 = vld [vmem:[%s15570_s6] sm:$0xff] }
 0x28e   :  { %15950 = vst [vmem:[#allocation95_spill] sm:$0xff] %v12378_v3  ;;  %1919 = vmatprep.mubr.f32.mxu0 %v12378_v3 }
 0x28f   :  { %v9282_v18 = vpop.eup %9281  ;;  %1920 = vmatmul.mubr.f32.gmra.mrb[90].mxu0 %v12381_v0  ;;  %15953 = vst [vmem:[#allocation98_spill] sm:$0xff] %v12389_v62 }
 0x290   :  { %v12386_v17 = vmul.f32 %v9282_v18, %v12316_v13  ;;  %v9284_v10 = vpop.eup %9283  ;;  %v1708_v13 = vsub.s32 4, %v15920_v2 }
 0x291   :  { %v12397_v22 = vmul.f32 %v9284_v10, %v12328_v20 }
 0x292   :  { %15952 = vst [vmem:[#allocation97_spill] sm:$0xff] %v12386_v17  ;;  %1924 = vmatprep.mubr.f32.mxu0 %v12386_v17  ;;  %v12405_v36 = vrot.slane %v10953_v49, %v1708_v13 }
 0x293   :  { %v9286_v42 = vpop.eup %9285  ;;  %1925 = vmatmul.mubr.f32.gmra.mrb[92].mxu0 %v12389_v62  ;;  %15955 = vst [vmem:[#allocation100_spill] sm:$0xff] %v12397_v22 }
 0x294   :  { %v12394_v41 = vmul.f32 %v9286_v42, %v12332_v60 }
 0x296   :  { %15954 = vst [vmem:[#allocation99_spill] sm:$0xff] %v12394_v41  ;;  %1929 = vmatprep.mubr.f32.mxu0 %v12394_v41 }
 0x297   :  { %1930 = vmatmul.mubr.f32.gmra.mrb[94].mxu0 %v12397_v22 }
 0x2d5   :  { %v1776_v44 = vpop.f32.mrb[32].mxu0 }
 0x2d6   :  { %v1777_v47 = vadd.f32 %v1776_v44, %v12405_v36  ;;  %v1778_v60 = vpop.f32.mrb[33].mxu0 }
 0x2d8   :  { %v7781_v39 = vmul.f32 -1.442695, %v1777_v47 }
 0x2d9   :  { %v1781_v57 = vpop.f32.mrb[34].mxu0 }
 0x2da   :  { %9287 = vpow2.f32 %v7781_v39  ;;  %v1782_v20 = vadd.f32 %v1781_v57, %v12405_v36  ;;  %v1783_v55 = vpop.f32.mrb[35].mxu0 }
 0x2dc   :  { %v7782_v40 = vmul.f32 -1.442695, %v1782_v20 }
 0x2dd   :  { %v1786_v54 = vpop.f32.mrb[36].mxu0 }
 0x2de   :  { %9289 = vpow2.f32 %v7782_v40  ;;  %v1787_v21 = vadd.f32 %v1786_v54, %v12405_v36  ;;  %v1788_v18 = vpop.f32.mrb[37].mxu0 }
 0x2e0   :  { %v7783_v10 = vmul.f32 -1.442695, %v1787_v21 }
 0x2e2   :  { %9291 = vpow2.f32 %v7783_v10 }
 0x2e4   :  { %v9288_v42 = vpop.eup %9287 }
 0x2e5   :  { %v1791_v13 = vpop.f32.mrb[38].mxu0  ;;  %v2031_v49 = vadd.f32 1.0, %v9288_v42 }
 0x2e6   :  { %v12411_v44 = vadd.f32 %v1791_v13, %v12405_v36  ;;  %v1793_v60 = vpop.f32.mrb[39].mxu0 }
 0x2e7   :  { %9293 = vrcp.f32 %v2031_v49 }
 0x2e8   :  { %v7784_v39 = vmul.f32 -1.442695, %v12411_v44  ;;  %v9290_v57 = vpop.eup %9289 }
 0x2e9   :  { %v1796_v55 = vpop.f32.mrb[40].mxu0  ;;  %v2032_v41 = vadd.f32 1.0, %v9290_v57 }
 0x2ea   :  { %9295 = vpow2.f32 %v7784_v39  ;;  %v12415_v40 = vadd.f32 %v1796_v55, %v12405_v36  ;;  %v1798_v54 = vpop.f32.mrb[41].mxu0 }
 0x2eb   :  { %9297 = vrcp.f32 %v2032_v41 }
 0x2ec   :  { %v7785_v18 = vmul.f32 -1.442695, %v12415_v40  ;;  %v9292_v10 = vpop.eup %9291 }
 0x2ed   :  { %v1801_v42 = vpop.f32.mrb[42].mxu0  ;;  %v2033_v22 = vadd.f32 1.0, %v9292_v10 }
 0x2ee   :  { %9299 = vpow2.f32 %v7785_v18  ;;  %v12419_v13 = vadd.f32 %v1801_v42, %v12405_v36  ;;  %v1803_v49 = vpop.f32.mrb[43].mxu0 }
 0x2ef   :  { %9301 = vrcp.f32 %v2033_v22 }
 0x2f0   :  { %v7786_v60 = vmul.f32 -1.442695, %v12419_v13 }
 0x2f1   :  { %v1806_v57 = vpop.f32.mrb[44].mxu0  ;;  %v9294_v39 = vpop.eup %9293 }
 0x2f2   :  { %9303 = vpow2.f32 %v7786_v60  ;;  %v12423_v55 = vadd.f32 %v1806_v57, %v12405_v36  ;;  %v1808_v41 = vpop.f32.mrb[45].mxu0  ;;  %v2127_v54 = vmul.f32 %v9294_v39, %v1777_v47 }
 0x2f4   :  { %v9296_v62 = vpop.eup %9295  ;;  %v7787_v10 = vmul.f32 -1.442695, %v12423_v55  ;;  %7813 = vmatmul.mubr.msk.f32.vlgmr.msra.gmra.mrb[96].mxu1 %vm2171_vm4, %v2127_v54 }
 0x2f5   :  { %v2034_v18 = vadd.f32 1.0, %v9296_v62  ;;  %v1811_v17 = vpop.f32.mrb[46].mxu0  ;;  %v9298_v42 = vpop.eup %9297  ;;  %2338 = vmatprep.mubr.f32.mxu1 %v15919_v27 }
 0x2f6   :  { %9305 = vpow2.f32 %v7787_v10  ;;  %v12428_v22 = vadd.f32 %v1811_v17, %v12405_v36  ;;  %v1813_v49 = vpop.f32.mrb[47].mxu0  ;;  %v2128_v60 = vmul.f32 %v9298_v42, %v1782_v20 }
 0x2f7   :  { %9307 = vrcp.f32 %v2034_v18 }
 0x2f8   :  { %v9300_v57 = vpop.eup %9299  ;;  %v7788_v47 = vmul.f32 -1.442695, %v12428_v22  ;;  %7814 = vmatmul.mubr.msk.f32.gmra.mrb[98].mxu1 %vm2171_vm4, %v2128_v60 }
 0x2f9   :  { %v2035_v39 = vadd.f32 1.0, %v9300_v57  ;;  %v1816_v41 = vpop.f32.mrb[48].mxu0  ;;  %v9302_v62 = vpop.eup %9301  ;;  %2344 = vmatprep.mubr.f32.mxu1 %v15919_v27 }
 0x2fa   :  { %9309 = vpow2.f32 %v7788_v47  ;;  %v12434_v54 = vadd.f32 %v1816_v41, %v12405_v36  ;;  %v1818_v10 = vpop.f32.mrb[49].mxu0  ;;  %v2129_v17 = vmul.f32 %v9302_v62, %v1787_v21 }
 0x2fb   :  { %9311 = vrcp.f32 %v2035_v39 }
 0x2fc   :  { %v9304_v49 = vpop.eup %9303  ;;  %v7789_v20 = vmul.f32 -1.442695, %v12434_v54  ;;  %7815 = vmatmul.mubr.msk.f32.gmra.mrb[100].mxu1 %vm2171_vm4, %v2129_v17 }
 0x2fd   :  { %v2036_v18 = vadd.f32 1.0, %v9304_v49  ;;  %2350 = vmatprep.mubr.f32.mxu1 %v15919_v27 }
 0x2fe   :  { %9313 = vpow2.f32 %v7789_v20 }
 0x2ff   :  { %9315 = vrcp.f32 %v2036_v18  ;;  %v1821_v42 = vpop.f32.mrb[50].mxu0 }
 0x300   :  { %v9306_v60 = vpop.eup %9305  ;;  %v12441_v57 = vadd.f32 %v1821_v42, %v12405_v36  ;;  %v1823_v47 = vpop.f32.mrb[51].mxu0 }
 0x301   :  { %v9308_v41 = vpop.eup %9307  ;;  %v2037_v10 = vadd.f32 1.0, %v9306_v60 }
 0x302   :  { %v2130_v21 = vmul.f32 %v9308_v41, %v12411_v44  ;;  %v7790_v39 = vmul.f32 -1.442695, %v12441_v57  ;;  %v3039_v41 = vld [vmem:[#allocation2 + $0x208] sm:$0xff] }
 0x303   :  { %9317 = vrcp.f32 %v2037_v10  ;;  %v1826_v62 = vpop.f32.mrb[52].mxu0  ;;  %v3041_v10 = vld [vmem:[#allocation2 + $0x218] sm:$0xff] }
 0x304   :  { %v9310_v49 = vpop.eup %9309  ;;  %9319 = vpow2.f32 %v7790_v39  ;;  %v12446_v17 = vadd.f32 %v1826_v62, %v12405_v36  ;;  %v1828_v20 = vpop.f32.mrb[53].mxu0  ;;  %7816 = vmatmul.mubr.msk.f32.gmra.mrb[102].mxu1 %vm2171_vm4, %v2130_v21  ;;  %v3038_v39 = vld [vmem:[#allocation2 + $0x200] sm:$0xff]  ;;  %v8487_v21 = vpack.c.bf16 %v3041_v10, %v3039_v41  ;;  %v3044_v41 = vld [vmem:[#allocation2 + $0x230] sm:$0xff]  ;;  %v3047_v10 = vld [vmem:[#allocation2 + $0x248] sm:$0xff] }
 0x305   :  { %v9312_v18 = vpop.eup %9311  ;;  %v2038_v42 = vadd.f32 1.0, %v9310_v49  ;;  %2356 = vmatprep.mubr.f32.mxu1 %v15919_v27  ;;  %v3040_v49 = vld [vmem:[#allocation2 + $0x210] sm:$0xff] }
 0x306   :  { %v2131_v60 = vmul.f32 %v9312_v18, %v12415_v40  ;;  %v7791_v44 = vmul.f32 -1.442695, %v12446_v17  ;;  %8488 = vmatprep.subr.bf16.mxu0 %v8487_v21 }
 0x307   :  { %9321 = vrcp.f32 %v2038_v42  ;;  %v8489_v42 = vpack.c.bf16 %v3040_v49, %v3038_v39  ;;  %v3046_v39 = vld [vmem:[#allocation2 + $0x240] sm:$0xff] }
 0x308   :  { %v9314_v47 = vpop.eup %9313  ;;  %9323 = vpow2.f32 %v7791_v44  ;;  %7817 = vmatmul.mubr.msk.f32.gmra.mrb[104].mxu1 %vm2171_vm4, %v2131_v60  ;;  %v3043_v60 = vld [vmem:[#allocation2 + $0x228] sm:$0xff]  ;;  %v3045_v44 = vld [vmem:[#allocation2 + $0x238] sm:$0xff] }
 0x309   :  { %v9316_v62 = vpop.eup %9315  ;;  %v2039_v20 = vadd.f32 1.0, %v9314_v47  ;;  %v1831_v0 = vpop.f32.mrb[54].mxu0  ;;  %2362 = vmatprep.mubr.f32.mxu1 %v15919_v27  ;;  %8490 = vmatpush1.bf16.msra.mxu0 %v8489_v42  ;;  %v8491_v47 = vpack.c.bf16 %v3045_v44, %v3043_v60  ;;  %v3052_v44 = vld [vmem:[#allocation2 + $0x270] sm:$0xff] }
 0x30a   :  { %v2132_v3 = vmul.f32 %v9316_v62, %v12419_v13  ;;  %v12456_v40 = vadd.f32 %v1831_v0, %v12405_v36  ;;  %v1833_v18 = vpop.f32.mrb[55].mxu0  ;;  %v8493_v0 = vpack.c.bf16 %v3044_v41, %v3042_v43  ;;  %v8495_v62 = vpack.c.bf16 %v3049_v5, %v3047_v10  ;;  %v3050_v43 = vld [vmem:[#allocation2 + $0x260] sm:$0xff]  ;;  %v3057_v10 = vld [vmem:[#allocation2 + $0x298] sm:$0xff] }
 0x30b   :  { %9325 = vrcp.f32 %v2039_v20  ;;  %v3048_v20 = vld [vmem:[#allocation2 + $0x250] sm:$0xff]  ;;  %8492 = vmatprep.subr.bf16.mxu0 %v8491_v47  ;;  %v3051_v18 = vld [vmem:[#allocation2 + $0x268] sm:$0xff] }
 0x30c   :  { %v7792_v45 = vmul.f32 -1.442695, %v12456_v40  ;;  %7818 = vmatmul.mubr.msk.f32.gmra.mrb[106].mxu1 %vm2171_vm4, %v2132_v3  ;;  %v8497_v42 = vpack.c.bf16 %v3048_v20, %v3046_v39  ;;  %v8499_v5 = vpack.c.bf16 %v3053_v37, %v3051_v18  ;;  %v3055_v47 = vld [vmem:[#allocation2 + $0x288] sm:$0xff]  ;;  %v8501_v39 = vpack.c.bf16 %v3052_v44, %v3050_v43 }
 0x30d   :  { %v9318_v13 = vpop.eup %9317  ;;  %2368 = vmatprep.mubr.f32.mxu1 %v15919_v27  ;;  %8494 = vmatpush1.bf16.msra.mxu0 %v8493_v0 }
 0x30e   :  { %v9320_v21 = vpop.eup %9319  ;;  %v2133_v49 = vmul.f32 %v9318_v13, %v12423_v55  ;;  %9327 = vpow2.f32 %v7792_v45  ;;  %8496 = vmatprep.subr.bf16.mxu0 %v8495_v62  ;;  %v3054_v62 = vld [vmem:[#allocation2 + $0x280] sm:$0xff] }
 0x30f   :  { %v2040_v3 = vadd.f32 1.0, %v9320_v21 }
 0x310   :  { %7819 = vmatmul.mubr.msk.f32.gmra.mrb[108].mxu1 %vm2171_vm4, %v2133_v49  ;;  %v3056_v49 = vld [vmem:[#allocation2 + $0x290] sm:$0xff] }
 0x311   :  { %v9322_v60 = vpop.eup %9321  ;;  %9329 = vrcp.f32 %v2040_v3  ;;  %2374 = vmatprep.mubr.f32.mxu1 %v15919_v27  ;;  %8498 = vmatpush1.bf16.msra.mxu0 %v8497_v42  ;;  %v3059_v3 = vld [vmem:[#allocation2 + $0x2a8] sm:$0xff]  ;;  %v8505_v44 = vpack.c.bf16 %v3056_v49, %v3054_v62 }
 0x312   :  { %v9324_v41 = vpop.eup %9323  ;;  %v2134_v55 = vmul.f32 %v9322_v60, %v12428_v22  ;;  %v1836_v45 = vpop.f32.mrb[56].mxu0  ;;  %8500 = vmatprep.subr.bf16.mxu0 %v8499_v5  ;;  %v8503_v22 = vpack.c.bf16 %v3057_v10, %v3055_v47  ;;  %v3061_v60 = vld [vmem:[#allocation2 + $0x2b8] sm:$0xff]  ;;  %v3058_v47 = vld [vmem:[#allocation2 + $0x2a0] sm:$0xff] }
 0x313   :  { %v2041_v13 = vadd.f32 1.0, %v9324_v41  ;;  %v12466_v21 = vadd.f32 %v1836_v45, %v12405_v36  ;;  %v1838_v0 = vpop.f32.mrb[57].mxu0  ;;  %v8507_v5 = vpack.c.bf16 %v3061_v60, %v3059_v3  ;;  %v3064_v3 = vld [vmem:[#allocation2 + $0x2d0] sm:$0xff] }
 0x314   :  { %7820 = vmatmul.mubr.msk.f32.gmra.mrb[110].mxu1 %vm2171_vm4, %v2134_v55  ;;  %v3065_v0 = vld [vmem:[#allocation2 + $0x2d8] sm:$0xff] }
 0x315   :  { %v9326_v20 = vpop.eup %9325  ;;  %9331 = vrcp.f32 %v2041_v13  ;;  %v7793_v37 = vmul.f32 -1.442695, %v12466_v21  ;;  %2380 = vmatprep.mubr.f32.mxu1 %v15919_v27  ;;  %8502 = vmatpush1.bf16.msra.mxu0 %v8501_v39  ;;  %v3063_v13 = vld [vmem:[#allocation2 + $0x2c8] sm:$0xff] }
 0x316   :  { %v2135_v18 = vmul.f32 %v9326_v20, %v12434_v54  ;;  %8504 = vmatprep.subr.bf16.mxu0 %v8503_v22  ;;  %v3060_v54 = vld [vmem:[#allocation2 + $0x2b0] sm:$0xff]  ;;  %v8511_v22 = vpack.c.bf16 %v3065_v0, %v3063_v13  ;;  %v3071_v0 = vld [vmem:[#allocation2 + $0x308] sm:$0xff] }
 0x317   :  { %9333 = vpow2.f32 %v7793_v37  ;;  %v1841_v41 = vpop.f32.mrb[58].mxu0  ;;  %v8509_v49 = vpack.c.bf16 %v3060_v54, %v3058_v47  ;;  %v3066_v47 = vld [vmem:[#allocation2 + $0x2e0] sm:$0xff]  ;;  %v3068_v54 = vld [vmem:[#allocation2 + $0x2f0] sm:$0xff] }
 0x318   :  { %v9328_v45 = vpop.eup %9327  ;;  %v12473_v42 = vadd.f32 %v1841_v41, %v12405_v36  ;;  %v1843_v43 = vpop.f32.mrb[59].mxu0  ;;  %7821 = vmatmul.mubr.msk.f32.gmra.mrb[112].mxu1 %vm2171_vm4, %v2135_v18  ;;  %v3062_v18 = vld [vmem:[#allocation2 + $0x2c0] sm:$0xff] }
 0x319   :  { %v2042_v55 = vadd.f32 1.0, %v9328_v45  ;;  %2386 = vmatprep.mubr.f32.mxu1 %v15919_v27  ;;  %8506 = vmatpush1.bf16.msra.mxu0 %v8505_v44  ;;  %v3067_v45 = vld [vmem:[#allocation2 + $0x2e8] sm:$0xff]  ;;  %v3069_v43 = vld [vmem:[#allocation2 + $0x2f8] sm:$0xff] }
 0x31a   :  { %v7794_v10 = vmul.f32 -1.442695, %v12473_v42  ;;  %8508 = vmatprep.subr.bf16.mxu0 %v8507_v5  ;;  %v8515_v5 = vpack.c.bf16 %v3069_v43, %v3067_v45 }
 0x31b   :  { %v9330_v20 = vpop.eup %9329  ;;  %9335 = vrcp.f32 %v2042_v55  ;;  %v1846_v37 = vpop.f32.mrb[60].mxu0 }
 0x31c   :  { %v2136_v41 = vmul.f32 %v9330_v20, %v12441_v57  ;;  %9337 = vpow2.f32 %v7794_v10  ;;  %v12480_v39 = vadd.f32 %v1846_v37, %v12405_v36  ;;  %v1848_v62 = vpop.f32.mrb[61].mxu0  ;;  %v8513_v10 = vpack.c.bf16 %v3064_v3, %v3062_v18  ;;  %v3073_v20 = vld [vmem:[#allocation2 + $0x318] sm:$0xff]  ;;  %v3075_v3 = vld [vmem:[#allocation2 + $0x328] sm:$0xff] }
 0x31d   :  { %8510 = vmatpush1.bf16.msra.mxu0 %v8509_v49  ;;  %v8517_v37 = vpack.c.bf16 %v3068_v54, %v3066_v47  ;;  %v3070_v62 = vld [vmem:[#allocation2 + $0x300] sm:$0xff]  ;;  %v3072_v49 = vld [vmem:[#allocation2 + $0x310] sm:$0xff]  ;;  %v3079_v54 = vld [vmem:[#allocation2 + $0x348] sm:$0xff] }
 0x31e   :  { %v7795_v60 = vmul.f32 -1.442695, %v12480_v39  ;;  %7822 = vmatmul.mubr.msk.f32.gmra.mrb[114].mxu1 %vm2171_vm4, %v2136_v41  ;;  %8512 = vmatprep.subr.bf16.mxu0 %v8511_v22  ;;  %v8521_v43 = vpack.c.bf16 %v3072_v49, %v3070_v62  ;;  %v3080_v49 = vld [vmem:[#allocation2 + $0x350] sm:$0xff] }
 0x31f   :  { %v9332_v55 = vpop.eup %9331  ;;  %2392 = vmatprep.mubr.f32.mxu1 %v15919_v27 }
 0x320   :  { %v2137_v57 = vmul.f32 %v9332_v55, %v12446_v17  ;;  %9339 = vpow2.f32 %v7795_v60  ;;  %v8519_v17 = vpack.c.bf16 %v3073_v20, %v3071_v0  ;;  %v3077_v60 = vld [vmem:[#allocation2 + $0x338] sm:$0xff] }
 0x321   :  { %v9334_v44 = vpop.eup %9333  ;;  %8514 = vmatpush1.bf16.msra.mxu0 %v8513_v10  ;;  %v3074_v10 = vld [vmem:[#allocation2 + $0x320] sm:$0xff] }
 0x322   :  { %v2043_v13 = vadd.f32 1.0, %v9334_v44  ;;  %7823 = vmatmul.mubr.msk.f32.gmra.mrb[116].mxu1 %vm2171_vm4, %v2137_v57  ;;  %8516 = vmatprep.subr.bf16.mxu0 %v8515_v5  ;;  %v8523_v57 = vpack.c.bf16 %v3077_v60, %v3075_v3  ;;  %v3076_v44 = vld [vmem:[#allocation2 + $0x330] sm:$0xff]  ;;  %v3083_v60 = vld [vmem:[#allocation2 + $0x368] sm:$0xff] }
 0x323   :  { %2398 = vmatprep.mubr.f32.mxu1 %v15919_v27 }
 0x324   :  { %9341 = vrcp.f32 %v2043_v13  ;;  %v3081_v13 = vld [vmem:[#allocation2 + $0x358] sm:$0xff] }
 0x325   :  { %v9336_v41 = vpop.eup %9335  ;;  %8518 = vmatpush1.bf16.msra.mxu0 %v8517_v37  ;;  %v8525_v37 = vpack.c.bf16 %v3076_v44, %v3074_v10  ;;  %v8527_v62 = vpack.c.bf16 %v3081_v13, %v3079_v54  ;;  %v3082_v44 = vld [vmem:[#allocation2 + $0x360] sm:$0xff] }
 0x326   :  { %v9338_v18 = vpop.eup %9337  ;;  %v2138_v22 = vmul.f32 %v9336_v41, %v12456_v40  ;;  %8520 = vmatprep.subr.bf16.mxu0 %v8519_v17  ;;  %v3078_v17 = vld [vmem:[#allocation2 + $0x340] sm:$0xff] }
 0x327   :  { %v2044_v45 = vadd.f32 1.0, %v9338_v18 }
 0x328   :  { %7824 = vmatmul.mubr.msk.f32.gmra.mrb[118].mxu1 %vm2171_vm4, %v2138_v22  ;;  %v1851_v55 = vpop.f32.mrb[62].mxu0 }
 0x329   :  { %9343 = vrcp.f32 %v2044_v45  ;;  %2404 = vmatprep.mubr.f32.mxu1 %v15919_v27  ;;  %v12492_v47 = vadd.f32 %v1851_v55, %v12405_v36  ;;  %v1853_v40 = vpop.f32.mrb[63].mxu0  ;;  %8522 = vmatpush1.bf16.msra.mxu0 %v8521_v43  ;;  %v3085_v45 = vld [vmem:[#allocation2 + $0x378] sm:$0xff]  ;;  %v8529_v43 = vpack.c.bf16 %v3080_v49, %v3078_v17 }
 0x32a   :  { %v9340_v5 = vpop.eup %9339  ;;  %8524 = vmatprep.subr.bf16.mxu0 %v8523_v57  ;;  %v8531_v57 = vpack.c.bf16 %v3085_v45, %v3083_v60  ;;  %v3084_v40 = vld [vmem:[#allocation2 + $0x370] sm:$0xff] }
 0x32b   :  { %v2045_v0 = vadd.f32 1.0, %v9340_v5  ;;  %v7796_v20 = vmul.f32 -1.442695, %v12492_v47 }
 0x32c   :  { %v1856_v41 = vpop.f32.mrb[64].mxu0 }
 0x32d   :  { %9345 = vrcp.f32 %v2045_v0  ;;  %v12496_v22 = vadd.f32 %v1856_v41, %v12405_v36  ;;  %v1858_v3 = vpop.f32.mrb[65].mxu0  ;;  %8526 = vmatpush1.bf16.msra.mxu0 %v8525_v37  ;;  %v8533_v37 = vpack.c.bf16 %v3084_v40, %v3082_v44 }
 0x32e   :  { %v9342_v18 = vpop.eup %9341  ;;  %9347 = vpow2.f32 %v7796_v20  ;;  %8528 = vmatprep.subr.bf16.mxu0 %v8527_v62 }
 0x32f   :  { %v2139_v55 = vmul.f32 %v9342_v18, %v12466_v21  ;;  %v7797_v5 = vmul.f32 -1.442695, %v12496_v22 }
 0x330   :  { %v1861_v10 = vpop.f32.mrb[66].mxu0 }
 0x331   :  { %7825 = vmatmul.mubr.msk.f32.gmra.mrb[120].mxu1 %vm2171_vm4, %v2139_v55  ;;  %9349 = vpow2.f32 %v7797_v5  ;;  %v12502_v54 = vadd.f32 %v1861_v10, %v12405_v36  ;;  %v1863_v13 = vpop.f32.mrb[67].mxu0  ;;  %8530 = vmatpush1.bf16.msra.mxu0 %v8529_v43 }
 0x332   :  { %2410 = vmatprep.mubr.f32.mxu1 %v15919_v27  ;;  %8532 = vmatprep.subr.bf16.mxu0 %v8531_v57 }
 0x333   :  { %v9344_v0 = vpop.eup %9343  ;;  %v7798_v20 = vmul.f32 -1.442695, %v12502_v54 }
 0x334   :  { %v2140_v21 = vmul.f32 %v9344_v0, %v12473_v42  ;;  %v1866_v41 = vpop.f32.mrb[68].mxu0 }
 0x335   :  { %9351 = vpow2.f32 %v7798_v20  ;;  %v12508_v62 = vadd.f32 %v1866_v41, %v12405_v36  ;;  %v1868_v17 = vpop.f32.mrb[69].mxu0  ;;  %8534 = vmatpush1.bf16.msra.mxu0 %v8533_v37 }
 0x336   :  { %7826 = vmatmul.mubr.msk.f32.gmra.mrb[122].mxu1 %vm2171_vm4, %v2140_v21 }
 0x337   :  { %v9346_v49 = vpop.eup %9345  ;;  %2416 = vmatprep.mubr.f32.mxu1 %v15919_v27  ;;  %v7799_v42 = vmul.f32 -1.442695, %v12508_v62 }
 0x338   :  { %v9348_v18 = vpop.eup %9347  ;;  %v2141_v3 = vmul.f32 %v9346_v49, %v12480_v39 }
 0x339   :  { %v2046_v60 = vadd.f32 1.0, %v9348_v18  ;;  %9353 = vpow2.f32 %v7799_v42  ;;  %v1871_v45 = vpop.f32.mrb[70].mxu0 }
 0x33a   :  { %7827 = vmatmul.mubr.msk.f32.gmra.mrb[124].mxu1 %vm2171_vm4, %v2141_v3  ;;  %v12516_v55 = vadd.f32 %v1871_v45, %v12405_v36  ;;  %v1873_v5 = vpop.f32.mrb[71].mxu0 }
 0x33b   :  { %9355 = vrcp.f32 %v2046_v60  ;;  %2422 = vmatprep.mubr.f32.mxu1 %v15919_v27  ;;  %v9350_v43 = vpop.eup %9349 }
 0x33c   :  { %v2047_v10 = vadd.f32 1.0, %v9350_v43  ;;  %v7800_v57 = vmul.f32 -1.442695, %v12516_v55 }
 0x33d   :  { %v1876_v39 = vpop.f32.mrb[72].mxu0 }
 0x33e   :  { %9357 = vrcp.f32 %v2047_v10  ;;  %v12521_v44 = vadd.f32 %v1876_v39, %v12405_v36  ;;  %v1878_v40 = vpop.f32.mrb[73].mxu0 }
 0x33f   :  { %v9352_v13 = vpop.eup %9351  ;;  %9359 = vpow2.f32 %v7800_v57 }
 0x340   :  { %v2048_v0 = vadd.f32 1.0, %v9352_v13  ;;  %v7801_v21 = vmul.f32 -1.442695, %v12521_v44 }
 0x341   :  { %v1881_v20 = vpop.f32.mrb[74].mxu0 }
 0x342   :  { %9361 = vrcp.f32 %v2048_v0  ;;  %v12525_v37 = vadd.f32 %v1881_v20, %v12405_v36  ;;  %v1883_v41 = vpop.f32.mrb[75].mxu0 }
 0x343   :  { %v9354_v17 = vpop.eup %9353  ;;  %9363 = vpow2.f32 %v7801_v21 }
 0x344   :  { %v2049_v18 = vadd.f32 1.0, %v9354_v17  ;;  %v7802_v3 = vmul.f32 -1.442695, %v12525_v37 }
 0x345   :  { %v9356_v49 = vpop.eup %9355  ;;  %v1886_v60 = vpop.f32.mrb[76].mxu0 }
 0x346   :  { %v2142_v42 = vmul.f32 %v9356_v49, %v12492_v47  ;;  %9365 = vrcp.f32 %v2049_v18  ;;  %v12530_v45 = vadd.f32 %v1886_v60, %v12405_v36  ;;  %v1888_v5 = vpop.f32.mrb[77].mxu0 }
 0x347   :  { %9367 = vpow2.f32 %v7802_v3 }
 0x348   :  { %7828 = vmatmul.mubr.msk.f32.gmra.mrb[126].mxu1 %vm2171_vm4, %v2142_v42  ;;  %v9358_v43 = vpop.eup %9357  ;;  %v7803_v10 = vmul.f32 -1.442695, %v12530_v45 }
 0x349   :  { %2428 = vmatprep.mubr.f32.mxu1 %v15919_v27  ;;  %v9360_v57 = vpop.eup %9359  ;;  %v2143_v39 = vmul.f32 %v9358_v43, %v12496_v22  ;;  %v1891_v40 = vpop.f32.mrb[78].mxu0 }
 0x34a   :  { %v2050_v13 = vadd.f32 1.0, %v9360_v57  ;;  %9369 = vpow2.f32 %v7803_v10  ;;  %v12537_v47 = vadd.f32 %v1891_v40, %v12405_v36  ;;  %v1893_v0 = vpop.f32.mrb[79].mxu0 }
 0x34c   :  { %7829 = vmatmul.mubr.msk.f32.gmra.mrb[128].mxu1 %vm2171_vm4, %v2143_v39  ;;  %v9362_v21 = vpop.eup %9361  ;;  %9371 = vrcp.f32 %v2050_v13  ;;  %v7804_v20 = vmul.f32 -1.442695, %v12537_v47 }
 0x34d   :  { %2434 = vmatprep.mubr.f32.mxu1 %v15919_v27  ;;  %v9364_v41 = vpop.eup %9363  ;;  %v2144_v17 = vmul.f32 %v9362_v21, %v12502_v54  ;;  %v1896_v49 = vpop.f32.mrb[80].mxu0 }
 0x34e   :  { %v2051_v22 = vadd.f32 1.0, %v9364_v41  ;;  %9373 = vpow2.f32 %v7804_v20  ;;  %v12544_v18 = vadd.f32 %v1896_v49, %v12405_v36  ;;  %v1898_v3 = vpop.f32.mrb[81].mxu0 }
 0x350   :  { %7830 = vmatmul.mubr.msk.f32.gmra.mrb[130].mxu1 %vm2171_vm4, %v2144_v17  ;;  %v9366_v42 = vpop.eup %9365  ;;  %9375 = vrcp.f32 %v2051_v22  ;;  %v7805_v60 = vmul.f32 -1.442695, %v12544_v18 }
 0x351   :  { %2440 = vmatprep.mubr.f32.mxu1 %v15919_v27  ;;  %v9368_v5 = vpop.eup %9367  ;;  %v2145_v43 = vmul.f32 %v9366_v42, %v12508_v62 }
 0x352   :  { %v2052_v10 = vadd.f32 1.0, %v9368_v5  ;;  %9377 = vpow2.f32 %v7805_v60  ;;  %v1901_v54 = vpop.f32.mrb[82].mxu0  ;;  %v3087_v5 = vld [vmem:[#allocation2 + $0x388] sm:$0xff] }
 0x353   :  { %v12551_v57 = vadd.f32 %v1901_v54, %v12405_v36  ;;  %v1903_v39 = vpop.f32.mrb[83].mxu0 }
 0x354   :  { %7831 = vmatmul.mubr.msk.f32.gmra.mrb[132].mxu1 %vm2171_vm4, %v2145_v43  ;;  %v9370_v40 = vpop.eup %9369  ;;  %9379 = vrcp.f32 %v2052_v10  ;;  %v3089_v43 = vld [vmem:[#allocation2 + $0x398] sm:$0xff]  ;;  %v3086_v10 = vld [vmem:[#allocation2 + $0x380] sm:$0xff] }
 0x355   :  { %2446 = vmatprep.mubr.f32.mxu1 %v15919_v27  ;;  %v2053_v13 = vadd.f32 1.0, %v9370_v40  ;;  %v7806_v0 = vmul.f32 -1.442695, %v12551_v57  ;;  %v8535_v40 = vpack.c.bf16 %v3089_v43, %v3087_v5 }
 0x356   :  { %v9372_v21 = vpop.eup %9371  ;;  %v1906_v20 = vpop.f32.mrb[84].mxu0 }
 0x357   :  { %v2146_v62 = vmul.f32 %v9372_v21, %v12516_v55  ;;  %9381 = vrcp.f32 %v2053_v13  ;;  %v12558_v41 = vadd.f32 %v1906_v20, %v12405_v36  ;;  %v1908_v17 = vpop.f32.mrb[85].mxu0  ;;  %v3088_v13 = vld [vmem:[#allocation2 + $0x390] sm:$0xff]  ;;  %8536 = vmatprep.subr.bf16.mxu0 %v8535_v40 }
 0x358   :  { %v9374_v49 = vpop.eup %9373  ;;  %9383 = vpow2.f32 %v7806_v0  ;;  %v8537_v21 = vpack.c.bf16 %v3088_v13, %v3086_v10 }
 0x359   :  { %v2054_v22 = vadd.f32 1.0, %v9374_v49  ;;  %v7807_v3 = vmul.f32 -1.442695, %v12558_v41  ;;  %7832 = vmatmul.mubr.msk.f32.gmra.mrb[134].mxu1 %vm2171_vm4, %v2146_v62 }
 0x35a   :  { %v9376_v42 = vpop.eup %9375  ;;  %v1911_v60 = vpop.f32.mrb[86].mxu0  ;;  %2452 = vmatprep.mubr.f32.mxu1 %v15919_v27  ;;  %8538 = vmatpush1.bf16.msra.mxu0 %v8537_v21 }
 0x35b   :  { %v2147_v55 = vmul.f32 %v9376_v42, %v12521_v44  ;;  %9385 = vrcp.f32 %v2054_v22  ;;  %v12565_v54 = vadd.f32 %v1911_v60, %v12405_v36  ;;  %v1913_v39 = vpop.f32.mrb[87].mxu0 }
 0x35c   :  { %v9378_v0 = vpop.eup %9377  ;;  %9387 = vpow2.f32 %v7807_v3  ;;  %v3093_v39 = vld [vmem:[#allocation2 + $0x3b8] sm:$0xff] }
 0x35d   :  { %v2055_v20 = vadd.f32 1.0, %v9378_v0  ;;  %v7808_v62 = vmul.f32 -1.442695, %v12565_v54  ;;  %7833 = vmatmul.mubr.msk.f32.gmra.mrb[136].mxu1 %vm2171_vm4, %v2147_v55  ;;  %v3091_v55 = vld [vmem:[#allocation2 + $0x3a8] sm:$0xff] }
 0x35e   :  { %v9380_v17 = vpop.eup %9379  ;;  %v1916_v49 = vpop.f32.mrb[88].mxu0  ;;  %2458 = vmatprep.mubr.f32.mxu1 %v15919_v27  ;;  %v8539_v21 = vpack.c.bf16 %v3093_v39, %v3091_v55 }
 0x35f   :  { %v2148_v44 = vmul.f32 %v9380_v17, %v12525_v37  ;;  %9389 = vrcp.f32 %v2055_v20  ;;  %v12572_v22 = vadd.f32 %v1916_v49, %v12405_v36  ;;  %v1918_v42 = vpop.f32.mrb[89].mxu0  ;;  %v3090_v37 = vld [vmem:[#allocation2 + $0x3a0] sm:$0xff]  ;;  %v3092_v20 = vld [vmem:[#allocation2 + $0x3b0] sm:$0xff] }
 0x360   :  { %9391 = vpow2.f32 %v7808_v62  ;;  %v8541_v62 = vpack.c.bf16 %v3092_v20, %v3090_v37  ;;  %8540 = vmatprep.subr.bf16.mxu0 %v8539_v21 }
 0x361   :  { %v9382_v3 = vpop.eup %9381  ;;  %v7809_v60 = vmul.f32 -1.442695, %v12572_v22  ;;  %7834 = vmatmul.mubr.msk.f32.gmra.mrb[138].mxu1 %vm2171_vm4, %v2148_v44 }
 0x362   :  { %v9384_v5 = vpop.eup %9383  ;;  %v2149_v43 = vmul.f32 %v9382_v3, %v12530_v45  ;;  %v1921_v10 = vpop.f32.mrb[90].mxu0  ;;  %2464 = vmatprep.mubr.f32.mxu1 %v15919_v27  ;;  %8542 = vmatpush1.bf16.msra.mxu0 %v8541_v62  ;;  %v3095_v62 = vld [vmem:[#allocation2 + $0x3c8] sm:$0xff] }
 0x363   :  { %v2056_v40 = vadd.f32 1.0, %v9384_v5  ;;  %9393 = vpow2.f32 %v7809_v60  ;;  %v12579_v13 = vadd.f32 %v1921_v10, %v12405_v36  ;;  %v1923_v0 = vpop.f32.mrb[91].mxu0 }
 0x365   :  { %v9386_v17 = vpop.eup %9385  ;;  %9395 = vrcp.f32 %v2056_v40  ;;  %v7810_v49 = vmul.f32 -1.442695, %v12579_v13  ;;  %7835 = vmatmul.mubr.msk.f32.gmra.mrb[140].mxu1 %vm2171_vm4, %v2149_v43 }
 0x366   :  { %v9388_v45 = vpop.eup %9387  ;;  %v2150_v44 = vmul.f32 %v9386_v17, %v12537_v47  ;;  %v1926_v42 = vpop.f32.mrb[92].mxu0  ;;  %2470 = vmatprep.mubr.f32.mxu1 %v15919_v27  ;;  %v3097_v17 = vld [vmem:[#allocation2 + $0x3d8] sm:$0xff] }
 0x367   :  { %v2057_v3 = vadd.f32 1.0, %v9388_v45  ;;  %9397 = vpow2.f32 %v7810_v49  ;;  %v12586_v60 = vadd.f32 %v1926_v42, %v12405_v36  ;;  %v1928_v5 = vpop.f32.mrb[93].mxu0  ;;  %v3094_v49 = vld [vmem:[#allocation2 + $0x3c0] sm:$0xff] }
 0x369   :  { %v9390_v10 = vpop.eup %9389  ;;  %9399 = vrcp.f32 %v2057_v3  ;;  %v7811_v55 = vmul.f32 -1.442695, %v12586_v60  ;;  %7836 = vmatmul.mubr.msk.f32.gmra.mrb[142].mxu1 %vm2171_vm4, %v2150_v44  ;;  %v3096_v44 = vld [vmem:[#allocation2 + $0x3d0] sm:$0xff] }
 0x36a   :  { %v9392_v43 = vpop.eup %9391  ;;  %v2151_v39 = vmul.f32 %v9390_v10, %v12544_v18  ;;  %v1931_v47 = vpop.f32.mrb[94].mxu0  ;;  %2476 = vmatprep.mubr.f32.mxu1 %v15919_v27  ;;  %v8543_v18 = vpack.c.bf16 %v3097_v17, %v3095_v62  ;;  %v8545_v3 = vpack.c.bf16 %v3096_v44, %v3094_v49  ;;  %v3100_v17 = vld [vmem:[#allocation2 + $0x3f0] sm:$0xff] }
 0x36b   :  { %v2058_v37 = vadd.f32 1.0, %v9392_v43  ;;  %9401 = vpow2.f32 %v7811_v55  ;;  %v1932_v40 = vadd.f32 %v1931_v47, %v12405_v36  ;;  %v1933_v0 = vpop.f32.mrb[95].mxu0 }
 0x36c   :  { %8544 = vmatprep.subr.bf16.mxu0 %v8543_v18  ;;  %v3101_v0 = vld [vmem:[#allocation2 + $0x3f8] sm:$0xff] }
 0x36d   :  { %v9394_v21 = vpop.eup %9393  ;;  %9403 = vrcp.f32 %v2058_v37  ;;  %v7812_v20 = vmul.f32 -1.442695, %v1932_v40  ;;  %7837 = vmatmul.mubr.msk.f32.gmra.mrb[144].mxu1 %vm2171_vm4, %v2151_v39  ;;  %8546 = vmatpush1.bf16.msra.mxu0 %v8545_v3 }
 0x36e   :  { %v2059_v45 = vadd.f32 1.0, %v9394_v21  ;;  %2482 = vmatprep.mubr.f32.mxu1 %v15919_v27  ;;  %v3098_v21 = vld [vmem:[#allocation2 + $0x3e0] sm:$0xff] }
 0x36f   :  { %v9396_v42 = vpop.eup %9395  ;;  %9405 = vpow2.f32 %v7812_v20 }
 0x370   :  { %v2152_v5 = vmul.f32 %v9396_v42, %v12551_v57  ;;  %9407 = vrcp.f32 %v2059_v45  ;;  %v3099_v57 = vld [vmem:[#allocation2 + $0x3e8] sm:$0xff]  ;;  %v8549_v45 = vpack.c.bf16 %v3100_v17, %v3098_v21 }
 0x371   :  { %v9398_v36 = vpop.eup %9397  ;;  %v8547_v62 = vpack.c.bf16 %v3101_v0, %v3099_v57 }
 0x372   :  { %v2060_v10 = vadd.f32 1.0, %v9398_v36  ;;  %7838 = vmatmul.mubr.msk.f32.gmra.mrb[146].mxu1 %vm2171_vm4, %v2152_v5 }
 0x373   :  { %v9400_v55 = vpop.eup %9399  ;;  %2488 = vmatprep.mubr.f32.mxu1 %v15919_v27  ;;  %8548 = vmatprep.subr.bf16.mxu0 %v8547_v62 }
 0x374   :  { %v2153_v43 = vmul.f32 %v9400_v55, %v12558_v41  ;;  %9409 = vrcp.f32 %v2060_v10  ;;  %8550 = vmatpush1.bf16.msra.mxu0 %v8549_v45  ;;  %v2165_v10 = vsub.s32 7, %v15920_v2 }
 0x375   :  { %v9402_v39 = vpop.eup %9401 }
 0x376   :  { %v2061_v47 = vadd.f32 1.0, %v9402_v39  ;;  %7839 = vmatmul.mubr.msk.f32.gmra.mrb[148].mxu1 %vm2171_vm4, %v2153_v43 }
 0x377   :  { %v9404_v37 = vpop.eup %9403  ;;  %2494 = vmatprep.mubr.f32.mxu1 %v15919_v27 }
 0x378   :  { %v2154_v20 = vmul.f32 %v9404_v37, %v12565_v54  ;;  %9411 = vrcp.f32 %v2061_v47 }
 0x379   :  { %v9406_v49 = vpop.eup %9405 }
 0x37a   :  { %v9408_v18 = vpop.eup %9407  ;;  %v2062_v41 = vadd.f32 1.0, %v9406_v49  ;;  %7840 = vmatmul.mubr.msk.f32.gmra.mrb[150].mxu1 %vm2171_vm4, %v2154_v20 }
 0x37b   :  { %v2155_v44 = vmul.f32 %v9408_v18, %v12572_v22  ;;  %2500 = vmatprep.mubr.f32.mxu1 %v15919_v27 }
 0x37c   :  { %9413 = vrcp.f32 %v2062_v41 }
 0x37e   :  { %v9410_v42 = vpop.eup %9409  ;;  %7841 = vmatmul.mubr.msk.f32.gmra.mrb[152].mxu1 %vm2171_vm4, %v2155_v44 }
 0x37f   :  { %v2156_v54 = vmul.f32 %v9410_v42, %v12579_v13  ;;  %2506 = vmatprep.mubr.f32.mxu1 %v15919_v27  ;;  %v10954_v13 = vld [vmem:[%s15570_s6] sm:$0xff] }
 0x380   :  { %v12618_v55 = vrot.slane %v10954_v13, %v2165_v10 }
 0x382   :  { %v9412_v3 = vpop.eup %9411  ;;  %7842 = vmatmul.mubr.msk.f32.gmra.mrb[154].mxu1 %vm2171_vm4, %v2156_v54 }
 0x383   :  { %v2157_v5 = vmul.f32 %v9412_v3, %v12586_v60  ;;  %2512 = vmatprep.mubr.f32.mxu1 %v15919_v27  ;;  %v10955_v60 = vld [vmem:[%s15570_s6 + $0x8] sm:$0xff] }
 0x384   :  { %v12623_v43 = vrot.slane %v10955_v60, %v2165_v10 }
 0x386   :  { %v9414_v36 = vpop.eup %9413  ;;  %7843 = vmatmul.mubr.msk.f32.gmra.mrb[156].mxu1 %vm2171_vm4, %v2157_v5 }
 0x387   :  { %v2158_v22 = vmul.f32 %v9414_v36, %v1932_v40  ;;  %2518 = vmatprep.mubr.f32.mxu1 %v15919_v27 }
 0x38a   :  { %7844 = vmatmul.mubr.msk.f32.gmra.mrb[158].mxu1 %vm2171_vm4, %v2158_v22 }
 0x3c7   :  { %v2334_v39 = vpop.f32.mrb[96].mxu1 }
 0x3c8   :  { %v2335_v40 = vadd.f32 %v2334_v39, %v12618_v55  ;;  %v2336_v47 = vpop.f32.mrb[97].mxu1 }
 0x3c9   :  { %v2337_v37 = vadd.f32 %v2336_v47, %v12623_v43 }
 0x3ca   :  { %v7845_v57 = vmul.f32 -1.442695, %v2335_v40 }
 0x3cb   :  { %v7846_v0 = vmul.f32 -1.442695, %v2337_v37  ;;  %v2340_v21 = vpop.f32.mrb[98].mxu1 }
 0x3cc   :  { %9415 = vpow2.f32 %v7845_v57  ;;  %v2341_v20 = vadd.f32 %v2340_v21, %v12618_v55  ;;  %v2342_v62 = vpop.f32.mrb[99].mxu1 }
 0x3cd   :  { %9417 = vpow2.f32 %v7846_v0  ;;  %v2343_v17 = vadd.f32 %v2342_v62, %v12623_v43 }
 0x3ce   :  { %v7847_v49 = vmul.f32 -1.442695, %v2341_v20 }
 0x3cf   :  { %v7848_v45 = vmul.f32 -1.442695, %v2343_v17  ;;  %v2346_v18 = vpop.f32.mrb[100].mxu1 }
 0x3d0   :  { %9419 = vpow2.f32 %v7847_v49  ;;  %v2347_v41 = vadd.f32 %v2346_v18, %v12618_v55  ;;  %v2348_v44 = vpop.f32.mrb[101].mxu1 }
 0x3d1   :  { %9421 = vpow2.f32 %v7848_v45  ;;  %v2349_v42 = vadd.f32 %v2348_v44, %v12623_v43 }
 0x3d2   :  { %v7849_v54 = vmul.f32 -1.442695, %v2347_v41 }
 0x3d3   :  { %v7850_v3 = vmul.f32 -1.442695, %v2349_v42 }
 0x3d4   :  { %9423 = vpow2.f32 %v7849_v54 }
 0x3d5   :  { %9425 = vpow2.f32 %v7850_v3 }
 0x3d6   :  { %v9416_v5 = vpop.eup %9415 }
 0x3d7   :  { %v2352_v36 = vpop.f32.mrb[102].mxu1  ;;  %v9418_v22 = vpop.eup %9417  ;;  %v2717_v10 = vadd.f32 1.0, %v9416_v5 }
 0x3d8   :  { %v2353_v13 = vadd.f32 %v2352_v36, %v12618_v55  ;;  %v2354_v60 = vpop.f32.mrb[103].mxu1  ;;  %v2718_v39 = vadd.f32 1.0, %v9418_v22 }
 0x3d9   :  { %v2355_v40 = vadd.f32 %v2354_v60, %v12623_v43  ;;  %9427 = vrcp.f32 %v2717_v10 }
 0x3da   :  { %v7851_v47 = vmul.f32 -1.442695, %v2353_v13  ;;  %v9420_v37 = vpop.eup %9419  ;;  %9429 = vrcp.f32 %v2718_v39 }
 0x3db   :  { %v7852_v57 = vmul.f32 -1.442695, %v2355_v40  ;;  %v2358_v0 = vpop.f32.mrb[104].mxu1  ;;  %v9422_v21 = vpop.eup %9421  ;;  %v2719_v20 = vadd.f32 1.0, %v9420_v37 }
 0x3dc   :  { %9431 = vpow2.f32 %v7851_v47  ;;  %v2359_v62 = vadd.f32 %v2358_v0, %v12618_v55  ;;  %v2360_v17 = vpop.f32.mrb[105].mxu1  ;;  %v2720_v49 = vadd.f32 1.0, %v9422_v21 }
 0x3dd   :  { %9433 = vpow2.f32 %v7852_v57  ;;  %v2361_v45 = vadd.f32 %v2360_v17, %v12623_v43 }
 0x3de   :  { %9435 = vrcp.f32 %v2719_v20  ;;  %v7853_v18 = vmul.f32 -1.442695, %v2359_v62  ;;  %v9424_v41 = vpop.eup %9423 }
 0x3df   :  { %9437 = vrcp.f32 %v2720_v49  ;;  %v7854_v44 = vmul.f32 -1.442695, %v2361_v45  ;;  %v2364_v42 = vpop.f32.mrb[106].mxu1  ;;  %v9426_v54 = vpop.eup %9425  ;;  %v2721_v3 = vadd.f32 1.0, %v9424_v41 }
 0x3e0   :  { %9439 = vpow2.f32 %v7853_v18  ;;  %v2365_v5 = vadd.f32 %v2364_v42, %v12618_v55  ;;  %v2366_v36 = vpop.f32.mrb[107].mxu1  ;;  %v2722_v22 = vadd.f32 1.0, %v9426_v54 }
 0x3e1   :  { %9441 = vpow2.f32 %v7854_v44  ;;  %v2367_v10 = vadd.f32 %v2366_v36, %v12623_v43 }
 0x3e2   :  { %9443 = vrcp.f32 %v2721_v3  ;;  %v7855_v13 = vmul.f32 -1.442695, %v2365_v5  ;;  %v15956_v5 = vld [vmem:[#allocation8_spill] sm:$0xff] }
 0x3e3   :  { %9445 = vrcp.f32 %v2722_v22  ;;  %v7856_v60 = vmul.f32 -1.442695, %v2367_v10  ;;  %v2370_v39 = vpop.f32.mrb[108].mxu1  ;;  %v9428_v40 = vpop.eup %9427  ;;  %v15957_v10 = vld [vmem:[#allocation7_spill] sm:$0xff] }
 0x3e4   :  { %9447 = vpow2.f32 %v7855_v13  ;;  %v2371_v47 = vadd.f32 %v2370_v39, %v12618_v55  ;;  %v2372_v37 = vpop.f32.mrb[109].mxu1  ;;  %v9430_v57 = vpop.eup %9429  ;;  %v2909_v21 = vmul.f32 %v9428_v40, %v11936_v8 }
 0x3e5   :  { %9449 = vpow2.f32 %v7856_v60  ;;  %v2373_v0 = vadd.f32 %v2372_v37, %v12623_v43  ;;  %v2910_v17 = vmul.f32 %v9430_v57, %v11933_v51 }
 0x3e6   :  { %v9432_v20 = vpop.eup %9431  ;;  %v7857_v62 = vmul.f32 -1.442695, %v2371_v47  ;;  %v12647_v13 = vadd.f32 %v2909_v21, %v15957_v10 }
 0x3e7   :  { %v9434_v49 = vpop.eup %9433  ;;  %v2723_v45 = vadd.f32 1.0, %v9432_v20  ;;  %v7858_v18 = vmul.f32 -1.442695, %v2373_v0  ;;  %v2376_v41 = vpop.f32.mrb[110].mxu1  ;;  %v12643_v36 = vadd.f32 %v2910_v17, %v15956_v5  ;;  %v15958_v17 = vld [vmem:[#allocation10_spill] sm:$0xff] }
 0x3e8   :  { %v9436_v44 = vpop.eup %9435  ;;  %v2724_v42 = vadd.f32 1.0, %v9434_v49  ;;  %9451 = vpow2.f32 %v7857_v62  ;;  %v2377_v54 = vadd.f32 %v2376_v41, %v12618_v55  ;;  %v2378_v3 = vpop.f32.mrb[111].mxu1  ;;  %v15959_v41 = vld [vmem:[#allocation9_spill] sm:$0xff] }
 0x3e9   :  { %v9438_v22 = vpop.eup %9437  ;;  %9453 = vrcp.f32 %v2723_v45  ;;  %v2379_v8 = vadd.f32 %v2378_v3, %v12623_v43  ;;  %v2911_v51 = vmul.f32 %v9436_v44, %v11955_v1  ;;  %3174 = vmatprep.mubr.f32.mxu0 %v12643_v36 }
 0x3ea   :  { %v9440_v60 = vpop.eup %9439  ;;  %9455 = vrcp.f32 %v2724_v42  ;;  %v7859_v39 = vmul.f32 -1.442695, %v2377_v54  ;;  %v2912_v40 = vmul.f32 %v9438_v22, %v11949_v26  ;;  %3175 = vmatmul.mubr.f32.vlgmr.msra.gmra.mrb[96].mxu0 %v12647_v13 }
 0x3eb   :  { %v9442_v47 = vpop.eup %9441  ;;  %v2725_v37 = vadd.f32 1.0, %v9440_v60  ;;  %9457 = vpow2.f32 %v7858_v18  ;;  %v7860_v57 = vmul.f32 -1.442695, %v2379_v8  ;;  %v2382_v0 = vpop.f32.mrb[112].mxu1  ;;  %v12659_v44 = vadd.f32 %v2911_v51, %v15959_v41  ;;  %v15960_v60 = vld [vmem:[#allocation12_spill] sm:$0xff] }
 0x3ec   :  { %v9444_v20 = vpop.eup %9443  ;;  %v2726_v62 = vadd.f32 1.0, %v9442_v47  ;;  %9459 = vpow2.f32 %v7859_v39  ;;  %v2383_v21 = vadd.f32 %v2382_v0, %v12618_v55  ;;  %v2384_v1 = vpop.f32.mrb[113].mxu1  ;;  %v12655_v49 = vadd.f32 %v2912_v40, %v15958_v17  ;;  %v15961_v39 = vld [vmem:[#allocation11_spill] sm:$0xff] }
 0x3ed   :  { %v9446_v45 = vpop.eup %9445  ;;  %9461 = vrcp.f32 %v2725_v37  ;;  %v2385_v26 = vadd.f32 %v2384_v1, %v12623_v43  ;;  %v2913_v18 = vmul.f32 %v9444_v20, %v11968_v4 }
 0x3ee   :  { %v9448_v42 = vpop.eup %9447  ;;  %9463 = vrcp.f32 %v2726_v62  ;;  %v7861_v54 = vmul.f32 -1.442695, %v2383_v21  ;;  %3180 = vmatprep.mubr.f32.mxu0 %v12655_v49  ;;  %v2914_v3 = vmul.f32 %v9446_v45, %v11965_v25 }
 0x3ef   :  { %v9450_v5 = vpop.eup %9449  ;;  %v2727_v22 = vadd.f32 1.0, %v9448_v42  ;;  %9465 = vpow2.f32 %v7860_v57  ;;  %v7862_v8 = vmul.f32 -1.442695, %v2385_v26  ;;  %3181 = vmatmul.mubr.f32.gmra.mrb[98].mxu0 %v12659_v44  ;;  %v12669_v40 = vadd.f32 %v2913_v18, %v15961_v39  ;;  %v15963_v39 = vld [vmem:[#allocation14_spill] sm:$0xff] }
 0x3f0   :  { %v2728_v10 = vadd.f32 1.0, %v9450_v5  ;;  %9467 = vpow2.f32 %v7861_v54  ;;  %v12666_v51 = vadd.f32 %v2914_v3, %v15960_v60 }
 0x3f1   :  { %9469 = vrcp.f32 %v2727_v22  ;;  %v2388_v4 = vpop.f32.mrb[114].mxu1 }
 0x3f2   :  { %v9452_v47 = vpop.eup %9451  ;;  %9471 = vrcp.f32 %v2728_v10  ;;  %v2389_v25 = vadd.f32 %v2388_v4, %v12618_v55  ;;  %v2390_v37 = vpop.f32.mrb[115].mxu1  ;;  %3186 = vmatprep.mubr.f32.mxu0 %v12666_v51  ;;  %v15962_v10 = vld [vmem:[#allocation13_spill] sm:$0xff] }
 0x3f3   :  { %v9454_v57 = vpop.eup %9453  ;;  %v2729_v0 = vadd.f32 1.0, %v9452_v47  ;;  %9473 = vpow2.f32 %v7862_v8  ;;  %v2391_v20 = vadd.f32 %v2390_v37, %v12623_v43  ;;  %3187 = vmatmul.mubr.f32.gmra.mrb[100].mxu0 %v12669_v40 }
 0x3f4   :  { %v9456_v62 = vpop.eup %9455  ;;  %v7863_v21 = vmul.f32 -1.442695, %v2389_v25  ;;  %v2915_v1 = vmul.f32 %v9454_v57, %v12002_v24 }
 0x3f5   :  { %v9458_v17 = vpop.eup %9457  ;;  %9475 = vrcp.f32 %v2729_v0  ;;  %v7864_v45 = vmul.f32 -1.442695, %v2391_v20  ;;  %v2394_v26 = vpop.f32.mrb[116].mxu1  ;;  %v2916_v41 = vmul.f32 %v9456_v62, %v11996_v12 }
 0x3f6   :  { %v9460_v18 = vpop.eup %9459  ;;  %v2730_v42 = vadd.f32 1.0, %v9458_v17  ;;  %9477 = vpow2.f32 %v7863_v21  ;;  %v2395_v54 = vadd.f32 %v2394_v26, %v12618_v55  ;;  %v2396_v3 = vpop.f32.mrb[117].mxu1  ;;  %v12683_v47 = vadd.f32 %v2915_v1, %v15963_v39  ;;  %v15964_v1 = vld [vmem:[#allocation15_spill] sm:$0xff] }
 0x3f7   :  { %v9462_v5 = vpop.eup %9461  ;;  %v2731_v22 = vadd.f32 1.0, %v9460_v18  ;;  %9479 = vpow2.f32 %v7864_v45  ;;  %v2397_v8 = vadd.f32 %v2396_v3, %v12623_v43  ;;  %v12680_v60 = vadd.f32 %v2916_v41, %v15962_v10  ;;  %v7973_v41 = vld [vmem:[%s15567_s3 + $0x100] sm:$0xff] }
 0x3f8   :  { %v9464_v24 = vpop.eup %9463  ;;  %9481 = vrcp.f32 %v2730_v42  ;;  %v7865_v4 = vmul.f32 -1.442695, %v2395_v54  ;;  %v2917_v12 = vmul.f32 %v9462_v5, %v12013_v28  ;;  %v15965_v28 = vld [vmem:[#allocation16_spill] sm:$0xff] }
 0x3f9   :  { %v9466_v25 = vpop.eup %9465  ;;  %9483 = vrcp.f32 %v2731_v22  ;;  %v7866_v37 = vmul.f32 -1.442695, %v2397_v8  ;;  %3192 = vmatprep.mubr.f32.mxu0 %v12680_v60  ;;  %v2918_v57 = vmul.f32 %v9464_v24, %v12010_v59  ;;  %v7974_v59 = vld [vmem:[%s15567_s3 + $0x108] sm:$0xff] }
 0x3fa   :  { %v9468_v0 = vpop.eup %9467  ;;  %v2732_v20 = vadd.f32 1.0, %v9466_v25  ;;  %9485 = vpow2.f32 %v7865_v4  ;;  %3193 = vmatmul.mubr.f32.gmra.mrb[102].mxu0 %v12683_v47  ;;  %v12693_v26 = vadd.f32 %v2917_v12, %v15965_v28  ;;  %v8552_v5 = vpack.c.bf16 %v7974_v59, %v7973_v41  ;;  %v15966_v25 = vld [vmem:[#allocation17_spill] sm:$0xff] }
 0x3fb   :  { %v9470_v62 = vpop.eup %9469  ;;  %v2733_v21 = vadd.f32 1.0, %v9468_v0  ;;  %9487 = vpow2.f32 %v7866_v37  ;;  %v2400_v17 = vpop.f32.mrb[118].mxu1  ;;  %v12690_v45 = vadd.f32 %v2918_v57, %v15964_v1  ;;  %v15967_v57 = vld [vmem:[#allocation18_spill] sm:$0xff] }
 0x3fc   :  { %v9472_v18 = vpop.eup %9471  ;;  %9489 = vrcp.f32 %v2732_v20  ;;  %v2401_v42 = vadd.f32 %v2400_v17, %v12618_v55  ;;  %v2402_v54 = vpop.f32.mrb[119].mxu1  ;;  %v2919_v3 = vmul.f32 %v9470_v62, %v12028_v52  ;;  %8553 = vmatpush1.bf16.msra.mxu1 %v8552_v5 }
 0x3fd   :  { %v9474_v22 = vpop.eup %9473  ;;  %9491 = vrcp.f32 %v2733_v21  ;;  %v2403_v8 = vadd.f32 %v2402_v54, %v12623_v43  ;;  %3198 = vmatprep.mubr.f32.mxu0 %v12690_v45  ;;  %v2920_v10 = vmul.f32 %v9472_v18, %v12024_v32  ;;  %8554 = vmatprep.subr.bf16.mxu1 %v15901_v46  ;;  %v7975_v18 = vld [vmem:[%s15567_s3 + $0x110] sm:$0xff]  ;;  %v7977_v54 = vld [vmem:[%s15567_s3 + $0x120] sm:$0xff] }
 0x3fe   :  { %v2734_v24 = vadd.f32 1.0, %v9474_v22  ;;  %v7867_v4 = vmul.f32 -1.442695, %v2401_v42  ;;  %3199 = vmatmul.mubr.f32.gmra.mrb[104].mxu0 %v12693_v26  ;;  %v12712_v0 = vadd.f32 %v2919_v3, %v15967_v57  ;;  %v7976_v42 = vld [vmem:[%s15567_s3 + $0x118] sm:$0xff]  ;;  %v15968_v22 = vld [vmem:[#allocation19_spill] sm:$0xff] }
 0x3ff   :  { %v9476_v39 = vpop.eup %9475  ;;  %v7868_v12 = vmul.f32 -1.442695, %v2403_v8  ;;  %v12708_v37 = vadd.f32 %v2920_v10, %v15966_v25  ;;  %v8555_v10 = vpack.c.bf16 %v7976_v42, %v7975_v18  ;;  %v15969_v25 = vld [vmem:[#allocation20_spill] sm:$0xff] }
 0x400   :  { %v9478_v52 = vpop.eup %9477  ;;  %9493 = vrcp.f32 %v2734_v24  ;;  %v2921_v17 = vmul.f32 %v9476_v39, %v12038_v6  ;;  %v7978_v24 = vld [vmem:[%s15567_s3 + $0x128] sm:$0xff] }
 0x401   :  { %v9480_v20 = vpop.eup %9479  ;;  %v2735_v62 = vadd.f32 1.0, %v9478_v52  ;;  %9495 = vpow2.f32 %v7867_v4  ;;  %3204 = vmatprep.mubr.f32.mxu0 %v12708_v37  ;;  %8556 = vmatpush1.bf16.msra.mxu1 %v8555_v10 }
 0x402   :  { %v9482_v32 = vpop.eup %9481  ;;  %v2736_v21 = vadd.f32 1.0, %v9480_v20  ;;  %9497 = vpow2.f32 %v7868_v12  ;;  %3205 = vmatmul.mubr.f32.gmra.mrb[106].mxu0 %v12712_v0  ;;  %v12736_v52 = vadd.f32 %v2921_v17, %v15969_v25  ;;  %8557 = vmatprep.subr.bf16.mxu1 %v15901_v46  ;;  %v7979_v17 = vld [vmem:[%s15567_s3 + $0x130] sm:$0xff] }
 0x403   :  { %v9484_v1 = vpop.eup %9483  ;;  %9499 = vrcp.f32 %v2735_v62  ;;  %v2922_v28 = vmul.f32 %v9482_v32, %v12034_v50 }
 0x404   :  { %v9486_v41 = vpop.eup %9485  ;;  %9501 = vrcp.f32 %v2736_v21  ;;  %v2406_v59 = vpop.f32.mrb[120].mxu1  ;;  %v2923_v57 = vmul.f32 %v9484_v1, %v12054_v58  ;;  %v8558_v21 = vpack.c.bf16 %v7978_v24, %v7977_v54  ;;  %v7980_v58 = vld [vmem:[%s15567_s3 + $0x138] sm:$0xff]  ;;  %v15972_v54 = vld [vmem:[#allocation22_spill] sm:$0xff] }
 0x405   :  { %v9488_v6 = vpop.eup %9487  ;;  %v2737_v3 = vadd.f32 1.0, %v9486_v41  ;;  %v2407_v5 = vadd.f32 %v2406_v59, %v12618_v55  ;;  %v2408_v50 = vpop.f32.mrb[121].mxu1  ;;  %v12729_v8 = vadd.f32 %v2922_v28, %v15968_v22  ;;  %v15970_v41 = vld [vmem:[#allocation21_spill] sm:$0xff]  ;;  %v8561_v10 = vpack.c.bf16 %v7980_v58, %v7979_v17 }
 0x406   :  { %v9490_v4 = vpop.eup %9489  ;;  %v2738_v39 = vadd.f32 1.0, %v9488_v6  ;;  %v2409_v12 = vadd.f32 %v2408_v50, %v12623_v43  ;;  %v12754_v6 = vadd.f32 %v2923_v57, %v15972_v54  ;;  %8559 = vmatpush1.bf16.msra.mxu1 %v8558_v21 }
 0x407   :  { %v9492_v20 = vpop.eup %9491  ;;  %9503 = vrcp.f32 %v2737_v3  ;;  %v7869_v62 = vmul.f32 -1.442695, %v2407_v5  ;;  %3210 = vmatprep.mubr.f32.mxu0 %v12729_v8  ;;  %v2924_v32 = vmul.f32 %v9490_v4, %v12048_v19  ;;  %8560 = vmatprep.subr.bf16.mxu1 %v15901_v46 }
 0x408   :  { %9505 = vrcp.f32 %v2738_v39  ;;  %v7870_v28 = vmul.f32 -1.442695, %v2409_v12  ;;  %3211 = vmatmul.mubr.f32.gmra.mrb[108].mxu0 %v12736_v52  ;;  %15973 = vst [vmem:[#allocation7_spill] sm:$0xff] %v12754_v6  ;;  %v2925_v3 = vmul.f32 %v9492_v20, %v12069_v48  ;;  %v7981_v48 = vld [vmem:[%s15567_s3 + $0x140] sm:$0xff]  ;;  %v7982_v12 = vld [vmem:[%s15567_s3 + $0x148] sm:$0xff] }
 0x409   :  { %9507 = vpow2.f32 %v7869_v62  ;;  %v2412_v1 = vpop.f32.mrb[122].mxu1  ;;  %v12750_v19 = vadd.f32 %v2924_v32, %v15970_v41 }
 0x40a   :  { %v9494_v59 = vpop.eup %9493  ;;  %9509 = vpow2.f32 %v7870_v28  ;;  %v2413_v18 = vadd.f32 %v2412_v1, %v12618_v55  ;;  %v2414_v42 = vpop.f32.mrb[123].mxu1  ;;  %v12773_v17 = vadd.f32 %v2925_v3, %v11530_v35  ;;  %8562 = vmatpush1.bf16.msra.mxu1 %v8561_v10  ;;  %v7983_v35 = vld [vmem:[%s15567_s3 + $0x150] sm:$0xff] }
 0x40b   :  { %15971 = vst [vmem:[#allocation8_spill] sm:$0xff] %v12750_v19  ;;  %v9496_v5 = vpop.eup %9495  ;;  %v2415_v50 = vadd.f32 %v2414_v42, %v12623_v43  ;;  %3216 = vmatprep.mubr.f32.mxu0 %v12750_v19  ;;  %v2926_v22 = vmul.f32 %v9494_v59, %v12061_v56  ;;  %8563 = vmatprep.subr.bf16.mxu1 %v15901_v46 }
 0x40c   :  { %v9498_v24 = vpop.eup %9497  ;;  %v2739_v4 = vadd.f32 1.0, %v9496_v5  ;;  %v7871_v39 = vmul.f32 -1.442695, %v2413_v18  ;;  %3217 = vmatmul.mubr.f32.gmra.mrb[110].mxu0 %v12754_v6  ;;  %15975 = vst [vmem:[#allocation9_spill] sm:$0xff] %v12773_v17 }
 0x40d   :  { %v9500_v25 = vpop.eup %9499  ;;  %v2740_v57 = vadd.f32 1.0, %v9498_v24  ;;  %v7872_v56 = vmul.f32 -1.442695, %v2415_v50  ;;  %v2418_v20 = vpop.f32.mrb[124].mxu1  ;;  %v12769_v62 = vadd.f32 %v2926_v22, %v11526_v14  ;;  %v8564_v14 = vpack.c.bf16 %v7982_v12, %v7981_v48 }
 0x40e   :  { %v9502_v32 = vpop.eup %9501  ;;  %9511 = vrcp.f32 %v2739_v4  ;;  %v2419_v21 = vadd.f32 %v2418_v20, %v12618_v55  ;;  %v2420_v28 = vpop.f32.mrb[125].mxu1  ;;  %v2927_v58 = vmul.f32 %v9500_v25, %v12085_v30  ;;  %v7984_v30 = vld [vmem:[%s15567_s3 + $0x158] sm:$0xff] }
 0x40f   :  { %15974 = vst [vmem:[#allocation10_spill] sm:$0xff] %v12769_v62  ;;  %9513 = vrcp.f32 %v2740_v57  ;;  %v2421_v1 = vadd.f32 %v2420_v28, %v12623_v43  ;;  %3222 = vmatprep.mubr.f32.mxu0 %v12769_v62  ;;  %v2928_v41 = vmul.f32 %v9502_v32, %v12081_v29  ;;  %8565 = vmatpush1.bf16.msra.mxu1 %v8564_v14  ;;  %v7987_v57 = vld [vmem:[%s15567_s3 + $0x170] sm:$0xff]  ;;  %v15981_v20 = vld [vmem:[#allocation68_spill] sm:$0xff] }
 0x410   :  { %9515 = vpow2.f32 %v7871_v39  ;;  %v7873_v59 = vmul.f32 -1.442695, %v2419_v21  ;;  %3223 = vmatmul.mubr.f32.gmra.mrb[112].mxu0 %v12773_v17  ;;  %v12791_v3 = vadd.f32 %v2927_v58, %v11554_v34  ;;  %v8567_v10 = vpack.c.bf16 %v7984_v30, %v7983_v35  ;;  %8566 = vmatprep.subr.bf16.mxu1 %v15901_v46  ;;  %v7986_v34 = vld [vmem:[%s15567_s3 + $0x168] sm:$0xff]  ;;  %v15982_v28 = vld [vmem:[#allocation67_spill] sm:$0xff] }
 0x411   :  { %v9504_v18 = vpop.eup %9503  ;;  %9517 = vpow2.f32 %v7872_v56  ;;  %v7874_v42 = vmul.f32 -1.442695, %v2421_v1  ;;  %v12788_v29 = vadd.f32 %v2928_v41, %v11543_v15  ;;  %v7985_v15 = vld [vmem:[%s15567_s3 + $0x160] sm:$0xff] }
 0x412   :  { %v9506_v54 = vpop.eup %9505  ;;  %9519 = vpow2.f32 %v7873_v59  ;;  %15977 = vst [vmem:[#allocation11_spill] sm:$0xff] %v12791_v3  ;;  %v2929_v5 = vmul.f32 %v9504_v18, %v12093_v38  ;;  %v8570_v12 = vpack.c.bf16 %v7986_v34, %v7985_v15  ;;  %v15985_v15 = vld [vmem:[#allocation25_spill] sm:$0xff] }
 0x413   :  { %15976 = vst [vmem:[#allocation12_spill] sm:$0xff] %v12788_v29  ;;  %v9508_v50 = vpop.eup %9507  ;;  %9521 = vpow2.f32 %v7874_v42  ;;  %3228 = vmatprep.mubr.f32.mxu0 %v12788_v29  ;;  %v2930_v22 = vmul.f32 %v9506_v54, %v12090_v9  ;;  %v15979_v9 = vld [vmem:[#allocation23_spill] sm:$0xff]  ;;  %8568 = vmatpush1.bf16.msra.mxu1 %v8567_v10  ;;  %v15983_v54 = vld [vmem:[#allocation24_spill] sm:$0xff] }
 0x414   :  { %v9510_v24 = vpop.eup %9509  ;;  %v2741_v4 = vadd.f32 1.0, %v9508_v50  ;;  %3229 = vmatmul.mubr.f32.gmra.mrb[114].mxu0 %v12791_v3  ;;  %v12808_v48 = vadd.f32 %v2929_v5, %v15979_v9  ;;  %8569 = vmatprep.subr.bf16.mxu1 %v15901_v46  ;;  %v7989_v50 = vld [vmem:[%s15567_s3 + $0x180] sm:$0xff] }
 0x415   :  { %v2742_v38 = vadd.f32 1.0, %v9510_v24  ;;  %v12805_v39 = vadd.f32 %v2930_v22, %v11566_v31  ;;  %v7988_v31 = vld [vmem:[%s15567_s3 + $0x178] sm:$0xff]  ;;  %v7990_v22 = vld [vmem:[%s15567_s3 + $0x188] sm:$0xff] }
 0x416   :  { %9523 = vrcp.f32 %v2741_v4  ;;  %15980 = vst [vmem:[#allocation14_spill] sm:$0xff] %v12808_v48  ;;  %v8573_v59 = vpack.c.bf16 %v7988_v31, %v7987_v57  ;;  %v8576_v57 = vpack.c.bf16 %v7990_v22, %v7989_v50  ;;  %v15989_v22 = vld [vmem:[#allocation26_spill] sm:$0xff] }
 0x417   :  { %15978 = vst [vmem:[#allocation13_spill] sm:$0xff] %v12805_v39  ;;  %9525 = vrcp.f32 %v2742_v38  ;;  %3234 = vmatprep.mubr.f32.mxu0 %v12805_v39  ;;  %8571 = vmatpush1.bf16.msra.mxu1 %v8570_v12 }
 0x418   :  { %v9512_v25 = vpop.eup %9511  ;;  %3235 = vmatmul.mubr.f32.gmra.mrb[116].mxu0 %v12808_v48  ;;  %8572 = vmatprep.subr.bf16.mxu1 %v15901_v46 }
 0x419   :  { %v9514_v56 = vpop.eup %9513  ;;  %v2931_v32 = vmul.f32 %v9512_v25, %v15981_v20 }
 0x41a   :  { %v9516_v21 = vpop.eup %9515  ;;  %v2932_v58 = vmul.f32 %v9514_v56, %v15982_v28 }
 0x41b   :  { %v9518_v1 = vpop.eup %9517  ;;  %v2743_v41 = vadd.f32 1.0, %v9516_v21  ;;  %v2424_v14 = vpop.f32.mrb[126].mxu1  ;;  %v12834_v34 = vadd.f32 %v2931_v32, %v15985_v15  ;;  %8574 = vmatpush1.bf16.msra.mxu1 %v8573_v59  ;;  %v7991_v32 = vld [vmem:[%s15567_s3 + $0x190] sm:$0xff]  ;;  %v7992_v21 = vld [vmem:[%s15567_s3 + $0x198] sm:$0xff]  ;;  %v15988_v59 = vld [vmem:[#allocation69_spill] sm:$0xff] }
 0x41c   :  { %v9520_v35 = vpop.eup %9519  ;;  %v2744_v30 = vadd.f32 1.0, %v9518_v1  ;;  %v2425_v18 = vadd.f32 %v2424_v14, %v12618_v55  ;;  %v2426_v42 = vpop.f32.mrb[127].mxu1  ;;  %v12823_v5 = vadd.f32 %v2932_v58, %v15983_v54  ;;  %8575 = vmatprep.subr.bf16.mxu1 %v15901_v46  ;;  %v15987_v1 = vld [vmem:[#allocation70_spill] sm:$0xff] }
 0x41d   :  { %v9522_v10 = vpop.eup %9521  ;;  %9527 = vrcp.f32 %v2743_v41  ;;  %v2745_v24 = vadd.f32 1.0, %v9520_v35  ;;  %v2427_v4 = vadd.f32 %v2426_v42, %v12623_v43  ;;  %15986 = vst [vmem:[#allocation16_spill] sm:$0xff] %v12834_v34  ;;  %v8579_v42 = vpack.c.bf16 %v7992_v21, %v7991_v32 }
 0x41e   :  { %15984 = vst [vmem:[#allocation15_spill] sm:$0xff] %v12823_v5  ;;  %9529 = vrcp.f32 %v2744_v30  ;;  %v2746_v38 = vadd.f32 1.0, %v9522_v10  ;;  %v7875_v9 = vmul.f32 -1.442695, %v2425_v18  ;;  %3240 = vmatprep.mubr.f32.mxu0 %v12823_v5 }
 0x41f   :  { %9531 = vrcp.f32 %v2745_v24  ;;  %v7876_v12 = vmul.f32 -1.442695, %v2427_v4  ;;  %v2430_v25 = vpop.f32.mrb[128].mxu1  ;;  %3241 = vmatmul.mubr.f32.gmra.mrb[118].mxu0 %v12834_v34  ;;  %8577 = vmatpush1.bf16.msra.mxu1 %v8576_v57  ;;  %v7993_v24 = vld [vmem:[%s15567_s3 + $0x1a0] sm:$0xff]  ;;  %v7994_v4 = vld [vmem:[%s15567_s3 + $0x1a8] sm:$0xff] }
 0x420   :  { %v9524_v31 = vpop.eup %9523  ;;  %9533 = vrcp.f32 %v2746_v38  ;;  %v2431_v56 = vadd.f32 %v2430_v25, %v12618_v55  ;;  %v2432_v20 = vpop.f32.mrb[129].mxu1  ;;  %8578 = vmatprep.subr.bf16.mxu1 %v15901_v46  ;;  %v15991_v38 = vld [vmem:[#allocation27_spill] sm:$0xff] }
 0x421   :  { %v9526_v28 = vpop.eup %9525  ;;  %9535 = vpow2.f32 %v7875_v9  ;;  %v2433_v58 = vadd.f32 %v2432_v20, %v12623_v43  ;;  %v2933_v41 = vmul.f32 %v9524_v31, %v15987_v1  ;;  %v7995_v1 = vld [vmem:[%s15567_s3 + $0x1b0] sm:$0xff] }
 0x422   :  { %9537 = vpow2.f32 %v7876_v12  ;;  %v7877_v14 = vmul.f32 -1.442695, %v2431_v56  ;;  %v2934_v35 = vmul.f32 %v9526_v28, %v15988_v59  ;;  %v8582_v56 = vpack.c.bf16 %v7994_v4, %v7993_v24  ;;  %v15993_v28 = vld [vmem:[#allocation72_spill] sm:$0xff]  ;;  %v15997_v4 = vld [vmem:[#allocation73_spill] sm:$0xff] }
 0x423   :  { %v7878_v30 = vmul.f32 -1.442695, %v2433_v58  ;;  %v2436_v18 = vpop.f32.mrb[130].mxu1  ;;  %v12862_v9 = vadd.f32 %v2933_v41, %v15991_v38  ;;  %8580 = vmatpush1.bf16.msra.mxu1 %v8579_v42  ;;  %v7996_v41 = vld [vmem:[%s15567_s3 + $0x1b8] sm:$0xff] }
 0x424   :  { %9539 = vpow2.f32 %v7877_v14  ;;  %v2437_v54 = vadd.f32 %v2436_v18, %v12618_v55  ;;  %v2438_v50 = vpop.f32.mrb[131].mxu1  ;;  %v12851_v10 = vadd.f32 %v2934_v35, %v15989_v22  ;;  %8581 = vmatprep.subr.bf16.mxu1 %v15901_v46  ;;  %v15994_v35 = vld [vmem:[#allocation71_spill] sm:$0xff]  ;;  %v15995_v22 = vld [vmem:[#allocation28_spill] sm:$0xff]  ;;  %v8585_v38 = vpack.c.bf16 %v7996_v41, %v7995_v1 }
 0x425   :  { %9541 = vpow2.f32 %v7878_v30  ;;  %v2439_v15 = vadd.f32 %v2438_v50, %v12623_v43  ;;  %15992 = vst [vmem:[#allocation18_spill] sm:$0xff] %v12862_v9 }
 0x426   :  { %15990 = vst [vmem:[#allocation17_spill] sm:$0xff] %v12851_v10  ;;  %v7879_v12 = vmul.f32 -1.442695, %v2437_v54  ;;  %3246 = vmatprep.mubr.f32.mxu0 %v12851_v10 }
 0x427   :  { %v9528_v25 = vpop.eup %9527  ;;  %v7880_v57 = vmul.f32 -1.442695, %v2439_v15  ;;  %v2442_v31 = vpop.f32.mrb[132].mxu1  ;;  %3247 = vmatmul.mubr.f32.gmra.mrb[120].mxu0 %v12862_v9  ;;  %8583 = vmatpush1.bf16.msra.mxu1 %v8582_v56 }
 0x428   :  { %v9530_v20 = vpop.eup %9529  ;;  %9543 = vpow2.f32 %v7879_v12  ;;  %v2443_v32 = vadd.f32 %v2442_v31, %v12618_v55  ;;  %v2444_v21 = vpop.f32.mrb[133].mxu1  ;;  %v2935_v58 = vmul.f32 %v9528_v25, %v15993_v28  ;;  %v15998_v31 = vld [vmem:[#allocation29_spill] sm:$0xff]  ;;  %8584 = vmatprep.subr.bf16.mxu1 %v15901_v46 }
 0x429   :  { %v9532_v14 = vpop.eup %9531  ;;  %9545 = vpow2.f32 %v7880_v57  ;;  %v2445_v59 = vadd.f32 %v2444_v21, %v12623_v43  ;;  %v2936_v30 = vmul.f32 %v9530_v20, %v15994_v35  ;;  %v16000_v21 = vld [vmem:[#allocation74_spill] sm:$0xff] }
 0x42a   :  { %v9534_v18 = vpop.eup %9533  ;;  %v7881_v42 = vmul.f32 -1.442695, %v2443_v32  ;;  %v12882_v57 = vadd.f32 %v2935_v58, %v15998_v31  ;;  %v2937_v28 = vmul.f32 %v9532_v14, %v16000_v21 }
 0x42b   :  { %v9536_v54 = vpop.eup %9535  ;;  %v7882_v50 = vmul.f32 -1.442695, %v2445_v59  ;;  %v12878_v24 = vadd.f32 %v2936_v30, %v15995_v22  ;;  %v2938_v15 = vmul.f32 %v9534_v18, %v15997_v4  ;;  %v16001_v59 = vld [vmem:[#allocation30_spill] sm:$0xff]  ;;  %8586 = vmatpush1.bf16.msra.mxu1 %v8585_v38 }
 0x42c   :  { %v9538_v12 = vpop.eup %9537  ;;  %v2747_v25 = vadd.f32 1.0, %v9536_v54  ;;  %9547 = vpow2.f32 %v7881_v42  ;;  %15999 = vst [vmem:[#allocation20_spill] sm:$0xff] %v12882_v57  ;;  %v2448_v32 = vpop.f32.mrb[134].mxu1  ;;  %v16003_v54 = vld [vmem:[#allocation31_spill] sm:$0xff]  ;;  %8587 = vmatprep.subr.bf16.mxu1 %v15901_v46 }
 0x42d   :  { %15996 = vst [vmem:[#allocation19_spill] sm:$0xff] %v12878_v24  ;;  %v2748_v20 = vadd.f32 1.0, %v9538_v12  ;;  %9549 = vpow2.f32 %v7882_v50  ;;  %3252 = vmatprep.mubr.f32.mxu0 %v12878_v24  ;;  %v12888_v35 = vadd.f32 %v2938_v15, %v16001_v59  ;;  %v2449_v1 = vadd.f32 %v2448_v32, %v12618_v55  ;;  %v2450_v41 = vpop.f32.mrb[135].mxu1 }
 0x42e   :  { %v9540_v56 = vpop.eup %9539  ;;  %9551 = vrcp.f32 %v2747_v25  ;;  %3253 = vmatmul.mubr.f32.gmra.mrb[122].mxu0 %v12882_v57  ;;  %v2451_v30 = vadd.f32 %v2450_v41, %v12623_v43  ;;  %v12895_v50 = vadd.f32 %v2937_v28, %v16003_v54 }
 0x42f   :  { %16002 = vst [vmem:[#allocation21_spill] sm:$0xff] %v12888_v35  ;;  %v9542_v58 = vpop.eup %9541  ;;  %9553 = vrcp.f32 %v2748_v20  ;;  %v2749_v14 = vadd.f32 1.0, %v9540_v56  ;;  %3258 = vmatprep.mubr.f32.mxu0 %v12888_v35  ;;  %v7883_v42 = vmul.f32 -1.442695, %v2449_v1 }
 0x430   :  { %v2750_v18 = vadd.f32 1.0, %v9542_v58  ;;  %16004 = vst [vmem:[#allocation22_spill] sm:$0xff] %v12895_v50  ;;  %v7884_v22 = vmul.f32 -1.442695, %v2451_v30  ;;  %v2454_v4 = vpop.f32.mrb[136].mxu1 }
 0x431   :  { %9555 = vrcp.f32 %v2749_v14  ;;  %v2455_v12 = vadd.f32 %v2454_v4, %v12618_v55  ;;  %v2456_v25 = vpop.f32.mrb[137].mxu1 }
 0x432   :  { %v9544_v15 = vpop.eup %9543  ;;  %9557 = vrcp.f32 %v2750_v18  ;;  %3259 = vmatmul.mubr.f32.gmra.mrb[124].mxu0 %v12895_v50  ;;  %v2457_v38 = vadd.f32 %v2456_v25, %v12623_v43  ;;  %v16012_v50 = vld [vmem:[#allocation78_spill] sm:$0xff] }
 0x433   :  { %v9546_v31 = vpop.eup %9545  ;;  %v2751_v21 = vadd.f32 1.0, %v9544_v15  ;;  %9559 = vpow2.f32 %v7883_v42  ;;  %v7885_v28 = vmul.f32 -1.442695, %v2455_v12  ;;  %v16005_v12 = vld [vmem:[#allocation76_spill] sm:$0xff] }
 0x434   :  { %v2752_v20 = vadd.f32 1.0, %v9546_v31  ;;  %9561 = vpow2.f32 %v7884_v22  ;;  %v7886_v32 = vmul.f32 -1.442695, %v2457_v38  ;;  %v2460_v59 = vpop.f32.mrb[138].mxu1  ;;  %v16006_v38 = vld [vmem:[#allocation75_spill] sm:$0xff] }
 0x435   :  { %9563 = vrcp.f32 %v2751_v21  ;;  %v2461_v1 = vadd.f32 %v2460_v59, %v12618_v55  ;;  %v2462_v41 = vpop.f32.mrb[139].mxu1 }
 0x436   :  { %v9548_v56 = vpop.eup %9547  ;;  %9565 = vrcp.f32 %v2752_v20  ;;  %v2463_v30 = vadd.f32 %v2462_v41, %v12623_v43 }
 0x437   :  { %v9550_v58 = vpop.eup %9549  ;;  %v2753_v14 = vadd.f32 1.0, %v9548_v56  ;;  %9567 = vpow2.f32 %v7885_v28  ;;  %v7887_v54 = vmul.f32 -1.442695, %v2461_v1  ;;  %v16007_v1 = vld [vmem:[#allocation32_spill] sm:$0xff] }
 0x438   :  { %v9552_v18 = vpop.eup %9551  ;;  %v2754_v42 = vadd.f32 1.0, %v9550_v58  ;;  %9569 = vpow2.f32 %v7886_v32  ;;  %v7888_v22 = vmul.f32 -1.442695, %v2463_v30  ;;  %v2466_v15 = vpop.f32.mrb[140].mxu1 }
 0x439   :  { %v9554_v4 = vpop.eup %9553  ;;  %9571 = vrcp.f32 %v2753_v14  ;;  %v2939_v25 = vmul.f32 %v9552_v18, %v16005_v12  ;;  %v2467_v31 = vadd.f32 %v2466_v15, %v12618_v55  ;;  %v2468_v21 = vpop.f32.mrb[141].mxu1  ;;  %v16009_v18 = vld [vmem:[#allocation33_spill] sm:$0xff] }
 0x43a   :  { %9573 = vrcp.f32 %v2754_v42  ;;  %v2940_v20 = vmul.f32 %v9554_v4, %v16006_v38  ;;  %v2469_v28 = vadd.f32 %v2468_v21, %v12623_v43  ;;  %v16011_v15 = vld [vmem:[#allocation77_spill] sm:$0xff] }
 0x43b   :  { %v9556_v59 = vpop.eup %9555  ;;  %9575 = vpow2.f32 %v7887_v54  ;;  %v7889_v32 = vmul.f32 -1.442695, %v2467_v31  ;;  %v12911_v42 = vadd.f32 %v2939_v25, %v16009_v18  ;;  %v16013_v25 = vld [vmem:[#allocation34_spill] sm:$0xff] }
 0x43c   :  { %v9558_v56 = vpop.eup %9557  ;;  %9577 = vpow2.f32 %v7888_v22  ;;  %v12908_v41 = vadd.f32 %v2940_v20, %v16007_v1  ;;  %v7890_v14 = vmul.f32 -1.442695, %v2469_v28  ;;  %v2472_v30 = vpop.f32.mrb[142].mxu1  ;;  %v2941_v4 = vmul.f32 %v9556_v59, %v16012_v50  ;;  %v16015_v59 = vld [vmem:[#allocation80_spill] sm:$0xff] }
 0x43d   :  { %v9560_v58 = vpop.eup %9559  ;;  %16010 = vst [vmem:[#allocation68_spill] sm:$0xff] %v12911_v42  ;;  %v2942_v12 = vmul.f32 %v9558_v56, %v16011_v15  ;;  %9579 = vpow2.f32 %v7889_v32  ;;  %v2473_v21 = vadd.f32 %v2472_v30, %v12618_v55  ;;  %v2474_v22 = vpop.f32.mrb[143].mxu1  ;;  %v16016_v15 = vld [vmem:[#allocation35_spill] sm:$0xff] }
 0x43e   :  { %16008 = vst [vmem:[#allocation23_spill] sm:$0xff] %v12908_v41  ;;  %v9562_v38 = vpop.eup %9561  ;;  %v2755_v54 = vadd.f32 1.0, %v9560_v58  ;;  %3264 = vmatprep.mubr.f32.mxu0 %v12908_v41  ;;  %9581 = vpow2.f32 %v7890_v14  ;;  %v2475_v28 = vadd.f32 %v2474_v22, %v12623_v43  ;;  %v12925_v14 = vadd.f32 %v2941_v4, %v16016_v15 }
 0x43f   :  { %v9564_v31 = vpop.eup %9563  ;;  %v2756_v20 = vadd.f32 1.0, %v9562_v38  ;;  %3265 = vmatmul.mubr.f32.gmra.mrb[126].mxu0 %v12911_v42  ;;  %v12920_v1 = vadd.f32 %v2942_v12, %v16013_v25  ;;  %v7891_v50 = vmul.f32 -1.442695, %v2473_v21  ;;  %v16018_v38 = vld [vmem:[#allocation79_spill] sm:$0xff] }
 0x440   :  { %v9566_v56 = vpop.eup %9565  ;;  %9583 = vrcp.f32 %v2755_v54  ;;  %v2943_v32 = vmul.f32 %v9564_v31, %v16015_v59  ;;  %v7892_v30 = vmul.f32 -1.442695, %v2475_v28  ;;  %v2478_v18 = vpop.f32.mrb[144].mxu1  ;;  %16017 = vst [vmem:[#allocation24_spill] sm:$0xff] %v12925_v14 }
 0x441   :  { %16014 = vst [vmem:[#allocation67_spill] sm:$0xff] %v12920_v1  ;;  %v9568_v58 = vpop.eup %9567  ;;  %9585 = vrcp.f32 %v2756_v20  ;;  %3270 = vmatprep.mubr.f32.mxu0 %v12920_v1  ;;  %v2944_v22 = vmul.f32 %v9566_v56, %v16018_v38  ;;  %v2479_v12 = vadd.f32 %v2478_v18, %v12618_v55  ;;  %v2480_v54 = vpop.f32.mrb[145].mxu1  ;;  %v16019_v20 = vld [vmem:[#allocation36_spill] sm:$0xff]  ;;  %v16021_v56 = vld [vmem:[#allocation37_spill] sm:$0xff]  ;;  %v16024_v18 = vld [vmem:[#allocation82_spill] sm:$0xff] }
 0x442   :  { %v9570_v42 = vpop.eup %9569  ;;  %v2757_v41 = vadd.f32 1.0, %v9568_v58  ;;  %9587 = vpow2.f32 %v7891_v50  ;;  %v2481_v31 = vadd.f32 %v2480_v54, %v12623_v43  ;;  %v12935_v15 = vadd.f32 %v2943_v32, %v16021_v56  ;;  %v16025_v32 = vld [vmem:[#allocation38_spill] sm:$0xff]  ;;  %v16031_v1 = vld [vmem:[#allocation40_spill] sm:$0xff] }
 0x443   :  { %v9572_v21 = vpop.eup %9571  ;;  %v2758_v25 = vadd.f32 1.0, %v9570_v42  ;;  %9589 = vpow2.f32 %v7892_v30  ;;  %3271 = vmatmul.mubr.f32.gmra.mrb[128].mxu0 %v12925_v14  ;;  %v12932_v28 = vadd.f32 %v2944_v22, %v16019_v20  ;;  %v7893_v59 = vmul.f32 -1.442695, %v2479_v12  ;;  %v16023_v42 = vld [vmem:[#allocation81_spill] sm:$0xff] }
 0x444   :  { %v9574_v4 = vpop.eup %9573  ;;  %9591 = vrcp.f32 %v2757_v41  ;;  %16022 = vst [vmem:[#allocation70_spill] sm:$0xff] %v12935_v15  ;;  %v7894_v58 = vmul.f32 -1.442695, %v2481_v31  ;;  %v2945_v38 = vmul.f32 %v9572_v21, %v16024_v18 }
 0x445   :  { %16020 = vst [vmem:[#allocation25_spill] sm:$0xff] %v12932_v28  ;;  %v9576_v50 = vpop.eup %9575  ;;  %9593 = vrcp.f32 %v2758_v25  ;;  %3276 = vmatprep.mubr.f32.mxu0 %v12932_v28  ;;  %v2946_v30 = vmul.f32 %v9574_v4, %v16023_v42  ;;  %v2484_v22 = vpop.f32.mrb[146].mxu1 }
 0x446   :  { %v9578_v54 = vpop.eup %9577  ;;  %v2759_v14 = vadd.f32 1.0, %v9576_v50  ;;  %9595 = vpow2.f32 %v7893_v59  ;;  %v2485_v41 = vadd.f32 %v2484_v22, %v12618_v55  ;;  %v2486_v12 = vpop.f32.mrb[147].mxu1  ;;  %v16027_v59 = vld [vmem:[#allocation39_spill] sm:$0xff] }
 0x447   :  { %v2760_v20 = vadd.f32 1.0, %v9578_v54  ;;  %9597 = vpow2.f32 %v7894_v58  ;;  %3277 = vmatmul.mubr.f32.gmra.mrb[130].mxu0 %v12935_v15  ;;  %v12943_v25 = vadd.f32 %v2946_v30, %v16025_v32  ;;  %v9580_v31 = vpop.eup %9579  ;;  %v2487_v4 = vadd.f32 %v2486_v12, %v12623_v43  ;;  %v16029_v12 = vld [vmem:[#allocation84_spill] sm:$0xff] }
 0x448   :  { %9599 = vrcp.f32 %v2759_v14  ;;  %v9582_v56 = vpop.eup %9581  ;;  %v2761_v21 = vadd.f32 1.0, %v9580_v31  ;;  %v7895_v50 = vmul.f32 -1.442695, %v2485_v41  ;;  %v12948_v58 = vadd.f32 %v2945_v38, %v16027_v59  ;;  %v16030_v31 = vld [vmem:[#allocation83_spill] sm:$0xff] }
 0x449   :  { %16026 = vst [vmem:[#allocation69_spill] sm:$0xff] %v12943_v25  ;;  %9601 = vrcp.f32 %v2760_v20  ;;  %3282 = vmatprep.mubr.f32.mxu0 %v12943_v25  ;;  %v2762_v18 = vadd.f32 1.0, %v9582_v56  ;;  %v7896_v54 = vmul.f32 -1.442695, %v2487_v4  ;;  %v2490_v22 = vpop.f32.mrb[148].mxu1 }
 0x44a   :  { %16028 = vst [vmem:[#allocation26_spill] sm:$0xff] %v12948_v58  ;;  %v9584_v42 = vpop.eup %9583  ;;  %9603 = vrcp.f32 %v2761_v21  ;;  %v2491_v30 = vadd.f32 %v2490_v22, %v12618_v55  ;;  %v2492_v14 = vpop.f32.mrb[149].mxu1 }
 0x44b   :  { %v9586_v15 = vpop.eup %9585  ;;  %3283 = vmatmul.mubr.f32.gmra.mrb[132].mxu0 %v12948_v58  ;;  %v2947_v20 = vmul.f32 %v9584_v42, %v16029_v12  ;;  %9605 = vrcp.f32 %v2762_v18  ;;  %v2493_v41 = vadd.f32 %v2492_v14, %v12623_v43  ;;  %v16033_v14 = vld [vmem:[#allocation41_spill] sm:$0xff] }
 0x44c   :  { %v9588_v32 = vpop.eup %9587  ;;  %v2948_v38 = vmul.f32 %v9586_v15, %v16030_v31  ;;  %9607 = vpow2.f32 %v7895_v50  ;;  %v7897_v4 = vmul.f32 -1.442695, %v2491_v30  ;;  %v16035_v15 = vld [vmem:[#allocation86_spill] sm:$0xff] }
 0x44d   :  { %v9590_v59 = vpop.eup %9589  ;;  %v2763_v25 = vadd.f32 1.0, %v9588_v32  ;;  %9609 = vpow2.f32 %v7896_v54  ;;  %v7898_v21 = vmul.f32 -1.442695, %v2493_v41  ;;  %v2496_v22 = vpop.f32.mrb[150].mxu1  ;;  %v12960_v12 = vadd.f32 %v2947_v20, %v16033_v14  ;;  %v16036_v54 = vld [vmem:[#allocation85_spill] sm:$0xff] }
 0x44e   :  { %v9592_v56 = vpop.eup %9591  ;;  %v2764_v28 = vadd.f32 1.0, %v9590_v59  ;;  %v12956_v35 = vadd.f32 %v2948_v38, %v16031_v1  ;;  %v2497_v42 = vadd.f32 %v2496_v22, %v12618_v55  ;;  %v2498_v18 = vpop.f32.mrb[151].mxu1 }
 0x44f   :  { %v9594_v58 = vpop.eup %9593  ;;  %9611 = vrcp.f32 %v2763_v25  ;;  %16034 = vst [vmem:[#allocation72_spill] sm:$0xff] %v12960_v12  ;;  %v2949_v32 = vmul.f32 %v9592_v56, %v16035_v15  ;;  %v2499_v30 = vadd.f32 %v2498_v18, %v12623_v43  ;;  %v16037_v56 = vld [vmem:[#allocation42_spill] sm:$0xff] }
 0x450   :  { %16032 = vst [vmem:[#allocation27_spill] sm:$0xff] %v12956_v35  ;;  %v9596_v50 = vpop.eup %9595  ;;  %9613 = vrcp.f32 %v2764_v28  ;;  %3288 = vmatprep.mubr.f32.mxu0 %v12956_v35  ;;  %v2950_v41 = vmul.f32 %v9594_v58, %v16036_v54  ;;  %v7899_v25 = vmul.f32 -1.442695, %v2497_v42  ;;  %v16039_v58 = vld [vmem:[#allocation43_spill] sm:$0xff] }
 0x451   :  { %v9598_v1 = vpop.eup %9597  ;;  %v2765_v31 = vadd.f32 1.0, %v9596_v50  ;;  %9615 = vpow2.f32 %v7897_v4  ;;  %3289 = vmatmul.mubr.f32.gmra.mrb[134].mxu0 %v12960_v12  ;;  %v7900_v20 = vmul.f32 -1.442695, %v2499_v30  ;;  %v2502_v22 = vpop.f32.mrb[152].mxu1  ;;  %v12972_v54 = vadd.f32 %v2949_v32, %v16039_v58  ;;  %v16041_v4 = vld [vmem:[#allocation88_spill] sm:$0xff] }
 0x452   :  { %v9600_v38 = vpop.eup %9599  ;;  %v2766_v59 = vadd.f32 1.0, %v9598_v1  ;;  %9617 = vpow2.f32 %v7898_v21  ;;  %v12968_v14 = vadd.f32 %v2950_v41, %v16037_v56  ;;  %v2503_v18 = vadd.f32 %v2502_v22, %v12618_v55  ;;  %v2504_v15 = vpop.f32.mrb[153].mxu1  ;;  %v16042_v21 = vld [vmem:[#allocation87_spill] sm:$0xff]  ;;  %v16043_v32 = vld [vmem:[#allocation44_spill] sm:$0xff] }
 0x453   :  { %v9602_v28 = vpop.eup %9601  ;;  %9619 = vrcp.f32 %v2765_v31  ;;  %16040 = vst [vmem:[#allocation28_spill] sm:$0xff] %v12972_v54  ;;  %v2951_v42 = vmul.f32 %v9600_v38, %v16041_v4  ;;  %v2505_v50 = vadd.f32 %v2504_v15, %v12623_v43  ;;  %v16045_v38 = vld [vmem:[#allocation45_spill] sm:$0xff] }
 0x454   :  { %16038 = vst [vmem:[#allocation71_spill] sm:$0xff] %v12968_v14  ;;  %9621 = vrcp.f32 %v2766_v59  ;;  %3294 = vmatprep.mubr.f32.mxu0 %v12968_v14  ;;  %v2952_v30 = vmul.f32 %v9602_v28, %v16042_v21  ;;  %v9604_v1 = vpop.eup %9603  ;;  %v7901_v41 = vmul.f32 -1.442695, %v2503_v18  ;;  %v16047_v21 = vld [vmem:[#allocation89_spill] sm:$0xff]  ;;  %v16048_v18 = vld [vmem:[#allocation90_spill] sm:$0xff] }
 0x455   :  { %9623 = vpow2.f32 %v7899_v25  ;;  %3295 = vmatmul.mubr.f32.gmra.mrb[136].mxu0 %v12972_v54  ;;  %v9606_v31 = vpop.eup %9605  ;;  %v7902_v22 = vmul.f32 -1.442695, %v2505_v50  ;;  %v2508_v56 = vpop.f32.mrb[154].mxu1  ;;  %v12983_v59 = vadd.f32 %v2951_v42, %v16045_v38  ;;  %v2953_v14 = vmul.f32 %v9604_v1, %v16048_v18 }
 0x456   :  { %9625 = vpow2.f32 %v7900_v20  ;;  %v12980_v58 = vadd.f32 %v2952_v30, %v16043_v32  ;;  %v9608_v15 = vpop.eup %9607  ;;  %v2509_v4 = vadd.f32 %v2508_v56, %v12618_v55  ;;  %v2510_v28 = vpop.f32.mrb[155].mxu1  ;;  %v2954_v25 = vmul.f32 %v9606_v31, %v16047_v21 }
 0x457   :  { %16046 = vst [vmem:[#allocation29_spill] sm:$0xff] %v12983_v59  ;;  %9627 = vpow2.f32 %v7901_v41  ;;  %v9610_v54 = vpop.eup %9609  ;;  %v2767_v12 = vadd.f32 1.0, %v9608_v15  ;;  %v2511_v20 = vadd.f32 %v2510_v28, %v12623_v43  ;;  %v16049_v41 = vld [vmem:[#allocation46_spill] sm:$0xff] }
 0x458   :  { %16044 = vst [vmem:[#allocation73_spill] sm:$0xff] %v12980_v58  ;;  %9629 = vpow2.f32 %v7902_v22  ;;  %3300 = vmatprep.mubr.f32.mxu0 %v12980_v58  ;;  %v2768_v30 = vadd.f32 1.0, %v9610_v54  ;;  %v7903_v42 = vmul.f32 -1.442695, %v2509_v4  ;;  %v12992_v32 = vadd.f32 %v2954_v25, %v16049_v41  ;;  %v16051_v54 = vld [vmem:[#allocation47_spill] sm:$0xff] }
 0x459   :  { %v9612_v50 = vpop.eup %9611  ;;  %3301 = vmatmul.mubr.f32.gmra.mrb[138].mxu0 %v12983_v59  ;;  %9631 = vrcp.f32 %v2767_v12  ;;  %v7904_v31 = vmul.f32 -1.442695, %v2511_v20  ;;  %v2514_v38 = vpop.f32.mrb[156].mxu1  ;;  %v12998_v4 = vadd.f32 %v2953_v14, %v16051_v54  ;;  %v7998_v20 = vld [vmem:[%s15567_s3 + $0x1c8] sm:$0xff] }
 0x45a   :  { %16050 = vst [vmem:[#allocation74_spill] sm:$0xff] %v12992_v32  ;;  %v9614_v56 = vpop.eup %9613  ;;  %v2955_v1 = vmul.f32 %v9612_v50, %v12324_v33  ;;  %9633 = vrcp.f32 %v2768_v30  ;;  %v2515_v22 = vadd.f32 %v2514_v38, %v12618_v55  ;;  %v2516_v28 = vpop.f32.mrb[157].mxu1  ;;  %3306 = vmatprep.mubr.f32.mxu0 %v12992_v32  ;;  %v7997_v33 = vld [vmem:[%s15567_s3 + $0x1c0] sm:$0xff] }
 0x45b   :  { %v9616_v15 = vpop.eup %9615  ;;  %16052 = vst [vmem:[#allocation30_spill] sm:$0xff] %v12998_v4  ;;  %v2956_v21 = vmul.f32 %v9614_v56, %v12321_v63  ;;  %9635 = vpow2.f32 %v7903_v42  ;;  %v2517_v12 = vadd.f32 %v2516_v28, %v12623_v43  ;;  %v16053_v63 = vld [vmem:[#allocation48_spill] sm:$0xff]  ;;  %v8588_v54 = vpack.c.bf16 %v7998_v20, %v7997_v33  ;;  %v16057_v33 = vld [vmem:[#allocation50_spill] sm:$0xff] }
 0x45c   :  { %v9618_v25 = vpop.eup %9617  ;;  %v2769_v18 = vadd.f32 1.0, %v9616_v15  ;;  %9637 = vpow2.f32 %v7904_v31  ;;  %v7905_v14 = vmul.f32 -1.442695, %v2515_v22  ;;  %v16055_v15 = vld [vmem:[#allocation49_spill] sm:$0xff] }
 0x45d   :  { %v9620_v50 = vpop.eup %9619  ;;  %v2770_v30 = vadd.f32 1.0, %v9618_v25  ;;  %3307 = vmatmul.mubr.f32.gmra.mrb[140].mxu0 %v12998_v4  ;;  %v13010_v41 = vadd.f32 %v2956_v21, %v16053_v63  ;;  %v7906_v56 = vmul.f32 -1.442695, %v2517_v12  ;;  %v2520_v38 = vpop.f32.mrb[158].mxu1  ;;  %v13013_v28 = vadd.f32 %v2955_v1, %v16055_v15  ;;  %8589 = vmatpush1.bf16.msra.mxu1 %v8588_v54 }
 0x45e   :  { %v9622_v42 = vpop.eup %9621  ;;  %9639 = vrcp.f32 %v2769_v18  ;;  %v2521_v59 = vadd.f32 %v2520_v38, %v12618_v55  ;;  %v2522_v25 = vpop.f32.mrb[159].mxu1  ;;  %v2957_v22 = vmul.f32 %v9620_v50, %v12341_v61  ;;  %8590 = vmatprep.subr.bf16.mxu1 %v15901_v46 }
 0x45f   :  { %16054 = vst [vmem:[#allocation31_spill] sm:$0xff] %v13010_v41  ;;  %16056 = vst [vmem:[#allocation76_spill] sm:$0xff] %v13013_v28  ;;  %v9624_v32 = vpop.eup %9623  ;;  %9641 = vrcp.f32 %v2770_v30  ;;  %3312 = vmatprep.mubr.f32.mxu0 %v13010_v41  ;;  %v2958_v31 = vmul.f32 %v9622_v42, %v12337_v11  ;;  %v2523_v18 = vadd.f32 %v2522_v25, %v12623_v43  ;;  %v16059_v43 = vld [vmem:[#allocation51_spill] sm:$0xff] }
 0x460   :  { %v9626_v21 = vpop.eup %9625  ;;  %v2771_v63 = vadd.f32 1.0, %v9624_v32  ;;  %9643 = vpow2.f32 %v7905_v14  ;;  %v7907_v61 = vmul.f32 -1.442695, %v2521_v59  ;;  %v13027_v30 = vadd.f32 %v2957_v22, %v16059_v43  ;;  %v7999_v42 = vld [vmem:[%s15567_s3 + $0x1d0] sm:$0xff] }
 0x461   :  { %v9628_v1 = vpop.eup %9627  ;;  %v2772_v12 = vadd.f32 1.0, %v9626_v21  ;;  %9645 = vpow2.f32 %v7906_v56  ;;  %3313 = vmatmul.mubr.f32.gmra.mrb[142].mxu0 %v13013_v28  ;;  %v13022_v55 = vadd.f32 %v2958_v31, %v16057_v33  ;;  %v7908_v50 = vmul.f32 -1.442695, %v2523_v18  ;;  %v8000_v56 = vld [vmem:[%s15567_s3 + $0x1d8] sm:$0xff]  ;;  %v16063_v33 = vld [vmem:[#allocation53_spill] sm:$0xff] }
 0x462   :  { %v9630_v20 = vpop.eup %9629  ;;  %9647 = vrcp.f32 %v2771_v63  ;;  %v2773_v11 = vadd.f32 1.0, %v9628_v1  ;;  %16060 = vst [vmem:[#allocation32_spill] sm:$0xff] %v13027_v30  ;;  %v8591_v15 = vpack.c.bf16 %v8000_v56, %v7999_v42  ;;  %v16061_v18 = vld [vmem:[#allocation52_spill] sm:$0xff] }
 0x463   :  { %16058 = vst [vmem:[#allocation75_spill] sm:$0xff] %v13022_v55  ;;  %9649 = vrcp.f32 %v2772_v12  ;;  %v2774_v32 = vadd.f32 1.0, %v9630_v20  ;;  %3318 = vmatprep.mubr.f32.mxu0 %v13022_v55  ;;  %v9632_v14 = vpop.eup %9631 }
 0x464   :  { %9651 = vrcp.f32 %v2773_v11  ;;  %v9634_v38 = vpop.eup %9633  ;;  %v2959_v59 = vmul.f32 %v9632_v14, %v12349_v53  ;;  %8592 = vmatpush1.bf16.msra.mxu1 %v8591_v15  ;;  %v16065_v14 = vld [vmem:[#allocation54_spill] sm:$0xff] }
 0x465   :  { %9653 = vrcp.f32 %v2774_v32  ;;  %3319 = vmatmul.mubr.f32.gmra.mrb[144].mxu0 %v13027_v30  ;;  %v9636_v54 = vpop.eup %9635  ;;  %v2960_v25 = vmul.f32 %v9634_v38, %v12346_v23  ;;  %8593 = vmatprep.subr.bf16.mxu1 %v15901_v46  ;;  %v16067_v38 = vld [vmem:[#allocation55_spill] sm:$0xff] }
 0x466   :  { %9655 = vpow2.f32 %v7907_v61  ;;  %v9638_v31 = vpop.eup %9637  ;;  %v2775_v22 = vadd.f32 1.0, %v9636_v54  ;;  %v13043_v53 = vadd.f32 %v2959_v59, %v16063_v33  ;;  %v16073_v33 = vld [vmem:[#allocation93_spill] sm:$0xff] }
 0x467   :  { %9657 = vpow2.f32 %v7908_v50  ;;  %v2776_v63 = vadd.f32 1.0, %v9638_v31  ;;  %v13039_v1 = vadd.f32 %v2960_v25, %v16061_v18  ;;  %v16071_v18 = vld [vmem:[#allocation56_spill] sm:$0xff] }
 0x468   :  { %v9640_v21 = vpop.eup %9639  ;;  %9659 = vrcp.f32 %v2775_v22  ;;  %16064 = vst [vmem:[#allocation77_spill] sm:$0xff] %v13043_v53  ;;  %v8001_v22 = vld [vmem:[%s15567_s3 + $0x1e0] sm:$0xff] }
 0x469   :  { %16062 = vst [vmem:[#allocation33_spill] sm:$0xff] %v13039_v1  ;;  %v9642_v12 = vpop.eup %9641  ;;  %v2961_v20 = vmul.f32 %v9640_v21, %v12358_v16  ;;  %9661 = vrcp.f32 %v2776_v63  ;;  %3324 = vmatprep.mubr.f32.mxu0 %v13039_v1  ;;  %v16069_v16 = vld [vmem:[#allocation92_spill] sm:$0xff]  ;;  %v8002_v21 = vld [vmem:[%s15567_s3 + $0x1e8] sm:$0xff] }
 0x46a   :  { %v9644_v11 = vpop.eup %9643  ;;  %v2962_v23 = vmul.f32 %v9642_v12, %v12353_v7  ;;  %3325 = vmatmul.mubr.f32.gmra.mrb[146].mxu0 %v13043_v53  ;;  %v16070_v7 = vld [vmem:[#allocation91_spill] sm:$0xff] }
 0x46b   :  { %v9646_v61 = vpop.eup %9645  ;;  %v2777_v32 = vadd.f32 1.0, %v9644_v11  ;;  %v13053_v59 = vadd.f32 %v2961_v20, %v16067_v38  ;;  %v8594_v11 = vpack.c.bf16 %v8002_v21, %v8001_v22  ;;  %v16077_v38 = vld [vmem:[#allocation58_spill] sm:$0xff]  ;;  %v16082_v21 = vld [vmem:[#allocation96_spill] sm:$0xff] }
 0x46c   :  { %v9648_v50 = vpop.eup %9647  ;;  %v2778_v43 = vadd.f32 1.0, %v9646_v61  ;;  %v13050_v42 = vadd.f32 %v2962_v23, %v16065_v14 }
 0x46d   :  { %v9650_v56 = vpop.eup %9649  ;;  %9663 = vrcp.f32 %v2777_v32  ;;  %16068 = vst [vmem:[#allocation34_spill] sm:$0xff] %v13053_v59  ;;  %v2963_v15 = vmul.f32 %v9648_v50, %v16069_v16  ;;  %v16074_v32 = vld [vmem:[#allocation57_spill] sm:$0xff]  ;;  %8595 = vmatpush1.bf16.msra.mxu1 %v8594_v11  ;;  %v16083_v11 = vld [vmem:[#allocation60_spill] sm:$0xff] }
 0x46e   :  { %16066 = vst [vmem:[#allocation78_spill] sm:$0xff] %v13050_v42  ;;  %v9652_v54 = vpop.eup %9651  ;;  %9665 = vrcp.f32 %v2778_v43  ;;  %3330 = vmatprep.mubr.f32.mxu0 %v13050_v42  ;;  %v2964_v25 = vmul.f32 %v9650_v56, %v16070_v7  ;;  %v16076_v43 = vld [vmem:[#allocation94_spill] sm:$0xff]  ;;  %8596 = vmatprep.subr.bf16.mxu1 %v15901_v46 }
 0x46f   :  { %v9654_v31 = vpop.eup %9653  ;;  %3331 = vmatmul.mubr.f32.gmra.mrb[148].mxu0 %v13053_v59  ;;  %v13070_v50 = vadd.f32 %v2963_v15, %v16074_v32  ;;  %v2965_v14 = vmul.f32 %v9652_v54, %v16076_v43  ;;  %v16079_v15 = vld [vmem:[#allocation59_spill] sm:$0xff]  ;;  %v16085_v43 = vld [vmem:[#allocation61_spill] sm:$0xff] }
 0x470   :  { %v9656_v63 = vpop.eup %9655  ;;  %v13066_v12 = vadd.f32 %v2964_v25, %v16071_v18  ;;  %v2966_v20 = vmul.f32 %v9654_v31, %v16073_v33  ;;  %v16081_v54 = vld [vmem:[#allocation95_spill] sm:$0xff]  ;;  %v8004_v33 = vld [vmem:[%s15567_s3 + $0x1f8] sm:$0xff] }
 0x471   :  { %v9658_v23 = vpop.eup %9657  ;;  %v2779_v61 = vadd.f32 1.0, %v9656_v63  ;;  %16075 = vst [vmem:[#allocation35_spill] sm:$0xff] %v13070_v50  ;;  %v13081_v31 = vadd.f32 %v2965_v14, %v16079_v15  ;;  %v8003_v18 = vld [vmem:[%s15567_s3 + $0x1f0] sm:$0xff]  ;;  %v16089_v15 = vld [vmem:[#allocation62_spill] sm:$0xff] }
 0x472   :  { %16072 = vst [vmem:[#allocation80_spill] sm:$0xff] %v13066_v12  ;;  %v2780_v56 = vadd.f32 1.0, %v9658_v23  ;;  %3336 = vmatprep.mubr.f32.mxu0 %v13066_v12  ;;  %v13075_v16 = vadd.f32 %v2966_v20, %v16077_v38  ;;  %v9660_v7 = vpop.eup %9659 }
 0x473   :  { %9667 = vrcp.f32 %v2779_v61  ;;  %3337 = vmatmul.mubr.f32.gmra.mrb[150].mxu0 %v13070_v50  ;;  %v9662_v25 = vpop.eup %9661  ;;  %16080 = vst [vmem:[#allocation36_spill] sm:$0xff] %v13081_v31  ;;  %v2967_v63 = vmul.f32 %v9660_v7, %v16082_v21  ;;  %v8597_v61 = vpack.c.bf16 %v8004_v33, %v8003_v18  ;;  %v16088_v7 = vld [vmem:[#allocation98_spill] sm:$0xff] }
 0x474   :  { %16078 = vst [vmem:[#allocation79_spill] sm:$0xff] %v13075_v16  ;;  %9669 = vrcp.f32 %v2780_v56  ;;  %3342 = vmatprep.mubr.f32.mxu0 %v13075_v16  ;;  %v2968_v22 = vmul.f32 %v9662_v25, %v16081_v54  ;;  %v16087_v56 = vld [vmem:[#allocation97_spill] sm:$0xff] }
 0x475   :  { %v13097_v14 = vadd.f32 %v2967_v63, %v16085_v43  ;;  %8598 = vmatpush1.bf16.msra.mxu1 %v8597_v61 }
 0x476   :  { %v13093_v23 = vadd.f32 %v2968_v22, %v16083_v11  ;;  %v16091_v22 = vld [vmem:[#allocation63_spill] sm:$0xff]  ;;  %v16093_v11 = vld [vmem:[#allocation100_spill] sm:$0xff] }
 0x477   :  { %v9664_v20 = vpop.eup %9663  ;;  %3343 = vmatmul.mubr.f32.gmra.mrb[152].mxu0 %v13081_v31  ;;  %16086 = vst [vmem:[#allocation81_spill] sm:$0xff] %v13097_v14 }
 0x478   :  { %16084 = vst [vmem:[#allocation37_spill] sm:$0xff] %v13093_v23  ;;  %v9666_v32 = vpop.eup %9665  ;;  %3348 = vmatprep.mubr.f32.mxu0 %v13093_v23  ;;  %v2969_v25 = vmul.f32 %v9664_v20, %v16088_v7  ;;  %v16095_v20 = vld [vmem:[#allocation64_spill] sm:$0xff] }
 0x479   :  { %v2970_v38 = vmul.f32 %v9666_v32, %v16087_v56  ;;  %v16094_v32 = vld [vmem:[#allocation99_spill] sm:$0xff]  ;;  %v16097_v56 = vld [vmem:[#allocation65_spill] sm:$0xff] }
 0x47a   :  { %v13107_v18 = vadd.f32 %v2969_v25, %v16091_v22  ;;  %v10956_v25 = vld [vmem:[%s15570_s6] sm:$0xff] }
 0x47b   :  { %3349 = vmatmul.mubr.f32.gmra.mrb[154].mxu0 %v13097_v14  ;;  %v13103_v54 = vadd.f32 %v2970_v38, %v16089_v15  ;;  %v13122_v38 = vsub.s32 2, %v15920_v2 }
 0x47c   :  { %16092 = vst [vmem:[#allocation38_spill] sm:$0xff] %v13107_v18 }
 0x47d   :  { %16090 = vst [vmem:[#allocation82_spill] sm:$0xff] %v13103_v54  ;;  %v9668_v21 = vpop.eup %9667  ;;  %3354 = vmatprep.mubr.f32.mxu0 %v13103_v54  ;;  %16099 = vst [vmem:[#allocation83_spill] sm:$0xff] %v13122_v38  ;;  %v13128_v15 = vrot.slane %v10956_v25, %v13122_v38 }
 0x47e   :  { %v9670_v33 = vpop.eup %9669  ;;  %v2971_v63 = vmul.f32 %v9668_v21, %v16093_v11  ;;  %v10957_v21 = vld [vmem:[%s15570_s6 + $0x8] sm:$0xff] }
 0x47f   :  { %3355 = vmatmul.mubr.f32.gmra.mrb[156].mxu0 %v13107_v18  ;;  %v2972_v43 = vmul.f32 %v9670_v33, %v16094_v32  ;;  %v13134_v22 = vrot.slane %v10957_v21, %v13122_v38 }
 0x480   :  { %v13116_v7 = vadd.f32 %v2971_v63, %v16097_v56 }
 0x481   :  { %v13113_v61 = vadd.f32 %v2972_v43, %v16095_v20 }
 0x482   :  { %16098 = vst [vmem:[#allocation84_spill] sm:$0xff] %v13116_v7 }
 0x483   :  { %16096 = vst [vmem:[#allocation39_spill] sm:$0xff] %v13113_v61  ;;  %3360 = vmatprep.mubr.f32.mxu0 %v13113_v61 }
 0x484   :  { %3361 = vmatmul.mubr.f32.gmra.mrb[158].mxu0 %v13116_v7 }
 0x485   :  { %4474 = vmatprep.mubr.f32.mxu0 %v15919_v27 }
 0x4bd   :  { %v3176_v33 = vpop.f32.mrb[96].mxu0 }
 0x4be   :  { %v13137_v11 = vadd.f32 %v3176_v33, %v13128_v15  ;;  %v3178_v63 = vpop.f32.mrb[97].mxu0 }
 0x4bf   :  { %v13140_v32 = vadd.f32 %v3178_v63, %v13134_v22 }
 0x4c0   :  { %v7909_v43 = vmul.f32 -1.442695, %v13137_v11 }
 0x4c1   :  { %v7910_v20 = vmul.f32 -1.442695, %v13140_v32 }
 0x4c2   :  { %v3182_v56 = vpop.f32.mrb[98].mxu0  ;;  %9671 = vpow2.f32 %v7909_v43 }
 0x4c3   :  { %v13145_v25 = vadd.f32 %v3182_v56, %v13128_v15  ;;  %v3184_v7 = vpop.f32.mrb[99].mxu0  ;;  %9673 = vpow2.f32 %v7910_v20 }
 0x4c4   :  { %v13148_v21 = vadd.f32 %v3184_v7, %v13134_v22 }
 0x4c5   :  { %v7911_v33 = vmul.f32 -1.442695, %v13145_v25 }
 0x4c6   :  { %v7912_v38 = vmul.f32 -1.442695, %v13148_v21  ;;  %v3188_v63 = vpop.f32.mrb[100].mxu0 }
 0x4c7   :  { %9675 = vpow2.f32 %v7911_v33  ;;  %v13153_v61 = vadd.f32 %v3188_v63, %v13128_v15  ;;  %v3190_v18 = vpop.f32.mrb[101].mxu0 }
 0x4c8   :  { %9677 = vpow2.f32 %v7912_v38  ;;  %v13156_v43 = vadd.f32 %v3190_v18, %v13134_v22 }
 0x4c9   :  { %v7913_v56 = vmul.f32 -1.442695, %v13153_v61 }
 0x4ca   :  { %v7914_v20 = vmul.f32 -1.442695, %v13156_v43 }
 0x4cb   :  { %9679 = vpow2.f32 %v7913_v56 }
 0x4cc   :  { %9681 = vpow2.f32 %v7914_v20  ;;  %v9672_v7 = vpop.eup %9671 }
 0x4cd   :  { %v3194_v54 = vpop.f32.mrb[102].mxu0  ;;  %v9674_v14 = vpop.eup %9673  ;;  %v3559_v23 = vadd.f32 1.0, %v9672_v7 }
 0x4ce   :  { %v13161_v33 = vadd.f32 %v3194_v54, %v13128_v15  ;;  %v3196_v63 = vpop.f32.mrb[103].mxu0  ;;  %v3560_v31 = vadd.f32 1.0, %v9674_v14 }
 0x4cf   :  { %v13164_v38 = vadd.f32 %v3196_v63, %v13134_v22  ;;  %9683 = vrcp.f32 %v3559_v23 }
 0x4d0   :  { %v7915_v18 = vmul.f32 -1.442695, %v13161_v33  ;;  %9685 = vrcp.f32 %v3560_v31 }
 0x4d1   :  { %v9676_v16 = vpop.eup %9675  ;;  %v7916_v56 = vmul.f32 -1.442695, %v13164_v38  ;;  %v3200_v20 = vpop.f32.mrb[104].mxu0 }
 0x4d2   :  { %v9678_v50 = vpop.eup %9677  ;;  %v3561_v12 = vadd.f32 1.0, %v9676_v16  ;;  %9687 = vpow2.f32 %v7915_v18  ;;  %v13169_v7 = vadd.f32 %v3200_v20, %v13128_v15  ;;  %v3202_v54 = vpop.f32.mrb[105].mxu0 }
 0x4d3   :  { %v3562_v59 = vadd.f32 1.0, %v9678_v50  ;;  %9689 = vpow2.f32 %v7916_v56  ;;  %v13172_v14 = vadd.f32 %v3202_v54, %v13134_v22 }
 0x4d4   :  { %9691 = vrcp.f32 %v3561_v12  ;;  %v7917_v23 = vmul.f32 -1.442695, %v13169_v7 }
 0x4d5   :  { %v9680_v63 = vpop.eup %9679  ;;  %9693 = vrcp.f32 %v3562_v59  ;;  %v7918_v31 = vmul.f32 -1.442695, %v13172_v14  ;;  %v3206_v42 = vpop.f32.mrb[106].mxu0 }
 0x4d6   :  { %v9682_v53 = vpop.eup %9681  ;;  %v3563_v16 = vadd.f32 1.0, %v9680_v63  ;;  %9695 = vpow2.f32 %v7917_v23  ;;  %v13177_v18 = vadd.f32 %v3206_v42, %v13128_v15  ;;  %v3208_v20 = vpop.f32.mrb[107].mxu0 }
 0x4d7   :  { %v3564_v50 = vadd.f32 1.0, %v9682_v53  ;;  %9697 = vpow2.f32 %v7918_v31  ;;  %v13180_v56 = vadd.f32 %v3208_v20, %v13134_v22 }
 0x4d8   :  { %9699 = vrcp.f32 %v3563_v16  ;;  %v7919_v12 = vmul.f32 -1.442695, %v13177_v18 }
 0x4d9   :  { %9701 = vrcp.f32 %v3564_v50  ;;  %v7920_v59 = vmul.f32 -1.442695, %v13180_v56  ;;  %v9684_v54 = vpop.eup %9683 }
 0x4da   :  { %9703 = vpow2.f32 %v7919_v12  ;;  %v9686_v1 = vpop.eup %9685  ;;  %v13191_v16 = vmul.f32 %v9684_v54, %v13137_v11 }
 0x4db   :  { %9705 = vpow2.f32 %v7920_v59  ;;  %v3212_v23 = vpop.f32.mrb[108].mxu0  ;;  %v13185_v42 = vmul.f32 %v9686_v1, %v13140_v32 }
 0x4dc   :  { %v9688_v63 = vpop.eup %9687  ;;  %v13188_v53 = vadd.f32 %v3212_v23, %v13128_v15  ;;  %v3214_v31 = vpop.f32.mrb[109].mxu0 }
 0x4dd   :  { %v9690_v20 = vpop.eup %9689  ;;  %v3565_v50 = vadd.f32 1.0, %v9688_v63  ;;  %v13194_v30 = vadd.f32 %v3214_v31, %v13134_v22  ;;  %3916 = vmatprep.mubr.f32.mxu1 %v13185_v42 }
 0x4de   :  { %v9692_v12 = vpop.eup %9691  ;;  %v3566_v55 = vadd.f32 1.0, %v9690_v20  ;;  %v7921_v59 = vmul.f32 -1.442695, %v13188_v53  ;;  %3917 = vmatmul.mubr.f32.vlgmr.msra.gmra.mrb[160].mxu1 %v13191_v16 }
 0x4df   :  { %v9694_v1 = vpop.eup %9693  ;;  %9707 = vrcp.f32 %v3565_v50  ;;  %v7922_v32 = vmul.f32 -1.442695, %v13194_v30  ;;  %v3218_v23 = vpop.f32.mrb[110].mxu0  ;;  %v13207_v20 = vmul.f32 %v9692_v12, %v13145_v25 }
 0x4e0   :  { %v9696_v28 = vpop.eup %9695  ;;  %v13201_v11 = vmul.f32 %v9694_v1, %v13148_v21  ;;  %9709 = vrcp.f32 %v3566_v55  ;;  %v13204_v54 = vadd.f32 %v3218_v23, %v13128_v15  ;;  %v3220_v63 = vpop.f32.mrb[111].mxu0 }
 0x4e1   :  { %v9698_v31 = vpop.eup %9697  ;;  %v3567_v41 = vadd.f32 1.0, %v9696_v28  ;;  %9711 = vpow2.f32 %v7921_v59  ;;  %v13210_v50 = vadd.f32 %v3220_v63, %v13134_v22 }
 0x4e2   :  { %v9700_v4 = vpop.eup %9699  ;;  %v3568_v58 = vadd.f32 1.0, %v9698_v31  ;;  %9713 = vpow2.f32 %v7922_v32  ;;  %v7923_v21 = vmul.f32 -1.442695, %v13204_v54  ;;  %3921 = vmatprep.mubr.f32.mxu1 %v13201_v11 }
 0x4e3   :  { %v9702_v55 = vpop.eup %9701  ;;  %9715 = vrcp.f32 %v3567_v41  ;;  %v7924_v1 = vmul.f32 -1.442695, %v13210_v50  ;;  %v3224_v23 = vpop.f32.mrb[112].mxu0  ;;  %3922 = vmatmul.mubr.f32.gmra.mrb[162].mxu1 %v13207_v20  ;;  %v13223_v63 = vmul.f32 %v9700_v4, %v13153_v61 }
 0x4e4   :  { %v9704_v25 = vpop.eup %9703  ;;  %v13217_v28 = vmul.f32 %v9702_v55, %v13156_v43  ;;  %9717 = vrcp.f32 %v3568_v58  ;;  %v13220_v12 = vadd.f32 %v3224_v23, %v13128_v15  ;;  %v3226_v59 = vpop.f32.mrb[113].mxu0 }
 0x4e5   :  { %v9706_v32 = vpop.eup %9705  ;;  %v3569_v31 = vadd.f32 1.0, %v9704_v25  ;;  %9719 = vpow2.f32 %v7923_v21  ;;  %v13226_v41 = vadd.f32 %v3226_v59, %v13134_v22 }
 0x4e6   :  { %v3570_v35 = vadd.f32 1.0, %v9706_v32  ;;  %9721 = vpow2.f32 %v7924_v1  ;;  %v7925_v57 = vmul.f32 -1.442695, %v13220_v12  ;;  %3926 = vmatprep.mubr.f32.mxu1 %v13217_v28 }
 0x4e7   :  { %9723 = vrcp.f32 %v3569_v31  ;;  %v7926_v58 = vmul.f32 -1.442695, %v13226_v41  ;;  %v3230_v43 = vpop.f32.mrb[114].mxu0  ;;  %3927 = vmatmul.mubr.f32.gmra.mrb[164].mxu1 %v13223_v63 }
 0x4e8   :  { %9725 = vrcp.f32 %v3570_v35  ;;  %v13233_v4 = vadd.f32 %v3230_v43, %v13128_v15  ;;  %v3232_v61 = vpop.f32.mrb[115].mxu0 }
 0x4e9   :  { %v9708_v21 = vpop.eup %9707  ;;  %9727 = vpow2.f32 %v7925_v57  ;;  %v13236_v55 = vadd.f32 %v3232_v61, %v13134_v22 }
 0x4ea   :  { %v9710_v1 = vpop.eup %9709  ;;  %9729 = vpow2.f32 %v7926_v58  ;;  %v7927_v23 = vmul.f32 -1.442695, %v13233_v4  ;;  %v13244_v43 = vmul.f32 %v9708_v21, %v13161_v33 }
 0x4eb   :  { %v9712_v25 = vpop.eup %9711  ;;  %v13240_v59 = vmul.f32 %v9710_v1, %v13164_v38  ;;  %v7928_v32 = vmul.f32 -1.442695, %v13236_v55  ;;  %v3236_v35 = vpop.f32.mrb[116].mxu0 }
 0x4ec   :  { %v9714_v31 = vpop.eup %9713  ;;  %v3571_v24 = vadd.f32 1.0, %v9712_v25  ;;  %9731 = vpow2.f32 %v7927_v23  ;;  %v13247_v57 = vadd.f32 %v3236_v35, %v13128_v15  ;;  %v3238_v61 = vpop.f32.mrb[117].mxu0 }
 0x4ed   :  { %v9716_v58 = vpop.eup %9715  ;;  %v3572_v9 = vadd.f32 1.0, %v9714_v31  ;;  %9733 = vpow2.f32 %v7928_v32  ;;  %v13250_v10 = vadd.f32 %v3238_v61, %v13134_v22  ;;  %3931 = vmatprep.mubr.f32.mxu1 %v13240_v59 }
 0x4ee   :  { %v9718_v38 = vpop.eup %9717  ;;  %9735 = vrcp.f32 %v3571_v24  ;;  %v7929_v1 = vmul.f32 -1.442695, %v13247_v57  ;;  %3932 = vmatmul.mubr.f32.gmra.mrb[166].mxu1 %v13244_v43  ;;  %v13260_v32 = vmul.f32 %v9716_v58, %v13169_v7 }
 0x4ef   :  { %v9720_v33 = vpop.eup %9719  ;;  %v13256_v21 = vmul.f32 %v9718_v38, %v13172_v14  ;;  %9737 = vrcp.f32 %v3572_v9  ;;  %v7930_v23 = vmul.f32 -1.442695, %v13250_v10 }
 0x4f0   :  { %v9722_v25 = vpop.eup %9721  ;;  %v3573_v35 = vadd.f32 1.0, %v9720_v33  ;;  %9739 = vpow2.f32 %v7929_v1 }
 0x4f1   :  { %v9724_v31 = vpop.eup %9723  ;;  %v3574_v61 = vadd.f32 1.0, %v9722_v25  ;;  %9741 = vpow2.f32 %v7930_v23  ;;  %3936 = vmatprep.mubr.f32.mxu1 %v13256_v21 }
 0x4f2   :  { %v9726_v24 = vpop.eup %9725  ;;  %9743 = vrcp.f32 %v3573_v35  ;;  %v3242_v34 = vpop.f32.mrb[118].mxu0  ;;  %3937 = vmatmul.mubr.f32.gmra.mrb[168].mxu1 %v13260_v32  ;;  %v13271_v1 = vmul.f32 %v9724_v31, %v13177_v18  ;;  %v8038_v18 = vld [vmem:[%s15568_s4 + $0x28] sm:$0xff]  ;;  %v8040_v31 = vld [vmem:[%s15568_s4 + $0x38] sm:$0xff] }
 0x4f3   :  { %v9728_v14 = vpop.eup %9727  ;;  %v13265_v9 = vmul.f32 %v9726_v24, %v13180_v56  ;;  %9745 = vrcp.f32 %v3574_v61  ;;  %v13268_v7 = vadd.f32 %v3242_v34, %v13128_v15  ;;  %v3244_v58 = vpop.f32.mrb[119].mxu0 }
 0x4f4   :  { %v9730_v38 = vpop.eup %9729  ;;  %v3575_v33 = vadd.f32 1.0, %v9728_v14  ;;  %v13274_v23 = vadd.f32 %v3244_v58, %v13134_v22  ;;  %v8037_v14 = vld [vmem:[%s15568_s4 + $0x20] sm:$0xff] }
 0x4f5   :  { %v3576_v25 = vadd.f32 1.0, %v9730_v38  ;;  %v7931_v35 = vmul.f32 -1.442695, %v13268_v7  ;;  %3941 = vmatprep.mubr.f32.mxu1 %v13265_v9 }
 0x4f6   :  { %v9732_v56 = vpop.eup %9731  ;;  %9747 = vrcp.f32 %v3575_v33  ;;  %3942 = vmatmul.mubr.f32.gmra.mrb[170].mxu1 %v13271_v1  ;;  %v7932_v24 = vmul.f32 -1.442695, %v13274_v23  ;;  %v8599_v33 = vpack.c.bf16 %v8040_v31, %v8038_v18 }
 0x4f7   :  { %v9734_v34 = vpop.eup %9733  ;;  %9749 = vrcp.f32 %v3576_v25  ;;  %v3577_v61 = vadd.f32 1.0, %v9732_v56  ;;  %v8039_v25 = vld [vmem:[%s15568_s4 + $0x30] sm:$0xff] }
 0x4f8   :  { %v9736_v58 = vpop.eup %9735  ;;  %v3578_v38 = vadd.f32 1.0, %v9734_v34  ;;  %9751 = vpow2.f32 %v7931_v35  ;;  %v8601_v5 = vpack.c.bf16 %v8039_v25, %v8037_v14  ;;  %8600 = vmatprep.subr.bf16.mxu0 %v8599_v33 }
 0x4f9   :  { %v9738_v56 = vpop.eup %9737  ;;  %9753 = vrcp.f32 %v3577_v61  ;;  %v13296_v17 = vmul.f32 %v9736_v58, %v13188_v53 }
 0x4fa   :  { %v9740_v48 = vpop.eup %9739  ;;  %v13293_v39 = vmul.f32 %v9738_v56, %v13194_v30  ;;  %9755 = vrcp.f32 %v3578_v38  ;;  %v3248_v3 = vpop.f32.mrb[120].mxu0  ;;  %8602 = vmatpush1.bf16.msra.mxu0 %v8601_v5 }
 0x4fb   :  { %v9742_v29 = vpop.eup %9741  ;;  %v3579_v35 = vadd.f32 1.0, %v9740_v48  ;;  %9757 = vpow2.f32 %v7932_v24  ;;  %v13299_v34 = vadd.f32 %v3248_v3, %v13128_v15  ;;  %v3250_v18 = vpop.f32.mrb[121].mxu0  ;;  %8667 = vmatprep.subr.bf16.mxu0 %v15901_v46 }
 0x4fc   :  { %v9744_v61 = vpop.eup %9743  ;;  %v3580_v31 = vadd.f32 1.0, %v9742_v29  ;;  %v13302_v14 = vadd.f32 %v3250_v18, %v13134_v22  ;;  %3946 = vmatprep.mubr.f32.mxu1 %v13293_v39 }
 0x4fd   :  { %v9746_v30 = vpop.eup %9745  ;;  %9759 = vrcp.f32 %v3579_v35  ;;  %v7933_v53 = vmul.f32 -1.442695, %v13299_v34  ;;  %3947 = vmatmul.mubr.f32.gmra.mrb[172].mxu1 %v13296_v17  ;;  %v13313_v29 = vmul.f32 %v9744_v61, %v13204_v54 }
 0x4fe   :  { %v13309_v3 = vmul.f32 %v9746_v30, %v13210_v50  ;;  %9761 = vrcp.f32 %v3580_v31  ;;  %v7934_v48 = vmul.f32 -1.442695, %v13302_v14 }
 0x4ff   :  { %9763 = vpow2.f32 %v7933_v53 }
 0x500   :  { %16100 = vst [vmem:[#allocation40_spill] sm:$0xff] %v13309_v3  ;;  %v9748_v5 = vpop.eup %9747  ;;  %9765 = vpow2.f32 %v7934_v48  ;;  %3951 = vmatprep.mubr.f32.mxu1 %v13309_v3 }
 0x501   :  { %v9750_v24 = vpop.eup %9749  ;;  %v3254_v58 = vpop.f32.mrb[122].mxu0  ;;  %3952 = vmatmul.mubr.f32.gmra.mrb[174].mxu1 %v13313_v29  ;;  %v13324_v54 = vmul.f32 %v9748_v5, %v13220_v12 }
 0x502   :  { %v9752_v38 = vpop.eup %9751  ;;  %v13318_v33 = vmul.f32 %v9750_v24, %v13226_v41  ;;  %v13321_v50 = vadd.f32 %v3254_v58, %v13128_v15  ;;  %v3256_v25 = vpop.f32.mrb[123].mxu0 }
 0x503   :  { %v9754_v56 = vpop.eup %9753  ;;  %16102 = vst [vmem:[#allocation86_spill] sm:$0xff] %v13324_v54  ;;  %v3581_v35 = vadd.f32 1.0, %v9752_v38  ;;  %v13327_v18 = vadd.f32 %v3256_v25, %v13134_v22 }
 0x504   :  { %16101 = vst [vmem:[#allocation41_spill] sm:$0xff] %v13318_v33  ;;  %v9756_v61 = vpop.eup %9755  ;;  %v7935_v31 = vmul.f32 -1.442695, %v13321_v50  ;;  %3956 = vmatprep.mubr.f32.mxu1 %v13318_v33  ;;  %v13340_v38 = vmul.f32 %v9754_v56, %v13233_v4 }
 0x505   :  { %v9758_v30 = vpop.eup %9757  ;;  %v13332_v41 = vmul.f32 %v9756_v61, %v13236_v55  ;;  %9767 = vrcp.f32 %v3581_v35  ;;  %v7936_v53 = vmul.f32 -1.442695, %v13327_v18  ;;  %v3260_v48 = vpop.f32.mrb[124].mxu0  ;;  %3957 = vmatmul.mubr.f32.gmra.mrb[176].mxu1 %v13324_v54 }
 0x506   :  { %v3582_v12 = vadd.f32 1.0, %v9758_v30  ;;  %9769 = vpow2.f32 %v7935_v31  ;;  %v13337_v5 = vadd.f32 %v3260_v48, %v13128_v15  ;;  %v3262_v24 = vpop.f32.mrb[125].mxu0  ;;  %16104 = vst [vmem:[#allocation42_spill] sm:$0xff] %v13340_v38 }
 0x507   :  { %16103 = vst [vmem:[#allocation85_spill] sm:$0xff] %v13332_v41  ;;  %v9760_v58 = vpop.eup %9759  ;;  %9771 = vpow2.f32 %v7936_v53  ;;  %v13343_v55 = vadd.f32 %v3262_v24, %v13134_v22  ;;  %3961 = vmatprep.mubr.f32.mxu1 %v13332_v41 }
 0x508   :  { %v9762_v25 = vpop.eup %9761  ;;  %9773 = vrcp.f32 %v3582_v12  ;;  %v7937_v35 = vmul.f32 -1.442695, %v13337_v5  ;;  %v13353_v53 = vmul.f32 %v9760_v58, %v13247_v57 }
 0x509   :  { %v9764_v61 = vpop.eup %9763  ;;  %v13348_v31 = vmul.f32 %v9762_v25, %v13250_v10  ;;  %v7938_v30 = vmul.f32 -1.442695, %v13343_v55  ;;  %3962 = vmatmul.mubr.f32.gmra.mrb[178].mxu1 %v13340_v38 }
 0x50a   :  { %v9766_v4 = vpop.eup %9765  ;;  %v3583_v56 = vadd.f32 1.0, %v9764_v61  ;;  %9775 = vpow2.f32 %v7937_v35  ;;  %16106 = vst [vmem:[#allocation88_spill] sm:$0xff] %v13353_v53 }
 0x50b   :  { %16105 = vst [vmem:[#allocation43_spill] sm:$0xff] %v13348_v31  ;;  %v3584_v48 = vadd.f32 1.0, %v9766_v4  ;;  %9777 = vpow2.f32 %v7938_v30  ;;  %3966 = vmatprep.mubr.f32.mxu1 %v13348_v31 }
 0x50c   :  { %9779 = vrcp.f32 %v3583_v56 }
 0x50d   :  { %9781 = vrcp.f32 %v3584_v48  ;;  %3967 = vmatmul.mubr.f32.gmra.mrb[180].mxu1 %v13353_v53 }
 0x50f   :  { %v9768_v10 = vpop.eup %9767 }
 0x510   :  { %v9770_v12 = vpop.eup %9769  ;;  %v13364_v30 = vmul.f32 %v9768_v10, %v13268_v7 }
 0x511   :  { %v9772_v24 = vpop.eup %9771  ;;  %v3585_v25 = vadd.f32 1.0, %v9770_v12 }
 0x512   :  { %v9774_v41 = vpop.eup %9773  ;;  %v3586_v38 = vadd.f32 1.0, %v9772_v24  ;;  %v3266_v62 = vpop.f32.mrb[126].mxu0  ;;  %16108 = vst [vmem:[#allocation44_spill] sm:$0xff] %v13364_v30 }
 0x513   :  { %v13358_v35 = vmul.f32 %v9774_v41, %v13274_v23  ;;  %9783 = vrcp.f32 %v3585_v25  ;;  %v13361_v57 = vadd.f32 %v3266_v62, %v13128_v15  ;;  %v3268_v58 = vpop.f32.mrb[127].mxu0 }
 0x514   :  { %v9776_v61 = vpop.eup %9775  ;;  %9785 = vrcp.f32 %v3586_v38  ;;  %v13367_v4 = vadd.f32 %v3268_v58, %v13134_v22 }
 0x515   :  { %16107 = vst [vmem:[#allocation87_spill] sm:$0xff] %v13358_v35  ;;  %v9778_v56 = vpop.eup %9777  ;;  %v3587_v48 = vadd.f32 1.0, %v9776_v61  ;;  %v7939_v12 = vmul.f32 -1.442695, %v13361_v57  ;;  %3971 = vmatprep.mubr.f32.mxu1 %v13358_v35 }
 0x516   :  { %v9780_v23 = vpop.eup %9779  ;;  %v3588_v41 = vadd.f32 1.0, %v9778_v56  ;;  %v7940_v62 = vmul.f32 -1.442695, %v13367_v4  ;;  %v3272_v24 = vpop.f32.mrb[128].mxu0  ;;  %3972 = vmatmul.mubr.f32.gmra.mrb[182].mxu1 %v13364_v30 }
 0x517   :  { %v9782_v25 = vpop.eup %9781  ;;  %9787 = vrcp.f32 %v3587_v48  ;;  %v13374_v7 = vadd.f32 %v3272_v24, %v13128_v15  ;;  %v3274_v38 = vpop.f32.mrb[129].mxu0  ;;  %v13383_v61 = vmul.f32 %v9780_v23, %v13299_v34 }
 0x518   :  { %v13377_v10 = vmul.f32 %v9782_v25, %v13302_v14  ;;  %9789 = vrcp.f32 %v3588_v41  ;;  %v13380_v58 = vadd.f32 %v3274_v38, %v13134_v22 }
 0x519   :  { %16110 = vst [vmem:[#allocation89_spill] sm:$0xff] %v13383_v61  ;;  %9791 = vpow2.f32 %v7939_v12  ;;  %v7941_v56 = vmul.f32 -1.442695, %v13374_v7 }
 0x51a   :  { %16109 = vst [vmem:[#allocation45_spill] sm:$0xff] %v13377_v10  ;;  %9793 = vpow2.f32 %v7940_v62  ;;  %v7942_v48 = vmul.f32 -1.442695, %v13380_v58  ;;  %v3278_v35 = vpop.f32.mrb[130].mxu0  ;;  %3976 = vmatprep.mubr.f32.mxu1 %v13377_v10 }
 0x51b   :  { %9795 = vpow2.f32 %v7941_v56  ;;  %v13389_v14 = vadd.f32 %v3278_v35, %v13128_v15  ;;  %v3280_v41 = vpop.f32.mrb[131].mxu0  ;;  %3977 = vmatmul.mubr.f32.gmra.mrb[184].mxu1 %v13383_v61 }
 0x51c   :  { %9797 = vpow2.f32 %v7942_v48  ;;  %v13393_v34 = vadd.f32 %v3280_v41, %v13134_v22 }
 0x51d   :  { %v9784_v12 = vpop.eup %9783  ;;  %v7943_v23 = vmul.f32 -1.442695, %v13389_v14 }
 0x51e   :  { %v9786_v62 = vpop.eup %9785  ;;  %v7944_v24 = vmul.f32 -1.442695, %v13393_v34  ;;  %v3284_v25 = vpop.f32.mrb[132].mxu0  ;;  %v13404_v48 = vmul.f32 %v9784_v12, %v13321_v50 }
 0x51f   :  { %v13398_v38 = vmul.f32 %v9786_v62, %v13327_v18  ;;  %9799 = vpow2.f32 %v7943_v23  ;;  %v13401_v35 = vadd.f32 %v3284_v25, %v13128_v15  ;;  %v3286_v56 = vpop.f32.mrb[133].mxu0 }
 0x520   :  { %16112 = vst [vmem:[#allocation46_spill] sm:$0xff] %v13404_v48  ;;  %9801 = vpow2.f32 %v7944_v24  ;;  %v13407_v41 = vadd.f32 %v3286_v56, %v13134_v22 }
 0x521   :  { %16111 = vst [vmem:[#allocation90_spill] sm:$0xff] %v13398_v38  ;;  %v9788_v10 = vpop.eup %9787  ;;  %v7945_v61 = vmul.f32 -1.442695, %v13401_v35  ;;  %3981 = vmatprep.mubr.f32.mxu1 %v13398_v38 }
 0x522   :  { %v9790_v30 = vpop.eup %9789  ;;  %v7946_v18 = vmul.f32 -1.442695, %v13407_v41  ;;  %3982 = vmatmul.mubr.f32.gmra.mrb[186].mxu1 %v13404_v48  ;;  %v13417_v12 = vmul.f32 %v9788_v10, %v13337_v5 }
 0x523   :  { %v9792_v23 = vpop.eup %9791  ;;  %v13414_v62 = vmul.f32 %v9790_v30, %v13343_v55  ;;  %9803 = vpow2.f32 %v7945_v61 }
 0x524   :  { %v9794_v50 = vpop.eup %9793  ;;  %16114 = vst [vmem:[#allocation48_spill] sm:$0xff] %v13417_v12  ;;  %v3589_v24 = vadd.f32 1.0, %v9792_v23  ;;  %9805 = vpow2.f32 %v7946_v18  ;;  %v3290_v25 = vpop.f32.mrb[134].mxu0 }
 0x525   :  { %16113 = vst [vmem:[#allocation47_spill] sm:$0xff] %v13414_v62  ;;  %v9796_v56 = vpop.eup %9795  ;;  %v3590_v31 = vadd.f32 1.0, %v9794_v50  ;;  %v13420_v38 = vadd.f32 %v3290_v25, %v13128_v15  ;;  %v3292_v53 = vpop.f32.mrb[135].mxu0  ;;  %3986 = vmatprep.mubr.f32.mxu1 %v13414_v62 }
 0x526   :  { %v9798_v48 = vpop.eup %9797  ;;  %9807 = vrcp.f32 %v3589_v24  ;;  %v3591_v55 = vadd.f32 1.0, %v9796_v56  ;;  %v13424_v30 = vadd.f32 %v3292_v53, %v13134_v22  ;;  %3987 = vmatmul.mubr.f32.gmra.mrb[188].mxu1 %v13417_v12 }
 0x527   :  { %9809 = vrcp.f32 %v3590_v31  ;;  %v3592_v5 = vadd.f32 1.0, %v9798_v48  ;;  %v7947_v10 = vmul.f32 -1.442695, %v13420_v38 }
 0x528   :  { %9811 = vrcp.f32 %v3591_v55  ;;  %v7948_v61 = vmul.f32 -1.442695, %v13424_v30  ;;  %v3296_v18 = vpop.f32.mrb[136].mxu0 }
 0x529   :  { %v9800_v23 = vpop.eup %9799  ;;  %9813 = vrcp.f32 %v3592_v5  ;;  %v13430_v50 = vadd.f32 %v3296_v18, %v13128_v15  ;;  %v3298_v24 = vpop.f32.mrb[137].mxu0 }
 0x52a   :  { %v9802_v25 = vpop.eup %9801  ;;  %v3593_v56 = vadd.f32 1.0, %v9800_v23  ;;  %9815 = vpow2.f32 %v7947_v10  ;;  %v13433_v53 = vadd.f32 %v3298_v24, %v13134_v22 }
 0x52b   :  { %v3594_v31 = vadd.f32 1.0, %v9802_v25  ;;  %9817 = vpow2.f32 %v7948_v61  ;;  %v7949_v48 = vmul.f32 -1.442695, %v13430_v50 }
 0x52c   :  { %9819 = vrcp.f32 %v3593_v56  ;;  %v7950_v55 = vmul.f32 -1.442695, %v13433_v53  ;;  %v3302_v62 = vpop.f32.mrb[138].mxu0 }
 0x52d   :  { %v9804_v12 = vpop.eup %9803  ;;  %9821 = vrcp.f32 %v3594_v31  ;;  %v13438_v5 = vadd.f32 %v3302_v62, %v13128_v15  ;;  %v3304_v18 = vpop.f32.mrb[139].mxu0 }
 0x52e   :  { %v9806_v33 = vpop.eup %9805  ;;  %v3595_v23 = vadd.f32 1.0, %v9804_v12  ;;  %9823 = vpow2.f32 %v7949_v48  ;;  %v13441_v10 = vadd.f32 %v3304_v18, %v13134_v22 }
 0x52f   :  { %v3596_v24 = vadd.f32 1.0, %v9806_v33  ;;  %9825 = vpow2.f32 %v7950_v55  ;;  %v7951_v61 = vmul.f32 -1.442695, %v13438_v5 }
 0x530   :  { %v9808_v25 = vpop.eup %9807  ;;  %9827 = vrcp.f32 %v3595_v23  ;;  %v7952_v56 = vmul.f32 -1.442695, %v13441_v10  ;;  %v3308_v54 = vpop.f32.mrb[140].mxu0 }
 0x531   :  { %v9810_v31 = vpop.eup %9809  ;;  %9829 = vrcp.f32 %v3596_v24  ;;  %v13446_v62 = vadd.f32 %v3308_v54, %v13128_v15  ;;  %v3310_v6 = vpop.f32.mrb[141].mxu0  ;;  %v13455_v18 = vmul.f32 %v9808_v25, %v13361_v57 }
 0x532   :  { %v9812_v12 = vpop.eup %9811  ;;  %v13449_v48 = vmul.f32 %v9810_v31, %v13367_v4  ;;  %9831 = vpow2.f32 %v7951_v61  ;;  %v13452_v33 = vadd.f32 %v3310_v6, %v13134_v22 }
 0x533   :  { %v9814_v55 = vpop.eup %9813  ;;  %16116 = vst [vmem:[#allocation50_spill] sm:$0xff] %v13455_v18  ;;  %9833 = vpow2.f32 %v7952_v56  ;;  %v7953_v23 = vmul.f32 -1.442695, %v13446_v62 }
 0x534   :  { %16115 = vst [vmem:[#allocation49_spill] sm:$0xff] %v13449_v48  ;;  %v9816_v24 = vpop.eup %9815  ;;  %v13459_v54 = vmul.f32 %v9814_v55, %v13380_v58  ;;  %v7954_v19 = vmul.f32 -1.442695, %v13452_v33  ;;  %v3314_v3 = vpop.f32.mrb[142].mxu0  ;;  %3991 = vmatprep.mubr.f32.mxu1 %v13449_v48  ;;  %v13472_v55 = vmul.f32 %v9812_v12, %v13374_v7 }
 0x535   :  { %v9818_v4 = vpop.eup %9817  ;;  %v3597_v61 = vadd.f32 1.0, %v9816_v24  ;;  %9835 = vpow2.f32 %v7953_v23  ;;  %v13464_v6 = vadd.f32 %v3314_v3, %v13128_v15  ;;  %v3316_v57 = vpop.f32.mrb[143].mxu0  ;;  %3992 = vmatmul.mubr.f32.gmra.mrb[190].mxu1 %v13455_v18 }
 0x536   :  { %16117 = vst [vmem:[#allocation51_spill] sm:$0xff] %v13459_v54  ;;  %v9820_v25 = vpop.eup %9819  ;;  %v3598_v56 = vadd.f32 1.0, %v9818_v4  ;;  %9837 = vpow2.f32 %v7954_v19  ;;  %v13468_v58 = vadd.f32 %v3316_v57, %v13134_v22  ;;  %3996 = vmatprep.mubr.f32.mxu1 %v13459_v54  ;;  %16118 = vst [vmem:[#allocation52_spill] sm:$0xff] %v13472_v55 }
 0x537   :  { %v9822_v31 = vpop.eup %9821  ;;  %9839 = vrcp.f32 %v3597_v61  ;;  %v7955_v23 = vmul.f32 -1.442695, %v13464_v6 }
 0x538   :  { %v9824_v3 = vpop.eup %9823  ;;  %v13476_v24 = vmul.f32 %v9822_v31, %v13393_v34  ;;  %9841 = vrcp.f32 %v3598_v56  ;;  %v7956_v4 = vmul.f32 -1.442695, %v13468_v58  ;;  %v3320_v19 = vpop.f32.mrb[144].mxu0  ;;  %v13488_v56 = vmul.f32 %v9820_v25, %v13389_v14 }
 0x539   :  { %v9826_v48 = vpop.eup %9825  ;;  %v3599_v57 = vadd.f32 1.0, %v9824_v3  ;;  %9843 = vpow2.f32 %v7955_v23  ;;  %v13480_v54 = vadd.f32 %v3320_v19, %v13128_v15  ;;  %v3322_v18 = vpop.f32.mrb[145].mxu0  ;;  %3997 = vmatmul.mubr.f32.gmra.mrb[192].mxu1 %v13472_v55 }
 0x53a   :  { %16119 = vst [vmem:[#allocation53_spill] sm:$0xff] %v13476_v24  ;;  %v9828_v7 = vpop.eup %9827  ;;  %v3600_v12 = vadd.f32 1.0, %v9826_v48  ;;  %9845 = vpow2.f32 %v7956_v4  ;;  %v13484_v61 = vadd.f32 %v3322_v18, %v13134_v22  ;;  %4001 = vmatprep.mubr.f32.mxu1 %v13476_v24  ;;  %16120 = vst [vmem:[#allocation54_spill] sm:$0xff] %v13488_v56 }
 0x53b   :  { %v9830_v34 = vpop.eup %9829  ;;  %9847 = vrcp.f32 %v3599_v57  ;;  %v7957_v31 = vmul.f32 -1.442695, %v13480_v54  ;;  %v13498_v25 = vmul.f32 %v9828_v7, %v13401_v35 }
 0x53c   :  { %v9832_v23 = vpop.eup %9831  ;;  %v13492_v3 = vmul.f32 %v9830_v34, %v13407_v41  ;;  %9849 = vrcp.f32 %v3600_v12  ;;  %v7958_v48 = vmul.f32 -1.442695, %v13484_v61 }
 0x53d   :  { %v9834_v4 = vpop.eup %9833  ;;  %v3601_v19 = vadd.f32 1.0, %v9832_v23  ;;  %9851 = vpow2.f32 %v7957_v31  ;;  %4002 = vmatmul.mubr.f32.gmra.mrb[194].mxu1 %v13488_v56  ;;  %v3326_v24 = vpop.f32.mrb[146].mxu0  ;;  %16122 = vst [vmem:[#allocation92_spill] sm:$0xff] %v13498_v25 }
 0x53e   :  { %16121 = vst [vmem:[#allocation55_spill] sm:$0xff] %v13492_v3  ;;  %v3602_v18 = vadd.f32 1.0, %v9834_v4  ;;  %9853 = vpow2.f32 %v7958_v48  ;;  %4006 = vmatprep.mubr.f32.mxu1 %v13492_v3  ;;  %v13501_v41 = vadd.f32 %v3326_v24, %v13128_v15  ;;  %v3328_v57 = vpop.f32.mrb[147].mxu0 }
 0x53f   :  { %v9836_v14 = vpop.eup %9835  ;;  %9855 = vrcp.f32 %v3601_v19  ;;  %v13504_v31 = vadd.f32 %v3328_v57, %v13134_v22 }
 0x540   :  { %v9838_v12 = vpop.eup %9837  ;;  %9857 = vrcp.f32 %v3602_v18  ;;  %v3603_v34 = vadd.f32 1.0, %v9836_v14  ;;  %v7959_v4 = vmul.f32 -1.442695, %v13501_v41 }
 0x541   :  { %v9840_v23 = vpop.eup %9839  ;;  %v3604_v48 = vadd.f32 1.0, %v9838_v12  ;;  %4007 = vmatmul.mubr.f32.gmra.mrb[196].mxu1 %v13498_v25  ;;  %v7960_v35 = vmul.f32 -1.442695, %v13504_v31 }
 0x542   :  { %v9842_v3 = vpop.eup %9841  ;;  %9859 = vrcp.f32 %v3603_v34  ;;  %v3332_v7 = vpop.f32.mrb[148].mxu0  ;;  %v13516_v12 = vmul.f32 %v9840_v23, %v13420_v38 }
 0x543   :  { %v9844_v24 = vpop.eup %9843  ;;  %v13510_v19 = vmul.f32 %v9842_v3, %v13424_v30  ;;  %9861 = vrcp.f32 %v3604_v48  ;;  %v13513_v18 = vadd.f32 %v3332_v7, %v13128_v15  ;;  %v3334_v14 = vpop.f32.mrb[149].mxu0 }
 0x544   :  { %v9846_v57 = vpop.eup %9845  ;;  %16124 = vst [vmem:[#allocation56_spill] sm:$0xff] %v13516_v12  ;;  %v3605_v56 = vadd.f32 1.0, %v9844_v24  ;;  %9863 = vpow2.f32 %v7959_v4  ;;  %v13519_v34 = vadd.f32 %v3334_v14, %v13134_v22 }
 0x545   :  { %16123 = vst [vmem:[#allocation91_spill] sm:$0xff] %v13510_v19  ;;  %v9848_v25 = vpop.eup %9847  ;;  %v3606_v55 = vadd.f32 1.0, %v9846_v57  ;;  %9865 = vpow2.f32 %v7960_v35  ;;  %v7961_v30 = vmul.f32 -1.442695, %v13513_v18  ;;  %4011 = vmatprep.mubr.f32.mxu1 %v13510_v19 }
 0x546   :  { %v9850_v3 = vpop.eup %9849  ;;  %9867 = vrcp.f32 %v3605_v56  ;;  %v7962_v48 = vmul.f32 -1.442695, %v13519_v34  ;;  %v3338_v7 = vpop.f32.mrb[150].mxu0  ;;  %4012 = vmatmul.mubr.f32.gmra.mrb[198].mxu1 %v13516_v12  ;;  %v13532_v14 = vmul.f32 %v9848_v25, %v13430_v50 }
 0x547   :  { %v9852_v38 = vpop.eup %9851  ;;  %v13526_v23 = vmul.f32 %v9850_v3, %v13433_v53  ;;  %9869 = vrcp.f32 %v3606_v55  ;;  %v13529_v4 = vadd.f32 %v3338_v7, %v13128_v15  ;;  %v3340_v35 = vpop.f32.mrb[151].mxu0 }
 0x548   :  { %v9854_v24 = vpop.eup %9853  ;;  %16126 = vst [vmem:[#allocation57_spill] sm:$0xff] %v13532_v14  ;;  %v3607_v57 = vadd.f32 1.0, %v9852_v38  ;;  %9871 = vpow2.f32 %v7961_v30  ;;  %v13535_v56 = vadd.f32 %v3340_v35, %v13134_v22 }
 0x549   :  { %16125 = vst [vmem:[#allocation93_spill] sm:$0xff] %v13526_v23  ;;  %v9856_v19 = vpop.eup %9855  ;;  %v3608_v12 = vadd.f32 1.0, %v9854_v24  ;;  %9873 = vpow2.f32 %v7962_v48  ;;  %v7963_v53 = vmul.f32 -1.442695, %v13529_v4  ;;  %4016 = vmatprep.mubr.f32.mxu1 %v13526_v23 }
 0x54a   :  { %v9858_v55 = vpop.eup %9857  ;;  %9875 = vrcp.f32 %v3607_v57  ;;  %v7964_v3 = vmul.f32 -1.442695, %v13535_v56  ;;  %v3344_v7 = vpop.f32.mrb[152].mxu0  ;;  %4017 = vmatmul.mubr.f32.gmra.mrb[200].mxu1 %v13532_v14  ;;  %v13548_v38 = vmul.f32 %v9856_v19, %v13438_v5 }
 0x54b   :  { %v13542_v50 = vmul.f32 %v9858_v55, %v13441_v10  ;;  %9877 = vrcp.f32 %v3608_v12  ;;  %v13545_v25 = vadd.f32 %v3344_v7, %v13128_v15  ;;  %v3346_v30 = vpop.f32.mrb[153].mxu0 }
 0x54c   :  { %v9860_v48 = vpop.eup %9859  ;;  %16128 = vst [vmem:[#allocation58_spill] sm:$0xff] %v13548_v38  ;;  %9879 = vpow2.f32 %v7963_v53  ;;  %v13551_v35 = vadd.f32 %v3346_v30, %v13134_v22 }
 0x54d   :  { %16127 = vst [vmem:[#allocation94_spill] sm:$0xff] %v13542_v50  ;;  %v9862_v24 = vpop.eup %9861  ;;  %9881 = vpow2.f32 %v7964_v3  ;;  %v7965_v57 = vmul.f32 -1.442695, %v13545_v25  ;;  %4021 = vmatprep.mubr.f32.mxu1 %v13542_v50  ;;  %v13564_v23 = vmul.f32 %v9860_v48, %v13446_v62 }
 0x54e   :  { %v9864_v10 = vpop.eup %9863  ;;  %v13556_v12 = vmul.f32 %v9862_v24, %v13452_v33  ;;  %v7966_v55 = vmul.f32 -1.442695, %v13551_v35  ;;  %v3350_v7 = vpop.f32.mrb[154].mxu0  ;;  %4022 = vmatmul.mubr.f32.gmra.mrb[202].mxu1 %v13548_v38 }
 0x54f   :  { %v9866_v5 = vpop.eup %9865  ;;  %v3609_v19 = vadd.f32 1.0, %v9864_v10  ;;  %9883 = vpow2.f32 %v7965_v57  ;;  %v13561_v53 = vadd.f32 %v3350_v7, %v13128_v15  ;;  %v3352_v3 = vpop.f32.mrb[155].mxu0 }
 0x550   :  { %16129 = vst [vmem:[#allocation59_spill] sm:$0xff] %v13556_v12  ;;  %v9868_v30 = vpop.eup %9867  ;;  %v3610_v50 = vadd.f32 1.0, %v9866_v5  ;;  %9885 = vpow2.f32 %v7966_v55  ;;  %v13567_v33 = vadd.f32 %v3352_v3, %v13134_v22  ;;  %4026 = vmatprep.mubr.f32.mxu1 %v13556_v12 }
 0x551   :  { %v9870_v24 = vpop.eup %9869  ;;  %9887 = vrcp.f32 %v3609_v19  ;;  %v7967_v10 = vmul.f32 -1.442695, %v13561_v53  ;;  %v13580_v12 = vmul.f32 %v9868_v30, %v13464_v6 }
 0x552   :  { %v9872_v57 = vpop.eup %9871  ;;  %v13572_v7 = vmul.f32 %v9870_v24, %v13468_v58  ;;  %9889 = vrcp.f32 %v3610_v50  ;;  %v7968_v38 = vmul.f32 -1.442695, %v13567_v33  ;;  %v3356_v62 = vpop.f32.mrb[156].mxu0  ;;  %4027 = vmatmul.mubr.f32.gmra.mrb[204].mxu1 %v13564_v23 }
 0x553   :  { %v9874_v48 = vpop.eup %9873  ;;  %v3611_v55 = vadd.f32 1.0, %v9872_v57  ;;  %9891 = vpow2.f32 %v7967_v10  ;;  %v13577_v5 = vadd.f32 %v3356_v62, %v13128_v15  ;;  %v3358_v3 = vpop.f32.mrb[157].mxu0 }
 0x554   :  { %16130 = vst [vmem:[#allocation95_spill] sm:$0xff] %v13572_v7  ;;  %v9876_v19 = vpop.eup %9875  ;;  %v3612_v14 = vadd.f32 1.0, %v9874_v48  ;;  %9893 = vpow2.f32 %v7968_v38  ;;  %v13583_v58 = vadd.f32 %v3358_v3, %v13134_v22  ;;  %4031 = vmatprep.mubr.f32.mxu1 %v13572_v7 }
 0x555   :  { %v9878_v50 = vpop.eup %9877  ;;  %9895 = vrcp.f32 %v3611_v55  ;;  %v7969_v24 = vmul.f32 -1.442695, %v13577_v5  ;;  %v13593_v48 = vmul.f32 %v9876_v19, %v13480_v54 }
 0x556   :  { %v9880_v10 = vpop.eup %9879  ;;  %v13588_v57 = vmul.f32 %v9878_v50, %v13484_v61  ;;  %9897 = vrcp.f32 %v3612_v14  ;;  %v7970_v62 = vmul.f32 -1.442695, %v13583_v58  ;;  %4032 = vmatmul.mubr.f32.gmra.mrb[206].mxu1 %v13580_v12 }
 0x557   :  { %v9882_v6 = vpop.eup %9881  ;;  %v3613_v38 = vadd.f32 1.0, %v9880_v10  ;;  %9899 = vpow2.f32 %v7969_v24  ;;  %v3362_v30 = vpop.f32.mrb[158].mxu0 }
 0x558   :  { %v3614_v3 = vadd.f32 1.0, %v9882_v6  ;;  %9901 = vpow2.f32 %v7970_v62  ;;  %v13596_v55 = vadd.f32 %v3362_v30, %v13128_v15  ;;  %v3364_v7 = vpop.f32.mrb[159].mxu0  ;;  %4036 = vmatprep.mubr.f32.mxu1 %v13588_v57 }
 0x559   :  { %v9884_v61 = vpop.eup %9883  ;;  %9903 = vrcp.f32 %v3613_v38  ;;  %v13600_v14 = vadd.f32 %v3364_v7, %v13134_v22 }
 0x55a   :  { %v9886_v50 = vpop.eup %9885  ;;  %9905 = vrcp.f32 %v3614_v3  ;;  %v3615_v24 = vadd.f32 1.0, %v9884_v61  ;;  %v7971_v10 = vmul.f32 -1.442695, %v13596_v55  ;;  %4037 = vmatmul.mubr.f32.gmra.mrb[208].mxu1 %v13593_v48 }
 0x55b   :  { %v9888_v54 = vpop.eup %9887  ;;  %v3616_v19 = vadd.f32 1.0, %v9886_v50  ;;  %v7972_v15 = vmul.f32 -1.442695, %v13600_v14 }
 0x55c   :  { %v9890_v62 = vpop.eup %9889  ;;  %9907 = vrcp.f32 %v3615_v24  ;;  %v13609_v7 = vmul.f32 %v9888_v54, %v13501_v41 }
 0x55d   :  { %v9892_v6 = vpop.eup %9891  ;;  %v13606_v30 = vmul.f32 %v9890_v62, %v13504_v31  ;;  %9909 = vrcp.f32 %v3616_v19 }
 0x55e   :  { %v9894_v22 = vpop.eup %9893  ;;  %v3617_v38 = vadd.f32 1.0, %v9892_v6  ;;  %9911 = vpow2.f32 %v7971_v10 }
 0x55f   :  { %v9896_v3 = vpop.eup %9895  ;;  %v3618_v61 = vadd.f32 1.0, %v9894_v22  ;;  %9913 = vpow2.f32 %v7972_v15  ;;  %4041 = vmatprep.mubr.f32.mxu1 %v13606_v30 }
 0x560   :  { %v9898_v50 = vpop.eup %9897  ;;  %9915 = vrcp.f32 %v3617_v38  ;;  %4042 = vmatmul.mubr.f32.gmra.mrb[210].mxu1 %v13609_v7  ;;  %v13617_v41 = vmul.f32 %v9896_v3, %v13513_v18 }
 0x561   :  { %v9900_v24 = vpop.eup %9899  ;;  %v13614_v31 = vmul.f32 %v9898_v50, %v13519_v34  ;;  %9917 = vrcp.f32 %v3618_v61 }
 0x562   :  { %v9902_v19 = vpop.eup %9901  ;;  %v3619_v54 = vadd.f32 1.0, %v9900_v24 }
 0x563   :  { %16131 = vst [vmem:[#allocation96_spill] sm:$0xff] %v13614_v31  ;;  %v9904_v10 = vpop.eup %9903  ;;  %v3620_v62 = vadd.f32 1.0, %v9902_v19  ;;  %4046 = vmatprep.mubr.f32.mxu1 %v13614_v31 }
 0x564   :  { %v9906_v15 = vpop.eup %9905  ;;  %9919 = vrcp.f32 %v3619_v54  ;;  %4047 = vmatmul.mubr.f32.gmra.mrb[212].mxu1 %v13617_v41  ;;  %v13625_v22 = vmul.f32 %v9904_v10, %v13529_v4 }
 0x565   :  { %v13622_v6 = vmul.f32 %v9906_v15, %v13535_v56  ;;  %9921 = vrcp.f32 %v3620_v62 }
 0x566   :  { %v9908_v34 = vpop.eup %9907  ;;  %16133 = vst [vmem:[#allocation61_spill] sm:$0xff] %v13625_v22 }
 0x567   :  { %16132 = vst [vmem:[#allocation60_spill] sm:$0xff] %v13622_v6  ;;  %v9910_v38 = vpop.eup %9909  ;;  %4051 = vmatprep.mubr.f32.mxu1 %v13622_v6  ;;  %v13633_v56 = vmul.f32 %v9908_v34, %v13545_v25  ;;  %v5191_v6 = vld [vmem:[#allocation2 + $0x458] sm:$0xff] }
 0x568   :  { %v9912_v18 = vpop.eup %9911  ;;  %v13629_v3 = vmul.f32 %v9910_v38, %v13551_v35  ;;  %4052 = vmatmul.mubr.f32.gmra.mrb[214].mxu1 %v13625_v22  ;;  %v5186_v22 = vld [vmem:[#allocation2 + $0x430] sm:$0xff] }
 0x569   :  { %v9914_v61 = vpop.eup %9913  ;;  %v3621_v50 = vadd.f32 1.0, %v9912_v18  ;;  %16135 = vst [vmem:[#allocation98_spill] sm:$0xff] %v13633_v56 }
 0x56a   :  { %16134 = vst [vmem:[#allocation97_spill] sm:$0xff] %v13629_v3  ;;  %v9916_v24 = vpop.eup %9915  ;;  %v3622_v19 = vadd.f32 1.0, %v9914_v61  ;;  %4056 = vmatprep.mubr.f32.mxu1 %v13629_v3  ;;  %v5184_v3 = vld [vmem:[#allocation2 + $0x420] sm:$0xff] }
 0x56b   :  { %v9918_v4 = vpop.eup %9917  ;;  %9923 = vrcp.f32 %v3621_v50  ;;  %v13641_v10 = vmul.f32 %v9916_v24, %v13561_v53 }
 0x56c   :  { %v13637_v54 = vmul.f32 %v9918_v4, %v13567_v33  ;;  %9925 = vrcp.f32 %v3622_v19  ;;  %4057 = vmatmul.mubr.f32.gmra.mrb[216].mxu1 %v13633_v56  ;;  %v5187_v56 = vld [vmem:[#allocation2 + $0x438] sm:$0xff] }
 0x56d   :  { %16137 = vst [vmem:[#allocation63_spill] sm:$0xff] %v13641_v10 }
 0x56e   :  { %16136 = vst [vmem:[#allocation62_spill] sm:$0xff] %v13637_v54  ;;  %v9920_v35 = vpop.eup %9919  ;;  %4061 = vmatprep.mubr.f32.mxu1 %v13637_v54  ;;  %v5182_v54 = vld [vmem:[#allocation2 + $0x410] sm:$0xff] }
 0x56f   :  { %v9922_v62 = vpop.eup %9921  ;;  %v13649_v15 = vmul.f32 %v9920_v35, %v13577_v5  ;;  %v10958_v5 = vld [vmem:[%s15570_s6] sm:$0xff] }
 0x570   :  { %v13645_v25 = vmul.f32 %v9922_v62, %v13583_v58  ;;  %4062 = vmatmul.mubr.f32.gmra.mrb[218].mxu1 %v13641_v10  ;;  %v3850_v58 = vsub.s32 5, %v15920_v2 }
 0x571   :  { %16139 = vst [vmem:[#allocation99_spill] sm:$0xff] %v13649_v15 }
 0x572   :  { %16138 = vst [vmem:[#allocation100_spill] sm:$0xff] %v13645_v25  ;;  %4066 = vmatprep.mubr.f32.mxu1 %v13645_v25  ;;  %v13665_v18 = vrot.slane %v10958_v5, %v3850_v58 }
 0x574   :  { %4067 = vmatmul.mubr.f32.gmra.mrb[220].mxu1 %v13649_v15 }
 0x575   :  { %v9924_v33 = vpop.eup %9923 }
 0x576   :  { %v9926_v34 = vpop.eup %9925  ;;  %v13657_v38 = vmul.f32 %v9924_v33, %v13596_v55 }
 0x577   :  { %v13654_v53 = vmul.f32 %v9926_v34, %v13600_v14 }
 0x578   :  { %16141 = vst [vmem:[#allocation65_spill] sm:$0xff] %v13657_v38 }
 0x579   :  { %16140 = vst [vmem:[#allocation64_spill] sm:$0xff] %v13654_v53  ;;  %4071 = vmatprep.mubr.f32.mxu1 %v13654_v53 }
 0x57a   :  { %4072 = vmatmul.mubr.f32.gmra.mrb[222].mxu1 %v13657_v38 }
 0x5b1   :  { %v3918_v61 = vpop.f32.mrb[160].mxu1 }
 0x5b2   :  { %v3919_v50 = vadd.f32 %v3918_v61, %v13665_v18  ;;  %v3920_v14 = vpop.f32.mrb[161].mxu1 }
 0x5b4   :  { %v8005_v24 = vmul.f32 -1.442695, %v3919_v50 }
 0x5b6   :  { %v3923_v19 = vpop.f32.mrb[162].mxu1  ;;  %9927 = vpow2.f32 %v8005_v24 }
 0x5b7   :  { %v3924_v55 = vadd.f32 %v3923_v19, %v13665_v18  ;;  %v3925_v4 = vpop.f32.mrb[163].mxu1 }
 0x5b9   :  { %v8006_v35 = vmul.f32 -1.442695, %v3924_v55 }
 0x5ba   :  { %v3928_v62 = vpop.f32.mrb[164].mxu1 }
 0x5bb   :  { %9929 = vpow2.f32 %v8006_v35  ;;  %v3929_v33 = vadd.f32 %v3928_v62, %v13665_v18  ;;  %v3930_v34 = vpop.f32.mrb[165].mxu1 }
 0x5bd   :  { %v8007_v2 = vmul.f32 -1.442695, %v3929_v33 }
 0x5bf   :  { %9931 = vpow2.f32 %v8007_v2 }
 0x5c0   :  { %v9928_v58 = vpop.eup %9927 }
 0x5c1   :  { %v3933_v5 = vpop.f32.mrb[166].mxu1  ;;  %v4173_v53 = vadd.f32 1.0, %v9928_v58 }
 0x5c2   :  { %v3934_v61 = vadd.f32 %v3933_v5, %v13665_v18  ;;  %v3935_v14 = vpop.f32.mrb[167].mxu1 }
 0x5c3   :  { %9933 = vrcp.f32 %v4173_v53 }
 0x5c4   :  { %v8008_v38 = vmul.f32 -1.442695, %v3934_v61 }
 0x5c5   :  { %v9930_v24 = vpop.eup %9929  ;;  %v3938_v25 = vpop.f32.mrb[168].mxu1 }
 0x5c6   :  { %v4174_v19 = vadd.f32 1.0, %v9930_v24  ;;  %9935 = vpow2.f32 %v8008_v38  ;;  %v13672_v4 = vadd.f32 %v3938_v25, %v13665_v18  ;;  %v3940_v35 = vpop.f32.mrb[169].mxu1 }
 0x5c8   :  { %9937 = vrcp.f32 %v4174_v19  ;;  %v8009_v62 = vmul.f32 -1.442695, %v13672_v4 }
 0x5c9   :  { %v9932_v2 = vpop.eup %9931  ;;  %v3943_v34 = vpop.f32.mrb[170].mxu1 }
 0x5ca   :  { %v4175_v15 = vadd.f32 1.0, %v9932_v2  ;;  %9939 = vpow2.f32 %v8009_v62  ;;  %v13676_v58 = vadd.f32 %v3943_v34, %v13665_v18  ;;  %v3945_v53 = vpop.f32.mrb[171].mxu1 }
 0x5cc   :  { %9941 = vrcp.f32 %v4175_v15  ;;  %v8010_v5 = vmul.f32 -1.442695, %v13676_v58 }
 0x5cd   :  { %v9934_v14 = vpop.eup %9933 }
 0x5ce   :  { %9943 = vpow2.f32 %v8010_v5  ;;  %v4269_v38 = vmul.f32 %v9934_v14, %v3919_v50 }
 0x5d0   :  { %v9936_v25 = vpop.eup %9935  ;;  %v3948_v24 = vpop.f32.mrb[172].mxu1  ;;  %8041 = vmatmul.mubr.msk.f32.vlgmr.msra.gmra.mrb[160].mxu0 %vm2171_vm4, %v4269_v38 }
 0x5d1   :  { %v4176_v35 = vadd.f32 1.0, %v9936_v25  ;;  %v13680_v19 = vadd.f32 %v3948_v24, %v13665_v18  ;;  %v3950_v10 = vpop.f32.mrb[173].mxu1  ;;  %4480 = vmatprep.mubr.f32.mxu0 %v15919_v27 }
 0x5d2   :  { %v9938_v62 = vpop.eup %9937 }
 0x5d3   :  { %v4270_v2 = vmul.f32 %v9938_v62, %v3924_v55  ;;  %9945 = vrcp.f32 %v4176_v35  ;;  %v8011_v15 = vmul.f32 -1.442695, %v13680_v19 }
 0x5d4   :  { %v9940_v34 = vpop.eup %9939  ;;  %v3953_v53 = vpop.f32.mrb[174].mxu1 }
 0x5d5   :  { %v4177_v5 = vadd.f32 1.0, %v9940_v34  ;;  %9947 = vpow2.f32 %v8011_v15  ;;  %v13686_v50 = vadd.f32 %v3953_v53, %v13665_v18  ;;  %v3955_v14 = vpop.f32.mrb[175].mxu1  ;;  %8042 = vmatmul.mubr.msk.f32.gmra.mrb[162].mxu0 %vm2171_vm4, %v4270_v2 }
 0x5d6   :  { %v9942_v10 = vpop.eup %9941  ;;  %4486 = vmatprep.mubr.f32.mxu0 %v15919_v27 }
 0x5d7   :  { %v4271_v38 = vmul.f32 %v9942_v10, %v3929_v33  ;;  %9949 = vrcp.f32 %v4177_v5  ;;  %v8012_v55 = vmul.f32 -1.442695, %v13686_v50 }
 0x5d8   :  { %v9944_v25 = vpop.eup %9943  ;;  %v3958_v24 = vpop.f32.mrb[176].mxu1 }
 0x5d9   :  { %v4178_v35 = vadd.f32 1.0, %v9944_v25  ;;  %9951 = vpow2.f32 %v8012_v55  ;;  %v13692_v62 = vadd.f32 %v3958_v24, %v13665_v18  ;;  %v3960_v15 = vpop.f32.mrb[177].mxu1  ;;  %8043 = vmatmul.mubr.msk.f32.gmra.mrb[164].mxu0 %vm2171_vm4, %v4271_v38 }
 0x5da   :  { %4492 = vmatprep.mubr.f32.mxu0 %v15919_v27 }
 0x5db   :  { %9953 = vrcp.f32 %v4178_v35  ;;  %v8013_v2 = vmul.f32 -1.442695, %v13692_v62 }
 0x5dc   :  { %v3963_v34 = vpop.f32.mrb[178].mxu1 }
 0x5dd   :  { %v9946_v33 = vpop.eup %9945  ;;  %9955 = vpow2.f32 %v8013_v2  ;;  %v13698_v53 = vadd.f32 %v3963_v34, %v13665_v18  ;;  %v3965_v5 = vpop.f32.mrb[179].mxu1 }
 0x5de   :  { %v4272_v14 = vmul.f32 %v9946_v33, %v3934_v61 }
 0x5df   :  { %v9948_v10 = vpop.eup %9947  ;;  %v8014_v55 = vmul.f32 -1.442695, %v13698_v53 }
 0x5e0   :  { %v4179_v25 = vadd.f32 1.0, %v9948_v10  ;;  %v3968_v24 = vpop.f32.mrb[180].mxu1  ;;  %8044 = vmatmul.mubr.msk.f32.gmra.mrb[166].mxu0 %vm2171_vm4, %v4272_v14 }
 0x5e1   :  { %v9950_v38 = vpop.eup %9949  ;;  %9957 = vpow2.f32 %v8014_v55  ;;  %v13703_v35 = vadd.f32 %v3968_v24, %v13665_v18  ;;  %v3970_v15 = vpop.f32.mrb[181].mxu1  ;;  %4498 = vmatprep.mubr.f32.mxu0 %v15919_v27 }
 0x5e2   :  { %v4273_v2 = vmul.f32 %v9950_v38, %v13672_v4  ;;  %9959 = vrcp.f32 %v4179_v25  ;;  %v5181_v38 = vld [vmem:[#allocation2 + $0x408] sm:$0xff]  ;;  %v5183_v15 = vld [vmem:[#allocation2 + $0x418] sm:$0xff] }
 0x5e3   :  { %v9952_v34 = vpop.eup %9951  ;;  %v8015_v61 = vmul.f32 -1.442695, %v13703_v35 }
 0x5e4   :  { %v4180_v33 = vadd.f32 1.0, %v9952_v34  ;;  %8045 = vmatmul.mubr.msk.f32.gmra.mrb[168].mxu0 %vm2171_vm4, %v4273_v2  ;;  %v5180_v2 = vld [vmem:[#allocation2 + $0x400] sm:$0xff] }
 0x5e5   :  { %v9954_v5 = vpop.eup %9953  ;;  %9961 = vpow2.f32 %v8015_v61  ;;  %4504 = vmatprep.mubr.f32.mxu0 %v15919_v27  ;;  %v8603_v61 = vpack.c.bf16 %v5183_v15, %v5181_v38  ;;  %v8609_v38 = vpack.c.bf16 %v5186_v22, %v5184_v3 }
 0x5e6   :  { %v4274_v14 = vmul.f32 %v9954_v5, %v13676_v58  ;;  %9963 = vrcp.f32 %v4180_v33 }
 0x5e7   :  { %v9956_v10 = vpop.eup %9955  ;;  %8604 = vmatprep.subr.bf16.mxu1 %v8603_v61  ;;  %v5190_v61 = vld [vmem:[#allocation2 + $0x450] sm:$0xff] }
 0x5e8   :  { %v4181_v55 = vadd.f32 1.0, %v9956_v10  ;;  %8046 = vmatmul.mubr.msk.f32.gmra.mrb[170].mxu0 %vm2171_vm4, %v4274_v14  ;;  %v8605_v10 = vpack.c.bf16 %v5182_v54, %v5180_v2  ;;  %v5185_v14 = vld [vmem:[#allocation2 + $0x428] sm:$0xff] }
 0x5e9   :  { %v3973_v24 = vpop.f32.mrb[182].mxu1  ;;  %4510 = vmatprep.mubr.f32.mxu0 %v15919_v27 }
 0x5ea   :  { %9965 = vrcp.f32 %v4181_v55  ;;  %v13714_v4 = vadd.f32 %v3973_v24, %v13665_v18  ;;  %v3975_v25 = vpop.f32.mrb[183].mxu1  ;;  %v8607_v24 = vpack.c.bf16 %v5187_v56, %v5185_v14  ;;  %8606 = vmatpush1.bf16.msra.mxu1 %v8605_v10  ;;  %v5195_v14 = vld [vmem:[#allocation2 + $0x478] sm:$0xff]  ;;  %v5194_v10 = vld [vmem:[#allocation2 + $0x470] sm:$0xff] }
 0x5eb   :  { %v9958_v34 = vpop.eup %9957  ;;  %v5189_v25 = vld [vmem:[#allocation2 + $0x448] sm:$0xff] }
 0x5ec   :  { %v9960_v58 = vpop.eup %9959  ;;  %v4182_v33 = vadd.f32 1.0, %v9958_v34  ;;  %v8016_v5 = vmul.f32 -1.442695, %v13714_v4  ;;  %8608 = vmatprep.subr.bf16.mxu1 %v8607_v24  ;;  %v8611_v2 = vpack.c.bf16 %v5191_v6, %v5189_v25  ;;  %v5197_v24 = vld [vmem:[#allocation2 + $0x488] sm:$0xff]  ;;  %v5199_v25 = vld [vmem:[#allocation2 + $0x498] sm:$0xff] }
 0x5ed   :  { %v4275_v55 = vmul.f32 %v9960_v58, %v13680_v19  ;;  %v5188_v19 = vld [vmem:[#allocation2 + $0x440] sm:$0xff] }
 0x5ee   :  { %9967 = vrcp.f32 %v4182_v33  ;;  %v3978_v31 = vpop.f32.mrb[184].mxu1  ;;  %v5193_v33 = vld [vmem:[#allocation2 + $0x468] sm:$0xff]  ;;  %8610 = vmatpush1.bf16.msra.mxu1 %v8609_v38 }
 0x5ef   :  { %v9962_v15 = vpop.eup %9961  ;;  %9969 = vpow2.f32 %v8016_v5  ;;  %v13719_v34 = vadd.f32 %v3978_v31, %v13665_v18  ;;  %v3980_v54 = vpop.f32.mrb[185].mxu1  ;;  %8047 = vmatmul.mubr.msk.f32.gmra.mrb[172].mxu0 %vm2171_vm4, %v4275_v55  ;;  %v8613_v31 = vpack.c.bf16 %v5190_v61, %v5188_v19  ;;  %8612 = vmatprep.subr.bf16.mxu1 %v8611_v2  ;;  %v8615_v6 = vpack.c.bf16 %v5195_v14, %v5193_v33  ;;  %v5192_v5 = vld [vmem:[#allocation2 + $0x460] sm:$0xff]  ;;  %v5201_v14 = vld [vmem:[#allocation2 + $0x4a8] sm:$0xff] }
 0x5f0   :  { %v9964_v56 = vpop.eup %9963  ;;  %v4183_v58 = vadd.f32 1.0, %v9962_v15  ;;  %4516 = vmatprep.mubr.f32.mxu0 %v15919_v27  ;;  %v8617_v19 = vpack.c.bf16 %v5194_v10, %v5192_v5  ;;  %v8619_v2 = vpack.c.bf16 %v5199_v25, %v5197_v24  ;;  %v5196_v61 = vld [vmem:[#allocation2 + $0x480] sm:$0xff]  ;;  %v5202_v25 = vld [vmem:[#allocation2 + $0x4b0] sm:$0xff] }
 0x5f1   :  { %v4276_v22 = vmul.f32 %v9964_v56, %v13686_v50  ;;  %v8017_v3 = vmul.f32 -1.442695, %v13719_v34  ;;  %v5198_v56 = vld [vmem:[#allocation2 + $0x490] sm:$0xff]  ;;  %v5200_v24 = vld [vmem:[#allocation2 + $0x4a0] sm:$0xff] }
 0x5f2   :  { %9971 = vrcp.f32 %v4183_v58  ;;  %8614 = vmatpush1.bf16.msra.mxu1 %v8613_v31  ;;  %v8621_v5 = vpack.c.bf16 %v5198_v56, %v5196_v61  ;;  %v5204_v61 = vld [vmem:[#allocation2 + $0x4c0] sm:$0xff]  ;;  %v5206_v56 = vld [vmem:[#allocation2 + $0x4d0] sm:$0xff] }
 0x5f3   :  { %9973 = vpow2.f32 %v8017_v3  ;;  %8048 = vmatmul.mubr.msk.f32.gmra.mrb[174].mxu0 %vm2171_vm4, %v4276_v22  ;;  %8616 = vmatprep.subr.bf16.mxu1 %v8615_v6 }
 0x5f4   :  { %v9966_v55 = vpop.eup %9965  ;;  %4522 = vmatprep.mubr.f32.mxu0 %v15919_v27 }
 0x5f5   :  { %v4277_v15 = vmul.f32 %v9966_v55, %v13692_v62  ;;  %v3983_v50 = vpop.f32.mrb[186].mxu1  ;;  %v5203_v62 = vld [vmem:[#allocation2 + $0x4b8] sm:$0xff] }
 0x5f6   :  { %v13729_v54 = vadd.f32 %v3983_v50, %v13665_v18  ;;  %v3985_v38 = vpop.f32.mrb[187].mxu1  ;;  %8618 = vmatpush1.bf16.msra.mxu1 %v8617_v19  ;;  %v8623_v10 = vpack.c.bf16 %v5203_v62, %v5201_v14  ;;  %v8625_v19 = vpack.c.bf16 %v5202_v25, %v5200_v24  ;;  %v5209_v14 = vld [vmem:[#allocation2 + $0x4e8] sm:$0xff]  ;;  %v5211_v62 = vld [vmem:[#allocation2 + $0x4f8] sm:$0xff] }
 0x5f7   :  { %8049 = vmatmul.mubr.msk.f32.gmra.mrb[176].mxu0 %vm2171_vm4, %v4277_v15  ;;  %8620 = vmatprep.subr.bf16.mxu1 %v8619_v2  ;;  %v5215_v24 = vld [vmem:[#allocation2 + $0x518] sm:$0xff] }
 0x5f8   :  { %v9968_v58 = vpop.eup %9967  ;;  %v8018_v33 = vmul.f32 -1.442695, %v13729_v54  ;;  %4528 = vmatprep.mubr.f32.mxu0 %v15919_v27 }
 0x5f9   :  { %v9970_v22 = vpop.eup %9969  ;;  %v4278_v3 = vmul.f32 %v9968_v58, %v13698_v53  ;;  %v3988_v55 = vpop.f32.mrb[188].mxu1  ;;  %v5205_v53 = vld [vmem:[#allocation2 + $0x4c8] sm:$0xff]  ;;  %v5207_v58 = vld [vmem:[#allocation2 + $0x4d8] sm:$0xff] }
 0x5fa   :  { %v4184_v50 = vadd.f32 1.0, %v9970_v22  ;;  %9975 = vpow2.f32 %v8018_v33  ;;  %v13736_v31 = vadd.f32 %v3988_v55, %v13665_v18  ;;  %v3990_v6 = vpop.f32.mrb[189].mxu1  ;;  %8622 = vmatpush1.bf16.msra.mxu1 %v8621_v5  ;;  %v8627_v2 = vpack.c.bf16 %v5207_v58, %v5205_v53  ;;  %v5213_v5 = vld [vmem:[#allocation2 + $0x508] sm:$0xff] }
 0x5fb   :  { %8050 = vmatmul.mubr.msk.f32.gmra.mrb[178].mxu0 %vm2171_vm4, %v4278_v3  ;;  %8624 = vmatprep.subr.bf16.mxu1 %v8623_v10  ;;  %v8629_v3 = vpack.c.bf16 %v5206_v56, %v5204_v61  ;;  %v5210_v6 = vld [vmem:[#allocation2 + $0x4f0] sm:$0xff]  ;;  %v8635_v58 = vpack.c.bf16 %v5215_v24, %v5213_v5  ;;  %v5219_v61 = vld [vmem:[#allocation2 + $0x538] sm:$0xff] }
 0x5fc   :  { %v9972_v15 = vpop.eup %9971  ;;  %9977 = vrcp.f32 %v4184_v50  ;;  %v8019_v38 = vmul.f32 -1.442695, %v13736_v31  ;;  %4534 = vmatprep.mubr.f32.mxu0 %v15919_v27  ;;  %v8631_v50 = vpack.c.bf16 %v5211_v62, %v5209_v14  ;;  %v5218_v5 = vld [vmem:[#allocation2 + $0x530] sm:$0xff] }
 0x5fd   :  { %v9974_v33 = vpop.eup %9973  ;;  %v4279_v22 = vmul.f32 %v9972_v15, %v13703_v35  ;;  %v5208_v35 = vld [vmem:[#allocation2 + $0x4e0] sm:$0xff] }
 0x5fe   :  { %v4185_v55 = vadd.f32 1.0, %v9974_v33  ;;  %9979 = vpow2.f32 %v8019_v38  ;;  %8626 = vmatpush1.bf16.msra.mxu1 %v8625_v19  ;;  %v8633_v10 = vpack.c.bf16 %v5210_v6, %v5208_v35  ;;  %v5212_v33 = vld [vmem:[#allocation2 + $0x500] sm:$0xff] }
 0x5ff   :  { %8051 = vmatmul.mubr.msk.f32.gmra.mrb[180].mxu0 %vm2171_vm4, %v4279_v22  ;;  %8628 = vmatprep.subr.bf16.mxu1 %v8627_v2  ;;  %v5214_v22 = vld [vmem:[#allocation2 + $0x510] sm:$0xff]  ;;  %v5217_v2 = vld [vmem:[#allocation2 + $0x528] sm:$0xff] }
 0x600   :  { %9981 = vrcp.f32 %v4185_v55  ;;  %4540 = vmatprep.mubr.f32.mxu0 %v15919_v27  ;;  %v8639_v6 = vpack.c.bf16 %v5219_v61, %v5217_v2  ;;  %v5225_v2 = vld [vmem:[#allocation2 + $0x568] sm:$0xff]  ;;  %v5227_v61 = vld [vmem:[#allocation2 + $0x578] sm:$0xff] }
 0x602   :  { %8630 = vmatpush1.bf16.msra.mxu1 %v8629_v3 }
 0x603   :  { %8632 = vmatprep.subr.bf16.mxu1 %v8631_v50 }
 0x604   :  { %v9976_v15 = vpop.eup %9975 }
 0x605   :  { %v4186_v25 = vadd.f32 1.0, %v9976_v15  ;;  %v5216_v15 = vld [vmem:[#allocation2 + $0x520] sm:$0xff] }
 0x606   :  { %v9978_v38 = vpop.eup %9977  ;;  %8634 = vmatpush1.bf16.msra.mxu1 %v8633_v10 }
 0x607   :  { %v4280_v53 = vmul.f32 %v9978_v38, %v13714_v4  ;;  %9983 = vrcp.f32 %v4186_v25  ;;  %v8637_v4 = vpack.c.bf16 %v5214_v22, %v5212_v33  ;;  %8636 = vmatprep.subr.bf16.mxu1 %v8635_v58  ;;  %v5221_v25 = vld [vmem:[#allocation2 + $0x548] sm:$0xff]  ;;  %v5223_v38 = vld [vmem:[#allocation2 + $0x558] sm:$0xff]  ;;  %v5220_v33 = vld [vmem:[#allocation2 + $0x540] sm:$0xff] }
 0x608   :  { %v9980_v55 = vpop.eup %9979  ;;  %v3993_v19 = vpop.f32.mrb[190].mxu1  ;;  %v8643_v58 = vpack.c.bf16 %v5223_v38, %v5221_v25  ;;  %v5222_v22 = vld [vmem:[#allocation2 + $0x550] sm:$0xff] }
 0x609   :  { %v4187_v56 = vadd.f32 1.0, %v9980_v55  ;;  %v13746_v14 = vadd.f32 %v3993_v19, %v13665_v18  ;;  %v3995_v62 = vpop.f32.mrb[191].mxu1  ;;  %8052 = vmatmul.mubr.msk.f32.gmra.mrb[182].mxu0 %vm2171_vm4, %v4280_v53 }
 0x60a   :  { %v9982_v3 = vpop.eup %9981  ;;  %4546 = vmatprep.mubr.f32.mxu0 %v15919_v27  ;;  %8638 = vmatpush1.bf16.msra.mxu1 %v8637_v4  ;;  %v8645_v4 = vpack.c.bf16 %v5222_v22, %v5220_v33 }
 0x60b   :  { %v4281_v50 = vmul.f32 %v9982_v3, %v13719_v34  ;;  %9985 = vrcp.f32 %v4187_v56  ;;  %v8020_v35 = vmul.f32 -1.442695, %v13746_v14  ;;  %v8641_v34 = vpack.c.bf16 %v5218_v5, %v5216_v15  ;;  %8640 = vmatprep.subr.bf16.mxu1 %v8639_v6  ;;  %v5224_v15 = vld [vmem:[#allocation2 + $0x560] sm:$0xff]  ;;  %v5226_v5 = vld [vmem:[#allocation2 + $0x570] sm:$0xff] }
 0x60c   :  { %v3998_v24 = vpop.f32.mrb[192].mxu1  ;;  %v8647_v6 = vpack.c.bf16 %v5227_v61, %v5225_v2 }
 0x60d   :  { %9987 = vpow2.f32 %v8020_v35  ;;  %v13753_v53 = vadd.f32 %v3998_v24, %v13665_v18  ;;  %v4000_v55 = vpop.f32.mrb[193].mxu1  ;;  %8053 = vmatmul.mubr.msk.f32.gmra.mrb[184].mxu0 %vm2171_vm4, %v4281_v50 }
 0x60e   :  { %4552 = vmatprep.mubr.f32.mxu0 %v15919_v27  ;;  %8642 = vmatpush1.bf16.msra.mxu1 %v8641_v34  ;;  %v8649_v34 = vpack.c.bf16 %v5226_v5, %v5224_v15 }
 0x60f   :  { %v8021_v10 = vmul.f32 -1.442695, %v13753_v53  ;;  %8644 = vmatprep.subr.bf16.mxu1 %v8643_v58 }
 0x610   :  { %v4003_v19 = vpop.f32.mrb[194].mxu1 }
 0x611   :  { %v9984_v56 = vpop.eup %9983  ;;  %9989 = vpow2.f32 %v8021_v10  ;;  %v13759_v62 = vadd.f32 %v4003_v19, %v13665_v18  ;;  %v4005_v3 = vpop.f32.mrb[195].mxu1 }
 0x612   :  { %v4282_v50 = vmul.f32 %v9984_v56, %v13729_v54  ;;  %8646 = vmatpush1.bf16.msra.mxu1 %v8645_v4 }
 0x613   :  { %v8022_v35 = vmul.f32 -1.442695, %v13759_v62  ;;  %8648 = vmatprep.subr.bf16.mxu1 %v8647_v6 }
 0x614   :  { %v4008_v24 = vpop.f32.mrb[196].mxu1  ;;  %8054 = vmatmul.mubr.msk.f32.gmra.mrb[186].mxu0 %vm2171_vm4, %v4282_v50 }
 0x615   :  { %v9986_v25 = vpop.eup %9985  ;;  %9991 = vpow2.f32 %v8022_v35  ;;  %v13765_v38 = vadd.f32 %v4008_v24, %v13665_v18  ;;  %v4010_v55 = vpop.f32.mrb[197].mxu1  ;;  %4558 = vmatprep.mubr.f32.mxu0 %v15919_v27 }
 0x616   :  { %v4283_v54 = vmul.f32 %v9986_v25, %v13736_v31  ;;  %8650 = vmatpush1.bf16.msra.mxu1 %v8649_v34 }
 0x617   :  { %v9988_v10 = vpop.eup %9987  ;;  %v8023_v58 = vmul.f32 -1.442695, %v13765_v38 }
 0x618   :  { %v4188_v33 = vadd.f32 1.0, %v9988_v10  ;;  %8055 = vmatmul.mubr.msk.f32.gmra.mrb[188].mxu0 %vm2171_vm4, %v4283_v54 }
 0x619   :  { %9993 = vpow2.f32 %v8023_v58  ;;  %v4013_v22 = vpop.f32.mrb[198].mxu1  ;;  %4564 = vmatprep.mubr.f32.mxu0 %v15919_v27 }
 0x61a   :  { %9995 = vrcp.f32 %v4188_v33  ;;  %v13773_v19 = vadd.f32 %v4013_v22, %v13665_v18  ;;  %v4015_v2 = vpop.f32.mrb[199].mxu1 }
 0x61b   :  { %v9990_v31 = vpop.eup %9989 }
 0x61c   :  { %v4189_v61 = vadd.f32 1.0, %v9990_v31  ;;  %v8024_v56 = vmul.f32 -1.442695, %v13773_v19 }
 0x61d   :  { %v4018_v3 = vpop.f32.mrb[200].mxu1 }
 0x61e   :  { %9997 = vrcp.f32 %v4189_v61  ;;  %v13777_v50 = vadd.f32 %v4018_v3, %v13665_v18  ;;  %v4020_v4 = vpop.f32.mrb[201].mxu1 }
 0x61f   :  { %v9992_v35 = vpop.eup %9991  ;;  %9999 = vpow2.f32 %v8024_v56 }
 0x620   :  { %v4190_v6 = vadd.f32 1.0, %v9992_v35  ;;  %v8025_v15 = vmul.f32 -1.442695, %v13777_v50 }
 0x621   :  { %v4023_v5 = vpop.f32.mrb[202].mxu1 }
 0x622   :  { %10001 = vrcp.f32 %v4190_v6  ;;  %v13781_v24 = vadd.f32 %v4023_v5, %v13665_v18  ;;  %v4025_v25 = vpop.f32.mrb[203].mxu1 }
 0x623   :  { %v9994_v55 = vpop.eup %9993  ;;  %10003 = vpow2.f32 %v8025_v15 }
 0x624   :  { %v9996_v54 = vpop.eup %9995  ;;  %v4191_v34 = vadd.f32 1.0, %v9994_v55  ;;  %v8026_v10 = vmul.f32 -1.442695, %v13781_v24 }
 0x625   :  { %v4284_v58 = vmul.f32 %v9996_v54, %v13746_v14  ;;  %v4028_v33 = vpop.f32.mrb[204].mxu1 }
 0x626   :  { %10005 = vrcp.f32 %v4191_v34  ;;  %v13786_v22 = vadd.f32 %v4028_v33, %v13665_v18  ;;  %v4030_v2 = vpop.f32.mrb[205].mxu1 }
 0x627   :  { %10007 = vpow2.f32 %v8026_v10  ;;  %8056 = vmatmul.mubr.msk.f32.gmra.mrb[190].mxu0 %vm2171_vm4, %v4284_v58 }
 0x628   :  { %v9998_v31 = vpop.eup %9997  ;;  %v8027_v61 = vmul.f32 -1.442695, %v13786_v22  ;;  %4570 = vmatprep.mubr.f32.mxu0 %v15919_v27 }
 0x629   :  { %v10000_v56 = vpop.eup %9999  ;;  %v4285_v3 = vmul.f32 %v9998_v31, %v13753_v53  ;;  %v4033_v4 = vpop.f32.mrb[206].mxu1 }
 0x62a   :  { %v4192_v35 = vadd.f32 1.0, %v10000_v56  ;;  %10009 = vpow2.f32 %v8027_v61  ;;  %v13793_v14 = vadd.f32 %v4033_v4, %v13665_v18  ;;  %v4035_v6 = vpop.f32.mrb[207].mxu1 }
 0x62b   :  { %8057 = vmatmul.mubr.msk.f32.gmra.mrb[192].mxu0 %vm2171_vm4, %v4285_v3 }
 0x62c   :  { %v10002_v15 = vpop.eup %10001  ;;  %10011 = vrcp.f32 %v4192_v35  ;;  %v8028_v5 = vmul.f32 -1.442695, %v13793_v14  ;;  %4576 = vmatprep.mubr.f32.mxu0 %v15919_v27 }
 0x62d   :  { %v10004_v25 = vpop.eup %10003  ;;  %v4286_v55 = vmul.f32 %v10002_v15, %v13759_v62  ;;  %v4038_v54 = vpop.f32.mrb[208].mxu1 }
 0x62e   :  { %v4193_v53 = vadd.f32 1.0, %v10004_v25  ;;  %10013 = vpow2.f32 %v8028_v5  ;;  %v13800_v34 = vadd.f32 %v4038_v54, %v13665_v18  ;;  %v4040_v10 = vpop.f32.mrb[209].mxu1  ;;  %v5229_v25 = vld [vmem:[#allocation2 + $0x588] sm:$0xff]  ;;  %v5228_v54 = vld [vmem:[#allocation2 + $0x580] sm:$0xff] }
 0x62f   :  { %8058 = vmatmul.mubr.msk.f32.gmra.mrb[194].mxu0 %vm2171_vm4, %v4286_v55  ;;  %v5231_v55 = vld [vmem:[#allocation2 + $0x598] sm:$0xff] }
 0x630   :  { %v10006_v58 = vpop.eup %10005  ;;  %10015 = vrcp.f32 %v4193_v53  ;;  %v8029_v33 = vmul.f32 -1.442695, %v13800_v34  ;;  %4582 = vmatprep.mubr.f32.mxu0 %v15919_v27 }
 0x631   :  { %v10008_v2 = vpop.eup %10007  ;;  %v4287_v31 = vmul.f32 %v10006_v58, %v13765_v38 }
 0x632   :  { %v4194_v61 = vadd.f32 1.0, %v10008_v2  ;;  %10017 = vpow2.f32 %v8029_v33  ;;  %v8651_v33 = vpack.c.bf16 %v5231_v55, %v5229_v25  ;;  %v5230_v2 = vld [vmem:[#allocation2 + $0x590] sm:$0xff] }
 0x633   :  { %v4043_v62 = vpop.f32.mrb[210].mxu1  ;;  %8059 = vmatmul.mubr.msk.f32.gmra.mrb[196].mxu0 %vm2171_vm4, %v4287_v31 }
 0x634   :  { %v10010_v56 = vpop.eup %10009  ;;  %10019 = vrcp.f32 %v4194_v61  ;;  %v13808_v3 = vadd.f32 %v4043_v62, %v13665_v18  ;;  %v4045_v4 = vpop.f32.mrb[211].mxu1  ;;  %4588 = vmatprep.mubr.f32.mxu0 %v15919_v27  ;;  %v8653_v61 = vpack.c.bf16 %v5230_v2, %v5228_v54  ;;  %8652 = vmatprep.subr.bf16.mxu1 %v8651_v33  ;;  %v5233_v54 = vld [vmem:[#allocation2 + $0x5a8] sm:$0xff] }
 0x635   :  { %v4195_v35 = vadd.f32 1.0, %v10010_v56 }
 0x636   :  { %v10012_v6 = vpop.eup %10011  ;;  %v8030_v15 = vmul.f32 -1.442695, %v13808_v3  ;;  %8654 = vmatpush1.bf16.msra.mxu1 %v8653_v61  ;;  %v5234_v61 = vld [vmem:[#allocation2 + $0x5b0] sm:$0xff] }
 0x637   :  { %v4288_v5 = vmul.f32 %v10012_v6, %v13773_v19  ;;  %10021 = vrcp.f32 %v4195_v35  ;;  %v4048_v38 = vpop.f32.mrb[212].mxu1 }
 0x638   :  { %v10014_v53 = vpop.eup %10013  ;;  %10023 = vpow2.f32 %v8030_v15  ;;  %v13814_v10 = vadd.f32 %v4048_v38, %v13665_v18  ;;  %v4050_v58 = vpop.f32.mrb[213].mxu1 }
 0x639   :  { %v4196_v31 = vadd.f32 1.0, %v10014_v53  ;;  %8060 = vmatmul.mubr.msk.f32.gmra.mrb[198].mxu0 %vm2171_vm4, %v4288_v5  ;;  %v5235_v53 = vld [vmem:[#allocation2 + $0x5b8] sm:$0xff]  ;;  %v5232_v58 = vld [vmem:[#allocation2 + $0x5a0] sm:$0xff] }
 0x63a   :  { %v10016_v62 = vpop.eup %10015  ;;  %v8031_v19 = vmul.f32 -1.442695, %v13814_v10  ;;  %4594 = vmatprep.mubr.f32.mxu0 %v15919_v27 }
 0x63b   :  { %v4289_v56 = vmul.f32 %v10016_v62, %v13777_v50  ;;  %10025 = vrcp.f32 %v4196_v31  ;;  %v4053_v4 = vpop.f32.mrb[214].mxu1  ;;  %v8655_v31 = vpack.c.bf16 %v5235_v53, %v5233_v54 }
 0x63c   :  { %v10018_v35 = vpop.eup %10017  ;;  %10027 = vpow2.f32 %v8031_v19  ;;  %v13821_v6 = vadd.f32 %v4053_v4, %v13665_v18  ;;  %v4055_v15 = vpop.f32.mrb[215].mxu1  ;;  %v8657_v19 = vpack.c.bf16 %v5234_v61, %v5232_v58 }
 0x63d   :  { %v4197_v38 = vadd.f32 1.0, %v10018_v35  ;;  %8061 = vmatmul.mubr.msk.f32.gmra.mrb[200].mxu0 %vm2171_vm4, %v4289_v56  ;;  %8656 = vmatprep.subr.bf16.mxu1 %v8655_v31 }
 0x63e   :  { %v10020_v5 = vpop.eup %10019  ;;  %v8032_v25 = vmul.f32 -1.442695, %v13821_v6  ;;  %4600 = vmatprep.mubr.f32.mxu0 %v15919_v27  ;;  %8658 = vmatpush1.bf16.msra.mxu1 %v8657_v19  ;;  %v5237_v19 = vld [vmem:[#allocation2 + $0x5c8] sm:$0xff] }
 0x63f   :  { %v4290_v55 = vmul.f32 %v10020_v5, %v13781_v24  ;;  %10029 = vrcp.f32 %v4197_v38  ;;  %v4058_v50 = vpop.f32.mrb[216].mxu1 }
 0x640   :  { %10031 = vpow2.f32 %v8032_v25  ;;  %v13828_v33 = vadd.f32 %v4058_v50, %v13665_v18  ;;  %v4060_v2 = vpop.f32.mrb[217].mxu1 }
 0x641   :  { %v10022_v62 = vpop.eup %10021  ;;  %8062 = vmatmul.mubr.msk.f32.gmra.mrb[202].mxu0 %vm2171_vm4, %v4290_v55 }
 0x642   :  { %v10024_v56 = vpop.eup %10023  ;;  %v4291_v4 = vmul.f32 %v10022_v62, %v13786_v22  ;;  %v8033_v24 = vmul.f32 -1.442695, %v13828_v33  ;;  %4606 = vmatprep.mubr.f32.mxu0 %v15919_v27 }
 0x643   :  { %v4198_v35 = vadd.f32 1.0, %v10024_v56  ;;  %v4063_v15 = vpop.f32.mrb[218].mxu1  ;;  %v5239_v56 = vld [vmem:[#allocation2 + $0x5d8] sm:$0xff] }
 0x644   :  { %10033 = vpow2.f32 %v8033_v24  ;;  %v13835_v38 = vadd.f32 %v4063_v15, %v13665_v18  ;;  %v4065_v5 = vpop.f32.mrb[219].mxu1  ;;  %v5238_v15 = vld [vmem:[#allocation2 + $0x5d0] sm:$0xff] }
 0x645   :  { %v10026_v25 = vpop.eup %10025  ;;  %10035 = vrcp.f32 %v4198_v35  ;;  %8063 = vmatmul.mubr.msk.f32.gmra.mrb[204].mxu0 %vm2171_vm4, %v4291_v4  ;;  %v5236_v4 = vld [vmem:[#allocation2 + $0x5c0] sm:$0xff]  ;;  %v8659_v35 = vpack.c.bf16 %v5239_v56, %v5237_v19  ;;  %v5243_v19 = vld [vmem:[#allocation2 + $0x5f8] sm:$0xff] }
 0x646   :  { %v10028_v55 = vpop.eup %10027  ;;  %v4292_v22 = vmul.f32 %v10026_v25, %v13793_v14  ;;  %v8034_v50 = vmul.f32 -1.442695, %v13835_v38  ;;  %4612 = vmatprep.mubr.f32.mxu0 %v15919_v27  ;;  %v8661_v5 = vpack.c.bf16 %v5238_v15, %v5236_v4  ;;  %v5240_v56 = vld [vmem:[#allocation2 + $0x5e0] sm:$0xff] }
 0x647   :  { %v4199_v54 = vadd.f32 1.0, %v10028_v55  ;;  %v4068_v53 = vpop.f32.mrb[220].mxu1  ;;  %8660 = vmatprep.subr.bf16.mxu1 %v8659_v35 }
 0x648   :  { %10037 = vpow2.f32 %v8034_v50  ;;  %v13842_v58 = vadd.f32 %v4068_v53, %v13665_v18  ;;  %v4070_v2 = vpop.f32.mrb[221].mxu1  ;;  %8662 = vmatpush1.bf16.msra.mxu1 %v8661_v5 }
 0x649   :  { %v10030_v31 = vpop.eup %10029  ;;  %10039 = vrcp.f32 %v4199_v54  ;;  %8064 = vmatmul.mubr.msk.f32.gmra.mrb[206].mxu0 %vm2171_vm4, %v4292_v22 }
 0x64a   :  { %v10032_v61 = vpop.eup %10031  ;;  %v4293_v62 = vmul.f32 %v10030_v31, %v13800_v34  ;;  %v8035_v14 = vmul.f32 -1.442695, %v13842_v58  ;;  %4618 = vmatprep.mubr.f32.mxu0 %v15919_v27 }
 0x64b   :  { %v4200_v24 = vadd.f32 1.0, %v10032_v61 }
 0x64c   :  { %10041 = vpow2.f32 %v8035_v14  ;;  %v5241_v14 = vld [vmem:[#allocation2 + $0x5e8] sm:$0xff] }
 0x64d   :  { %10043 = vrcp.f32 %v4200_v24  ;;  %v4073_v25 = vpop.f32.mrb[222].mxu1  ;;  %8065 = vmatmul.mubr.msk.f32.gmra.mrb[208].mxu0 %vm2171_vm4, %v4293_v62  ;;  %v5242_v24 = vld [vmem:[#allocation2 + $0x5f0] sm:$0xff] }
 0x64e   :  { %v10034_v55 = vpop.eup %10033  ;;  %v4074_v34 = vadd.f32 %v4073_v25, %v13665_v18  ;;  %v4075_v22 = vpop.f32.mrb[223].mxu1  ;;  %4624 = vmatprep.mubr.f32.mxu0 %v15919_v27  ;;  %v8665_v5 = vpack.c.bf16 %v5242_v24, %v5240_v56 }
 0x64f   :  { %v10036_v50 = vpop.eup %10035  ;;  %v4201_v54 = vadd.f32 1.0, %v10034_v55 }
 0x650   :  { %v4294_v53 = vmul.f32 %v10036_v50, %v13808_v3  ;;  %v8036_v2 = vmul.f32 -1.442695, %v4074_v34  ;;  %v8663_v3 = vpack.c.bf16 %v5243_v19, %v5241_v14 }
 0x651   :  { %10045 = vrcp.f32 %v4201_v54 }
 0x652   :  { %v10038_v31 = vpop.eup %10037  ;;  %10047 = vpow2.f32 %v8036_v2  ;;  %8066 = vmatmul.mubr.msk.f32.gmra.mrb[210].mxu0 %vm2171_vm4, %v4294_v53  ;;  %8664 = vmatprep.subr.bf16.mxu1 %v8663_v3 }
 0x653   :  { %v10040_v61 = vpop.eup %10039  ;;  %v4202_v62 = vadd.f32 1.0, %v10038_v31  ;;  %4630 = vmatprep.mubr.f32.mxu0 %v15919_v27  ;;  %8666 = vmatpush1.bf16.msra.mxu1 %v8665_v5 }
 0x654   :  { %v4295_v18 = vmul.f32 %v10040_v61, %v13814_v10  ;;  %v42_v61 = vld [vmem:[%s15570_s6 + $0x10] sm:$0x7] }
 0x655   :  { %10049 = vrcp.f32 %v4202_v62  ;;  %v16142_v62 = vld [vmem:[#allocation6_spill] sm:$0xff] }
 0x656   :  { %v10042_v4 = vpop.eup %10041  ;;  %8067 = vmatmul.mubr.msk.f32.gmra.mrb[212].mxu0 %vm2171_vm4, %v4295_v18  ;;  %v13877_v18 = vrot.slane %v42_v61, %v16142_v62 }
 0x657   :  { %v10044_v35 = vpop.eup %10043  ;;  %v4203_v15 = vadd.f32 1.0, %v10042_v4  ;;  %4636 = vmatprep.mubr.f32.mxu0 %v15919_v27 }
 0x658   :  { %v4296_v25 = vmul.f32 %v10044_v35, %v13821_v6 }
 0x659   :  { %10051 = vrcp.f32 %v4203_v15 }
 0x65a   :  { %8068 = vmatmul.mubr.msk.f32.gmra.mrb[214].mxu0 %vm2171_vm4, %v4296_v25 }
 0x65b   :  { %v10046_v10 = vpop.eup %10045  ;;  %4642 = vmatprep.mubr.f32.mxu0 %v15919_v27 }
 0x65c   :  { %v10048_v55 = vpop.eup %10047  ;;  %v4297_v22 = vmul.f32 %v10046_v10, %v13828_v33 }
 0x65d   :  { %v4204_v50 = vadd.f32 1.0, %v10048_v55 }
 0x65e   :  { %8069 = vmatmul.mubr.msk.f32.gmra.mrb[216].mxu0 %vm2171_vm4, %v4297_v22 }
 0x65f   :  { %v10050_v54 = vpop.eup %10049  ;;  %10053 = vrcp.f32 %v4204_v50  ;;  %4648 = vmatprep.mubr.f32.mxu0 %v15919_v27 }
 0x660   :  { %v4298_v6 = vmul.f32 %v10050_v54, %v13835_v38  ;;  %v43_v38 = vld [vmem:[%s15570_s6 + $0x18] sm:$0x7] }
 0x662   :  { %8070 = vmatmul.mubr.msk.f32.gmra.mrb[218].mxu0 %vm2171_vm4, %v4298_v6 }
 0x663   :  { %v10052_v53 = vpop.eup %10051  ;;  %4654 = vmatprep.mubr.f32.mxu0 %v15919_v27 }
 0x664   :  { %v4299_v2 = vmul.f32 %v10052_v53, %v13842_v58  ;;  %v13880_v58 = vrot.slane %v43_v38, %v16142_v62 }
 0x666   :  { %8071 = vmatmul.mubr.msk.f32.gmra.mrb[220].mxu0 %vm2171_vm4, %v4299_v2 }
 0x667   :  { %4660 = vmatprep.mubr.f32.mxu0 %v15919_v27 }
 0x669   :  { %v10054_v33 = vpop.eup %10053 }
 0x66a   :  { %v4300_v31 = vmul.f32 %v10054_v33, %v4074_v34 }
 0x66c   :  { %8072 = vmatmul.mubr.msk.f32.gmra.mrb[222].mxu0 %vm2171_vm4, %v4300_v31 }
 0x6a3   :  { %v4476_v14 = vpop.f32.mrb[160].mxu0 }
 0x6a4   :  { %v4477_v19 = vadd.f32 %v4476_v14, %v13877_v18  ;;  %v4478_v34 = vpop.f32.mrb[161].mxu0 }
 0x6a5   :  { %v4479_v56 = vadd.f32 %v4478_v34, %v13880_v58 }
 0x6a6   :  { %v8073_v4 = vmul.f32 -1.442695, %v4477_v19 }
 0x6a7   :  { %v8074_v3 = vmul.f32 -1.442695, %v4479_v56 }
 0x6a8   :  { %v4482_v24 = vpop.f32.mrb[162].mxu0  ;;  %10055 = vpow2.f32 %v8073_v4 }
 0x6a9   :  { %v4483_v35 = vadd.f32 %v4482_v24, %v13877_v18  ;;  %v4484_v15 = vpop.f32.mrb[163].mxu0  ;;  %10057 = vpow2.f32 %v8074_v3 }
 0x6aa   :  { %v4485_v5 = vadd.f32 %v4484_v15, %v13880_v58 }
 0x6ab   :  { %v8075_v25 = vmul.f32 -1.442695, %v4483_v35 }
 0x6ac   :  { %v8076_v10 = vmul.f32 -1.442695, %v4485_v5  ;;  %v4488_v55 = vpop.f32.mrb[164].mxu0 }
 0x6ad   :  { %10059 = vpow2.f32 %v8075_v25  ;;  %v4489_v22 = vadd.f32 %v4488_v55, %v13877_v18  ;;  %v4490_v50 = vpop.f32.mrb[165].mxu0 }
 0x6ae   :  { %10061 = vpow2.f32 %v8076_v10  ;;  %v4491_v54 = vadd.f32 %v4490_v50, %v13880_v58 }
 0x6af   :  { %v8077_v6 = vmul.f32 -1.442695, %v4489_v22 }
 0x6b0   :  { %v8078_v53 = vmul.f32 -1.442695, %v4491_v54 }
 0x6b1   :  { %10063 = vpow2.f32 %v8077_v6 }
 0x6b2   :  { %10065 = vpow2.f32 %v8078_v53  ;;  %v10056_v2 = vpop.eup %10055 }
 0x6b3   :  { %v4494_v33 = vpop.f32.mrb[166].mxu0  ;;  %v10058_v31 = vpop.eup %10057  ;;  %v4859_v61 = vadd.f32 1.0, %v10056_v2 }
 0x6b4   :  { %v4495_v38 = vadd.f32 %v4494_v33, %v13877_v18  ;;  %v4496_v62 = vpop.f32.mrb[167].mxu0  ;;  %v4860_v14 = vadd.f32 1.0, %v10058_v31 }
 0x6b5   :  { %v4497_v19 = vadd.f32 %v4496_v62, %v13880_v58  ;;  %10067 = vrcp.f32 %v4859_v61 }
 0x6b6   :  { %v8079_v34 = vmul.f32 -1.442695, %v4495_v38  ;;  %10069 = vrcp.f32 %v4860_v14 }
 0x6b7   :  { %v10060_v56 = vpop.eup %10059  ;;  %v8080_v4 = vmul.f32 -1.442695, %v4497_v19  ;;  %v4500_v3 = vpop.f32.mrb[168].mxu0 }
 0x6b8   :  { %v10062_v24 = vpop.eup %10061  ;;  %v4861_v35 = vadd.f32 1.0, %v10060_v56  ;;  %10071 = vpow2.f32 %v8079_v34  ;;  %v4501_v15 = vadd.f32 %v4500_v3, %v13877_v18  ;;  %v4502_v5 = vpop.f32.mrb[169].mxu0 }
 0x6b9   :  { %v4862_v25 = vadd.f32 1.0, %v10062_v24  ;;  %10073 = vpow2.f32 %v8080_v4  ;;  %v4503_v10 = vadd.f32 %v4502_v5, %v13880_v58 }
 0x6ba   :  { %10075 = vrcp.f32 %v4861_v35  ;;  %v8081_v55 = vmul.f32 -1.442695, %v4501_v15 }
 0x6bb   :  { %v10064_v22 = vpop.eup %10063  ;;  %10077 = vrcp.f32 %v4862_v25  ;;  %v8082_v50 = vmul.f32 -1.442695, %v4503_v10  ;;  %v4506_v54 = vpop.f32.mrb[170].mxu0 }
 0x6bc   :  { %v10066_v6 = vpop.eup %10065  ;;  %v4863_v53 = vadd.f32 1.0, %v10064_v22  ;;  %10079 = vpow2.f32 %v8081_v55  ;;  %v4507_v2 = vadd.f32 %v4506_v54, %v13877_v18  ;;  %v4508_v33 = vpop.f32.mrb[171].mxu0 }
 0x6bd   :  { %v4864_v31 = vadd.f32 1.0, %v10066_v6  ;;  %10081 = vpow2.f32 %v8082_v50  ;;  %v4509_v61 = vadd.f32 %v4508_v33, %v13880_v58 }
 0x6be   :  { %10083 = vrcp.f32 %v4863_v53  ;;  %v8083_v38 = vmul.f32 -1.442695, %v4507_v2 }
 0x6bf   :  { %10085 = vrcp.f32 %v4864_v31  ;;  %v8084_v62 = vmul.f32 -1.442695, %v4509_v61  ;;  %v10068_v14 = vpop.eup %10067 }
 0x6c0   :  { %10087 = vpow2.f32 %v8083_v38  ;;  %v10070_v19 = vpop.eup %10069  ;;  %v5051_v34 = vmul.f32 %v10068_v14, %v13191_v16 }
 0x6c1   :  { %10089 = vpow2.f32 %v8084_v62  ;;  %v5052_v3 = vmul.f32 %v10070_v19, %v13185_v42 }
 0x6c2   :  { %v10072_v56 = vpop.eup %10071  ;;  %v4512_v4 = vpop.f32.mrb[172].mxu0  ;;  %v13902_v16 = vadd.f32 %v5051_v34, %v12647_v13 }
 0x6c3   :  { %v10074_v24 = vpop.eup %10073  ;;  %v4865_v35 = vadd.f32 1.0, %v10072_v56  ;;  %v4513_v15 = vadd.f32 %v4512_v4, %v13877_v18  ;;  %v4514_v5 = vpop.f32.mrb[173].mxu0  ;;  %v13899_v22 = vadd.f32 %v5052_v3, %v12643_v36 }
 0x6c4   :  { %v10076_v25 = vpop.eup %10075  ;;  %v4866_v10 = vadd.f32 1.0, %v10074_v24  ;;  %v4515_v55 = vadd.f32 %v4514_v5, %v13880_v58 }
 0x6c5   :  { %v10078_v50 = vpop.eup %10077  ;;  %10091 = vrcp.f32 %v4865_v35  ;;  %v8085_v54 = vmul.f32 -1.442695, %v4513_v15  ;;  %v5053_v42 = vmul.f32 %v10076_v25, %v13207_v20  ;;  %5316 = vmatprep.mubr.f32.mxu1 %v13899_v22 }
 0x6c6   :  { %v10080_v6 = vpop.eup %10079  ;;  %10093 = vrcp.f32 %v4866_v10  ;;  %v8086_v53 = vmul.f32 -1.442695, %v4515_v55  ;;  %v4518_v2 = vpop.f32.mrb[174].mxu0  ;;  %v5054_v33 = vmul.f32 %v10078_v50, %v13201_v11  ;;  %5317 = vmatmul.mubr.f32.vlgmr.msra.gmra.mrb[224].mxu1 %v13902_v16 }
 0x6c7   :  { %v10082_v31 = vpop.eup %10081  ;;  %v4867_v61 = vadd.f32 1.0, %v10080_v6  ;;  %10095 = vpow2.f32 %v8085_v54  ;;  %v4519_v36 = vadd.f32 %v4518_v2, %v13877_v18  ;;  %v4520_v38 = vpop.f32.mrb[175].mxu0  ;;  %v13914_v11 = vadd.f32 %v5053_v42, %v12659_v44 }
 0x6c8   :  { %v10084_v13 = vpop.eup %10083  ;;  %v4868_v62 = vadd.f32 1.0, %v10082_v31  ;;  %10097 = vpow2.f32 %v8086_v53  ;;  %v4521_v20 = vadd.f32 %v4520_v38, %v13880_v58  ;;  %v13911_v14 = vadd.f32 %v5054_v33, %v12655_v49 }
 0x6c9   :  { %v10086_v19 = vpop.eup %10085  ;;  %10099 = vrcp.f32 %v4867_v61  ;;  %v8087_v34 = vmul.f32 -1.442695, %v4519_v36  ;;  %v5055_v56 = vmul.f32 %v10084_v13, %v13223_v63 }
 0x6ca   :  { %v10088_v4 = vpop.eup %10087  ;;  %10101 = vrcp.f32 %v4868_v62  ;;  %v8088_v3 = vmul.f32 -1.442695, %v4521_v20  ;;  %v4524_v24 = vpop.f32.mrb[176].mxu0  ;;  %5322 = vmatprep.mubr.f32.mxu1 %v13911_v14  ;;  %v5056_v35 = vmul.f32 %v10086_v19, %v13217_v28 }
 0x6cb   :  { %v10090_v15 = vpop.eup %10089  ;;  %v4869_v5 = vadd.f32 1.0, %v10088_v4  ;;  %10103 = vpow2.f32 %v8087_v34  ;;  %v4525_v49 = vadd.f32 %v4524_v24, %v13877_v18  ;;  %v4526_v25 = vpop.f32.mrb[177].mxu0  ;;  %5323 = vmatmul.mubr.f32.gmra.mrb[226].mxu1 %v13914_v11  ;;  %v13926_v50 = vadd.f32 %v5055_v56, %v12669_v40 }
 0x6cc   :  { %v4870_v44 = vadd.f32 1.0, %v10090_v15  ;;  %10105 = vpow2.f32 %v8088_v3  ;;  %v4527_v63 = vadd.f32 %v4526_v25, %v13880_v58  ;;  %v13923_v10 = vadd.f32 %v5056_v35, %v12666_v51 }
 0x6cd   :  { %10107 = vrcp.f32 %v4869_v5  ;;  %v8089_v55 = vmul.f32 -1.442695, %v4525_v49 }
 0x6ce   :  { %10109 = vrcp.f32 %v4870_v44  ;;  %v8090_v28 = vmul.f32 -1.442695, %v4527_v63  ;;  %v4530_v54 = vpop.f32.mrb[178].mxu0  ;;  %5328 = vmatprep.mubr.f32.mxu1 %v13923_v10 }
 0x6cf   :  { %v10092_v42 = vpop.eup %10091  ;;  %10111 = vpow2.f32 %v8089_v55  ;;  %v4531_v6 = vadd.f32 %v4530_v54, %v13877_v18  ;;  %v4532_v53 = vpop.f32.mrb[179].mxu0  ;;  %5329 = vmatmul.mubr.f32.gmra.mrb[228].mxu1 %v13926_v50 }
 0x6d0   :  { %v10094_v2 = vpop.eup %10093  ;;  %10113 = vpow2.f32 %v8090_v28  ;;  %v4533_v51 = vadd.f32 %v4532_v53, %v13880_v58  ;;  %v5057_v33 = vmul.f32 %v10092_v42, %v13244_v43 }
 0x6d1   :  { %v10096_v40 = vpop.eup %10095  ;;  %v8091_v31 = vmul.f32 -1.442695, %v4531_v6  ;;  %v5058_v61 = vmul.f32 %v10094_v2, %v13240_v59 }
 0x6d2   :  { %v10098_v36 = vpop.eup %10097  ;;  %v4871_v38 = vadd.f32 1.0, %v10096_v40  ;;  %v8092_v13 = vmul.f32 -1.442695, %v4533_v51  ;;  %v4536_v62 = vpop.f32.mrb[180].mxu0  ;;  %v13940_v24 = vadd.f32 %v5057_v33, %v12683_v47 }
 0x6d3   :  { %v10100_v20 = vpop.eup %10099  ;;  %v4872_v19 = vadd.f32 1.0, %v10098_v36  ;;  %10115 = vpow2.f32 %v8091_v31  ;;  %v4537_v34 = vadd.f32 %v4536_v62, %v13877_v18  ;;  %v4538_v56 = vpop.f32.mrb[181].mxu0  ;;  %v13936_v4 = vadd.f32 %v5058_v61, %v12680_v60 }
 0x6d4   :  { %v10102_v3 = vpop.eup %10101  ;;  %10117 = vrcp.f32 %v4871_v38  ;;  %v4539_v43 = vadd.f32 %v4538_v56, %v13880_v58  ;;  %v5059_v59 = vmul.f32 %v10100_v20, %v13260_v32 }
 0x6d5   :  { %v10104_v35 = vpop.eup %10103  ;;  %10119 = vrcp.f32 %v4872_v19  ;;  %v8093_v15 = vmul.f32 -1.442695, %v4537_v34  ;;  %5334 = vmatprep.mubr.f32.mxu1 %v13936_v4  ;;  %v5060_v5 = vmul.f32 %v10102_v3, %v13256_v21 }
 0x6d6   :  { %v10106_v49 = vpop.eup %10105  ;;  %v4873_v25 = vadd.f32 1.0, %v10104_v35  ;;  %10121 = vpow2.f32 %v8092_v13  ;;  %v8094_v60 = vmul.f32 -1.442695, %v4539_v43  ;;  %5335 = vmatmul.mubr.f32.gmra.mrb[230].mxu1 %v13940_v24  ;;  %v13950_v55 = vadd.f32 %v5059_v59, %v12693_v26  ;;  %v8202_v26 = vld [vmem:[%s15567_s3 + $0x208] sm:$0xff] }
 0x6d7   :  { %v10108_v44 = vpop.eup %10107  ;;  %v4874_v63 = vadd.f32 1.0, %v10106_v49  ;;  %10123 = vpow2.f32 %v8093_v15  ;;  %v13947_v47 = vadd.f32 %v5060_v5, %v12690_v45  ;;  %v8201_v45 = vld [vmem:[%s15567_s3 + $0x200] sm:$0xff] }
 0x6d8   :  { %v10110_v32 = vpop.eup %10109  ;;  %10125 = vrcp.f32 %v4873_v25  ;;  %v5061_v28 = vmul.f32 %v10108_v44, %v13271_v1  ;;  %v8668_v2 = vpack.c.bf16 %v8202_v26, %v8201_v45  ;;  %v8203_v44 = vld [vmem:[%s15567_s3 + $0x210] sm:$0xff]  ;;  %v16144_v45 = vld [vmem:[#allocation8_spill] sm:$0xff] }
 0x6d9   :  { %v10112_v21 = vpop.eup %10111  ;;  %10127 = vrcp.f32 %v4874_v63  ;;  %5340 = vmatprep.mubr.f32.mxu1 %v13947_v47  ;;  %v5062_v54 = vmul.f32 %v10110_v32, %v13265_v9  ;;  %v8204_v63 = vld [vmem:[%s15567_s3 + $0x218] sm:$0xff] }
 0x6da   :  { %v10114_v42 = vpop.eup %10113  ;;  %v4875_v6 = vadd.f32 1.0, %v10112_v21  ;;  %10129 = vpow2.f32 %v8094_v60  ;;  %5341 = vmatmul.mubr.f32.gmra.mrb[232].mxu1 %v13950_v55  ;;  %v13966_v51 = vadd.f32 %v5061_v28, %v12712_v0  ;;  %8669 = vmatpush1.bf16.msra.mxu0 %v8668_v2 }
 0x6db   :  { %v4876_v1 = vadd.f32 1.0, %v10114_v42  ;;  %v13963_v53 = vadd.f32 %v5062_v54, %v12708_v37  ;;  %8670 = vmatprep.subr.bf16.mxu0 %v15901_v46  ;;  %v8206_v54 = vld [vmem:[%s15567_s3 + $0x228] sm:$0xff] }
 0x6dc   :  { %10131 = vrcp.f32 %v4875_v6  ;;  %v4542_v9 = vpop.f32.mrb[182].mxu0 }
 0x6dd   :  { %v10116_v33 = vpop.eup %10115  ;;  %10133 = vrcp.f32 %v4876_v1  ;;  %v4543_v40 = vadd.f32 %v4542_v9, %v13877_v18  ;;  %v4544_v31 = vpop.f32.mrb[183].mxu0  ;;  %5346 = vmatprep.mubr.f32.mxu1 %v13963_v53 }
 0x6de   :  { %v10118_v61 = vpop.eup %10117  ;;  %v4877_v36 = vadd.f32 1.0, %v10116_v33  ;;  %v4545_v38 = vadd.f32 %v4544_v31, %v13880_v58  ;;  %5347 = vmatmul.mubr.f32.gmra.mrb[234].mxu1 %v13966_v51  ;;  %v16146_v33 = vld [vmem:[#allocation7_spill] sm:$0xff]  ;;  %v16148_v31 = vld [vmem:[#allocation86_spill] sm:$0xff] }
 0x6df   :  { %v10120_v37 = vpop.eup %10119  ;;  %v8095_v13 = vmul.f32 -1.442695, %v4543_v40  ;;  %v5063_v0 = vmul.f32 %v10118_v61, %v13296_v17 }
 0x6e0   :  { %v10122_v62 = vpop.eup %10121  ;;  %10135 = vrcp.f32 %v4877_v36  ;;  %v8096_v20 = vmul.f32 -1.442695, %v4545_v38  ;;  %v4548_v19 = vpop.f32.mrb[184].mxu0  ;;  %v5064_v34 = vmul.f32 %v10120_v37, %v13293_v39  ;;  %v8207_v36 = vld [vmem:[%s15567_s3 + $0x230] sm:$0xff]  ;;  %v8208_v38 = vld [vmem:[%s15567_s3 + $0x238] sm:$0xff] }
 0x6e1   :  { %v10124_v56 = vpop.eup %10123  ;;  %v4878_v3 = vadd.f32 1.0, %v10122_v62  ;;  %10137 = vpow2.f32 %v8095_v13  ;;  %v4549_v43 = vadd.f32 %v4548_v19, %v13877_v18  ;;  %v4550_v59 = vpop.f32.mrb[185].mxu0  ;;  %v13981_v60 = vadd.f32 %v5063_v0, %v12736_v52  ;;  %v16143_v52 = vld [vmem:[#allocation40_spill] sm:$0xff]  ;;  %v16149_v0 = vld [vmem:[#allocation41_spill] sm:$0xff] }
 0x6e2   :  { %v10126_v35 = vpop.eup %10125  ;;  %v4879_v15 = vadd.f32 1.0, %v10124_v56  ;;  %10139 = vpow2.f32 %v8096_v20  ;;  %v4551_v5 = vadd.f32 %v4550_v59, %v13880_v58  ;;  %v13978_v49 = vadd.f32 %v5064_v34, %v12729_v8  ;;  %v8205_v8 = vld [vmem:[%s15567_s3 + $0x220] sm:$0xff]  ;;  %v16150_v56 = vld [vmem:[#allocation10_spill] sm:$0xff] }
 0x6e3   :  { %v10128_v17 = vpop.eup %10127  ;;  %10141 = vrcp.f32 %v4878_v3  ;;  %v8097_v25 = vmul.f32 -1.442695, %v4549_v43  ;;  %v5065_v39 = vmul.f32 %v10126_v35, %v13313_v29  ;;  %v8671_v29 = vpack.c.bf16 %v8204_v63, %v8203_v44 }
 0x6e4   :  { %v10130_v32 = vpop.eup %10129  ;;  %10143 = vrcp.f32 %v4879_v15  ;;  %v8098_v28 = vmul.f32 -1.442695, %v4551_v5  ;;  %5352 = vmatprep.mubr.f32.mxu1 %v13978_v49  ;;  %v5066_v21 = vmul.f32 %v10128_v17, %v16143_v52  ;;  %v8674_v1 = vpack.c.bf16 %v8206_v54, %v8205_v8  ;;  %v16152_v5 = vld [vmem:[#allocation9_spill] sm:$0xff] }
 0x6e5   :  { %v4880_v42 = vadd.f32 1.0, %v10130_v32  ;;  %10145 = vpow2.f32 %v8097_v25  ;;  %5353 = vmatmul.mubr.f32.gmra.mrb[236].mxu1 %v13981_v60  ;;  %8672 = vmatpush1.bf16.msra.mxu0 %v8671_v29  ;;  %v14003_v40 = vadd.f32 %v5065_v39, %v16146_v33  ;;  %v8677_v43 = vpack.c.bf16 %v8208_v38, %v8207_v36  ;;  %v8209_v25 = vld [vmem:[%s15567_s3 + $0x240] sm:$0xff]  ;;  %v8210_v39 = vld [vmem:[%s15567_s3 + $0x248] sm:$0xff] }
 0x6e6   :  { %v10132_v6 = vpop.eup %10131  ;;  %10147 = vpow2.f32 %v8098_v28  ;;  %v14000_v26 = vadd.f32 %v5066_v21, %v16144_v45  ;;  %8673 = vmatprep.subr.bf16.mxu0 %v15901_v46  ;;  %v16154_v29 = vld [vmem:[#allocation42_spill] sm:$0xff]  ;;  %v16155_v45 = vld [vmem:[#allocation85_spill] sm:$0xff] }
 0x6e7   :  { %v10134_v2 = vpop.eup %10133  ;;  %10149 = vrcp.f32 %v4880_v42  ;;  %v4554_v9 = vpop.f32.mrb[186].mxu0  ;;  %16147 = vst [vmem:[#allocation40_spill] sm:$0xff] %v14003_v40  ;;  %v5067_v61 = vmul.f32 %v10132_v6, %v16148_v31  ;;  %v8211_v31 = vld [vmem:[%s15567_s3 + $0x250] sm:$0xff] }
 0x6e8   :  { %16145 = vst [vmem:[#allocation6_spill] sm:$0xff] %v14000_v26  ;;  %v4555_v37 = vadd.f32 %v4554_v9, %v13877_v18  ;;  %v4556_v13 = vpop.f32.mrb[187].mxu0  ;;  %5358 = vmatprep.mubr.f32.mxu1 %v14000_v26  ;;  %v5068_v62 = vmul.f32 %v10134_v2, %v16149_v0  ;;  %v8680_v2 = vpack.c.bf16 %v8210_v39, %v8209_v25  ;;  %v16162_v25 = vld [vmem:[#allocation13_spill] sm:$0xff] }
 0x6e9   :  { %v4557_v20 = vadd.f32 %v4556_v13, %v13880_v58  ;;  %5359 = vmatmul.mubr.f32.gmra.mrb[238].mxu1 %v14003_v40  ;;  %8675 = vmatpush1.bf16.msra.mxu0 %v8674_v1  ;;  %v14022_v17 = vadd.f32 %v5067_v61, %v16152_v5  ;;  %v8212_v61 = vld [vmem:[%s15567_s3 + $0x258] sm:$0xff]  ;;  %v8214_v5 = vld [vmem:[%s15567_s3 + $0x268] sm:$0xff] }
 0x6ea   :  { %v10136_v19 = vpop.eup %10135  ;;  %v8099_v34 = vmul.f32 -1.442695, %v4555_v37  ;;  %v14019_v3 = vadd.f32 %v5068_v62, %v16150_v56  ;;  %8676 = vmatprep.subr.bf16.mxu0 %v15901_v46  ;;  %v16156_v37 = vld [vmem:[#allocation12_spill] sm:$0xff] }
 0x6eb   :  { %v10138_v59 = vpop.eup %10137  ;;  %v8100_v35 = vmul.f32 -1.442695, %v4557_v20  ;;  %v4560_v15 = vpop.f32.mrb[188].mxu0  ;;  %16153 = vst [vmem:[#allocation7_spill] sm:$0xff] %v14022_v17  ;;  %v5069_v54 = vmul.f32 %v10136_v19, %v16154_v29  ;;  %v16158_v20 = vld [vmem:[#allocation11_spill] sm:$0xff]  ;;  %v8216_v29 = vld [vmem:[%s15567_s3 + $0x278] sm:$0xff] }
 0x6ec   :  { %16151 = vst [vmem:[#allocation8_spill] sm:$0xff] %v14019_v3  ;;  %v10140_v44 = vpop.eup %10139  ;;  %v4881_v63 = vadd.f32 1.0, %v10138_v59  ;;  %10151 = vpow2.f32 %v8099_v34  ;;  %v4561_v8 = vadd.f32 %v4560_v15, %v13877_v18  ;;  %v4562_v32 = vpop.f32.mrb[189].mxu0  ;;  %5364 = vmatprep.mubr.f32.mxu1 %v14019_v3  ;;  %v16160_v34 = vld [vmem:[#allocation88_spill] sm:$0xff]  ;;  %v8213_v15 = vld [vmem:[%s15567_s3 + $0x260] sm:$0xff] }
 0x6ed   :  { %v10142_v28 = vpop.eup %10141  ;;  %v4882_v52 = vadd.f32 1.0, %v10140_v44  ;;  %10153 = vpow2.f32 %v8100_v35  ;;  %v4563_v21 = vadd.f32 %v4562_v32, %v13880_v58  ;;  %5365 = vmatmul.mubr.f32.gmra.mrb[240].mxu1 %v14022_v17  ;;  %8678 = vmatpush1.bf16.msra.mxu0 %v8677_v43  ;;  %v14048_v19 = vadd.f32 %v5069_v54, %v16158_v20  ;;  %v16161_v43 = vld [vmem:[#allocation43_spill] sm:$0xff]  ;;  %v16164_v44 = vld [vmem:[#allocation14_spill] sm:$0xff] }
 0x6ee   :  { %v10144_v42 = vpop.eup %10143  ;;  %10155 = vrcp.f32 %v4881_v63  ;;  %v8101_v6 = vmul.f32 -1.442695, %v4561_v8  ;;  %v5070_v1 = vmul.f32 %v10142_v28, %v16155_v45  ;;  %8679 = vmatprep.subr.bf16.mxu0 %v15901_v46  ;;  %v8683_v35 = vpack.c.bf16 %v8212_v61, %v8211_v31  ;;  %v16166_v45 = vld [vmem:[#allocation44_spill] sm:$0xff]  ;;  %v8218_v20 = vld [vmem:[%s15567_s3 + $0x288] sm:$0xff] }
 0x6ef   :  { %v10146_v9 = vpop.eup %10145  ;;  %10157 = vrcp.f32 %v4882_v52  ;;  %v8102_v33 = vmul.f32 -1.442695, %v4563_v21  ;;  %16159 = vst [vmem:[#allocation41_spill] sm:$0xff] %v14048_v19  ;;  %v5071_v56 = vmul.f32 %v10144_v42, %v16160_v34  ;;  %v8686_v32 = vpack.c.bf16 %v8214_v5, %v8213_v15  ;;  %v8215_v21 = vld [vmem:[%s15567_s3 + $0x270] sm:$0xff] }
 0x6f0   :  { %v10148_v36 = vpop.eup %10147  ;;  %v4883_v38 = vadd.f32 1.0, %v10146_v9  ;;  %10159 = vpow2.f32 %v8101_v6  ;;  %v14045_v13 = vadd.f32 %v5070_v1, %v16156_v37  ;;  %v8689_v61 = vpack.c.bf16 %v8216_v29, %v8215_v21  ;;  %v16173_v21 = vld [vmem:[#allocation45_spill] sm:$0xff] }
 0x6f1   :  { %v10150_v0 = vpop.eup %10149  ;;  %v4884_v62 = vadd.f32 1.0, %v10148_v36  ;;  %10161 = vpow2.f32 %v8102_v33  ;;  %8681 = vmatpush1.bf16.msra.mxu0 %v8680_v2  ;;  %v14065_v63 = vadd.f32 %v5071_v56, %v16164_v44  ;;  %v16167_v33 = vld [vmem:[#allocation87_spill] sm:$0xff] }
 0x6f2   :  { %16157 = vst [vmem:[#allocation86_spill] sm:$0xff] %v14045_v13  ;;  %10163 = vrcp.f32 %v4883_v38  ;;  %5370 = vmatprep.mubr.f32.mxu1 %v14045_v13  ;;  %v5072_v59 = vmul.f32 %v10150_v0, %v16161_v43  ;;  %8682 = vmatprep.subr.bf16.mxu0 %v15901_v46 }
 0x6f3   :  { %10165 = vrcp.f32 %v4884_v62  ;;  %5371 = vmatmul.mubr.f32.gmra.mrb[242].mxu1 %v14048_v19  ;;  %16165 = vst [vmem:[#allocation9_spill] sm:$0xff] %v14065_v63  ;;  %v8217_v62 = vld [vmem:[%s15567_s3 + $0x280] sm:$0xff] }
 0x6f4   :  { %v14062_v39 = vadd.f32 %v5072_v59, %v16162_v25  ;;  %v16168_v59 = vld [vmem:[#allocation15_spill] sm:$0xff]  ;;  %v16170_v25 = vld [vmem:[#allocation16_spill] sm:$0xff] }
 0x6f5   :  { %8684 = vmatpush1.bf16.msra.mxu0 %v8683_v35 }
 0x6f6   :  { %16163 = vst [vmem:[#allocation10_spill] sm:$0xff] %v14062_v39  ;;  %v10152_v8 = vpop.eup %10151  ;;  %5376 = vmatprep.mubr.f32.mxu1 %v14062_v39  ;;  %8685 = vmatprep.subr.bf16.mxu0 %v15901_v46 }
 0x6f7   :  { %v10154_v28 = vpop.eup %10153  ;;  %v4885_v52 = vadd.f32 1.0, %v10152_v8  ;;  %5377 = vmatmul.mubr.f32.gmra.mrb[244].mxu1 %v14065_v63  ;;  %v16172_v8 = vld [vmem:[#allocation89_spill] sm:$0xff] }
 0x6f8   :  { %v10156_v54 = vpop.eup %10155  ;;  %v4886_v42 = vadd.f32 1.0, %v10154_v28 }
 0x6f9   :  { %v10158_v6 = vpop.eup %10157  ;;  %10167 = vrcp.f32 %v4885_v52  ;;  %v5073_v1 = vmul.f32 %v10156_v54, %v16166_v45  ;;  %8687 = vmatpush1.bf16.msra.mxu0 %v8686_v32  ;;  %v8692_v54 = vpack.c.bf16 %v8218_v20, %v8217_v62  ;;  %v8219_v45 = vld [vmem:[%s15567_s3 + $0x290] sm:$0xff] }
 0x6fa   :  { %v10160_v2 = vpop.eup %10159  ;;  %10169 = vrcp.f32 %v4886_v42  ;;  %v4566_v9 = vpop.f32.mrb[190].mxu0  ;;  %v5074_v31 = vmul.f32 %v10158_v6, %v16167_v33  ;;  %8688 = vmatprep.subr.bf16.mxu0 %v15901_v46 }
 0x6fb   :  { %v10162_v36 = vpop.eup %10161  ;;  %v4887_v38 = vadd.f32 1.0, %v10160_v2  ;;  %v4567_v37 = vadd.f32 %v4566_v9, %v13877_v18  ;;  %v4568_v0 = vpop.f32.mrb[191].mxu0  ;;  %v14091_v44 = vadd.f32 %v5073_v1, %v16170_v25  ;;  %v8220_v1 = vld [vmem:[%s15567_s3 + $0x298] sm:$0xff]  ;;  %v16174_v9 = vld [vmem:[#allocation17_spill] sm:$0xff] }
 0x6fc   :  { %v10164_v34 = vpop.eup %10163  ;;  %v4888_v56 = vadd.f32 1.0, %v10162_v36  ;;  %v4569_v43 = vadd.f32 %v4568_v0, %v13880_v58  ;;  %v14088_v35 = vadd.f32 %v5074_v31, %v16168_v59  ;;  %v8695_v0 = vpack.c.bf16 %v8220_v1, %v8219_v45  ;;  %v16180_v45 = vld [vmem:[#allocation19_spill] sm:$0xff] }
 0x6fd   :  { %v10166_v15 = vpop.eup %10165  ;;  %10171 = vrcp.f32 %v4887_v38  ;;  %v8103_v5 = vmul.f32 -1.442695, %v4567_v37  ;;  %16171 = vst [vmem:[#allocation85_spill] sm:$0xff] %v14091_v44  ;;  %v5075_v32 = vmul.f32 %v10164_v34, %v16172_v8  ;;  %8690 = vmatpush1.bf16.msra.mxu0 %v8689_v61  ;;  %v16176_v61 = vld [vmem:[#allocation18_spill] sm:$0xff] }
 0x6fe   :  { %16169 = vst [vmem:[#allocation42_spill] sm:$0xff] %v14088_v35  ;;  %10173 = vrcp.f32 %v4888_v56  ;;  %v8104_v28 = vmul.f32 -1.442695, %v4569_v43  ;;  %v4572_v52 = vpop.f32.mrb[192].mxu0  ;;  %5382 = vmatprep.mubr.f32.mxu1 %v14088_v35  ;;  %v5076_v29 = vmul.f32 %v10166_v15, %v16173_v21  ;;  %8691 = vmatprep.subr.bf16.mxu0 %v15901_v46  ;;  %v8221_v56 = vld [vmem:[%s15567_s3 + $0x2a0] sm:$0xff]  ;;  %v8222_v43 = vld [vmem:[%s15567_s3 + $0x2a8] sm:$0xff] }
 0x6ff   :  { %10175 = vpow2.f32 %v8103_v5  ;;  %v4573_v42 = vadd.f32 %v4572_v52, %v13877_v18  ;;  %v4574_v6 = vpop.f32.mrb[193].mxu0  ;;  %5383 = vmatmul.mubr.f32.gmra.mrb[246].mxu1 %v14091_v44  ;;  %v14110_v36 = vadd.f32 %v5075_v32, %v16176_v61  ;;  %v16178_v5 = vld [vmem:[#allocation46_spill] sm:$0xff]  ;;  %v8267_v35 = vld [vmem:[%s15568_s4 + $0x50] sm:$0xff] }
 0x700   :  { %10177 = vpow2.f32 %v8104_v28  ;;  %v4575_v2 = vadd.f32 %v4574_v6, %v13880_v58  ;;  %v14107_v33 = vadd.f32 %v5076_v29, %v16174_v9  ;;  %v16179_v32 = vld [vmem:[#allocation90_spill] sm:$0xff]  ;;  %v8698_v29 = vpack.c.bf16 %v8222_v43, %v8221_v56  ;;  %v8224_v9 = vld [vmem:[%s15567_s3 + $0x2b8] sm:$0xff]  ;;  %v16185_v56 = vld [vmem:[#allocation47_spill] sm:$0xff] }
 0x701   :  { %v8105_v31 = vmul.f32 -1.442695, %v4573_v42  ;;  %16177 = vst [vmem:[#allocation11_spill] sm:$0xff] %v14110_v36  ;;  %8693 = vmatpush1.bf16.msra.mxu0 %v8692_v54 }
 0x702   :  { %16175 = vst [vmem:[#allocation12_spill] sm:$0xff] %v14107_v33  ;;  %v8106_v38 = vmul.f32 -1.442695, %v4575_v2  ;;  %v4578_v37 = vpop.f32.mrb[194].mxu0  ;;  %5388 = vmatprep.mubr.f32.mxu1 %v14107_v33  ;;  %8694 = vmatprep.subr.bf16.mxu0 %v15901_v46  ;;  %v8223_v2 = vld [vmem:[%s15567_s3 + $0x2b0] sm:$0xff] }
 0x703   :  { %v10168_v62 = vpop.eup %10167  ;;  %10179 = vpow2.f32 %v8105_v31  ;;  %v4579_v20 = vadd.f32 %v4578_v37, %v13877_v18  ;;  %v4580_v34 = vpop.f32.mrb[195].mxu0  ;;  %5389 = vmatmul.mubr.f32.gmra.mrb[248].mxu1 %v14110_v36 }
 0x704   :  { %v10170_v59 = vpop.eup %10169  ;;  %10181 = vpow2.f32 %v8106_v38  ;;  %v4581_v15 = vadd.f32 %v4580_v34, %v13880_v58  ;;  %v5077_v25 = vmul.f32 %v10168_v62, %v16178_v5  ;;  %v16182_v38 = vld [vmem:[#allocation20_spill] sm:$0xff] }
 0x705   :  { %v8107_v8 = vmul.f32 -1.442695, %v4579_v20  ;;  %v5078_v28 = vmul.f32 %v10170_v59, %v16179_v32  ;;  %8696 = vmatpush1.bf16.msra.mxu0 %v8695_v0  ;;  %v16184_v0 = vld [vmem:[#allocation48_spill] sm:$0xff] }
 0x706   :  { %v8108_v52 = vmul.f32 -1.442695, %v4581_v15  ;;  %v4584_v21 = vpop.f32.mrb[196].mxu0  ;;  %8697 = vmatprep.subr.bf16.mxu0 %v15901_v46  ;;  %v14138_v37 = vadd.f32 %v5077_v25, %v16182_v38 }
 0x707   :  { %v10172_v54 = vpop.eup %10171  ;;  %10183 = vpow2.f32 %v8107_v8  ;;  %v4585_v42 = vadd.f32 %v4584_v21, %v13877_v18  ;;  %v4586_v6 = vpop.f32.mrb[197].mxu0  ;;  %v14127_v1 = vadd.f32 %v5078_v28, %v16180_v45  ;;  %v8701_v8 = vpack.c.bf16 %v8224_v9, %v8223_v2  ;;  %v16186_v28 = vld [vmem:[#allocation21_spill] sm:$0xff]  ;;  %v16188_v21 = vld [vmem:[#allocation22_spill] sm:$0xff] }
 0x708   :  { %v10174_v31 = vpop.eup %10173  ;;  %10185 = vpow2.f32 %v8108_v52  ;;  %v4587_v61 = vadd.f32 %v4586_v6, %v13880_v58  ;;  %16183 = vst [vmem:[#allocation43_spill] sm:$0xff] %v14138_v37  ;;  %v5079_v62 = vmul.f32 %v10172_v54, %v16184_v0 }
 0x709   :  { %16181 = vst [vmem:[#allocation88_spill] sm:$0xff] %v14127_v1  ;;  %v10176_v20 = vpop.eup %10175  ;;  %v8109_v34 = vmul.f32 -1.442695, %v4585_v42  ;;  %5394 = vmatprep.mubr.f32.mxu1 %v14127_v1  ;;  %v5080_v43 = vmul.f32 %v10174_v31, %v16185_v56  ;;  %8699 = vmatpush1.bf16.msra.mxu0 %v8698_v29 }
 0x70a   :  { %v10178_v59 = vpop.eup %10177  ;;  %v4889_v15 = vadd.f32 1.0, %v10176_v20  ;;  %v8110_v5 = vmul.f32 -1.442695, %v4587_v61  ;;  %5395 = vmatmul.mubr.f32.gmra.mrb[250].mxu1 %v14138_v37  ;;  %8700 = vmatprep.subr.bf16.mxu0 %v15901_v46  ;;  %v14149_v54 = vadd.f32 %v5079_v62, %v16188_v21 }
 0x70b   :  { %v4890_v32 = vadd.f32 1.0, %v10178_v59  ;;  %10187 = vpow2.f32 %v8109_v34  ;;  %v14145_v25 = vadd.f32 %v5080_v43, %v16186_v28 }
 0x70c   :  { %10189 = vrcp.f32 %v4889_v15  ;;  %v4590_v52 = vpop.f32.mrb[198].mxu0  ;;  %16189 = vst [vmem:[#allocation14_spill] sm:$0xff] %v14149_v54 }
 0x70d   :  { %16187 = vst [vmem:[#allocation13_spill] sm:$0xff] %v14145_v25  ;;  %v10180_v42 = vpop.eup %10179  ;;  %10191 = vrcp.f32 %v4890_v32  ;;  %v4591_v6 = vadd.f32 %v4590_v52, %v13877_v18  ;;  %v4592_v45 = vpop.f32.mrb[199].mxu0  ;;  %5400 = vmatprep.mubr.f32.mxu1 %v14145_v25  ;;  %8702 = vmatpush1.bf16.msra.mxu0 %v8701_v8 }
 0x70e   :  { %v10182_v29 = vpop.eup %10181  ;;  %v4891_v2 = vadd.f32 1.0, %v10180_v42  ;;  %10193 = vpow2.f32 %v8110_v5  ;;  %v4593_v9 = vadd.f32 %v4592_v45, %v13880_v58  ;;  %5401 = vmatmul.mubr.f32.gmra.mrb[252].mxu1 %v14149_v54  ;;  %8703 = vmatprep.subr.bf16.mxu0 %v15901_v46 }
 0x70f   :  { %v4892_v31 = vadd.f32 1.0, %v10182_v29  ;;  %v8111_v61 = vmul.f32 -1.442695, %v4591_v6 }
 0x710   :  { %10195 = vrcp.f32 %v4891_v2  ;;  %v8112_v38 = vmul.f32 -1.442695, %v4593_v9  ;;  %v4596_v0 = vpop.f32.mrb[200].mxu0  ;;  %v16190_v9 = vld [vmem:[#allocation50_spill] sm:$0xff] }
 0x711   :  { %v10184_v62 = vpop.eup %10183  ;;  %10197 = vrcp.f32 %v4892_v31  ;;  %v4597_v20 = vadd.f32 %v4596_v0, %v13877_v18  ;;  %v4598_v34 = vpop.f32.mrb[201].mxu0 }
 0x712   :  { %v10186_v56 = vpop.eup %10185  ;;  %v4893_v43 = vadd.f32 1.0, %v10184_v62  ;;  %10199 = vpow2.f32 %v8111_v61  ;;  %v4599_v59 = vadd.f32 %v4598_v34, %v13880_v58  ;;  %v16191_v62 = vld [vmem:[#allocation49_spill] sm:$0xff] }
 0x713   :  { %v4894_v15 = vadd.f32 1.0, %v10186_v56  ;;  %10201 = vpow2.f32 %v8112_v38  ;;  %v8113_v5 = vmul.f32 -1.442695, %v4597_v20 }
 0x714   :  { %10203 = vrcp.f32 %v4893_v43  ;;  %v8114_v8 = vmul.f32 -1.442695, %v4599_v59  ;;  %v4602_v32 = vpop.f32.mrb[202].mxu0 }
 0x715   :  { %v10188_v28 = vpop.eup %10187  ;;  %10205 = vrcp.f32 %v4894_v15  ;;  %v4603_v52 = vadd.f32 %v4602_v32, %v13877_v18  ;;  %v4604_v21 = vpop.f32.mrb[203].mxu0 }
 0x716   :  { %v10190_v42 = vpop.eup %10189  ;;  %v4895_v6 = vadd.f32 1.0, %v10188_v28  ;;  %10207 = vpow2.f32 %v8113_v5  ;;  %v4605_v45 = vadd.f32 %v4604_v21, %v13880_v58  ;;  %v16192_v5 = vld [vmem:[#allocation23_spill] sm:$0xff] }
 0x717   :  { %v10192_v29 = vpop.eup %10191  ;;  %10209 = vpow2.f32 %v8114_v8  ;;  %v8115_v2 = vmul.f32 -1.442695, %v4603_v52  ;;  %v5081_v31 = vmul.f32 %v10190_v42, %v16190_v9  ;;  %v16194_v52 = vld [vmem:[#allocation68_spill] sm:$0xff]  ;;  %v16197_v9 = vld [vmem:[#allocation51_spill] sm:$0xff] }
 0x718   :  { %v10194_v61 = vpop.eup %10193  ;;  %10211 = vrcp.f32 %v4895_v6  ;;  %v8116_v38 = vmul.f32 -1.442695, %v4605_v45  ;;  %v4608_v0 = vpop.f32.mrb[204].mxu0  ;;  %v5082_v20 = vmul.f32 %v10192_v29, %v16191_v62  ;;  %v16196_v42 = vld [vmem:[#allocation52_spill] sm:$0xff] }
 0x719   :  { %v4896_v34 = vadd.f32 1.0, %v10194_v61  ;;  %10213 = vpow2.f32 %v8115_v2  ;;  %v4609_v56 = vadd.f32 %v4608_v0, %v13877_v18  ;;  %v4610_v43 = vpop.f32.mrb[205].mxu0  ;;  %v14168_v21 = vadd.f32 %v5081_v31, %v16194_v52 }
 0x71a   :  { %v10196_v59 = vpop.eup %10195  ;;  %10215 = vpow2.f32 %v8116_v38  ;;  %v4611_v15 = vadd.f32 %v4610_v43, %v13880_v58  ;;  %v14165_v8 = vadd.f32 %v5082_v20, %v16192_v5  ;;  %v16198_v43 = vld [vmem:[#allocation67_spill] sm:$0xff] }
 0x71b   :  { %v10198_v32 = vpop.eup %10197  ;;  %10217 = vrcp.f32 %v4896_v34  ;;  %v8117_v28 = vmul.f32 -1.442695, %v4609_v56  ;;  %16195 = vst [vmem:[#allocation87_spill] sm:$0xff] %v14168_v21  ;;  %v5083_v6 = vmul.f32 %v10196_v59, %v16196_v42 }
 0x71c   :  { %16193 = vst [vmem:[#allocation44_spill] sm:$0xff] %v14165_v8  ;;  %v10200_v45 = vpop.eup %10199  ;;  %v8118_v29 = vmul.f32 -1.442695, %v4611_v15  ;;  %v4614_v2 = vpop.f32.mrb[206].mxu0  ;;  %5406 = vmatprep.mubr.f32.mxu1 %v14165_v8  ;;  %v5084_v61 = vmul.f32 %v10198_v32, %v16197_v9  ;;  %v16200_v32 = vld [vmem:[#allocation24_spill] sm:$0xff] }
 0x71d   :  { %v10202_v38 = vpop.eup %10201  ;;  %v4897_v0 = vadd.f32 1.0, %v10200_v45  ;;  %10219 = vpow2.f32 %v8117_v28  ;;  %v4615_v62 = vadd.f32 %v4614_v2, %v13877_v18  ;;  %v4616_v20 = vpop.f32.mrb[207].mxu0  ;;  %5407 = vmatmul.mubr.f32.gmra.mrb[254].mxu1 %v14168_v21  ;;  %v14180_v52 = vadd.f32 %v5083_v6, %v16200_v32  ;;  %v16202_v28 = vld [vmem:[#allocation54_spill] sm:$0xff] }
 0x71e   :  { %v10204_v34 = vpop.eup %10203  ;;  %v4898_v31 = vadd.f32 1.0, %v10202_v38  ;;  %10221 = vpow2.f32 %v8118_v29  ;;  %v4617_v56 = vadd.f32 %v4616_v20, %v13880_v58  ;;  %v14177_v59 = vadd.f32 %v5084_v61, %v16198_v43  ;;  %v16203_v29 = vld [vmem:[#allocation53_spill] sm:$0xff] }
 0x71f   :  { %v10206_v15 = vpop.eup %10205  ;;  %10223 = vrcp.f32 %v4897_v0  ;;  %v8119_v5 = vmul.f32 -1.442695, %v4615_v62  ;;  %16201 = vst [vmem:[#allocation16_spill] sm:$0xff] %v14180_v52  ;;  %v5085_v42 = vmul.f32 %v10204_v34, %v16202_v28 }
 0x720   :  { %16199 = vst [vmem:[#allocation15_spill] sm:$0xff] %v14177_v59  ;;  %v10208_v45 = vpop.eup %10207  ;;  %10225 = vrcp.f32 %v4898_v31  ;;  %v8120_v2 = vmul.f32 -1.442695, %v4617_v56  ;;  %v4620_v9 = vpop.f32.mrb[208].mxu0  ;;  %5412 = vmatprep.mubr.f32.mxu1 %v14177_v59  ;;  %v5086_v38 = vmul.f32 %v10206_v15, %v16203_v29  ;;  %v16204_v31 = vld [vmem:[#allocation25_spill] sm:$0xff]  ;;  %v16206_v15 = vld [vmem:[#allocation70_spill] sm:$0xff] }
 0x721   :  { %v10210_v20 = vpop.eup %10209  ;;  %v4899_v21 = vadd.f32 1.0, %v10208_v45  ;;  %10227 = vpow2.f32 %v8119_v5  ;;  %v4621_v61 = vadd.f32 %v4620_v9, %v13877_v18  ;;  %v4622_v0 = vpop.f32.mrb[209].mxu0  ;;  %5413 = vmatmul.mubr.f32.gmra.mrb[0].mxu1 %v14180_v52  ;;  %v14192_v28 = vadd.f32 %v5085_v42, %v16206_v15  ;;  %v16209_v42 = vld [vmem:[#allocation55_spill] sm:$0xff] }
 0x722   :  { %v10212_v6 = vpop.eup %10211  ;;  %v4900_v62 = vadd.f32 1.0, %v10210_v20  ;;  %10229 = vpow2.f32 %v8120_v2  ;;  %v4623_v34 = vadd.f32 %v4622_v0, %v13880_v58  ;;  %v14189_v56 = vadd.f32 %v5086_v38, %v16204_v31  ;;  %v16208_v38 = vld [vmem:[#allocation92_spill] sm:$0xff] }
 0x723   :  { %v10214_v43 = vpop.eup %10213  ;;  %10231 = vrcp.f32 %v4899_v21  ;;  %v8121_v32 = vmul.f32 -1.442695, %v4621_v61  ;;  %16207 = vst [vmem:[#allocation45_spill] sm:$0xff] %v14192_v28  ;;  %v5087_v0 = vmul.f32 %v10212_v6, %v16208_v38  ;;  %v16212_v38 = vld [vmem:[#allocation26_spill] sm:$0xff] }
 0x724   :  { %16205 = vst [vmem:[#allocation89_spill] sm:$0xff] %v14189_v56  ;;  %v10216_v5 = vpop.eup %10215  ;;  %10233 = vrcp.f32 %v4900_v62  ;;  %v4901_v45 = vadd.f32 1.0, %v10214_v43  ;;  %v8122_v9 = vmul.f32 -1.442695, %v4623_v34  ;;  %5418 = vmatprep.mubr.f32.mxu1 %v14189_v56 }
 0x725   :  { %v10218_v29 = vpop.eup %10217  ;;  %v4902_v20 = vadd.f32 1.0, %v10216_v5  ;;  %10235 = vpow2.f32 %v8121_v32  ;;  %v4626_v2 = vpop.f32.mrb[210].mxu0  ;;  %5419 = vmatmul.mubr.f32.gmra.mrb[2].mxu1 %v14192_v28  ;;  %v16210_v32 = vld [vmem:[#allocation69_spill] sm:$0xff] }
 0x726   :  { %10237 = vrcp.f32 %v4901_v45  ;;  %v4627_v21 = vadd.f32 %v4626_v2, %v13877_v18  ;;  %v4628_v61 = vpop.f32.mrb[211].mxu0  ;;  %v5088_v31 = vmul.f32 %v10218_v29, %v16209_v42  ;;  %v14204_v2 = vadd.f32 %v5087_v0, %v16212_v38 }
 0x727   :  { %v10220_v15 = vpop.eup %10219  ;;  %10239 = vrcp.f32 %v4902_v20  ;;  %v4629_v62 = vadd.f32 %v4628_v61, %v13880_v58  ;;  %v16214_v61 = vld [vmem:[#allocation56_spill] sm:$0xff] }
 0x728   :  { %v10222_v34 = vpop.eup %10221  ;;  %v4903_v43 = vadd.f32 1.0, %v10220_v15  ;;  %10241 = vpow2.f32 %v8122_v9  ;;  %v8123_v5 = vmul.f32 -1.442695, %v4627_v21  ;;  %v14201_v56 = vadd.f32 %v5088_v31, %v16210_v32  ;;  %16213 = vst [vmem:[#allocation18_spill] sm:$0xff] %v14204_v2  ;;  %v16215_v31 = vld [vmem:[#allocation91_spill] sm:$0xff] }
 0x729   :  { %v10224_v28 = vpop.eup %10223  ;;  %v4904_v52 = vadd.f32 1.0, %v10222_v34  ;;  %v8124_v6 = vmul.f32 -1.442695, %v4629_v62  ;;  %v4632_v45 = vpop.f32.mrb[212].mxu0 }
 0x72a   :  { %16211 = vst [vmem:[#allocation17_spill] sm:$0xff] %v14201_v56  ;;  %v10226_v59 = vpop.eup %10225  ;;  %10243 = vrcp.f32 %v4903_v43  ;;  %v4633_v29 = vadd.f32 %v4632_v45, %v13877_v18  ;;  %v4634_v20 = vpop.f32.mrb[213].mxu0  ;;  %5424 = vmatprep.mubr.f32.mxu1 %v14201_v56  ;;  %v5089_v9 = vmul.f32 %v10224_v28, %v16214_v61  ;;  %v16216_v56 = vld [vmem:[#allocation27_spill] sm:$0xff]  ;;  %v16218_v61 = vld [vmem:[#allocation72_spill] sm:$0xff] }
 0x72b   :  { %v10228_v21 = vpop.eup %10227  ;;  %10245 = vrcp.f32 %v4904_v52  ;;  %v4635_v42 = vadd.f32 %v4634_v20, %v13880_v58  ;;  %5425 = vmatmul.mubr.f32.gmra.mrb[4].mxu1 %v14204_v2  ;;  %v5090_v15 = vmul.f32 %v10226_v59, %v16215_v31  ;;  %v16220_v59 = vld [vmem:[#allocation57_spill] sm:$0xff] }
 0x72c   :  { %v10230_v62 = vpop.eup %10229  ;;  %v4905_v0 = vadd.f32 1.0, %v10228_v21  ;;  %10247 = vpow2.f32 %v8123_v5  ;;  %v8125_v34 = vmul.f32 -1.442695, %v4633_v29  ;;  %v14217_v2 = vadd.f32 %v5089_v9, %v16218_v61 }
 0x72d   :  { %v10232_v43 = vpop.eup %10231  ;;  %v4906_v32 = vadd.f32 1.0, %v10230_v62  ;;  %10249 = vpow2.f32 %v8124_v6  ;;  %v8126_v45 = vmul.f32 -1.442695, %v4635_v42  ;;  %v4638_v38 = vpop.f32.mrb[214].mxu0  ;;  %v14213_v8 = vadd.f32 %v5090_v15, %v16216_v56  ;;  %v16221_v6 = vld [vmem:[#allocation93_spill] sm:$0xff] }
 0x72e   :  { %v10234_v28 = vpop.eup %10233  ;;  %10251 = vrcp.f32 %v4905_v0  ;;  %v4639_v52 = vadd.f32 %v4638_v38, %v13877_v18  ;;  %v4640_v20 = vpop.f32.mrb[215].mxu0  ;;  %16219 = vst [vmem:[#allocation90_spill] sm:$0xff] %v14217_v2  ;;  %v5091_v21 = vmul.f32 %v10232_v43, %v16220_v59  ;;  %v16222_v38 = vld [vmem:[#allocation71_spill] sm:$0xff] }
 0x72f   :  { %16217 = vst [vmem:[#allocation46_spill] sm:$0xff] %v14213_v8  ;;  %v10236_v5 = vpop.eup %10235  ;;  %10253 = vrcp.f32 %v4906_v32  ;;  %v4641_v29 = vadd.f32 %v4640_v20, %v13880_v58  ;;  %5430 = vmatprep.mubr.f32.mxu1 %v14213_v8  ;;  %v5092_v42 = vmul.f32 %v10234_v28, %v16221_v6  ;;  %v16224_v32 = vld [vmem:[#allocation28_spill] sm:$0xff] }
 0x730   :  { %v10238_v56 = vpop.eup %10237  ;;  %v4907_v31 = vadd.f32 1.0, %v10236_v5  ;;  %10255 = vpow2.f32 %v8125_v34  ;;  %v8127_v15 = vmul.f32 -1.442695, %v4639_v52  ;;  %5431 = vmatmul.mubr.f32.gmra.mrb[6].mxu1 %v14217_v2  ;;  %v14228_v61 = vadd.f32 %v5091_v21, %v16224_v32  ;;  %v16226_v5 = vld [vmem:[#allocation94_spill] sm:$0xff]  ;;  %v16228_v21 = vld [vmem:[#allocation73_spill] sm:$0xff] }
 0x731   :  { %v10240_v62 = vpop.eup %10239  ;;  %10257 = vpow2.f32 %v8126_v45  ;;  %v8128_v9 = vmul.f32 -1.442695, %v4641_v29  ;;  %v4644_v0 = vpop.f32.mrb[216].mxu0  ;;  %v14225_v43 = vadd.f32 %v5092_v42, %v16222_v38  ;;  %v16227_v52 = vld [vmem:[#allocation58_spill] sm:$0xff] }
 0x732   :  { %16225 = vst [vmem:[#allocation20_spill] sm:$0xff] %v14228_v61  ;;  %v10242_v20 = vpop.eup %10241  ;;  %10259 = vrcp.f32 %v4907_v31  ;;  %v4645_v28 = vadd.f32 %v4644_v0, %v13877_v18  ;;  %v4646_v59 = vpop.f32.mrb[217].mxu0  ;;  %v5094_v34 = vmul.f32 %v10240_v62, %v16226_v5  ;;  %v5093_v6 = vmul.f32 %v10238_v56, %v16227_v52 }
 0x733   :  { %16223 = vst [vmem:[#allocation19_spill] sm:$0xff] %v14225_v43  ;;  %v4908_v2 = vadd.f32 1.0, %v10242_v20  ;;  %10261 = vpow2.f32 %v8127_v15  ;;  %v4647_v45 = vadd.f32 %v4646_v59, %v13880_v58  ;;  %5436 = vmatprep.mubr.f32.mxu1 %v14225_v43  ;;  %v16232_v59 = vld [vmem:[#allocation59_spill] sm:$0xff] }
 0x734   :  { %v10244_v29 = vpop.eup %10243  ;;  %10263 = vpow2.f32 %v8128_v9  ;;  %v8129_v42 = vmul.f32 -1.442695, %v4645_v28  ;;  %5437 = vmatmul.mubr.f32.gmra.mrb[8].mxu1 %v14228_v61  ;;  %v14237_v31 = vadd.f32 %v5094_v34, %v16228_v21  ;;  %v16230_v9 = vld [vmem:[#allocation29_spill] sm:$0xff] }
 0x735   :  { %v10246_v0 = vpop.eup %10245  ;;  %10265 = vrcp.f32 %v4908_v2  ;;  %v8130_v38 = vmul.f32 -1.442695, %v4647_v45  ;;  %v4650_v62 = vpop.f32.mrb[218].mxu0  ;;  %v5095_v56 = vmul.f32 %v10244_v29, %v13564_v23  ;;  %v14243_v28 = vadd.f32 %v5093_v6, %v16230_v9  ;;  %v16233_v29 = vld [vmem:[#allocation74_spill] sm:$0xff]  ;;  %v8225_v6 = vld [vmem:[%s15567_s3 + $0x2c0] sm:$0xff] }
 0x736   :  { %16229 = vst [vmem:[#allocation48_spill] sm:$0xff] %v14237_v31  ;;  %v10248_v32 = vpop.eup %10247  ;;  %10267 = vpow2.f32 %v8129_v42  ;;  %v4651_v15 = vadd.f32 %v4650_v62, %v13877_v18  ;;  %v4652_v20 = vpop.f32.mrb[219].mxu0  ;;  %5442 = vmatprep.mubr.f32.mxu1 %v14237_v31  ;;  %v5096_v5 = vmul.f32 %v10246_v0, %v16232_v59  ;;  %v8226_v0 = vld [vmem:[%s15567_s3 + $0x2c8] sm:$0xff] }
 0x737   :  { %16231 = vst [vmem:[#allocation47_spill] sm:$0xff] %v14243_v28  ;;  %v10250_v34 = vpop.eup %10249  ;;  %v4909_v52 = vadd.f32 1.0, %v10248_v32  ;;  %10269 = vpow2.f32 %v8130_v38  ;;  %v4653_v2 = vadd.f32 %v4652_v20, %v13880_v58  ;;  %v16235_v20 = vld [vmem:[#allocation30_spill] sm:$0xff] }
 0x738   :  { %v10252_v45 = vpop.eup %10251  ;;  %v4910_v21 = vadd.f32 1.0, %v10250_v34  ;;  %v8131_v23 = vmul.f32 -1.442695, %v4651_v15  ;;  %5443 = vmatmul.mubr.f32.gmra.mrb[10].mxu1 %v14243_v28  ;;  %v14249_v42 = vadd.f32 %v5096_v5, %v16233_v29  ;;  %v14258_v9 = vadd.f32 %v5095_v56, %v16235_v20  ;;  %v16237_v29 = vld [vmem:[#allocation95_spill] sm:$0xff] }
 0x739   :  { %v10254_v62 = vpop.eup %10253  ;;  %10271 = vrcp.f32 %v4909_v52  ;;  %v8132_v38 = vmul.f32 -1.442695, %v4653_v2  ;;  %v4656_v32 = vpop.f32.mrb[220].mxu0  ;;  %v8704_v15 = vpack.c.bf16 %v8226_v0, %v8225_v6  ;;  %v5097_v31 = vmul.f32 %v10252_v45, %v13580_v12 }
 0x73a   :  { %16234 = vst [vmem:[#allocation21_spill] sm:$0xff] %v14249_v42  ;;  %16236 = vst [vmem:[#allocation22_spill] sm:$0xff] %v14258_v9  ;;  %v10256_v59 = vpop.eup %10255  ;;  %10273 = vrcp.f32 %v4910_v21  ;;  %v4657_v5 = vadd.f32 %v4656_v32, %v13877_v18  ;;  %v4658_v34 = vpop.f32.mrb[221].mxu0  ;;  %5448 = vmatprep.mubr.f32.mxu1 %v14249_v42  ;;  %v5098_v28 = vmul.f32 %v10254_v62, %v16237_v29  ;;  %v16238_v21 = vld [vmem:[#allocation31_spill] sm:$0xff]  ;;  %v16240_v32 = vld [vmem:[#allocation76_spill] sm:$0xff] }
 0x73b   :  { %v10258_v61 = vpop.eup %10257  ;;  %v4911_v43 = vadd.f32 1.0, %v10256_v59  ;;  %10275 = vpow2.f32 %v8131_v23  ;;  %v4659_v52 = vadd.f32 %v4658_v34, %v13880_v58  ;;  %8705 = vmatpush1.bf16.msra.mxu0 %v8704_v15  ;;  %v14272_v20 = vadd.f32 %v5097_v31, %v16240_v32  ;;  %v8227_v31 = vld [vmem:[%s15567_s3 + $0x2d0] sm:$0xff]  ;;  %v8228_v29 = vld [vmem:[%s15567_s3 + $0x2d8] sm:$0xff] }
 0x73c   :  { %v10260_v56 = vpop.eup %10259  ;;  %v4912_v2 = vadd.f32 1.0, %v10258_v61  ;;  %10277 = vpow2.f32 %v8132_v38  ;;  %v8133_v6 = vmul.f32 -1.442695, %v4657_v5  ;;  %5449 = vmatmul.mubr.f32.gmra.mrb[12].mxu1 %v14258_v9  ;;  %v14267_v0 = vadd.f32 %v5098_v28, %v16238_v21  ;;  %8706 = vmatprep.subr.bf16.mxu0 %v15901_v46  ;;  %v16242_v21 = vld [vmem:[#allocation75_spill] sm:$0xff] }
 0x73d   :  { %v10262_v62 = vpop.eup %10261  ;;  %10279 = vrcp.f32 %v4911_v43  ;;  %v8134_v23 = vmul.f32 -1.442695, %v4659_v52  ;;  %16241 = vst [vmem:[#allocation49_spill] sm:$0xff] %v14272_v20  ;;  %v5099_v28 = vmul.f32 %v10260_v56, %v13593_v48 }
 0x73e   :  { %16239 = vst [vmem:[#allocation50_spill] sm:$0xff] %v14267_v0  ;;  %v10264_v12 = vpop.eup %10263  ;;  %10281 = vrcp.f32 %v4912_v2  ;;  %v4913_v45 = vadd.f32 1.0, %v10262_v62  ;;  %5454 = vmatprep.mubr.f32.mxu1 %v14267_v0  ;;  %v8707_v2 = vpack.c.bf16 %v8228_v29, %v8227_v31  ;;  %v16248_v29 = vld [vmem:[#allocation77_spill] sm:$0xff] }
 0x73f   :  { %v10266_v61 = vpop.eup %10265  ;;  %v4914_v38 = vadd.f32 1.0, %v10264_v12  ;;  %10283 = vpow2.f32 %v8133_v6  ;;  %v4662_v15 = vpop.f32.mrb[222].mxu0 }
 0x740   :  { %v10268_v59 = vpop.eup %10267  ;;  %10285 = vrcp.f32 %v4913_v45  ;;  %v4663_v5 = vadd.f32 %v4662_v15, %v13877_v18  ;;  %v4664_v43 = vpop.f32.mrb[223].mxu0  ;;  %5455 = vmatmul.mubr.f32.gmra.mrb[14].mxu1 %v14272_v20  ;;  %v5100_v34 = vmul.f32 %v10266_v61, %v13588_v57  ;;  %v16244_v45 = vld [vmem:[#allocation32_spill] sm:$0xff]  ;;  %8708 = vmatpush1.bf16.msra.mxu0 %v8707_v2 }
 0x741   :  { %v10270_v52 = vpop.eup %10269  ;;  %10287 = vrcp.f32 %v4914_v38  ;;  %v4915_v48 = vadd.f32 1.0, %v10268_v59  ;;  %v4665_v56 = vadd.f32 %v4664_v43, %v13880_v58  ;;  %v14289_v32 = vadd.f32 %v5099_v28, %v16244_v45  ;;  %8709 = vmatprep.subr.bf16.mxu0 %v15901_v46  ;;  %v16246_v43 = vld [vmem:[#allocation33_spill] sm:$0xff] }
 0x742   :  { %v4916_v18 = vadd.f32 1.0, %v10270_v52  ;;  %10289 = vpow2.f32 %v8134_v23  ;;  %v8135_v6 = vmul.f32 -1.442695, %v4663_v5  ;;  %v14286_v62 = vadd.f32 %v5100_v34, %v16242_v21  ;;  %v16251_v21 = vld [vmem:[#allocation78_spill] sm:$0xff] }
 0x743   :  { %v10272_v57 = vpop.eup %10271  ;;  %10291 = vrcp.f32 %v4915_v48  ;;  %v8136_v12 = vmul.f32 -1.442695, %v4665_v56  ;;  %16245 = vst [vmem:[#allocation68_spill] sm:$0xff] %v14289_v32 }
 0x744   :  { %16243 = vst [vmem:[#allocation23_spill] sm:$0xff] %v14286_v62  ;;  %v10274_v61 = vpop.eup %10273  ;;  %10293 = vrcp.f32 %v4916_v18  ;;  %5460 = vmatprep.mubr.f32.mxu1 %v14286_v62  ;;  %v5101_v58 = vmul.f32 %v10272_v57, %v13609_v7 }
 0x745   :  { %v10276_v23 = vpop.eup %10275  ;;  %10295 = vpow2.f32 %v8135_v6  ;;  %5461 = vmatmul.mubr.f32.gmra.mrb[16].mxu1 %v14289_v32  ;;  %v5102_v38 = vmul.f32 %v10274_v61, %v13606_v30  ;;  %v16250_v30 = vld [vmem:[#allocation96_spill] sm:$0xff]  ;;  %v8230_v61 = vld [vmem:[%s15567_s3 + $0x2e8] sm:$0xff] }
 0x746   :  { %v10278_v15 = vpop.eup %10277  ;;  %v4917_v59 = vadd.f32 1.0, %v10276_v23  ;;  %10297 = vpow2.f32 %v8136_v12  ;;  %v14300_v7 = vadd.f32 %v5101_v58, %v16248_v29  ;;  %v16253_v12 = vld [vmem:[#allocation34_spill] sm:$0xff]  ;;  %v16255_v23 = vld [vmem:[#allocation60_spill] sm:$0xff] }
 0x747   :  { %v10280_v28 = vpop.eup %10279  ;;  %v4918_v5 = vadd.f32 1.0, %v10278_v15  ;;  %v14297_v34 = vadd.f32 %v5102_v38, %v16246_v43  ;;  %v16256_v15 = vld [vmem:[#allocation61_spill] sm:$0xff]  ;;  %v16257_v29 = vld [vmem:[#allocation80_spill] sm:$0xff] }
 0x748   :  { %v10282_v31 = vpop.eup %10281  ;;  %10299 = vrcp.f32 %v4917_v59  ;;  %16249 = vst [vmem:[#allocation51_spill] sm:$0xff] %v14300_v7  ;;  %v5103_v52 = vmul.f32 %v10280_v28, %v13617_v41  ;;  %v8229_v41 = vld [vmem:[%s15567_s3 + $0x2e0] sm:$0xff] }
 0x749   :  { %16247 = vst [vmem:[#allocation52_spill] sm:$0xff] %v14297_v34  ;;  %v10284_v48 = vpop.eup %10283  ;;  %10301 = vrcp.f32 %v4918_v5  ;;  %5466 = vmatprep.mubr.f32.mxu1 %v14297_v34  ;;  %v5104_v56 = vmul.f32 %v10282_v31, %v16250_v30  ;;  %v8710_v28 = vpack.c.bf16 %v8230_v61, %v8229_v41  ;;  %v16259_v30 = vld [vmem:[#allocation97_spill] sm:$0xff] }
 0x74a   :  { %v10286_v2 = vpop.eup %10285  ;;  %v4919_v18 = vadd.f32 1.0, %v10284_v48  ;;  %5467 = vmatmul.mubr.f32.gmra.mrb[18].mxu1 %v14300_v7  ;;  %v14310_v45 = vadd.f32 %v5103_v52, %v16253_v12  ;;  %v16262_v12 = vld [vmem:[#allocation98_spill] sm:$0xff] }
 0x74b   :  { %v10288_v6 = vpop.eup %10287  ;;  %v14307_v57 = vadd.f32 %v5104_v56, %v16251_v21  ;;  %v5105_v59 = vmul.f32 %v10286_v2, %v16256_v15  ;;  %8711 = vmatpush1.bf16.msra.mxu0 %v8710_v28  ;;  %v16265_v28 = vld [vmem:[#allocation36_spill] sm:$0xff] }
 0x74c   :  { %16254 = vst [vmem:[#allocation24_spill] sm:$0xff] %v14310_v45  ;;  %v10290_v58 = vpop.eup %10289  ;;  %10303 = vrcp.f32 %v4919_v18  ;;  %v5106_v38 = vmul.f32 %v10288_v6, %v16255_v23  ;;  %8712 = vmatprep.subr.bf16.mxu0 %v15901_v46  ;;  %v16260_v6 = vld [vmem:[#allocation35_spill] sm:$0xff] }
 0x74d   :  { %16252 = vst [vmem:[#allocation67_spill] sm:$0xff] %v14307_v57  ;;  %v10292_v5 = vpop.eup %10291  ;;  %v4920_v43 = vadd.f32 1.0, %v10290_v58  ;;  %5472 = vmatprep.mubr.f32.mxu1 %v14307_v57  ;;  %v14329_v21 = vadd.f32 %v5105_v59, %v16260_v6  ;;  %v16263_v58 = vld [vmem:[#allocation79_spill] sm:$0xff] }
 0x74e   :  { %v10294_v31 = vpop.eup %10293  ;;  %5473 = vmatmul.mubr.f32.gmra.mrb[20].mxu1 %v14310_v45  ;;  %v14323_v52 = vadd.f32 %v5106_v38, %v16257_v29  ;;  %v5107_v41 = vmul.f32 %v10292_v5, %v16262_v12  ;;  %v16268_v29 = vld [vmem:[#allocation63_spill] sm:$0xff]  ;;  %v16271_v12 = vld [vmem:[#allocation81_spill] sm:$0xff] }
 0x74f   :  { %v10296_v48 = vpop.eup %10295  ;;  %10305 = vrcp.f32 %v4920_v43  ;;  %v5108_v56 = vmul.f32 %v10294_v31, %v16259_v30  ;;  %16261 = vst [vmem:[#allocation53_spill] sm:$0xff] %v14329_v21  ;;  %v16267_v31 = vld [vmem:[#allocation62_spill] sm:$0xff]  ;;  %v8231_v5 = vld [vmem:[%s15567_s3 + $0x2f0] sm:$0xff]  ;;  %v8232_v30 = vld [vmem:[%s15567_s3 + $0x2f8] sm:$0xff] }
 0x750   :  { %16258 = vst [vmem:[#allocation54_spill] sm:$0xff] %v14323_v52  ;;  %v10298_v18 = vpop.eup %10297  ;;  %v4921_v2 = vadd.f32 1.0, %v10296_v48  ;;  %5478 = vmatprep.mubr.f32.mxu1 %v14323_v52  ;;  %v14338_v43 = vadd.f32 %v5107_v41, %v16265_v28  ;;  %v8713_v6 = vpack.c.bf16 %v8232_v30, %v8231_v5  ;;  %v16277_v30 = vld [vmem:[#allocation38_spill] sm:$0xff] }
 0x751   :  { %v4922_v61 = vadd.f32 1.0, %v10298_v18  ;;  %v14333_v23 = vadd.f32 %v5108_v56, %v16263_v58  ;;  %v16269_v18 = vld [vmem:[#allocation37_spill] sm:$0xff]  ;;  %v16273_v58 = vld [vmem:[#allocation99_spill] sm:$0xff] }
 0x752   :  { %v10300_v38 = vpop.eup %10299  ;;  %10307 = vrcp.f32 %v4921_v2  ;;  %5479 = vmatmul.mubr.f32.gmra.mrb[22].mxu1 %v14329_v21  ;;  %16266 = vst [vmem:[#allocation70_spill] sm:$0xff] %v14338_v43  ;;  %8714 = vmatpush1.bf16.msra.mxu0 %v8713_v6  ;;  %v16280_v6 = vld [vmem:[#allocation64_spill] sm:$0xff] }
 0x753   :  { %16264 = vst [vmem:[#allocation25_spill] sm:$0xff] %v14333_v23  ;;  %v10302_v15 = vpop.eup %10301  ;;  %10309 = vrcp.f32 %v4922_v61  ;;  %5484 = vmatprep.mubr.f32.mxu1 %v14333_v23  ;;  %v5109_v48 = vmul.f32 %v10300_v38, %v16268_v29  ;;  %8719 = vmatprep.subr.bf16.mxu0 %v15901_v46  ;;  %v16275_v29 = vld [vmem:[#allocation82_spill] sm:$0xff] }
 0x754   :  { %v5110_v59 = vmul.f32 %v10302_v15, %v16267_v31  ;;  %v16274_v15 = vld [vmem:[#allocation100_spill] sm:$0xff] }
 0x755   :  { %v14354_v41 = vadd.f32 %v5109_v48, %v16271_v12  ;;  %v16279_v48 = vld [vmem:[#allocation65_spill] sm:$0xff] }
 0x756   :  { %v10304_v56 = vpop.eup %10303  ;;  %5485 = vmatmul.mubr.f32.gmra.mrb[24].mxu1 %v14338_v43  ;;  %v14350_v2 = vadd.f32 %v5110_v59, %v16269_v18 }
 0x757   :  { %16272 = vst [vmem:[#allocation55_spill] sm:$0xff] %v14354_v41  ;;  %v5111_v38 = vmul.f32 %v10304_v56, %v16273_v58  ;;  %v16281_v58 = vld [vmem:[#allocation39_spill] sm:$0xff] }
 0x758   :  { %16270 = vst [vmem:[#allocation92_spill] sm:$0xff] %v14350_v2  ;;  %5490 = vmatprep.mubr.f32.mxu1 %v14350_v2 }
 0x759   :  { %v10306_v61 = vpop.eup %10305  ;;  %v14364_v18 = vadd.f32 %v5111_v38, %v16277_v30  ;;  %v16285_v38 = vld [vmem:[#allocation5_spill] sm:$0xff] }
 0x75a   :  { %5491 = vmatmul.mubr.f32.gmra.mrb[26].mxu1 %v14354_v41  ;;  %v5112_v28 = vmul.f32 %v10306_v61, %v16274_v15  ;;  %v16283_v61 = vld [vmem:[#allocation84_spill] sm:$0xff] }
 0x75b   :  { %16278 = vst [vmem:[#allocation26_spill] sm:$0xff] %v14364_v18 }
 0x75c   :  { %v10308_v31 = vpop.eup %10307  ;;  %v14361_v59 = vadd.f32 %v5112_v28, %v16275_v29  ;;  %v5246_v28 = vsub.s32 3, %v16285_v38 }
 0x75d   :  { %v10310_v5 = vpop.eup %10309  ;;  %v5113_v12 = vmul.f32 %v10308_v31, %v16279_v48  ;;  %v10959_v31 = vld [vmem:[%s15570_s6] sm:$0xff] }
 0x75e   :  { %16276 = vst [vmem:[#allocation69_spill] sm:$0xff] %v14361_v59  ;;  %5496 = vmatprep.mubr.f32.mxu1 %v14361_v59  ;;  %v5114_v56 = vmul.f32 %v10310_v5, %v16280_v6  ;;  %v14383_v29 = vrot.slane %v10959_v31, %v5246_v28  ;;  %v10960_v5 = vld [vmem:[%s15570_s6 + $0x8] sm:$0xff] }
 0x75f   :  { %5497 = vmatmul.mubr.f32.gmra.mrb[28].mxu1 %v14364_v18  ;;  %v14374_v15 = vadd.f32 %v5113_v12, %v16283_v61  ;;  %v14388_v30 = vrot.slane %v10960_v5, %v5246_v28 }
 0x760   :  { %v14371_v41 = vadd.f32 %v5114_v56, %v16281_v58 }
 0x761   :  { %16284 = vst [vmem:[#allocation91_spill] sm:$0xff] %v14374_v15 }
 0x762   :  { %16282 = vst [vmem:[#allocation56_spill] sm:$0xff] %v14371_v41  ;;  %5502 = vmatprep.mubr.f32.mxu1 %v14371_v41 }
 0x763   :  { %5503 = vmatmul.mubr.f32.gmra.mrb[30].mxu1 %v14374_v15 }
 0x764   :  { %6616 = vmatprep.mubr.f32.mxu1 %v15919_v27 }
 0x799   :  { %v5318_v48 = vpop.f32.mrb[224].mxu1 }
 0x79a   :  { %v14391_v12 = vadd.f32 %v5318_v48, %v14383_v29  ;;  %v5320_v6 = vpop.f32.mrb[225].mxu1 }
 0x79b   :  { %v14394_v56 = vadd.f32 %v5320_v6, %v14388_v30 }
 0x79c   :  { %v8137_v58 = vmul.f32 -1.442695, %v14391_v12 }
 0x79d   :  { %v8138_v61 = vmul.f32 -1.442695, %v14394_v56 }
 0x79e   :  { %v5324_v31 = vpop.f32.mrb[226].mxu1  ;;  %10311 = vpow2.f32 %v8137_v58 }
 0x79f   :  { %v14399_v15 = vadd.f32 %v5324_v31, %v14383_v29  ;;  %v5326_v41 = vpop.f32.mrb[227].mxu1  ;;  %10313 = vpow2.f32 %v8138_v61 }
 0x7a0   :  { %v14402_v28 = vadd.f32 %v5326_v41, %v14388_v30 }
 0x7a1   :  { %v8139_v5 = vmul.f32 -1.442695, %v14399_v15 }
 0x7a2   :  { %v8140_v48 = vmul.f32 -1.442695, %v14402_v28  ;;  %v5330_v6 = vpop.f32.mrb[228].mxu1 }
 0x7a3   :  { %10315 = vpow2.f32 %v8139_v5  ;;  %v14407_v18 = vadd.f32 %v5330_v6, %v14383_v29  ;;  %v5332_v59 = vpop.f32.mrb[229].mxu1 }
 0x7a4   :  { %10317 = vpow2.f32 %v8140_v48  ;;  %v14410_v58 = vadd.f32 %v5332_v59, %v14388_v30 }
 0x7a5   :  { %v8141_v31 = vmul.f32 -1.442695, %v14407_v18 }
 0x7a6   :  { %v8142_v61 = vmul.f32 -1.442695, %v14410_v58 }
 0x7a7   :  { %10319 = vpow2.f32 %v8141_v31 }
 0x7a8   :  { %10321 = vpow2.f32 %v8142_v61  ;;  %v10312_v41 = vpop.eup %10311 }
 0x7a9   :  { %v5336_v2 = vpop.f32.mrb[230].mxu1  ;;  %v10314_v43 = vpop.eup %10313  ;;  %v5701_v23 = vadd.f32 1.0, %v10312_v41 }
 0x7aa   :  { %v14415_v5 = vadd.f32 %v5336_v2, %v14383_v29  ;;  %v5338_v6 = vpop.f32.mrb[231].mxu1  ;;  %v5702_v21 = vadd.f32 1.0, %v10314_v43 }
 0x7ab   :  { %v14418_v48 = vadd.f32 %v5338_v6, %v14388_v30  ;;  %10323 = vrcp.f32 %v5701_v23 }
 0x7ac   :  { %v8143_v59 = vmul.f32 -1.442695, %v14415_v5  ;;  %10325 = vrcp.f32 %v5702_v21 }
 0x7ad   :  { %v10316_v52 = vpop.eup %10315  ;;  %v8144_v31 = vmul.f32 -1.442695, %v14418_v48  ;;  %v5342_v61 = vpop.f32.mrb[232].mxu1 }
 0x7ae   :  { %v10318_v45 = vpop.eup %10317  ;;  %v5703_v57 = vadd.f32 1.0, %v10316_v52  ;;  %10327 = vpow2.f32 %v8143_v59  ;;  %v14423_v41 = vadd.f32 %v5342_v61, %v14383_v29  ;;  %v5344_v2 = vpop.f32.mrb[233].mxu1 }
 0x7af   :  { %v5704_v7 = vadd.f32 1.0, %v10318_v45  ;;  %10329 = vpow2.f32 %v8144_v31  ;;  %v14426_v43 = vadd.f32 %v5344_v2, %v14388_v30 }
 0x7b0   :  { %10331 = vrcp.f32 %v5703_v57  ;;  %v8145_v23 = vmul.f32 -1.442695, %v14423_v41 }
 0x7b1   :  { %v10320_v6 = vpop.eup %10319  ;;  %10333 = vrcp.f32 %v5704_v7  ;;  %v8146_v21 = vmul.f32 -1.442695, %v14426_v43  ;;  %v5348_v34 = vpop.f32.mrb[234].mxu1 }
 0x7b2   :  { %v10322_v32 = vpop.eup %10321  ;;  %v5705_v52 = vadd.f32 1.0, %v10320_v6  ;;  %10335 = vpow2.f32 %v8145_v23  ;;  %v14431_v59 = vadd.f32 %v5348_v34, %v14383_v29  ;;  %v5350_v61 = vpop.f32.mrb[235].mxu1 }
 0x7b3   :  { %v5706_v45 = vadd.f32 1.0, %v10322_v32  ;;  %10337 = vpow2.f32 %v8146_v21  ;;  %v14434_v31 = vadd.f32 %v5350_v61, %v14388_v30 }
 0x7b4   :  { %10339 = vrcp.f32 %v5705_v52  ;;  %v8147_v57 = vmul.f32 -1.442695, %v14431_v59 }
 0x7b5   :  { %10341 = vrcp.f32 %v5706_v45  ;;  %v8148_v7 = vmul.f32 -1.442695, %v14434_v31  ;;  %v10324_v2 = vpop.eup %10323 }
 0x7b6   :  { %10343 = vpow2.f32 %v8147_v57  ;;  %v10326_v62 = vpop.eup %10325  ;;  %v14442_v21 = vmul.f32 %v10324_v2, %v14391_v12 }
 0x7b7   :  { %10345 = vpow2.f32 %v8148_v7  ;;  %v14439_v34 = vmul.f32 %v10326_v62, %v14394_v56 }
 0x7b8   :  { %v10328_v23 = vpop.eup %10327  ;;  %v5354_v6 = vpop.f32.mrb[236].mxu1 }
 0x7b9   :  { %v10330_v32 = vpop.eup %10329  ;;  %v5707_v61 = vadd.f32 1.0, %v10328_v23  ;;  %v14445_v52 = vadd.f32 %v5354_v6, %v14383_v29  ;;  %v5356_v45 = vpop.f32.mrb[237].mxu1  ;;  %6058 = vmatprep.mubr.f32.mxu0 %v14439_v34 }
 0x7ba   :  { %v10332_v20 = vpop.eup %10331  ;;  %v5708_v0 = vadd.f32 1.0, %v10330_v32  ;;  %v14448_v57 = vadd.f32 %v5356_v45, %v14388_v30  ;;  %6059 = vmatmul.mubr.f32.vlgmr.msra.gmra.mrb[224].mxu0 %v14442_v21 }
 0x7bb   :  { %v10334_v7 = vpop.eup %10333  ;;  %10347 = vrcp.f32 %v5707_v61  ;;  %v8149_v62 = vmul.f32 -1.442695, %v14445_v52  ;;  %v14458_v32 = vmul.f32 %v10332_v20, %v14399_v15 }
 0x7bc   :  { %v10336_v12 = vpop.eup %10335  ;;  %v14454_v56 = vmul.f32 %v10334_v7, %v14402_v28  ;;  %10349 = vrcp.f32 %v5708_v0  ;;  %v8150_v2 = vmul.f32 -1.442695, %v14448_v57  ;;  %v5360_v23 = vpop.f32.mrb[238].mxu1 }
 0x7bd   :  { %v10338_v6 = vpop.eup %10337  ;;  %v5709_v45 = vadd.f32 1.0, %v10336_v12  ;;  %10351 = vpow2.f32 %v8149_v62  ;;  %v14461_v61 = vadd.f32 %v5360_v23, %v14383_v29  ;;  %v5362_v9 = vpop.f32.mrb[239].mxu1 }
 0x7be   :  { %v10340_v42 = vpop.eup %10339  ;;  %v5710_v8 = vadd.f32 1.0, %v10338_v6  ;;  %10353 = vpow2.f32 %v8150_v2  ;;  %v14464_v28 = vadd.f32 %v5362_v9, %v14388_v30  ;;  %6063 = vmatprep.mubr.f32.mxu0 %v14454_v56 }
 0x7bf   :  { %v10342_v0 = vpop.eup %10341  ;;  %10355 = vrcp.f32 %v5709_v45  ;;  %v8151_v7 = vmul.f32 -1.442695, %v14461_v61  ;;  %6064 = vmatmul.mubr.f32.gmra.mrb[226].mxu0 %v14458_v32  ;;  %v14474_v9 = vmul.f32 %v10340_v42, %v14407_v18 }
 0x7c0   :  { %v10344_v20 = vpop.eup %10343  ;;  %v14470_v15 = vmul.f32 %v10342_v0, %v14410_v58  ;;  %10357 = vrcp.f32 %v5710_v8  ;;  %v8152_v62 = vmul.f32 -1.442695, %v14464_v28  ;;  %v5366_v12 = vpop.f32.mrb[240].mxu1 }
 0x7c1   :  { %v10346_v2 = vpop.eup %10345  ;;  %v5711_v23 = vadd.f32 1.0, %v10344_v20  ;;  %10359 = vpow2.f32 %v8151_v7  ;;  %v14477_v6 = vadd.f32 %v5366_v12, %v14383_v29  ;;  %v5368_v45 = vpop.f32.mrb[241].mxu1 }
 0x7c2   :  { %v5712_v54 = vadd.f32 1.0, %v10346_v2  ;;  %10361 = vpow2.f32 %v8152_v62  ;;  %v14480_v25 = vadd.f32 %v5368_v45, %v14388_v30  ;;  %6068 = vmatprep.mubr.f32.mxu0 %v14470_v15 }
 0x7c3   :  { %10363 = vrcp.f32 %v5711_v23  ;;  %v8153_v8 = vmul.f32 -1.442695, %v14477_v6  ;;  %6069 = vmatmul.mubr.f32.gmra.mrb[228].mxu0 %v14474_v9 }
 0x7c4   :  { %10365 = vrcp.f32 %v5712_v54  ;;  %v8154_v42 = vmul.f32 -1.442695, %v14480_v25 }
 0x7c5   :  { %v10348_v18 = vpop.eup %10347  ;;  %10367 = vpow2.f32 %v8153_v8 }
 0x7c6   :  { %v10350_v58 = vpop.eup %10349  ;;  %10369 = vpow2.f32 %v8154_v42  ;;  %v5372_v0 = vpop.f32.mrb[242].mxu1  ;;  %v14493_v23 = vmul.f32 %v10348_v18, %v14415_v5 }
 0x7c7   :  { %v10352_v7 = vpop.eup %10351  ;;  %v14487_v20 = vmul.f32 %v10350_v58, %v14418_v48  ;;  %v14490_v62 = vadd.f32 %v5372_v0, %v14383_v29  ;;  %v5374_v12 = vpop.f32.mrb[243].mxu1 }
 0x7c8   :  { %v10354_v2 = vpop.eup %10353  ;;  %v5713_v54 = vadd.f32 1.0, %v10352_v7  ;;  %v14496_v45 = vadd.f32 %v5374_v12, %v14388_v30 }
 0x7c9   :  { %v10356_v8 = vpop.eup %10355  ;;  %v5714_v37 = vadd.f32 1.0, %v10354_v2  ;;  %v8155_v42 = vmul.f32 -1.442695, %v14490_v62  ;;  %6073 = vmatprep.mubr.f32.mxu0 %v14487_v20 }
 0x7ca   :  { %v10358_v48 = vpop.eup %10357  ;;  %10371 = vrcp.f32 %v5713_v54  ;;  %v8156_v58 = vmul.f32 -1.442695, %v14496_v45  ;;  %v5378_v0 = vpop.f32.mrb[244].mxu1  ;;  %6074 = vmatmul.mubr.f32.gmra.mrb[230].mxu0 %v14493_v23  ;;  %v14509_v2 = vmul.f32 %v10356_v8, %v14423_v41 }
 0x7cb   :  { %v10360_v1 = vpop.eup %10359  ;;  %v14503_v5 = vmul.f32 %v10358_v48, %v14426_v43  ;;  %10373 = vrcp.f32 %v5714_v37  ;;  %v14506_v18 = vadd.f32 %v5378_v0, %v14383_v29  ;;  %v5380_v7 = vpop.f32.mrb[245].mxu1 }
 0x7cc   :  { %v10362_v12 = vpop.eup %10361  ;;  %v5715_v36 = vadd.f32 1.0, %v10360_v1  ;;  %10375 = vpow2.f32 %v8155_v42  ;;  %v14512_v54 = vadd.f32 %v5380_v7, %v14388_v30 }
 0x7cd   :  { %v10364_v33 = vpop.eup %10363  ;;  %v5716_v44 = vadd.f32 1.0, %v10362_v12  ;;  %10377 = vpow2.f32 %v8156_v58  ;;  %v8157_v43 = vmul.f32 -1.442695, %v14506_v18  ;;  %6078 = vmatprep.mubr.f32.mxu0 %v14503_v5 }
 0x7ce   :  { %v10366_v37 = vpop.eup %10365  ;;  %10379 = vrcp.f32 %v5715_v36  ;;  %v8158_v48 = vmul.f32 -1.442695, %v14512_v54  ;;  %6079 = vmatmul.mubr.f32.gmra.mrb[232].mxu0 %v14509_v2  ;;  %v14522_v42 = vmul.f32 %v10364_v33, %v14431_v59 }
 0x7cf   :  { %v10368_v41 = vpop.eup %10367  ;;  %v14519_v1 = vmul.f32 %v10366_v37, %v14434_v31  ;;  %10381 = vrcp.f32 %v5716_v44  ;;  %v8268_v37 = vld [vmem:[%s15568_s4 + $0x58] sm:$0xff] }
 0x7d0   :  { %v10370_v8 = vpop.eup %10369  ;;  %v5717_v58 = vadd.f32 1.0, %v10368_v41  ;;  %10383 = vpow2.f32 %v8157_v43  ;;  %v8266_v43 = vld [vmem:[%s15568_s4 + $0x48] sm:$0xff] }
 0x7d1   :  { %v5718_v0 = vadd.f32 1.0, %v10370_v8  ;;  %10385 = vpow2.f32 %v8158_v48  ;;  %6083 = vmatprep.mubr.f32.mxu0 %v14519_v1  ;;  %v8265_v48 = vld [vmem:[%s15568_s4 + $0x40] sm:$0xff] }
 0x7d2   :  { %10387 = vrcp.f32 %v5717_v58  ;;  %v5384_v36 = vpop.f32.mrb[246].mxu1  ;;  %6084 = vmatmul.mubr.f32.gmra.mrb[234].mxu0 %v14522_v42 }
 0x7d3   :  { %10389 = vrcp.f32 %v5718_v0  ;;  %v14527_v7 = vadd.f32 %v5384_v36, %v14383_v29  ;;  %v5386_v31 = vpop.f32.mrb[247].mxu1 }
 0x7d4   :  { %v10372_v44 = vpop.eup %10371  ;;  %v14530_v12 = vadd.f32 %v5386_v31, %v14388_v30  ;;  %v8715_v31 = vpack.c.bf16 %v8268_v37, %v8266_v43 }
 0x7d5   :  { %v10374_v33 = vpop.eup %10373  ;;  %v8159_v59 = vmul.f32 -1.442695, %v14527_v7  ;;  %v14543_v8 = vmul.f32 %v10372_v44, %v14445_v52  ;;  %v8717_v52 = vpack.c.bf16 %v8267_v35, %v8265_v48 }
 0x7d6   :  { %v10376_v41 = vpop.eup %10375  ;;  %v14546_v58 = vmul.f32 %v10374_v33, %v14448_v57  ;;  %v8160_v0 = vmul.f32 -1.442695, %v14530_v12  ;;  %v5390_v36 = vpop.f32.mrb[248].mxu1  ;;  %8716 = vmatprep.subr.bf16.mxu1 %v8715_v31 }
 0x7d7   :  { %v10378_v63 = vpop.eup %10377  ;;  %v5719_v39 = vadd.f32 1.0, %v10376_v41  ;;  %10391 = vpow2.f32 %v8159_v59  ;;  %v14553_v19 = vadd.f32 %v5390_v36, %v14383_v29  ;;  %v5392_v13 = vpop.f32.mrb[249].mxu1  ;;  %8718 = vmatpush1.bf16.msra.mxu1 %v8717_v52 }
 0x7d8   :  { %v10380_v44 = vpop.eup %10379  ;;  %v5720_v17 = vadd.f32 1.0, %v10378_v63  ;;  %10393 = vpow2.f32 %v8160_v0  ;;  %v14556_v57 = vadd.f32 %v5392_v13, %v14388_v30  ;;  %6088 = vmatprep.mubr.f32.mxu0 %v14546_v58 }
 0x7d9   :  { %v10382_v33 = vpop.eup %10381  ;;  %10395 = vrcp.f32 %v5719_v39  ;;  %v8161_v43 = vmul.f32 -1.442695, %v14553_v19  ;;  %6089 = vmatmul.mubr.f32.gmra.mrb[236].mxu0 %v14543_v8  ;;  %v14566_v13 = vmul.f32 %v10380_v44, %v14461_v61 }
 0x7da   :  { %v10384_v59 = vpop.eup %10383  ;;  %v14562_v37 = vmul.f32 %v10382_v33, %v14464_v28  ;;  %10397 = vrcp.f32 %v5720_v17  ;;  %v8162_v63 = vmul.f32 -1.442695, %v14556_v57 }
 0x7db   :  { %v10386_v35 = vpop.eup %10385  ;;  %16287 = vst [vmem:[#allocation72_spill] sm:$0xff] %v14566_v13  ;;  %v5721_v48 = vadd.f32 1.0, %v10384_v59  ;;  %10399 = vpow2.f32 %v8161_v43 }
 0x7dc   :  { %16286 = vst [vmem:[#allocation27_spill] sm:$0xff] %v14562_v37  ;;  %v10388_v41 = vpop.eup %10387  ;;  %v5722_v39 = vadd.f32 1.0, %v10386_v35  ;;  %10401 = vpow2.f32 %v8162_v63  ;;  %6093 = vmatprep.mubr.f32.mxu0 %v14562_v37 }
 0x7dd   :  { %v10390_v0 = vpop.eup %10389  ;;  %10403 = vrcp.f32 %v5721_v48  ;;  %v5396_v36 = vpop.f32.mrb[250].mxu1  ;;  %6094 = vmatmul.mubr.f32.gmra.mrb[238].mxu0 %v14566_v13  ;;  %v14577_v31 = vmul.f32 %v10388_v41, %v14477_v6 }
 0x7de   :  { %v14571_v17 = vmul.f32 %v10390_v0, %v14480_v25  ;;  %10405 = vrcp.f32 %v5722_v39  ;;  %v14574_v28 = vadd.f32 %v5396_v36, %v14383_v29  ;;  %v5398_v61 = vpop.f32.mrb[251].mxu1 }
 0x7df   :  { %16289 = vst [vmem:[#allocation93_spill] sm:$0xff] %v14577_v31  ;;  %v14580_v52 = vadd.f32 %v5398_v61, %v14388_v30 }
 0x7e0   :  { %16288 = vst [vmem:[#allocation57_spill] sm:$0xff] %v14571_v17  ;;  %v8163_v44 = vmul.f32 -1.442695, %v14574_v28  ;;  %6098 = vmatprep.mubr.f32.mxu0 %v14571_v17 }
 0x7e1   :  { %v10392_v33 = vpop.eup %10391  ;;  %v8164_v43 = vmul.f32 -1.442695, %v14580_v52  ;;  %v5402_v25 = vpop.f32.mrb[252].mxu1  ;;  %6099 = vmatmul.mubr.f32.gmra.mrb[240].mxu0 %v14577_v31 }
 0x7e2   :  { %v10394_v59 = vpop.eup %10393  ;;  %v5723_v63 = vadd.f32 1.0, %v10392_v33  ;;  %10407 = vpow2.f32 %v8163_v44  ;;  %v14587_v35 = vadd.f32 %v5402_v25, %v14383_v29  ;;  %v5404_v6 = vpop.f32.mrb[253].mxu1 }
 0x7e3   :  { %v10396_v48 = vpop.eup %10395  ;;  %v5724_v41 = vadd.f32 1.0, %v10394_v59  ;;  %10409 = vpow2.f32 %v8164_v43  ;;  %v14590_v39 = vadd.f32 %v5404_v6, %v14388_v30 }
 0x7e4   :  { %v10398_v0 = vpop.eup %10397  ;;  %10411 = vrcp.f32 %v5723_v63  ;;  %v8165_v36 = vmul.f32 -1.442695, %v14587_v35  ;;  %v14598_v25 = vmul.f32 %v10396_v48, %v14490_v62 }
 0x7e5   :  { %v10400_v61 = vpop.eup %10399  ;;  %v14594_v3 = vmul.f32 %v10398_v0, %v14496_v45  ;;  %10413 = vrcp.f32 %v5724_v41  ;;  %v8166_v44 = vmul.f32 -1.442695, %v14590_v39 }
 0x7e6   :  { %v10402_v33 = vpop.eup %10401  ;;  %16291 = vst [vmem:[#allocation28_spill] sm:$0xff] %v14598_v25  ;;  %v5725_v59 = vadd.f32 1.0, %v10400_v61  ;;  %10415 = vpow2.f32 %v8165_v36 }
 0x7e7   :  { %16290 = vst [vmem:[#allocation71_spill] sm:$0xff] %v14594_v3  ;;  %v10404_v43 = vpop.eup %10403  ;;  %v5726_v6 = vadd.f32 1.0, %v10402_v33  ;;  %10417 = vpow2.f32 %v8166_v44  ;;  %6103 = vmatprep.mubr.f32.mxu0 %v14594_v3 }
 0x7e8   :  { %v10406_v63 = vpop.eup %10405  ;;  %10419 = vrcp.f32 %v5725_v59  ;;  %6104 = vmatmul.mubr.f32.gmra.mrb[242].mxu0 %v14598_v25  ;;  %v14606_v41 = vmul.f32 %v10404_v43, %v14506_v18 }
 0x7e9   :  { %v14603_v45 = vmul.f32 %v10406_v63, %v14512_v54  ;;  %10421 = vrcp.f32 %v5726_v6 }
 0x7ea   :  { %16293 = vst [vmem:[#allocation58_spill] sm:$0xff] %v14606_v41 }
 0x7eb   :  { %16292 = vst [vmem:[#allocation94_spill] sm:$0xff] %v14603_v45  ;;  %6108 = vmatprep.mubr.f32.mxu0 %v14603_v45 }
 0x7ec   :  { %v10408_v62 = vpop.eup %10407  ;;  %6109 = vmatmul.mubr.f32.gmra.mrb[244].mxu0 %v14606_v41 }
 0x7ed   :  { %v10410_v48 = vpop.eup %10409  ;;  %v5727_v0 = vadd.f32 1.0, %v10408_v62 }
 0x7ee   :  { %v10412_v36 = vpop.eup %10411  ;;  %v5728_v61 = vadd.f32 1.0, %v10410_v48 }
 0x7ef   :  { %v10414_v44 = vpop.eup %10413  ;;  %10423 = vrcp.f32 %v5727_v0  ;;  %v14614_v18 = vmul.f32 %v10412_v36, %v14527_v7 }
 0x7f0   :  { %v10416_v33 = vpop.eup %10415  ;;  %v14611_v59 = vmul.f32 %v10414_v44, %v14530_v12  ;;  %10425 = vrcp.f32 %v5728_v61  ;;  %v5408_v54 = vpop.f32.mrb[254].mxu1 }
 0x7f1   :  { %v10418_v6 = vpop.eup %10417  ;;  %16295 = vst [vmem:[#allocation29_spill] sm:$0xff] %v14614_v18  ;;  %v5729_v43 = vadd.f32 1.0, %v10416_v33  ;;  %v14617_v63 = vadd.f32 %v5408_v54, %v14383_v29  ;;  %v5410_v45 = vpop.f32.mrb[255].mxu1 }
 0x7f2   :  { %16294 = vst [vmem:[#allocation73_spill] sm:$0xff] %v14611_v59  ;;  %v10420_v62 = vpop.eup %10419  ;;  %v5730_v41 = vadd.f32 1.0, %v10418_v6  ;;  %v14620_v48 = vadd.f32 %v5410_v45, %v14388_v30  ;;  %6113 = vmatprep.mubr.f32.mxu0 %v14611_v59 }
 0x7f3   :  { %v10422_v12 = vpop.eup %10421  ;;  %10427 = vrcp.f32 %v5729_v43  ;;  %v8167_v0 = vmul.f32 -1.442695, %v14617_v63  ;;  %6114 = vmatmul.mubr.f32.gmra.mrb[246].mxu0 %v14614_v18  ;;  %v14630_v44 = vmul.f32 %v10420_v62, %v14553_v19 }
 0x7f4   :  { %v14626_v7 = vmul.f32 %v10422_v12, %v14556_v57  ;;  %10429 = vrcp.f32 %v5730_v41  ;;  %v8168_v36 = vmul.f32 -1.442695, %v14620_v48  ;;  %v5414_v61 = vpop.f32.mrb[0].mxu1 }
 0x7f5   :  { %16297 = vst [vmem:[#allocation74_spill] sm:$0xff] %v14630_v44  ;;  %10431 = vpow2.f32 %v8167_v0  ;;  %v14633_v45 = vadd.f32 %v5414_v61, %v14383_v29  ;;  %v5416_v33 = vpop.f32.mrb[1].mxu1 }
 0x7f6   :  { %16296 = vst [vmem:[#allocation59_spill] sm:$0xff] %v14626_v7  ;;  %10433 = vpow2.f32 %v8168_v36  ;;  %v14636_v54 = vadd.f32 %v5416_v33, %v14388_v30  ;;  %6118 = vmatprep.mubr.f32.mxu0 %v14626_v7 }
 0x7f7   :  { %v8169_v57 = vmul.f32 -1.442695, %v14633_v45  ;;  %6119 = vmatmul.mubr.f32.gmra.mrb[248].mxu0 %v14630_v44 }
 0x7f8   :  { %v8170_v41 = vmul.f32 -1.442695, %v14636_v54  ;;  %v5420_v6 = vpop.f32.mrb[2].mxu1 }
 0x7f9   :  { %v10424_v19 = vpop.eup %10423  ;;  %10435 = vpow2.f32 %v8169_v57  ;;  %v14643_v43 = vadd.f32 %v5420_v6, %v14383_v29  ;;  %v5422_v62 = vpop.f32.mrb[3].mxu1 }
 0x7fa   :  { %v10426_v12 = vpop.eup %10425  ;;  %10437 = vpow2.f32 %v8170_v41  ;;  %v14646_v0 = vadd.f32 %v5422_v62, %v14388_v30  ;;  %v14653_v33 = vmul.f32 %v10424_v19, %v14574_v28 }
 0x7fb   :  { %v14649_v36 = vmul.f32 %v10426_v12, %v14580_v52  ;;  %v8171_v61 = vmul.f32 -1.442695, %v14643_v43 }
 0x7fc   :  { %16299 = vst [vmem:[#allocation95_spill] sm:$0xff] %v14653_v33  ;;  %v8172_v7 = vmul.f32 -1.442695, %v14646_v0 }
 0x7fd   :  { %16298 = vst [vmem:[#allocation30_spill] sm:$0xff] %v14649_v36  ;;  %v10428_v57 = vpop.eup %10427  ;;  %10439 = vpow2.f32 %v8171_v61  ;;  %6123 = vmatprep.mubr.f32.mxu0 %v14649_v36 }
 0x7fe   :  { %v10430_v6 = vpop.eup %10429  ;;  %10441 = vpow2.f32 %v8172_v7  ;;  %v5426_v41 = vpop.f32.mrb[4].mxu1  ;;  %6124 = vmatmul.mubr.f32.gmra.mrb[250].mxu0 %v14653_v33  ;;  %v14665_v44 = vmul.f32 %v10428_v57, %v14587_v35 }
 0x7ff   :  { %v10432_v62 = vpop.eup %10431  ;;  %v14659_v52 = vmul.f32 %v10430_v6, %v14590_v39  ;;  %v14662_v12 = vadd.f32 %v5426_v41, %v14383_v29  ;;  %v5428_v28 = vpop.f32.mrb[5].mxu1 }
 0x800   :  { %v10434_v19 = vpop.eup %10433  ;;  %16301 = vst [vmem:[#allocation76_spill] sm:$0xff] %v14665_v44  ;;  %v5731_v61 = vadd.f32 1.0, %v10432_v62  ;;  %v14668_v36 = vadd.f32 %v5428_v28, %v14388_v30 }
 0x801   :  { %16300 = vst [vmem:[#allocation31_spill] sm:$0xff] %v14659_v52  ;;  %v5732_v7 = vadd.f32 1.0, %v10434_v19  ;;  %v8173_v59 = vmul.f32 -1.442695, %v14662_v12  ;;  %6128 = vmatprep.mubr.f32.mxu0 %v14659_v52 }
 0x802   :  { %10443 = vrcp.f32 %v5731_v61  ;;  %v8174_v39 = vmul.f32 -1.442695, %v14668_v36  ;;  %6129 = vmatmul.mubr.f32.gmra.mrb[252].mxu0 %v14665_v44 }
 0x803   :  { %v10436_v6 = vpop.eup %10435  ;;  %10445 = vrcp.f32 %v5732_v7  ;;  %v5432_v41 = vpop.f32.mrb[6].mxu1 }
 0x804   :  { %v10438_v33 = vpop.eup %10437  ;;  %v5733_v35 = vadd.f32 1.0, %v10436_v6  ;;  %10447 = vpow2.f32 %v8173_v59  ;;  %v14675_v57 = vadd.f32 %v5432_v41, %v14383_v29  ;;  %v5434_v62 = vpop.f32.mrb[7].mxu1 }
 0x805   :  { %v5734_v28 = vadd.f32 1.0, %v10438_v33  ;;  %10449 = vpow2.f32 %v8174_v39  ;;  %v14678_v19 = vadd.f32 %v5434_v62, %v14388_v30 }
 0x806   :  { %10451 = vrcp.f32 %v5733_v35  ;;  %v8175_v61 = vmul.f32 -1.442695, %v14675_v57 }
 0x807   :  { %v10440_v52 = vpop.eup %10439  ;;  %10453 = vrcp.f32 %v5734_v28  ;;  %v8176_v7 = vmul.f32 -1.442695, %v14678_v19  ;;  %v5438_v44 = vpop.f32.mrb[8].mxu1 }
 0x808   :  { %v10442_v18 = vpop.eup %10441  ;;  %v5735_v6 = vadd.f32 1.0, %v10440_v52  ;;  %10455 = vpow2.f32 %v8175_v61  ;;  %v14683_v59 = vadd.f32 %v5438_v44, %v14383_v29  ;;  %v5440_v41 = vpop.f32.mrb[9].mxu1 }
 0x809   :  { %v5736_v33 = vadd.f32 1.0, %v10442_v18  ;;  %10457 = vpow2.f32 %v8176_v7  ;;  %v14686_v39 = vadd.f32 %v5440_v41, %v14388_v30 }
 0x80a   :  { %10459 = vrcp.f32 %v5735_v6  ;;  %v8177_v35 = vmul.f32 -1.442695, %v14683_v59 }
 0x80b   :  { %10461 = vrcp.f32 %v5736_v33  ;;  %v8178_v62 = vmul.f32 -1.442695, %v14686_v39  ;;  %v5444_v28 = vpop.f32.mrb[10].mxu1 }
 0x80c   :  { %v10444_v3 = vpop.eup %10443  ;;  %10463 = vpow2.f32 %v8177_v35  ;;  %v14691_v52 = vadd.f32 %v5444_v28, %v14383_v29  ;;  %v5446_v44 = vpop.f32.mrb[11].mxu1 }
 0x80d   :  { %v10446_v61 = vpop.eup %10445  ;;  %10465 = vpow2.f32 %v8178_v62  ;;  %v14694_v18 = vadd.f32 %v5446_v44, %v14388_v30  ;;  %v14701_v25 = vmul.f32 %v10444_v3, %v14617_v63 }
 0x80e   :  { %v10448_v7 = vpop.eup %10447  ;;  %v14697_v6 = vmul.f32 %v10446_v61, %v14620_v48  ;;  %v8179_v41 = vmul.f32 -1.442695, %v14691_v52 }
 0x80f   :  { %v10450_v33 = vpop.eup %10449  ;;  %16303 = vst [vmem:[#allocation32_spill] sm:$0xff] %v14701_v25  ;;  %v5737_v35 = vadd.f32 1.0, %v10448_v7  ;;  %v8180_v28 = vmul.f32 -1.442695, %v14694_v18  ;;  %v5450_v17 = vpop.f32.mrb[12].mxu1 }
 0x810   :  { %16302 = vst [vmem:[#allocation75_spill] sm:$0xff] %v14697_v6  ;;  %v10452_v31 = vpop.eup %10451  ;;  %v5738_v40 = vadd.f32 1.0, %v10450_v33  ;;  %10467 = vpow2.f32 %v8179_v41  ;;  %v14705_v62 = vadd.f32 %v5450_v17, %v14383_v29  ;;  %v5452_v44 = vpop.f32.mrb[13].mxu1  ;;  %6133 = vmatprep.mubr.f32.mxu0 %v14697_v6 }
 0x811   :  { %v10454_v48 = vpop.eup %10453  ;;  %10469 = vrcp.f32 %v5737_v35  ;;  %v14709_v61 = vadd.f32 %v5452_v44, %v14388_v30  ;;  %6134 = vmatmul.mubr.f32.gmra.mrb[254].mxu0 %v14701_v25  ;;  %v14717_v17 = vmul.f32 %v10452_v31, %v14633_v45 }
 0x812   :  { %v10456_v3 = vpop.eup %10455  ;;  %v14713_v63 = vmul.f32 %v10454_v48, %v14636_v54  ;;  %10471 = vrcp.f32 %v5738_v40  ;;  %v8181_v7 = vmul.f32 -1.442695, %v14705_v62 }
 0x813   :  { %v10458_v41 = vpop.eup %10457  ;;  %16305 = vst [vmem:[#allocation77_spill] sm:$0xff] %v14717_v17  ;;  %v5739_v33 = vadd.f32 1.0, %v10456_v3  ;;  %10473 = vpow2.f32 %v8180_v28  ;;  %v8182_v35 = vmul.f32 -1.442695, %v14709_v61  ;;  %v5456_v6 = vpop.f32.mrb[14].mxu1 }
 0x814   :  { %16304 = vst [vmem:[#allocation33_spill] sm:$0xff] %v14713_v63  ;;  %v10460_v44 = vpop.eup %10459  ;;  %v5740_v26 = vadd.f32 1.0, %v10458_v41  ;;  %10475 = vpow2.f32 %v8181_v7  ;;  %v14721_v25 = vadd.f32 %v5456_v6, %v14383_v29  ;;  %v5458_v54 = vpop.f32.mrb[15].mxu1  ;;  %6138 = vmatprep.mubr.f32.mxu0 %v14713_v63 }
 0x815   :  { %v10462_v40 = vpop.eup %10461  ;;  %10477 = vrcp.f32 %v5739_v33  ;;  %v14725_v48 = vadd.f32 %v5458_v54, %v14388_v30  ;;  %6139 = vmatmul.mubr.f32.gmra.mrb[0].mxu0 %v14717_v17  ;;  %v14733_v6 = vmul.f32 %v10460_v44, %v14643_v43 }
 0x816   :  { %v10464_v31 = vpop.eup %10463  ;;  %v14729_v45 = vmul.f32 %v10462_v40, %v14646_v0  ;;  %10479 = vrcp.f32 %v5740_v26  ;;  %v8183_v28 = vmul.f32 -1.442695, %v14721_v25 }
 0x817   :  { %v10466_v3 = vpop.eup %10465  ;;  %16307 = vst [vmem:[#allocation78_spill] sm:$0xff] %v14733_v6  ;;  %v5741_v7 = vadd.f32 1.0, %v10464_v31  ;;  %10481 = vpow2.f32 %v8182_v35  ;;  %v8184_v41 = vmul.f32 -1.442695, %v14725_v48 }
 0x818   :  { %16306 = vst [vmem:[#allocation96_spill] sm:$0xff] %v14729_v45  ;;  %v5742_v33 = vadd.f32 1.0, %v10466_v3  ;;  %10483 = vpow2.f32 %v8183_v28  ;;  %v5462_v54 = vpop.f32.mrb[16].mxu1  ;;  %6143 = vmatprep.mubr.f32.mxu0 %v14729_v45 }
 0x819   :  { %10485 = vrcp.f32 %v5741_v7  ;;  %v14738_v0 = vadd.f32 %v5462_v54, %v14383_v29  ;;  %v5464_v26 = vpop.f32.mrb[17].mxu1  ;;  %6144 = vmatmul.mubr.f32.gmra.mrb[2].mxu0 %v14733_v6 }
 0x81a   :  { %v10468_v40 = vpop.eup %10467  ;;  %10487 = vrcp.f32 %v5742_v33  ;;  %v14742_v43 = vadd.f32 %v5464_v26, %v14388_v30 }
 0x81b   :  { %v10470_v35 = vpop.eup %10469  ;;  %v5743_v44 = vadd.f32 1.0, %v10468_v40  ;;  %10489 = vpow2.f32 %v8184_v41  ;;  %v8185_v31 = vmul.f32 -1.442695, %v14738_v0 }
 0x81c   :  { %v10472_v28 = vpop.eup %10471  ;;  %v8186_v3 = vmul.f32 -1.442695, %v14742_v43  ;;  %v14750_v33 = vmul.f32 %v10470_v35, %v14662_v12 }
 0x81d   :  { %v10474_v7 = vpop.eup %10473  ;;  %v14747_v54 = vmul.f32 %v10472_v28, %v14668_v36  ;;  %10491 = vrcp.f32 %v5743_v44  ;;  %v5468_v45 = vpop.f32.mrb[18].mxu1 }
 0x81e   :  { %v10476_v6 = vpop.eup %10475  ;;  %16309 = vst [vmem:[#allocation60_spill] sm:$0xff] %v14750_v33  ;;  %v5744_v26 = vadd.f32 1.0, %v10474_v7  ;;  %10493 = vpow2.f32 %v8185_v31  ;;  %v14753_v40 = vadd.f32 %v5468_v45, %v14383_v29  ;;  %v5470_v41 = vpop.f32.mrb[19].mxu1 }
 0x81f   :  { %16308 = vst [vmem:[#allocation34_spill] sm:$0xff] %v14747_v54  ;;  %v10478_v63 = vpop.eup %10477  ;;  %v5745_v17 = vadd.f32 1.0, %v10476_v6  ;;  %10495 = vpow2.f32 %v8186_v3  ;;  %v14756_v37 = vadd.f32 %v5470_v41, %v14388_v30  ;;  %6148 = vmatprep.mubr.f32.mxu0 %v14747_v54 }
 0x820   :  { %v10480_v36 = vpop.eup %10479  ;;  %10497 = vrcp.f32 %v5744_v26  ;;  %v8187_v44 = vmul.f32 -1.442695, %v14753_v40  ;;  %6149 = vmatmul.mubr.f32.gmra.mrb[4].mxu0 %v14750_v33  ;;  %v14766_v28 = vmul.f32 %v10478_v63, %v14675_v57 }
 0x821   :  { %v10482_v12 = vpop.eup %10481  ;;  %v14762_v35 = vmul.f32 %v10480_v36, %v14678_v19  ;;  %10499 = vrcp.f32 %v5745_v17  ;;  %v8188_v45 = vmul.f32 -1.442695, %v14756_v37  ;;  %v5474_v6 = vpop.f32.mrb[20].mxu1 }
 0x822   :  { %v10484_v31 = vpop.eup %10483  ;;  %16311 = vst [vmem:[#allocation80_spill] sm:$0xff] %v14766_v28  ;;  %v5746_v3 = vadd.f32 1.0, %v10482_v12  ;;  %10501 = vpow2.f32 %v8187_v44  ;;  %v14769_v7 = vadd.f32 %v5474_v6, %v14383_v29  ;;  %v5476_v26 = vpop.f32.mrb[21].mxu1 }
 0x823   :  { %16310 = vst [vmem:[#allocation61_spill] sm:$0xff] %v14762_v35  ;;  %v10486_v41 = vpop.eup %10485  ;;  %v5747_v54 = vadd.f32 1.0, %v10484_v31  ;;  %10503 = vpow2.f32 %v8188_v45  ;;  %v14772_v19 = vadd.f32 %v5476_v26, %v14388_v30  ;;  %6153 = vmatprep.mubr.f32.mxu0 %v14762_v35 }
 0x824   :  { %v10488_v17 = vpop.eup %10487  ;;  %10505 = vrcp.f32 %v5746_v3  ;;  %v8189_v36 = vmul.f32 -1.442695, %v14769_v7  ;;  %6154 = vmatmul.mubr.f32.gmra.mrb[6].mxu0 %v14766_v28  ;;  %v14782_v45 = vmul.f32 %v10486_v41, %v14683_v59 }
 0x825   :  { %v10490_v57 = vpop.eup %10489  ;;  %v14778_v63 = vmul.f32 %v10488_v17, %v14686_v39  ;;  %10507 = vrcp.f32 %v5747_v54  ;;  %v8190_v44 = vmul.f32 -1.442695, %v14772_v19  ;;  %v5480_v12 = vpop.f32.mrb[22].mxu1 }
 0x826   :  { %16313 = vst [vmem:[#allocation35_spill] sm:$0xff] %v14782_v45  ;;  %v5748_v6 = vadd.f32 1.0, %v10490_v57  ;;  %10509 = vpow2.f32 %v8189_v36  ;;  %v14785_v31 = vadd.f32 %v5480_v12, %v14383_v29  ;;  %v5482_v3 = vpop.f32.mrb[23].mxu1 }
 0x827   :  { %16312 = vst [vmem:[#allocation97_spill] sm:$0xff] %v14778_v63  ;;  %v10492_v26 = vpop.eup %10491  ;;  %10511 = vpow2.f32 %v8190_v44  ;;  %v14788_v35 = vadd.f32 %v5482_v3, %v14388_v30  ;;  %6158 = vmatprep.mubr.f32.mxu0 %v14778_v63 }
 0x828   :  { %v10494_v39 = vpop.eup %10493  ;;  %10513 = vrcp.f32 %v5748_v6  ;;  %v8191_v54 = vmul.f32 -1.442695, %v14785_v31  ;;  %6159 = vmatmul.mubr.f32.gmra.mrb[8].mxu0 %v14782_v45 }
 0x829   :  { %v10496_v59 = vpop.eup %10495  ;;  %v5749_v41 = vadd.f32 1.0, %v10494_v39  ;;  %v8192_v17 = vmul.f32 -1.442695, %v14788_v35  ;;  %v5486_v36 = vpop.f32.mrb[24].mxu1  ;;  %v14804_v39 = vmul.f32 %v10492_v26, %v14691_v52 }
 0x82a   :  { %v10498_v57 = vpop.eup %10497  ;;  %v5750_v12 = vadd.f32 1.0, %v10496_v59  ;;  %10515 = vpow2.f32 %v8191_v54  ;;  %v14795_v44 = vadd.f32 %v5486_v36, %v14383_v29  ;;  %v5488_v3 = vpop.f32.mrb[25].mxu1 }
 0x82b   :  { %v10500_v28 = vpop.eup %10499  ;;  %v14798_v63 = vmul.f32 %v10498_v57, %v14694_v18  ;;  %10517 = vrcp.f32 %v5749_v41  ;;  %v14801_v6 = vadd.f32 %v5488_v3, %v14388_v30 }
 0x82c   :  { %v10502_v45 = vpop.eup %10501  ;;  %10519 = vrcp.f32 %v5750_v12  ;;  %v8193_v59 = vmul.f32 -1.442695, %v14795_v44  ;;  %v14820_v12 = vmul.f32 %v10500_v28, %v14705_v62 }
 0x82d   :  { %16314 = vst [vmem:[#allocation98_spill] sm:$0xff] %v14798_v63  ;;  %v10504_v54 = vpop.eup %10503  ;;  %v5751_v33 = vadd.f32 1.0, %v10502_v45  ;;  %10521 = vpow2.f32 %v8192_v17  ;;  %v8194_v36 = vmul.f32 -1.442695, %v14801_v6  ;;  %v5492_v13 = vpop.f32.mrb[26].mxu1  ;;  %6163 = vmatprep.mubr.f32.mxu0 %v14798_v63 }
 0x82e   :  { %v10506_v18 = vpop.eup %10505  ;;  %v5752_v41 = vadd.f32 1.0, %v10504_v54  ;;  %10523 = vpow2.f32 %v8193_v59  ;;  %v14810_v57 = vadd.f32 %v5492_v13, %v14383_v29  ;;  %v5494_v3 = vpop.f32.mrb[27].mxu1  ;;  %6164 = vmatmul.mubr.f32.gmra.mrb[10].mxu0 %v14804_v39  ;;  %16316 = vst [vmem:[#allocation36_spill] sm:$0xff] %v14820_v12 }
 0x82f   :  { %v10508_v52 = vpop.eup %10507  ;;  %v14814_v26 = vmul.f32 %v10506_v18, %v14709_v61  ;;  %10525 = vrcp.f32 %v5751_v33  ;;  %v14817_v45 = vadd.f32 %v5494_v3, %v14388_v30 }
 0x830   :  { %v10510_v17 = vpop.eup %10509  ;;  %10527 = vrcp.f32 %v5752_v41  ;;  %v8195_v59 = vmul.f32 -1.442695, %v14810_v57 }
 0x831   :  { %16315 = vst [vmem:[#allocation79_spill] sm:$0xff] %v14814_v26  ;;  %v10512_v13 = vpop.eup %10511  ;;  %v5753_v54 = vadd.f32 1.0, %v10510_v17  ;;  %10529 = vpow2.f32 %v8194_v36  ;;  %v8196_v63 = vmul.f32 -1.442695, %v14817_v45  ;;  %6168 = vmatprep.mubr.f32.mxu0 %v14814_v26  ;;  %v14833_v36 = vmul.f32 %v10508_v52, %v14721_v25 }
 0x832   :  { %v10514_v61 = vpop.eup %10513  ;;  %v5754_v18 = vadd.f32 1.0, %v10512_v13  ;;  %10531 = vpow2.f32 %v8195_v59  ;;  %v5498_v33 = vpop.f32.mrb[28].mxu1  ;;  %6169 = vmatmul.mubr.f32.gmra.mrb[12].mxu0 %v14820_v12 }
 0x833   :  { %v14827_v3 = vmul.f32 %v10514_v61, %v14725_v48  ;;  %10533 = vrcp.f32 %v5753_v54  ;;  %v14830_v62 = vadd.f32 %v5498_v33, %v14383_v29  ;;  %v5500_v28 = vpop.f32.mrb[29].mxu1  ;;  %16318 = vst [vmem:[#allocation63_spill] sm:$0xff] %v14833_v36 }
 0x834   :  { %v10516_v41 = vpop.eup %10515  ;;  %10535 = vrcp.f32 %v5754_v18  ;;  %v14836_v17 = vadd.f32 %v5500_v28, %v14388_v30 }
 0x835   :  { %16317 = vst [vmem:[#allocation62_spill] sm:$0xff] %v14827_v3  ;;  %v10518_v59 = vpop.eup %10517  ;;  %v5755_v13 = vadd.f32 1.0, %v10516_v41  ;;  %10537 = vpow2.f32 %v8196_v63  ;;  %v8197_v26 = vmul.f32 -1.442695, %v14830_v62  ;;  %6173 = vmatprep.mubr.f32.mxu0 %v14827_v3 }
 0x836   :  { %v10520_v48 = vpop.eup %10519  ;;  %v8198_v54 = vmul.f32 -1.442695, %v14836_v17  ;;  %v5504_v61 = vpop.f32.mrb[30].mxu1  ;;  %6174 = vmatmul.mubr.f32.gmra.mrb[14].mxu0 %v14833_v36  ;;  %v14849_v28 = vmul.f32 %v10518_v59, %v14738_v0 }
 0x837   :  { %v10522_v33 = vpop.eup %10521  ;;  %v14843_v25 = vmul.f32 %v10520_v48, %v14742_v43  ;;  %10539 = vrcp.f32 %v5755_v13  ;;  %v14846_v52 = vadd.f32 %v5504_v61, %v14383_v29  ;;  %v5506_v18 = vpop.f32.mrb[31].mxu1 }
 0x838   :  { %v10524_v63 = vpop.eup %10523  ;;  %v5756_v41 = vadd.f32 1.0, %v10522_v33  ;;  %10541 = vpow2.f32 %v8197_v26  ;;  %v14852_v3 = vadd.f32 %v5506_v18, %v14388_v30 }
 0x839   :  { %v10526_v12 = vpop.eup %10525  ;;  %v5757_v36 = vadd.f32 1.0, %v10524_v63  ;;  %10543 = vpow2.f32 %v8198_v54  ;;  %v8199_v43 = vmul.f32 -1.442695, %v14846_v52  ;;  %6178 = vmatprep.mubr.f32.mxu0 %v14843_v25 }
 0x83a   :  { %v10528_v13 = vpop.eup %10527  ;;  %10545 = vrcp.f32 %v5756_v41  ;;  %v8200_v29 = vmul.f32 -1.442695, %v14852_v3  ;;  %6179 = vmatmul.mubr.f32.gmra.mrb[16].mxu0 %v14849_v28  ;;  %v14862_v26 = vmul.f32 %v10526_v12, %v14753_v40 }
 0x83b   :  { %v10530_v0 = vpop.eup %10529  ;;  %v14859_v59 = vmul.f32 %v10528_v13, %v14756_v37  ;;  %10547 = vrcp.f32 %v5757_v36 }
 0x83c   :  { %v10532_v30 = vpop.eup %10531  ;;  %v5758_v48 = vadd.f32 1.0, %v10530_v0  ;;  %10549 = vpow2.f32 %v8199_v43 }
 0x83d   :  { %v10534_v54 = vpop.eup %10533  ;;  %v5759_v61 = vadd.f32 1.0, %v10532_v30  ;;  %10551 = vpow2.f32 %v8200_v29  ;;  %6183 = vmatprep.mubr.f32.mxu0 %v14859_v59 }
 0x83e   :  { %v10536_v33 = vpop.eup %10535  ;;  %10553 = vrcp.f32 %v5758_v48  ;;  %6184 = vmatmul.mubr.f32.gmra.mrb[18].mxu0 %v14862_v26  ;;  %v14870_v36 = vmul.f32 %v10534_v54, %v14769_v7 }
 0x83f   :  { %v10538_v18 = vpop.eup %10537  ;;  %v14867_v37 = vmul.f32 %v10536_v33, %v14772_v19  ;;  %10555 = vrcp.f32 %v5759_v61 }
 0x840   :  { %v5760_v40 = vadd.f32 1.0, %v10538_v18 }
 0x841   :  { %v10540_v12 = vpop.eup %10539  ;;  %6188 = vmatprep.mubr.f32.mxu0 %v14867_v37 }
 0x842   :  { %v10542_v63 = vpop.eup %10541  ;;  %10557 = vrcp.f32 %v5760_v40  ;;  %6189 = vmatmul.mubr.f32.gmra.mrb[20].mxu0 %v14870_v36  ;;  %v14878_v30 = vmul.f32 %v10540_v12, %v14785_v31 }
 0x843   :  { %v10544_v41 = vpop.eup %10543  ;;  %v5761_v43 = vadd.f32 1.0, %v10542_v63 }
 0x844   :  { %v10546_v13 = vpop.eup %10545  ;;  %v5762_v29 = vadd.f32 1.0, %v10544_v41 }
 0x845   :  { %v10548_v0 = vpop.eup %10547  ;;  %v14875_v19 = vmul.f32 %v10546_v13, %v14788_v35  ;;  %10559 = vrcp.f32 %v5761_v43 }
 0x846   :  { %v10550_v7 = vpop.eup %10549  ;;  %10561 = vrcp.f32 %v5762_v29  ;;  %v14886_v35 = vmul.f32 %v10548_v0, %v14795_v44 }
 0x847   :  { %v10552_v48 = vpop.eup %10551  ;;  %v5763_v54 = vadd.f32 1.0, %v10550_v7  ;;  %6193 = vmatprep.mubr.f32.mxu0 %v14875_v19 }
 0x848   :  { %v10554_v61 = vpop.eup %10553  ;;  %v5764_v33 = vadd.f32 1.0, %v10552_v48  ;;  %6194 = vmatmul.mubr.f32.gmra.mrb[22].mxu0 %v14878_v30 }
 0x849   :  { %v14883_v18 = vmul.f32 %v10554_v61, %v14801_v6  ;;  %10563 = vrcp.f32 %v5763_v54  ;;  %v10556_v40 = vpop.eup %10555 }
 0x84a   :  { %10565 = vrcp.f32 %v5764_v33  ;;  %v14894_v63 = vmul.f32 %v10556_v40, %v14810_v57 }
 0x84b   :  { %6198 = vmatprep.mubr.f32.mxu0 %v14883_v18 }
 0x84c   :  { %v10558_v31 = vpop.eup %10557  ;;  %6199 = vmatmul.mubr.f32.gmra.mrb[24].mxu0 %v14886_v35 }
 0x84d   :  { %v14891_v12 = vmul.f32 %v10558_v31, %v14817_v45 }
 0x84f   :  { %16319 = vst [vmem:[#allocation37_spill] sm:$0xff] %v14891_v12  ;;  %v10560_v41 = vpop.eup %10559  ;;  %6203 = vmatprep.mubr.f32.mxu0 %v14891_v12 }
 0x850   :  { %v10562_v6 = vpop.eup %10561  ;;  %6204 = vmatmul.mubr.f32.gmra.mrb[26].mxu0 %v14894_v63  ;;  %v14902_v43 = vmul.f32 %v10560_v41, %v14830_v62  ;;  %v10961_v62 = vld [vmem:[%s15570_s6] sm:$0xff] }
 0x851   :  { %v14899_v44 = vmul.f32 %v10562_v6, %v14836_v17  ;;  %v5992_v17 = vsub.s32 6, %v16285_v38 }
 0x852   :  { %16321 = vst [vmem:[#allocation99_spill] sm:$0xff] %v14902_v43 }
 0x853   :  { %16320 = vst [vmem:[#allocation81_spill] sm:$0xff] %v14899_v44  ;;  %v10564_v13 = vpop.eup %10563  ;;  %6208 = vmatprep.mubr.f32.mxu0 %v14899_v44  ;;  %v14918_v0 = vrot.slane %v10961_v62, %v5992_v17 }
 0x854   :  { %v10566_v45 = vpop.eup %10565  ;;  %6209 = vmatmul.mubr.f32.gmra.mrb[28].mxu0 %v14902_v43  ;;  %v14910_v29 = vmul.f32 %v10564_v13, %v14846_v52 }
 0x855   :  { %v14907_v57 = vmul.f32 %v10566_v45, %v14852_v3 }
 0x856   :  { %16323 = vst [vmem:[#allocation82_spill] sm:$0xff] %v14910_v29 }
 0x857   :  { %16322 = vst [vmem:[#allocation100_spill] sm:$0xff] %v14907_v57  ;;  %6213 = vmatprep.mubr.f32.mxu0 %v14907_v57 }
 0x858   :  { %6214 = vmatmul.mubr.f32.gmra.mrb[30].mxu0 %v14910_v29 }
 0x88d   :  { %v6060_v7 = vpop.f32.mrb[224].mxu0 }
 0x88e   :  { %v6061_v48 = vadd.f32 %v6060_v7, %v14918_v0  ;;  %v6062_v3 = vpop.f32.mrb[225].mxu0 }
 0x890   :  { %v8233_v54 = vmul.f32 -1.442695, %v6061_v48 }
 0x892   :  { %v6065_v61 = vpop.f32.mrb[226].mxu0  ;;  %10567 = vpow2.f32 %v8233_v54 }
 0x893   :  { %v6066_v52 = vadd.f32 %v6065_v61, %v14918_v0  ;;  %v6067_v33 = vpop.f32.mrb[227].mxu0 }
 0x895   :  { %v8234_v40 = vmul.f32 -1.442695, %v6066_v52 }
 0x896   :  { %v6070_v31 = vpop.f32.mrb[228].mxu0 }
 0x897   :  { %10569 = vpow2.f32 %v8234_v40  ;;  %v6071_v38 = vadd.f32 %v6070_v31, %v14918_v0  ;;  %v6072_v41 = vpop.f32.mrb[229].mxu0 }
 0x899   :  { %v8235_v6 = vmul.f32 -1.442695, %v6071_v38 }
 0x89b   :  { %10571 = vpow2.f32 %v8235_v6 }
 0x89c   :  { %v10568_v13 = vpop.eup %10567 }
 0x89d   :  { %v6075_v45 = vpop.f32.mrb[230].mxu0  ;;  %v6315_v17 = vadd.f32 1.0, %v10568_v13 }
 0x89e   :  { %v6076_v62 = vadd.f32 %v6075_v45, %v14918_v0  ;;  %v6077_v7 = vpop.f32.mrb[231].mxu0 }
 0x89f   :  { %10573 = vrcp.f32 %v6315_v17 }
 0x8a0   :  { %v8236_v3 = vmul.f32 -1.442695, %v6076_v62 }
 0x8a1   :  { %v10570_v54 = vpop.eup %10569  ;;  %v6080_v29 = vpop.f32.mrb[232].mxu0 }
 0x8a2   :  { %v6316_v61 = vadd.f32 1.0, %v10570_v54  ;;  %10575 = vpow2.f32 %v8236_v3  ;;  %v6081_v33 = vadd.f32 %v6080_v29, %v14918_v0  ;;  %v6082_v40 = vpop.f32.mrb[233].mxu0 }
 0x8a4   :  { %10577 = vrcp.f32 %v6316_v61  ;;  %v8237_v31 = vmul.f32 -1.442695, %v6081_v33 }
 0x8a5   :  { %v10572_v41 = vpop.eup %10571  ;;  %v6085_v57 = vpop.f32.mrb[234].mxu0 }
 0x8a6   :  { %v6317_v6 = vadd.f32 1.0, %v10572_v41  ;;  %10579 = vpow2.f32 %v8237_v31  ;;  %v14926_v13 = vadd.f32 %v6085_v57, %v14918_v0  ;;  %v6087_v45 = vpop.f32.mrb[235].mxu0 }
 0x8a8   :  { %10581 = vrcp.f32 %v6317_v6  ;;  %v8238_v17 = vmul.f32 -1.442695, %v14926_v13 }
 0x8a9   :  { %v10574_v7 = vpop.eup %10573 }
 0x8aa   :  { %10583 = vpow2.f32 %v8238_v17  ;;  %v6411_v54 = vmul.f32 %v10574_v7, %v6061_v48 }
 0x8ac   :  { %v10576_v3 = vpop.eup %10575  ;;  %v6090_v43 = vpop.f32.mrb[236].mxu0  ;;  %8269 = vmatmul.mubr.msk.f32.vlgmr.msra.gmra.mrb[32].mxu1 %vm2171_vm4, %v6411_v54 }
 0x8ad   :  { %v6318_v29 = vadd.f32 1.0, %v10576_v3  ;;  %v14930_v61 = vadd.f32 %v6090_v43, %v14918_v0  ;;  %v6092_v40 = vpop.f32.mrb[237].mxu0  ;;  %6622 = vmatprep.mubr.f32.mxu1 %v15919_v27 }
 0x8ae   :  { %v10578_v31 = vpop.eup %10577 }
 0x8af   :  { %v6412_v57 = vmul.f32 %v10578_v31, %v6066_v52  ;;  %10585 = vrcp.f32 %v6318_v29  ;;  %v8239_v41 = vmul.f32 -1.442695, %v14930_v61 }
 0x8b0   :  { %v10580_v6 = vpop.eup %10579  ;;  %v6095_v45 = vpop.f32.mrb[238].mxu0 }
 0x8b1   :  { %v6319_v17 = vadd.f32 1.0, %v10580_v6  ;;  %10587 = vpow2.f32 %v8239_v41  ;;  %v14936_v48 = vadd.f32 %v6095_v45, %v14918_v0  ;;  %v6097_v7 = vpop.f32.mrb[239].mxu0  ;;  %8270 = vmatmul.mubr.msk.f32.gmra.mrb[34].mxu1 %vm2171_vm4, %v6412_v57 }
 0x8b2   :  { %v10582_v43 = vpop.eup %10581  ;;  %6628 = vmatprep.mubr.f32.mxu1 %v15919_v27 }
 0x8b3   :  { %v6413_v54 = vmul.f32 %v10582_v43, %v6071_v38  ;;  %10589 = vrcp.f32 %v6319_v17  ;;  %v8240_v52 = vmul.f32 -1.442695, %v14936_v48 }
 0x8b4   :  { %v10584_v3 = vpop.eup %10583  ;;  %v6100_v29 = vpop.f32.mrb[240].mxu0 }
 0x8b5   :  { %v6320_v40 = vadd.f32 1.0, %v10584_v3  ;;  %10591 = vpow2.f32 %v8240_v52  ;;  %v14942_v31 = vadd.f32 %v6100_v29, %v14918_v0  ;;  %v6102_v41 = vpop.f32.mrb[241].mxu0  ;;  %8271 = vmatmul.mubr.msk.f32.gmra.mrb[36].mxu1 %vm2171_vm4, %v6413_v54 }
 0x8b6   :  { %6634 = vmatprep.mubr.f32.mxu1 %v15919_v27 }
 0x8b7   :  { %10593 = vrcp.f32 %v6320_v40  ;;  %v8241_v57 = vmul.f32 -1.442695, %v14942_v31 }
 0x8b9   :  { %v10586_v6 = vpop.eup %10585  ;;  %10595 = vpow2.f32 %v8241_v57 }
 0x8ba   :  { %v6414_v38 = vmul.f32 %v10586_v6, %v6076_v62 }
 0x8bb   :  { %v10588_v45 = vpop.eup %10587  ;;  %v6105_v17 = vpop.f32.mrb[242].mxu0 }
 0x8bc   :  { %v6321_v7 = vadd.f32 1.0, %v10588_v45  ;;  %v14948_v43 = vadd.f32 %v6105_v17, %v14918_v0  ;;  %v6107_v52 = vpop.f32.mrb[243].mxu0  ;;  %8272 = vmatmul.mubr.msk.f32.gmra.mrb[38].mxu1 %vm2171_vm4, %v6414_v38 }
 0x8bd   :  { %v10590_v3 = vpop.eup %10589  ;;  %6640 = vmatprep.mubr.f32.mxu1 %v15919_v27 }
 0x8be   :  { %v6415_v54 = vmul.f32 %v10590_v3, %v6081_v33  ;;  %10597 = vrcp.f32 %v6321_v7  ;;  %v8242_v29 = vmul.f32 -1.442695, %v14948_v43 }
 0x8bf   :  { %v10592_v40 = vpop.eup %10591  ;;  %v6110_v41 = vpop.f32.mrb[244].mxu0 }
 0x8c0   :  { %v6322_v57 = vadd.f32 1.0, %v10592_v40  ;;  %10599 = vpow2.f32 %v8242_v29  ;;  %v14954_v62 = vadd.f32 %v6110_v41, %v14918_v0  ;;  %v6112_v6 = vpop.f32.mrb[245].mxu0  ;;  %8273 = vmatmul.mubr.msk.f32.gmra.mrb[40].mxu1 %vm2171_vm4, %v6415_v54  ;;  %v7322_v40 = vld [vmem:[%s15569_s5 + $0x8] sm:$0xff] }
 0x8c1   :  { %v10594_v45 = vpop.eup %10593  ;;  %6646 = vmatprep.mubr.f32.mxu1 %v15919_v27 }
 0x8c2   :  { %v6416_v38 = vmul.f32 %v10594_v45, %v14926_v13  ;;  %10601 = vrcp.f32 %v6322_v57  ;;  %v8243_v33 = vmul.f32 -1.442695, %v14954_v62  ;;  %v7321_v13 = vld [vmem:[%s15569_s5] sm:$0xff] }
 0x8c3   :  { %v10596_v17 = vpop.eup %10595  ;;  %v8720_v6 = vpack.c.bf16 %v7322_v40, %v7321_v13  ;;  %v7325_v13 = vld [vmem:[%s15569_s5 + $0x20] sm:$0xff]  ;;  %v7326_v40 = vld [vmem:[%s15569_s5 + $0x28] sm:$0xff] }
 0x8c4   :  { %v6323_v7 = vadd.f32 1.0, %v10596_v17  ;;  %10603 = vpow2.f32 %v8243_v33  ;;  %8274 = vmatmul.mubr.msk.f32.gmra.mrb[42].mxu1 %vm2171_vm4, %v6416_v38  ;;  %v7323_v33 = vld [vmem:[%s15569_s5 + $0x10] sm:$0xff]  ;;  %v7324_v17 = vld [vmem:[%s15569_s5 + $0x18] sm:$0xff] }
 0x8c5   :  { %6652 = vmatprep.mubr.f32.mxu1 %v15919_v27  ;;  %8721 = vmatpush1.bf16.msra.mxu0 %v8720_v6 }
 0x8c6   :  { %10605 = vrcp.f32 %v6323_v7  ;;  %v6115_v52 = vpop.f32.mrb[246].mxu0  ;;  %8722 = vmatprep.subr.bf16.mxu0 %v15901_v46 }
 0x8c7   :  { %v14963_v3 = vadd.f32 %v6115_v52, %v14918_v0  ;;  %v6117_v54 = vpop.f32.mrb[247].mxu0 }
 0x8c8   :  { %v10598_v29 = vpop.eup %10597 }
 0x8c9   :  { %v6417_v41 = vmul.f32 %v10598_v29, %v14930_v61  ;;  %v8244_v57 = vmul.f32 -1.442695, %v14963_v3  ;;  %v8723_v61 = vpack.c.bf16 %v7324_v17, %v7323_v33  ;;  %v7327_v17 = vld [vmem:[%s15569_s5 + $0x30] sm:$0xff] }
 0x8ca   :  { %v10600_v45 = vpop.eup %10599  ;;  %v6120_v38 = vpop.f32.mrb[248].mxu0 }
 0x8cb   :  { %v6324_v7 = vadd.f32 1.0, %v10600_v45  ;;  %10607 = vpow2.f32 %v8244_v57  ;;  %v14980_v52 = vadd.f32 %v6120_v38, %v14918_v0  ;;  %v6122_v54 = vpop.f32.mrb[249].mxu0  ;;  %8275 = vmatmul.mubr.msk.f32.gmra.mrb[44].mxu1 %vm2171_vm4, %v6417_v41  ;;  %8724 = vmatpush1.bf16.msra.mxu0 %v8723_v61  ;;  %v8726_v38 = vpack.c.bf16 %v7326_v40, %v7325_v13 }
 0x8cc   :  { %v10602_v29 = vpop.eup %10601  ;;  %6658 = vmatprep.mubr.f32.mxu1 %v15919_v27  ;;  %8725 = vmatprep.subr.bf16.mxu0 %v15901_v46 }
 0x8cd   :  { %v6418_v57 = vmul.f32 %v10602_v29, %v14936_v48  ;;  %10609 = vrcp.f32 %v6324_v7  ;;  %v8245_v41 = vmul.f32 -1.442695, %v14980_v52  ;;  %v7328_v48 = vld [vmem:[%s15569_s5 + $0x38] sm:$0xff] }
 0x8ce   :  { %v10604_v6 = vpop.eup %10603  ;;  %v8729_v13 = vpack.c.bf16 %v7328_v48, %v7327_v17 }
 0x8cf   :  { %v6325_v45 = vadd.f32 1.0, %v10604_v6  ;;  %10611 = vpow2.f32 %v8245_v41  ;;  %8276 = vmatmul.mubr.msk.f32.gmra.mrb[46].mxu1 %vm2171_vm4, %v6418_v57  ;;  %8727 = vmatpush1.bf16.msra.mxu0 %v8726_v38  ;;  %v7330_v57 = vld [vmem:[%s15569_s5 + $0x48] sm:$0xff] }
 0x8d0   :  { %v10606_v33 = vpop.eup %10605  ;;  %6664 = vmatprep.mubr.f32.mxu1 %v15919_v27  ;;  %8728 = vmatprep.subr.bf16.mxu0 %v15901_v46 }
 0x8d1   :  { %v6419_v7 = vmul.f32 %v10606_v33, %v14942_v31  ;;  %10613 = vrcp.f32 %v6325_v45  ;;  %v6125_v54 = vpop.f32.mrb[250].mxu0  ;;  %v7329_v31 = vld [vmem:[%s15569_s5 + $0x40] sm:$0xff] }
 0x8d2   :  { %v15004_v61 = vadd.f32 %v6125_v54, %v14918_v0  ;;  %v6127_v29 = vpop.f32.mrb[251].mxu0  ;;  %v8732_v48 = vpack.c.bf16 %v7330_v57, %v7329_v31  ;;  %v7333_v57 = vld [vmem:[%s15569_s5 + $0x60] sm:$0xff] }
 0x8d3   :  { %8277 = vmatmul.mubr.msk.f32.gmra.mrb[48].mxu1 %vm2171_vm4, %v6419_v7  ;;  %8730 = vmatpush1.bf16.msra.mxu0 %v8729_v13  ;;  %v7331_v29 = vld [vmem:[%s15569_s5 + $0x50] sm:$0xff] }
 0x8d4   :  { %v8246_v40 = vmul.f32 -1.442695, %v15004_v61  ;;  %6670 = vmatprep.mubr.f32.mxu1 %v15919_v27  ;;  %8731 = vmatprep.subr.bf16.mxu0 %v15901_v46 }
 0x8d5   :  { %v10608_v41 = vpop.eup %10607  ;;  %v6130_v6 = vpop.f32.mrb[252].mxu0 }
 0x8d6   :  { %v6326_v45 = vadd.f32 1.0, %v10608_v41  ;;  %10615 = vpow2.f32 %v8246_v40  ;;  %v15017_v38 = vadd.f32 %v6130_v6, %v14918_v0  ;;  %v6132_v33 = vpop.f32.mrb[253].mxu0  ;;  %v7332_v40 = vld [vmem:[%s15569_s5 + $0x58] sm:$0xff] }
 0x8d7   :  { %v10610_v17 = vpop.eup %10609  ;;  %8733 = vmatpush1.bf16.msra.mxu0 %v8732_v48  ;;  %v7336_v48 = vld [vmem:[%s15569_s5 + $0x78] sm:$0xff] }
 0x8d8   :  { %v6420_v7 = vmul.f32 %v10610_v17, %v14948_v43  ;;  %10617 = vrcp.f32 %v6326_v45  ;;  %v8247_v54 = vmul.f32 -1.442695, %v15017_v38  ;;  %v8735_v43 = vpack.c.bf16 %v7332_v40, %v7331_v29  ;;  %8734 = vmatprep.subr.bf16.mxu0 %v15901_v46  ;;  %v7334_v45 = vld [vmem:[%s15569_s5 + $0x68] sm:$0xff] }
 0x8d9   :  { %v10612_v41 = vpop.eup %10611  ;;  %v8738_v33 = vpack.c.bf16 %v7334_v45, %v7333_v57 }
 0x8da   :  { %v6327_v6 = vadd.f32 1.0, %v10612_v41  ;;  %10619 = vpow2.f32 %v8247_v54  ;;  %8278 = vmatmul.mubr.msk.f32.gmra.mrb[50].mxu1 %vm2171_vm4, %v6420_v7 }
 0x8db   :  { %v10614_v13 = vpop.eup %10613  ;;  %6676 = vmatprep.mubr.f32.mxu1 %v15919_v27  ;;  %8736 = vmatpush1.bf16.msra.mxu0 %v8735_v43  ;;  %v7338_v43 = vld [vmem:[%s15569_s5 + $0x88] sm:$0xff] }
 0x8dc   :  { %v6421_v31 = vmul.f32 %v10614_v13, %v14954_v62  ;;  %10621 = vrcp.f32 %v6327_v6  ;;  %8737 = vmatprep.subr.bf16.mxu0 %v15901_v46  ;;  %v7335_v62 = vld [vmem:[%s15569_s5 + $0x70] sm:$0xff]  ;;  %v7337_v13 = vld [vmem:[%s15569_s5 + $0x80] sm:$0xff] }
 0x8dd   :  { %v8741_v40 = vpack.c.bf16 %v7336_v48, %v7335_v62  ;;  %v8744_v62 = vpack.c.bf16 %v7338_v43, %v7337_v13  ;;  %v7341_v13 = vld [vmem:[%s15569_s5 + $0xa0] sm:$0xff]  ;;  %v7342_v43 = vld [vmem:[%s15569_s5 + $0xa8] sm:$0xff] }
 0x8de   :  { %8279 = vmatmul.mubr.msk.f32.gmra.mrb[52].mxu1 %vm2171_vm4, %v6421_v31 }
 0x8df   :  { %6682 = vmatprep.mubr.f32.mxu1 %v15919_v27  ;;  %8739 = vmatpush1.bf16.msra.mxu0 %v8738_v33 }
 0x8e0   :  { %v10616_v17 = vpop.eup %10615  ;;  %8740 = vmatprep.subr.bf16.mxu0 %v15901_v46 }
 0x8e1   :  { %v6328_v7 = vadd.f32 1.0, %v10616_v17 }
 0x8e2   :  { %v10618_v54 = vpop.eup %10617 }
 0x8e3   :  { %v6422_v29 = vmul.f32 %v10618_v54, %v14963_v3  ;;  %10623 = vrcp.f32 %v6328_v7  ;;  %8742 = vmatpush1.bf16.msra.mxu0 %v8741_v40  ;;  %v7339_v7 = vld [vmem:[%s15569_s5 + $0x90] sm:$0xff]  ;;  %v7340_v54 = vld [vmem:[%s15569_s5 + $0x98] sm:$0xff] }
 0x8e4   :  { %v10620_v41 = vpop.eup %10619  ;;  %v6135_v6 = vpop.f32.mrb[254].mxu0  ;;  %8743 = vmatprep.subr.bf16.mxu0 %v15901_v46 }
 0x8e5   :  { %v6329_v31 = vadd.f32 1.0, %v10620_v41  ;;  %v15056_v57 = vadd.f32 %v6135_v6, %v14918_v0  ;;  %v6137_v3 = vpop.f32.mrb[255].mxu0  ;;  %8280 = vmatmul.mubr.msk.f32.gmra.mrb[54].mxu1 %vm2171_vm4, %v6422_v29  ;;  %v8747_v41 = vpack.c.bf16 %v7340_v54, %v7339_v7  ;;  %v7344_v7 = vld [vmem:[%s15569_s5 + $0xb8] sm:$0xff] }
 0x8e6   :  { %v10622_v45 = vpop.eup %10621  ;;  %6688 = vmatprep.mubr.f32.mxu1 %v15919_v27 }
 0x8e7   :  { %v6423_v33 = vmul.f32 %v10622_v45, %v14980_v52  ;;  %10625 = vrcp.f32 %v6329_v31  ;;  %v8248_v17 = vmul.f32 -1.442695, %v15056_v57  ;;  %8745 = vmatpush1.bf16.msra.mxu0 %v8744_v62  ;;  %v8750_v62 = vpack.c.bf16 %v7342_v43, %v7341_v13 }
 0x8e8   :  { %v6140_v48 = vpop.f32.mrb[0].mxu0  ;;  %8746 = vmatprep.subr.bf16.mxu0 %v15901_v46 }
 0x8e9   :  { %10627 = vpow2.f32 %v8248_v17  ;;  %v15070_v29 = vadd.f32 %v6140_v48, %v14918_v0  ;;  %v6142_v52 = vpop.f32.mrb[1].mxu0  ;;  %8281 = vmatmul.mubr.msk.f32.gmra.mrb[56].mxu1 %vm2171_vm4, %v6423_v33  ;;  %v7343_v48 = vld [vmem:[%s15569_s5 + $0xb0] sm:$0xff] }
 0x8ea   :  { %6694 = vmatprep.mubr.f32.mxu1 %v15919_v27 }
 0x8eb   :  { %v8249_v40 = vmul.f32 -1.442695, %v15070_v29  ;;  %8748 = vmatpush1.bf16.msra.mxu0 %v8747_v41  ;;  %v8753_v41 = vpack.c.bf16 %v7344_v7, %v7343_v48 }
 0x8ec   :  { %v6145_v6 = vpop.f32.mrb[2].mxu0  ;;  %8749 = vmatprep.subr.bf16.mxu0 %v15901_v46 }
 0x8ed   :  { %v10624_v31 = vpop.eup %10623  ;;  %10629 = vpow2.f32 %v8249_v40  ;;  %v15083_v3 = vadd.f32 %v6145_v6, %v14918_v0  ;;  %v6147_v45 = vpop.f32.mrb[3].mxu0 }
 0x8ee   :  { %v6424_v33 = vmul.f32 %v10624_v31, %v15004_v61 }
 0x8ef   :  { %v8250_v17 = vmul.f32 -1.442695, %v15083_v3  ;;  %8751 = vmatpush1.bf16.msra.mxu0 %v8750_v62 }
 0x8f0   :  { %8282 = vmatmul.mubr.msk.f32.gmra.mrb[58].mxu1 %vm2171_vm4, %v6424_v33  ;;  %8752 = vmatprep.subr.bf16.mxu0 %v15901_v46 }
 0x8f1   :  { %v10626_v54 = vpop.eup %10625  ;;  %10631 = vpow2.f32 %v8250_v17  ;;  %6700 = vmatprep.mubr.f32.mxu1 %v15919_v27 }
 0x8f2   :  { %v6425_v61 = vmul.f32 %v10626_v54, %v15017_v38 }
 0x8f3   :  { %v10628_v52 = vpop.eup %10627  ;;  %v6150_v40 = vpop.f32.mrb[4].mxu0  ;;  %8754 = vmatpush1.bf16.msra.mxu0 %v8753_v41 }
 0x8f4   :  { %v6330_v6 = vadd.f32 1.0, %v10628_v52  ;;  %v15098_v13 = vadd.f32 %v6150_v40, %v14918_v0  ;;  %v6152_v43 = vpop.f32.mrb[5].mxu0  ;;  %8283 = vmatmul.mubr.msk.f32.gmra.mrb[60].mxu1 %vm2171_vm4, %v6425_v61  ;;  %8755 = vmatprep.subr.bf16.mxu0 %v15901_v46 }
 0x8f5   :  { %6706 = vmatprep.mubr.f32.mxu1 %v15919_v27 }
 0x8f6   :  { %10633 = vrcp.f32 %v6330_v6  ;;  %v8251_v31 = vmul.f32 -1.442695, %v15098_v13 }
 0x8f7   :  { %v10630_v45 = vpop.eup %10629  ;;  %v6155_v38 = vpop.f32.mrb[6].mxu0 }
 0x8f8   :  { %v6331_v33 = vadd.f32 1.0, %v10630_v45  ;;  %10635 = vpow2.f32 %v8251_v31  ;;  %v15105_v17 = vadd.f32 %v6155_v38, %v14918_v0  ;;  %v6157_v62 = vpop.f32.mrb[7].mxu0 }
 0x8fa   :  { %10637 = vrcp.f32 %v6331_v33  ;;  %v8252_v48 = vmul.f32 -1.442695, %v15105_v17 }
 0x8fb   :  { %v10632_v7 = vpop.eup %10631  ;;  %v6160_v54 = vpop.f32.mrb[8].mxu0 }
 0x8fc   :  { %v6332_v61 = vadd.f32 1.0, %v10632_v7  ;;  %10639 = vpow2.f32 %v8252_v48  ;;  %v15110_v52 = vadd.f32 %v6160_v54, %v14918_v0  ;;  %v6162_v40 = vpop.f32.mrb[9].mxu0 }
 0x8fe   :  { %10641 = vrcp.f32 %v6332_v61  ;;  %v8253_v41 = vmul.f32 -1.442695, %v15110_v52 }
 0x900   :  { %v10634_v6 = vpop.eup %10633  ;;  %10643 = vpow2.f32 %v8253_v41 }
 0x901   :  { %v6426_v43 = vmul.f32 %v10634_v6, %v15056_v57  ;;  %v6165_v31 = vpop.f32.mrb[10].mxu0 }
 0x902   :  { %v10636_v45 = vpop.eup %10635  ;;  %v15115_v38 = vadd.f32 %v6165_v31, %v14918_v0  ;;  %v6167_v33 = vpop.f32.mrb[11].mxu0 }
 0x903   :  { %v6333_v62 = vadd.f32 1.0, %v10636_v45  ;;  %8284 = vmatmul.mubr.msk.f32.gmra.mrb[62].mxu1 %vm2171_vm4, %v6426_v43 }
 0x904   :  { %v10638_v48 = vpop.eup %10637  ;;  %v8254_v7 = vmul.f32 -1.442695, %v15115_v38  ;;  %6712 = vmatprep.mubr.f32.mxu1 %v15919_v27 }
 0x905   :  { %v6427_v54 = vmul.f32 %v10638_v48, %v15070_v29  ;;  %10645 = vrcp.f32 %v6333_v62  ;;  %v6170_v61 = vpop.f32.mrb[12].mxu0 }
 0x906   :  { %v10640_v40 = vpop.eup %10639  ;;  %10647 = vpow2.f32 %v8254_v7  ;;  %v15122_v57 = vadd.f32 %v6170_v61, %v14918_v0  ;;  %v6172_v41 = vpop.f32.mrb[13].mxu0 }
 0x907   :  { %v6334_v6 = vadd.f32 1.0, %v10640_v40  ;;  %8285 = vmatmul.mubr.msk.f32.gmra.mrb[64].mxu1 %vm2171_vm4, %v6427_v54 }
 0x908   :  { %v10642_v31 = vpop.eup %10641  ;;  %v8255_v43 = vmul.f32 -1.442695, %v15122_v57  ;;  %6718 = vmatprep.mubr.f32.mxu1 %v15919_v27 }
 0x909   :  { %v6428_v45 = vmul.f32 %v10642_v31, %v15083_v3  ;;  %10649 = vrcp.f32 %v6334_v6  ;;  %v6175_v29 = vpop.f32.mrb[14].mxu0 }
 0x90a   :  { %v10644_v33 = vpop.eup %10643  ;;  %10651 = vpow2.f32 %v8255_v43  ;;  %v15129_v62 = vadd.f32 %v6175_v29, %v14918_v0  ;;  %v6177_v48 = vpop.f32.mrb[15].mxu0 }
 0x90b   :  { %v6335_v7 = vadd.f32 1.0, %v10644_v33  ;;  %8286 = vmatmul.mubr.msk.f32.gmra.mrb[66].mxu1 %vm2171_vm4, %v6428_v45 }
 0x90c   :  { %v8256_v54 = vmul.f32 -1.442695, %v15129_v62  ;;  %6724 = vmatprep.mubr.f32.mxu1 %v15919_v27 }
 0x90d   :  { %10653 = vrcp.f32 %v6335_v7  ;;  %v6180_v61 = vpop.f32.mrb[16].mxu0 }
 0x90e   :  { %10655 = vpow2.f32 %v8256_v54  ;;  %v15135_v3 = vadd.f32 %v6180_v61, %v14918_v0  ;;  %v6182_v40 = vpop.f32.mrb[17].mxu0 }
 0x90f   :  { %v10646_v41 = vpop.eup %10645 }
 0x910   :  { %v10648_v6 = vpop.eup %10647  ;;  %v6429_v31 = vmul.f32 %v10646_v41, %v15098_v13  ;;  %v8257_v43 = vmul.f32 -1.442695, %v15135_v3 }
 0x911   :  { %v6336_v29 = vadd.f32 1.0, %v10648_v6  ;;  %v6185_v33 = vpop.f32.mrb[18].mxu0 }
 0x912   :  { %10657 = vpow2.f32 %v8257_v43  ;;  %v15140_v45 = vadd.f32 %v6185_v33, %v14918_v0  ;;  %v6187_v48 = vpop.f32.mrb[19].mxu0  ;;  %8287 = vmatmul.mubr.msk.f32.gmra.mrb[68].mxu1 %vm2171_vm4, %v6429_v31 }
 0x913   :  { %v10650_v7 = vpop.eup %10649  ;;  %10659 = vrcp.f32 %v6336_v29  ;;  %6730 = vmatprep.mubr.f32.mxu1 %v15919_v27 }
 0x914   :  { %v10652_v54 = vpop.eup %10651  ;;  %v6430_v61 = vmul.f32 %v10650_v7, %v15105_v17  ;;  %v8258_v13 = vmul.f32 -1.442695, %v15140_v45 }
 0x915   :  { %v6337_v40 = vadd.f32 1.0, %v10652_v54  ;;  %v6190_v41 = vpop.f32.mrb[20].mxu0 }
 0x916   :  { %10661 = vpow2.f32 %v8258_v13  ;;  %v15147_v6 = vadd.f32 %v6190_v41, %v14918_v0  ;;  %v6192_v43 = vpop.f32.mrb[21].mxu0  ;;  %8288 = vmatmul.mubr.msk.f32.gmra.mrb[70].mxu1 %vm2171_vm4, %v6430_v61 }
 0x917   :  { %v10654_v33 = vpop.eup %10653  ;;  %10663 = vrcp.f32 %v6337_v40  ;;  %6736 = vmatprep.mubr.f32.mxu1 %v15919_v27 }
 0x918   :  { %v10656_v31 = vpop.eup %10655  ;;  %v6431_v29 = vmul.f32 %v10654_v33, %v15110_v52  ;;  %v8259_v17 = vmul.f32 -1.442695, %v15147_v6 }
 0x919   :  { %v6338_v48 = vadd.f32 1.0, %v10656_v31  ;;  %v7345_v31 = vld [vmem:[%s15569_s5 + $0xc0] sm:$0xff] }
 0x91a   :  { %10665 = vpow2.f32 %v8259_v17  ;;  %8289 = vmatmul.mubr.msk.f32.gmra.mrb[72].mxu1 %vm2171_vm4, %v6431_v29  ;;  %v7346_v29 = vld [vmem:[%s15569_s5 + $0xc8] sm:$0xff]  ;;  %v7347_v17 = vld [vmem:[%s15569_s5 + $0xd0] sm:$0xff] }
 0x91b   :  { %10667 = vrcp.f32 %v6338_v48  ;;  %v6195_v7 = vpop.f32.mrb[22].mxu0  ;;  %6742 = vmatprep.mubr.f32.mxu1 %v15919_v27 }
 0x91c   :  { %v10658_v54 = vpop.eup %10657  ;;  %v15156_v61 = vadd.f32 %v6195_v7, %v14918_v0  ;;  %v6197_v13 = vpop.f32.mrb[23].mxu0 }
 0x91d   :  { %v10660_v40 = vpop.eup %10659  ;;  %v6339_v41 = vadd.f32 1.0, %v10658_v54  ;;  %v8756_v54 = vpack.c.bf16 %v7346_v29, %v7345_v31  ;;  %v7348_v13 = vld [vmem:[%s15569_s5 + $0xd8] sm:$0xff] }
 0x91e   :  { %v6432_v43 = vmul.f32 %v10660_v40, %v15115_v38  ;;  %v8260_v52 = vmul.f32 -1.442695, %v15156_v61 }
 0x91f   :  { %10669 = vrcp.f32 %v6339_v41  ;;  %v6200_v33 = vpop.f32.mrb[24].mxu0  ;;  %8757 = vmatpush1.bf16.msra.mxu0 %v8756_v54  ;;  %v7349_v54 = vld [vmem:[%s15569_s5 + $0xe0] sm:$0xff] }
 0x920   :  { %v10662_v48 = vpop.eup %10661  ;;  %10671 = vpow2.f32 %v8260_v52  ;;  %v15170_v38 = vadd.f32 %v6200_v33, %v14918_v0  ;;  %v6202_v7 = vpop.f32.mrb[25].mxu0  ;;  %8290 = vmatmul.mubr.msk.f32.gmra.mrb[74].mxu1 %vm2171_vm4, %v6432_v43  ;;  %v8759_v52 = vpack.c.bf16 %v7348_v13, %v7347_v17  ;;  %8758 = vmatprep.subr.bf16.mxu0 %v15901_v46 }
 0x921   :  { %v10664_v40 = vpop.eup %10663  ;;  %v6340_v41 = vadd.f32 1.0, %v10662_v48  ;;  %6748 = vmatprep.mubr.f32.mxu1 %v15919_v27 }
 0x922   :  { %v6433_v44 = vmul.f32 %v10664_v40, %v15122_v57  ;;  %v8261_v12 = vmul.f32 -1.442695, %v15170_v38 }
 0x923   :  { %10673 = vrcp.f32 %v6340_v41  ;;  %v6205_v33 = vpop.f32.mrb[26].mxu0  ;;  %8760 = vmatpush1.bf16.msra.mxu0 %v8759_v52 }
 0x924   :  { %v10666_v43 = vpop.eup %10665  ;;  %10675 = vpow2.f32 %v8261_v12  ;;  %v15181_v31 = vadd.f32 %v6205_v33, %v14918_v0  ;;  %v6207_v29 = vpop.f32.mrb[27].mxu0  ;;  %8291 = vmatmul.mubr.msk.f32.gmra.mrb[76].mxu1 %vm2171_vm4, %v6433_v44  ;;  %v7350_v12 = vld [vmem:[%s15569_s5 + $0xe8] sm:$0xff]  ;;  %8761 = vmatprep.subr.bf16.mxu0 %v15901_v46 }
 0x925   :  { %v10668_v48 = vpop.eup %10667  ;;  %v6341_v7 = vadd.f32 1.0, %v10666_v43  ;;  %6754 = vmatprep.mubr.f32.mxu1 %v15919_v27  ;;  %v8762_v44 = vpack.c.bf16 %v7350_v12, %v7349_v54 }
 0x926   :  { %v6434_v57 = vmul.f32 %v10668_v48, %v15129_v62  ;;  %v8262_v17 = vmul.f32 -1.442695, %v15181_v31 }
 0x927   :  { %10677 = vrcp.f32 %v6341_v7  ;;  %v6210_v13 = vpop.f32.mrb[28].mxu0  ;;  %8763 = vmatpush1.bf16.msra.mxu0 %v8762_v44 }
 0x928   :  { %10679 = vpow2.f32 %v8262_v17  ;;  %v6211_v40 = vadd.f32 %v6210_v13, %v14918_v0  ;;  %v6212_v62 = vpop.f32.mrb[29].mxu0  ;;  %8292 = vmatmul.mubr.msk.f32.gmra.mrb[78].mxu1 %vm2171_vm4, %v6434_v57  ;;  %8764 = vmatprep.subr.bf16.mxu0 %v15901_v46  ;;  %v7351_v46 = vld [vmem:[%s15569_s5 + $0xf0] sm:$0xff] }
 0x929   :  { %v10670_v41 = vpop.eup %10669  ;;  %6760 = vmatprep.mubr.f32.mxu1 %v15919_v27 }
 0x92a   :  { %v10672_v52 = vpop.eup %10671  ;;  %v6435_v33 = vmul.f32 %v10670_v41, %v15135_v3  ;;  %v8263_v43 = vmul.f32 -1.442695, %v6211_v40 }
 0x92b   :  { %v6342_v29 = vadd.f32 1.0, %v10672_v52  ;;  %v6215_v48 = vpop.f32.mrb[30].mxu0 }
 0x92c   :  { %10681 = vpow2.f32 %v8263_v43  ;;  %v6216_v7 = vadd.f32 %v6215_v48, %v14918_v0  ;;  %v6217_v17 = vpop.f32.mrb[31].mxu0  ;;  %8293 = vmatmul.mubr.msk.f32.gmra.mrb[80].mxu1 %vm2171_vm4, %v6435_v33  ;;  %v7352_v0 = vld [vmem:[%s15569_s5 + $0xf8] sm:$0xff] }
 0x92d   :  { %v10674_v54 = vpop.eup %10673  ;;  %10683 = vrcp.f32 %v6342_v29  ;;  %6766 = vmatprep.mubr.f32.mxu1 %v15919_v27  ;;  %v8765_v41 = vpack.c.bf16 %v7352_v0, %v7351_v46  ;;  %v10962_v46 = vld [vmem:[%s15570_s6 + $0x10] sm:$0x7]  ;;  %v16324_v0 = vld [vmem:[#allocation66_spill] sm:$0xff] }
 0x92e   :  { %v10676_v57 = vpop.eup %10675  ;;  %v6436_v12 = vmul.f32 %v10674_v54, %v15140_v45  ;;  %v8264_v3 = vmul.f32 -1.442695, %v6216_v7 }
 0x92f   :  { %v6343_v13 = vadd.f32 1.0, %v10676_v57  ;;  %8766 = vmatpush1.bf16.msra.mxu0 %v8765_v41 }
 0x930   :  { %10685 = vpow2.f32 %v8264_v3  ;;  %8294 = vmatmul.mubr.msk.f32.gmra.mrb[82].mxu1 %vm2171_vm4, %v6436_v12 }
 0x931   :  { %v10678_v44 = vpop.eup %10677  ;;  %10687 = vrcp.f32 %v6343_v13  ;;  %6772 = vmatprep.mubr.f32.mxu1 %v15919_v27 }
 0x932   :  { %v10680_v62 = vpop.eup %10679  ;;  %v6437_v45 = vmul.f32 %v10678_v44, %v15147_v6 }
 0x933   :  { %v6344_v52 = vadd.f32 1.0, %v10680_v62  ;;  %v10963_v62 = vld [vmem:[%s15570_s6 + $0x18] sm:$0x7] }
 0x934   :  { %8295 = vmatmul.mubr.msk.f32.gmra.mrb[84].mxu1 %vm2171_vm4, %v6437_v45 }
 0x935   :  { %10689 = vrcp.f32 %v6344_v52  ;;  %6778 = vmatprep.mubr.f32.mxu1 %v15919_v27 }
 0x936   :  { %v10682_v33 = vpop.eup %10681 }
 0x937   :  { %v10684_v43 = vpop.eup %10683  ;;  %v6345_v29 = vadd.f32 1.0, %v10682_v33 }
 0x938   :  { %v6438_v48 = vmul.f32 %v10684_v43, %v15156_v61 }
 0x939   :  { %10691 = vrcp.f32 %v6345_v29 }
 0x93a   :  { %v10686_v17 = vpop.eup %10685  ;;  %8296 = vmatmul.mubr.msk.f32.gmra.mrb[86].mxu1 %vm2171_vm4, %v6438_v48 }
 0x93b   :  { %v10688_v54 = vpop.eup %10687  ;;  %v6346_v57 = vadd.f32 1.0, %v10686_v17  ;;  %6784 = vmatprep.mubr.f32.mxu1 %v15919_v27 }
 0x93c   :  { %v6439_v6 = vmul.f32 %v10688_v54, %v15170_v38 }
 0x93d   :  { %10693 = vrcp.f32 %v6346_v57 }
 0x93e   :  { %8297 = vmatmul.mubr.msk.f32.gmra.mrb[88].mxu1 %vm2171_vm4, %v6439_v6 }
 0x93f   :  { %v10690_v12 = vpop.eup %10689  ;;  %6790 = vmatprep.mubr.f32.mxu1 %v15919_v27 }
 0x940   :  { %v6440_v3 = vmul.f32 %v10690_v12, %v15181_v31  ;;  %v15230_v31 = vrot.slane %v10962_v46, %v16324_v0 }
 0x942   :  { %8298 = vmatmul.mubr.msk.f32.gmra.mrb[90].mxu1 %vm2171_vm4, %v6440_v3 }
 0x943   :  { %v10692_v61 = vpop.eup %10691  ;;  %6796 = vmatprep.mubr.f32.mxu1 %v15919_v27 }
 0x944   :  { %v6441_v13 = vmul.f32 %v10692_v61, %v6211_v40  ;;  %v15236_v40 = vrot.slane %v10963_v62, %v16324_v0 }
 0x946   :  { %8299 = vmatmul.mubr.msk.f32.gmra.mrb[92].mxu1 %vm2171_vm4, %v6441_v13 }
 0x947   :  { %v10694_v44 = vpop.eup %10693  ;;  %6802 = vmatprep.mubr.f32.mxu1 %v15919_v27 }
 0x948   :  { %v6442_v38 = vmul.f32 %v10694_v44, %v6216_v7 }
 0x94a   :  { %8300 = vmatmul.mubr.msk.f32.gmra.mrb[94].mxu1 %vm2171_vm4, %v6442_v38 }
 0x97f   :  { %v6618_v45 = vpop.f32.mrb[32].mxu1 }
 0x980   :  { %v6619_v27 = vadd.f32 %v6618_v45, %v15230_v31  ;;  %v6620_v7 = vpop.f32.mrb[33].mxu1 }
 0x981   :  { %v6621_v41 = vadd.f32 %v6620_v7, %v15236_v40 }
 0x982   :  { %v8301_v52 = vmul.f32 -1.442695, %v6619_v27 }
 0x983   :  { %v8302_v33 = vmul.f32 -1.442695, %v6621_v41 }
 0x984   :  { %v6624_v43 = vpop.f32.mrb[34].mxu1  ;;  %10695 = vpow2.f32 %v8301_v52 }
 0x985   :  { %v6625_v29 = vadd.f32 %v6624_v43, %v15230_v31  ;;  %v6626_v48 = vpop.f32.mrb[35].mxu1  ;;  %10697 = vpow2.f32 %v8302_v33 }
 0x986   :  { %v6627_v17 = vadd.f32 %v6626_v48, %v15236_v40 }
 0x987   :  { %v8303_v54 = vmul.f32 -1.442695, %v6625_v29 }
 0x988   :  { %v8304_v57 = vmul.f32 -1.442695, %v6627_v17  ;;  %v6630_v6 = vpop.f32.mrb[36].mxu1 }
 0x989   :  { %10699 = vpow2.f32 %v8303_v54  ;;  %v6631_v12 = vadd.f32 %v6630_v6, %v15230_v31  ;;  %v6632_v3 = vpop.f32.mrb[37].mxu1 }
 0x98a   :  { %10701 = vpow2.f32 %v8304_v57  ;;  %v6633_v61 = vadd.f32 %v6632_v3, %v15236_v40 }
 0x98b   :  { %v8305_v13 = vmul.f32 -1.442695, %v6631_v12 }
 0x98c   :  { %v8306_v44 = vmul.f32 -1.442695, %v6633_v61 }
 0x98d   :  { %10703 = vpow2.f32 %v8305_v13 }
 0x98e   :  { %10705 = vpow2.f32 %v8306_v44  ;;  %v10696_v38 = vpop.eup %10695 }
 0x98f   :  { %v6636_v46 = vpop.f32.mrb[38].mxu1  ;;  %v10698_v0 = vpop.eup %10697  ;;  %v7001_v62 = vadd.f32 1.0, %v10696_v38 }
 0x990   :  { %v6637_v45 = vadd.f32 %v6636_v46, %v15230_v31  ;;  %v6638_v27 = vpop.f32.mrb[39].mxu1  ;;  %v7002_v7 = vadd.f32 1.0, %v10698_v0 }
 0x991   :  { %v6639_v41 = vadd.f32 %v6638_v27, %v15236_v40  ;;  %10707 = vrcp.f32 %v7001_v62 }
 0x992   :  { %v8307_v52 = vmul.f32 -1.442695, %v6637_v45  ;;  %10709 = vrcp.f32 %v7002_v7 }
 0x993   :  { %v10700_v33 = vpop.eup %10699  ;;  %v8308_v43 = vmul.f32 -1.442695, %v6639_v41  ;;  %v6642_v29 = vpop.f32.mrb[40].mxu1 }
 0x994   :  { %v10702_v48 = vpop.eup %10701  ;;  %v7003_v17 = vadd.f32 1.0, %v10700_v33  ;;  %10711 = vpow2.f32 %v8307_v52  ;;  %v6643_v54 = vadd.f32 %v6642_v29, %v15230_v31  ;;  %v6644_v57 = vpop.f32.mrb[41].mxu1 }
 0x995   :  { %v7004_v6 = vadd.f32 1.0, %v10702_v48  ;;  %10713 = vpow2.f32 %v8308_v43  ;;  %v6645_v12 = vadd.f32 %v6644_v57, %v15236_v40 }
 0x996   :  { %10715 = vrcp.f32 %v7003_v17  ;;  %v8309_v3 = vmul.f32 -1.442695, %v6643_v54 }
 0x997   :  { %v10704_v61 = vpop.eup %10703  ;;  %10717 = vrcp.f32 %v7004_v6  ;;  %v8310_v13 = vmul.f32 -1.442695, %v6645_v12  ;;  %v6648_v44 = vpop.f32.mrb[42].mxu1 }
 0x998   :  { %v10706_v38 = vpop.eup %10705  ;;  %v7005_v46 = vadd.f32 1.0, %v10704_v61  ;;  %10719 = vpow2.f32 %v8309_v3  ;;  %v6649_v0 = vadd.f32 %v6648_v44, %v15230_v31  ;;  %v6650_v62 = vpop.f32.mrb[43].mxu1 }
 0x999   :  { %v7006_v45 = vadd.f32 1.0, %v10706_v38  ;;  %10721 = vpow2.f32 %v8310_v13  ;;  %v6651_v27 = vadd.f32 %v6650_v62, %v15236_v40 }
 0x99a   :  { %10723 = vrcp.f32 %v7005_v46  ;;  %v8311_v7 = vmul.f32 -1.442695, %v6649_v0 }
 0x99b   :  { %10725 = vrcp.f32 %v7006_v45  ;;  %v8312_v41 = vmul.f32 -1.442695, %v6651_v27  ;;  %v10708_v52 = vpop.eup %10707 }
 0x99c   :  { %10727 = vpow2.f32 %v8311_v7  ;;  %v10710_v33 = vpop.eup %10709  ;;  %v7193_v43 = vmul.f32 %v10708_v52, %v14442_v21 }
 0x99d   :  { %10729 = vpow2.f32 %v8312_v41  ;;  %v7194_v17 = vmul.f32 %v10710_v33, %v14439_v34 }
 0x99e   :  { %v10712_v29 = vpop.eup %10711  ;;  %v6654_v48 = vpop.f32.mrb[44].mxu1  ;;  %v7257_v46 = vadd.f32 %v7193_v43, %v13902_v16 }
 0x99f   :  { %v10714_v54 = vpop.eup %10713  ;;  %v7007_v57 = vadd.f32 1.0, %v10712_v29  ;;  %v6655_v6 = vadd.f32 %v6654_v48, %v15230_v31  ;;  %v6656_v12 = vpop.f32.mrb[45].mxu1  ;;  %v7258_v44 = vadd.f32 %v7194_v17, %v13899_v22 }
 0x9a0   :  { %v10716_v3 = vpop.eup %10715  ;;  %v7008_v61 = vadd.f32 1.0, %v10714_v54  ;;  %v6657_v13 = vadd.f32 %v6656_v12, %v15236_v40 }
 0x9a1   :  { %v10718_v38 = vpop.eup %10717  ;;  %10731 = vrcp.f32 %v7007_v57  ;;  %v8313_v21 = vmul.f32 -1.442695, %v6655_v6  ;;  %v7195_v0 = vmul.f32 %v10716_v3, %v14458_v32  ;;  %7421 = vmatprep.mubr.f32.mxu0 %v7258_v44 }
 0x9a2   :  { %v10720_v62 = vpop.eup %10719  ;;  %10733 = vrcp.f32 %v7008_v61  ;;  %v8314_v34 = vmul.f32 -1.442695, %v6657_v13  ;;  %v6660_v45 = vpop.f32.mrb[46].mxu1  ;;  %v7196_v27 = vmul.f32 %v10718_v38, %v14454_v56  ;;  %7422 = vmatmul.mubr.f32.vlgmr.msra.gmra.mrb[32].mxu0 %v7257_v46 }
 0x9a3   :  { %v10722_v7 = vpop.eup %10721  ;;  %v7009_v41 = vadd.f32 1.0, %v10720_v62  ;;  %10735 = vpow2.f32 %v8313_v21  ;;  %v6661_v52 = vadd.f32 %v6660_v45, %v15230_v31  ;;  %v6662_v22 = vpop.f32.mrb[47].mxu1  ;;  %v7259_v17 = vadd.f32 %v7195_v0, %v13914_v11 }
 0x9a4   :  { %v10724_v33 = vpop.eup %10723  ;;  %v7010_v16 = vadd.f32 1.0, %v10722_v7  ;;  %10737 = vpow2.f32 %v8314_v34  ;;  %v6663_v43 = vadd.f32 %v6662_v22, %v15236_v40  ;;  %v7260_v32 = vadd.f32 %v7196_v27, %v13911_v14 }
 0x9a5   :  { %v10726_v29 = vpop.eup %10725  ;;  %10739 = vrcp.f32 %v7009_v41  ;;  %v8315_v48 = vmul.f32 -1.442695, %v6661_v52  ;;  %v7197_v56 = vmul.f32 %v10724_v33, %v14474_v9 }
 0x9a6   :  { %v10728_v54 = vpop.eup %10727  ;;  %10741 = vrcp.f32 %v7010_v16  ;;  %v8316_v57 = vmul.f32 -1.442695, %v6663_v43  ;;  %v6666_v6 = vpop.f32.mrb[48].mxu1  ;;  %7426 = vmatprep.mubr.f32.mxu0 %v7260_v32  ;;  %v7198_v12 = vmul.f32 %v10726_v29, %v14470_v15 }
 0x9a7   :  { %v10730_v3 = vpop.eup %10729  ;;  %v7011_v61 = vadd.f32 1.0, %v10728_v54  ;;  %10743 = vpow2.f32 %v8315_v48  ;;  %v6667_v13 = vadd.f32 %v6666_v6, %v15230_v31  ;;  %v6668_v14 = vpop.f32.mrb[49].mxu1  ;;  %7427 = vmatmul.mubr.f32.gmra.mrb[34].mxu0 %v7259_v17  ;;  %v7261_v46 = vadd.f32 %v7197_v56, %v13926_v50 }
 0x9a8   :  { %v7012_v44 = vadd.f32 1.0, %v10730_v3  ;;  %10745 = vpow2.f32 %v8316_v57  ;;  %v6669_v11 = vadd.f32 %v6668_v14, %v15236_v40  ;;  %v7262_v9 = vadd.f32 %v7198_v12, %v13923_v10 }
 0x9a9   :  { %10747 = vrcp.f32 %v7011_v61  ;;  %v8317_v38 = vmul.f32 -1.442695, %v6667_v13 }
 0x9aa   :  { %10749 = vrcp.f32 %v7012_v44  ;;  %v8318_v21 = vmul.f32 -1.442695, %v6669_v11  ;;  %7431 = vmatprep.mubr.f32.mxu0 %v7262_v9 }
 0x9ab   :  { %v10732_v15 = vpop.eup %10731  ;;  %10751 = vpow2.f32 %v8317_v38  ;;  %7432 = vmatmul.mubr.f32.gmra.mrb[36].mxu0 %v7261_v46 }
 0x9ac   :  { %v10734_v0 = vpop.eup %10733  ;;  %10753 = vpow2.f32 %v8318_v21  ;;  %v7199_v62 = vmul.f32 %v10732_v15, %v14493_v23 }
 0x9ad   :  { %v10736_v34 = vpop.eup %10735  ;;  %v6672_v45 = vpop.f32.mrb[50].mxu1  ;;  %v7200_v27 = vmul.f32 %v10734_v0, %v14487_v20 }
 0x9ae   :  { %v10738_v7 = vpop.eup %10737  ;;  %v7013_v10 = vadd.f32 1.0, %v10736_v34  ;;  %v6673_v41 = vadd.f32 %v6672_v45, %v15230_v31  ;;  %v6674_v52 = vpop.f32.mrb[51].mxu1  ;;  %v7263_v23 = vadd.f32 %v7199_v62, %v13940_v24 }
 0x9af   :  { %v10740_v50 = vpop.eup %10739  ;;  %v7014_v22 = vadd.f32 1.0, %v10738_v7  ;;  %v6675_v33 = vadd.f32 %v6674_v52, %v15236_v40  ;;  %v7264_v16 = vadd.f32 %v7200_v27, %v13936_v4 }
 0x9b0   :  { %v10742_v43 = vpop.eup %10741  ;;  %10755 = vrcp.f32 %v7013_v10  ;;  %v8319_v32 = vmul.f32 -1.442695, %v6673_v41  ;;  %v7201_v29 = vmul.f32 %v10740_v50, %v14509_v2 }
 0x9b1   :  { %v10744_v48 = vpop.eup %10743  ;;  %10757 = vrcp.f32 %v7014_v22  ;;  %v8320_v20 = vmul.f32 -1.442695, %v6675_v33  ;;  %v6678_v17 = vpop.f32.mrb[52].mxu1  ;;  %7436 = vmatprep.mubr.f32.mxu0 %v7264_v16  ;;  %v7202_v56 = vmul.f32 %v10742_v43, %v14503_v5 }
 0x9b2   :  { %v10746_v54 = vpop.eup %10745  ;;  %v7015_v57 = vadd.f32 1.0, %v10744_v48  ;;  %10759 = vpow2.f32 %v8319_v32  ;;  %v6679_v6 = vadd.f32 %v6678_v17, %v15230_v31  ;;  %v6680_v4 = vpop.f32.mrb[53].mxu1  ;;  %7437 = vmatmul.mubr.f32.gmra.mrb[38].mxu0 %v7263_v23  ;;  %v7265_v14 = vadd.f32 %v7201_v29, %v13950_v55  ;;  %v16325_v48 = vld [vmem:[#allocation72_spill] sm:$0xff] }
 0x9b3   :  { %v10748_v12 = vpop.eup %10747  ;;  %v7016_v3 = vadd.f32 1.0, %v10746_v54  ;;  %10761 = vpow2.f32 %v8320_v20  ;;  %v6681_v24 = vadd.f32 %v6680_v4, %v15236_v40  ;;  %v7266_v2 = vadd.f32 %v7202_v56, %v13947_v47  ;;  %v16326_v56 = vld [vmem:[#allocation27_spill] sm:$0xff] }
 0x9b4   :  { %v10750_v61 = vpop.eup %10749  ;;  %10763 = vrcp.f32 %v7015_v57  ;;  %v8321_v13 = vmul.f32 -1.442695, %v6679_v6  ;;  %v7203_v5 = vmul.f32 %v10748_v12, %v14522_v42 }
 0x9b5   :  { %v10752_v44 = vpop.eup %10751  ;;  %10765 = vrcp.f32 %v7016_v3  ;;  %v8322_v11 = vmul.f32 -1.442695, %v6681_v24  ;;  %7441 = vmatprep.mubr.f32.mxu0 %v7266_v2  ;;  %v7204_v9 = vmul.f32 %v10750_v61, %v14519_v1  ;;  %v16328_v2 = vld [vmem:[#allocation40_spill] sm:$0xff] }
 0x9b6   :  { %v10754_v38 = vpop.eup %10753  ;;  %v7017_v46 = vadd.f32 1.0, %v10752_v44  ;;  %10767 = vpow2.f32 %v8321_v13  ;;  %7442 = vmatmul.mubr.f32.gmra.mrb[40].mxu0 %v7265_v14  ;;  %v7267_v55 = vadd.f32 %v7203_v5, %v13966_v51  ;;  %v16329_v13 = vld [vmem:[#allocation93_spill] sm:$0xff] }
 0x9b7   :  { %v7018_v21 = vadd.f32 1.0, %v10754_v38  ;;  %10769 = vpow2.f32 %v8322_v11  ;;  %v7268_v47 = vadd.f32 %v7204_v9, %v13963_v53  ;;  %v16330_v11 = vld [vmem:[#allocation57_spill] sm:$0xff] }
 0x9b8   :  { %10771 = vrcp.f32 %v7017_v46  ;;  %v6684_v15 = vpop.f32.mrb[54].mxu1 }
 0x9b9   :  { %10773 = vrcp.f32 %v7018_v21  ;;  %v6685_v42 = vadd.f32 %v6684_v15, %v15230_v31  ;;  %v6686_v0 = vpop.f32.mrb[55].mxu1  ;;  %7446 = vmatprep.mubr.f32.mxu0 %v7268_v47  ;;  %v16331_v21 = vld [vmem:[#allocation8_spill] sm:$0xff] }
 0x9ba   :  { %v10756_v62 = vpop.eup %10755  ;;  %v6687_v1 = vadd.f32 %v6686_v0, %v15236_v40  ;;  %7447 = vmatmul.mubr.f32.gmra.mrb[42].mxu0 %v7267_v55  ;;  %v16332_v0 = vld [vmem:[#allocation7_spill] sm:$0xff] }
 0x9bb   :  { %v10758_v34 = vpop.eup %10757  ;;  %v8323_v45 = vmul.f32 -1.442695, %v6685_v42  ;;  %v7205_v27 = vmul.f32 %v10756_v62, %v14543_v8 }
 0x9bc   :  { %v10760_v7 = vpop.eup %10759  ;;  %v8324_v10 = vmul.f32 -1.442695, %v6687_v1  ;;  %v6690_v53 = vpop.f32.mrb[56].mxu1  ;;  %v7206_v41 = vmul.f32 %v10758_v34, %v14546_v58 }
 0x9bd   :  { %v10762_v52 = vpop.eup %10761  ;;  %v7019_v51 = vadd.f32 1.0, %v10760_v7  ;;  %10775 = vpow2.f32 %v8323_v45  ;;  %v6691_v50 = vadd.f32 %v6690_v53, %v15230_v31  ;;  %v6692_v22 = vpop.f32.mrb[57].mxu1  ;;  %v7269_v29 = vadd.f32 %v7205_v27, %v13981_v60 }
 0x9be   :  { %v10764_v33 = vpop.eup %10763  ;;  %v7020_v16 = vadd.f32 1.0, %v10762_v52  ;;  %10777 = vpow2.f32 %v8324_v10  ;;  %v6693_v43 = vadd.f32 %v6692_v22, %v15236_v40  ;;  %v7270_v32 = vadd.f32 %v7206_v41, %v13978_v49  ;;  %v16327_v49 = vld [vmem:[#allocation6_spill] sm:$0xff] }
 0x9bf   :  { %v10766_v23 = vpop.eup %10765  ;;  %10779 = vrcp.f32 %v7019_v51  ;;  %v8325_v8 = vmul.f32 -1.442695, %v6691_v50  ;;  %v7207_v58 = vmul.f32 %v10764_v33, %v16325_v48  ;;  %v16333_v51 = vld [vmem:[#allocation28_spill] sm:$0xff]  ;;  %v16335_v48 = vld [vmem:[#allocation86_spill] sm:$0xff] }
 0x9c0   :  { %v10768_v20 = vpop.eup %10767  ;;  %10781 = vrcp.f32 %v7020_v16  ;;  %v8326_v17 = vmul.f32 -1.442695, %v6693_v43  ;;  %7451 = vmatprep.mubr.f32.mxu0 %v7270_v32  ;;  %v7208_v54 = vmul.f32 %v10766_v23, %v16326_v56  ;;  %v16334_v16 = vld [vmem:[#allocation71_spill] sm:$0xff] }
 0x9c1   :  { %v10770_v57 = vpop.eup %10769  ;;  %v7021_v6 = vadd.f32 1.0, %v10768_v20  ;;  %10783 = vpow2.f32 %v8325_v8  ;;  %7452 = vmatmul.mubr.f32.gmra.mrb[44].mxu0 %v7269_v29  ;;  %v7271_v61 = vadd.f32 %v7207_v58, %v16328_v2 }
 0x9c2   :  { %v10772_v4 = vpop.eup %10771  ;;  %v7022_v12 = vadd.f32 1.0, %v10770_v57  ;;  %10785 = vpow2.f32 %v8326_v17  ;;  %v7272_v3 = vadd.f32 %v7208_v54, %v16327_v49  ;;  %v16336_v17 = vld [vmem:[#allocation41_spill] sm:$0xff]  ;;  %v16337_v54 = vld [vmem:[#allocation58_spill] sm:$0xff] }
 0x9c3   :  { %v10774_v24 = vpop.eup %10773  ;;  %10787 = vrcp.f32 %v7021_v6  ;;  %v6696_v60 = vpop.f32.mrb[58].mxu1  ;;  %v7209_v14 = vmul.f32 %v10772_v4, %v16329_v13  ;;  %v16338_v6 = vld [vmem:[#allocation94_spill] sm:$0xff] }
 0x9c4   :  { %10789 = vrcp.f32 %v7022_v12  ;;  %v6697_v5 = vadd.f32 %v6696_v60, %v15230_v31  ;;  %v6698_v44 = vpop.f32.mrb[59].mxu1  ;;  %7456 = vmatprep.mubr.f32.mxu0 %v7272_v3  ;;  %v7210_v9 = vmul.f32 %v10774_v24, %v16330_v11  ;;  %v16339_v12 = vld [vmem:[#allocation10_spill] sm:$0xff]  ;;  %v16340_v24 = vld [vmem:[#allocation9_spill] sm:$0xff] }
 0x9c5   :  { %v6699_v38 = vadd.f32 %v6698_v44, %v15236_v40  ;;  %7457 = vmatmul.mubr.f32.gmra.mrb[46].mxu0 %v7271_v61  ;;  %v7273_v62 = vadd.f32 %v7209_v14, %v16332_v0  ;;  %v16341_v44 = vld [vmem:[#allocation29_spill] sm:$0xff] }
 0x9c6   :  { %v8327_v46 = vmul.f32 -1.442695, %v6697_v5  ;;  %v7274_v47 = vadd.f32 %v7210_v9, %v16331_v21 }
 0x9c7   :  { %v10776_v15 = vpop.eup %10775  ;;  %v8328_v55 = vmul.f32 -1.442695, %v6699_v38  ;;  %v6702_v42 = vpop.f32.mrb[60].mxu1 }
 0x9c8   :  { %v10778_v1 = vpop.eup %10777  ;;  %v7023_v34 = vadd.f32 1.0, %v10776_v15  ;;  %10791 = vpow2.f32 %v8327_v46  ;;  %v6703_v45 = vadd.f32 %v6702_v42, %v15230_v31  ;;  %v6704_v27 = vpop.f32.mrb[61].mxu1  ;;  %7461 = vmatprep.mubr.f32.mxu0 %v7274_v47  ;;  %v16342_v46 = vld [vmem:[#allocation73_spill] sm:$0xff] }
 0x9c9   :  { %v10780_v7 = vpop.eup %10779  ;;  %v7024_v10 = vadd.f32 1.0, %v10778_v1  ;;  %10793 = vpow2.f32 %v8328_v55  ;;  %v6705_v53 = vadd.f32 %v6704_v27, %v15236_v40  ;;  %7462 = vmatmul.mubr.f32.gmra.mrb[48].mxu0 %v7273_v62 }
 0x9ca   :  { %v10782_v41 = vpop.eup %10781  ;;  %10795 = vrcp.f32 %v7023_v34  ;;  %v8329_v52 = vmul.f32 -1.442695, %v6703_v45  ;;  %v7211_v50 = vmul.f32 %v10780_v7, %v16333_v51  ;;  %v16343_v34 = vld [vmem:[#allocation42_spill] sm:$0xff] }
 0x9cb   :  { %v10784_v22 = vpop.eup %10783  ;;  %10797 = vrcp.f32 %v7024_v10  ;;  %v8330_v33 = vmul.f32 -1.442695, %v6705_v53  ;;  %v7212_v43 = vmul.f32 %v10782_v41, %v16334_v16  ;;  %v16344_v10 = vld [vmem:[#allocation85_spill] sm:$0xff]  ;;  %v16345_v41 = vld [vmem:[#allocation74_spill] sm:$0xff] }
 0x9cc   :  { %v10786_v32 = vpop.eup %10785  ;;  %v7025_v23 = vadd.f32 1.0, %v10784_v22  ;;  %10799 = vpow2.f32 %v8329_v52  ;;  %v7275_v56 = vadd.f32 %v7211_v50, %v16336_v17  ;;  %v16346_v22 = vld [vmem:[#allocation59_spill] sm:$0xff] }
 0x9cd   :  { %v10788_v8 = vpop.eup %10787  ;;  %v7026_v29 = vadd.f32 1.0, %v10786_v32  ;;  %10801 = vpow2.f32 %v8330_v33  ;;  %v7276_v58 = vadd.f32 %v7212_v43, %v16335_v48  ;;  %v16348_v48 = vld [vmem:[#allocation11_spill] sm:$0xff] }
 0x9ce   :  { %v10790_v20 = vpop.eup %10789  ;;  %10803 = vrcp.f32 %v7025_v23  ;;  %v7213_v57 = vmul.f32 %v10788_v8, %v16337_v54  ;;  %v16347_v23 = vld [vmem:[#allocation12_spill] sm:$0xff] }
 0x9cf   :  { %10805 = vrcp.f32 %v7026_v29  ;;  %7466 = vmatprep.mubr.f32.mxu0 %v7276_v58  ;;  %v7214_v4 = vmul.f32 %v10790_v20, %v16338_v6 }
 0x9d0   :  { %7467 = vmatmul.mubr.f32.gmra.mrb[50].mxu0 %v7275_v56  ;;  %v7277_v60 = vadd.f32 %v7213_v57, %v16340_v24  ;;  %v16350_v24 = vld [vmem:[#allocation30_spill] sm:$0xff] }
 0x9d1   :  { %v7278_v49 = vadd.f32 %v7214_v4, %v16339_v12  ;;  %v16349_v12 = vld [vmem:[#allocation95_spill] sm:$0xff] }
 0x9d2   :  { %v10792_v3 = vpop.eup %10791 }
 0x9d3   :  { %v10794_v2 = vpop.eup %10793  ;;  %v7027_v61 = vadd.f32 1.0, %v10792_v3  ;;  %7471 = vmatprep.mubr.f32.mxu0 %v7278_v49 }
 0x9d4   :  { %v10796_v13 = vpop.eup %10795  ;;  %v7028_v14 = vadd.f32 1.0, %v10794_v2  ;;  %7472 = vmatmul.mubr.f32.gmra.mrb[52].mxu0 %v7277_v60 }
 0x9d5   :  { %v10798_v5 = vpop.eup %10797  ;;  %10807 = vrcp.f32 %v7027_v61  ;;  %v7215_v11 = vmul.f32 %v10796_v13, %v16341_v44  ;;  %v16351_v13 = vld [vmem:[#allocation88_spill] sm:$0xff]  ;;  %v16352_v44 = vld [vmem:[#allocation43_spill] sm:$0xff] }
 0x9d6   :  { %v10800_v9 = vpop.eup %10799  ;;  %10809 = vrcp.f32 %v7028_v14  ;;  %v6708_v38 = vpop.f32.mrb[62].mxu1  ;;  %v7216_v21 = vmul.f32 %v10798_v5, %v16342_v46 }
 0x9d7   :  { %v10802_v47 = vpop.eup %10801  ;;  %v7029_v15 = vadd.f32 1.0, %v10800_v9  ;;  %v6709_v55 = vadd.f32 %v6708_v38, %v15230_v31  ;;  %v6710_v42 = vpop.f32.mrb[63].mxu1  ;;  %v7279_v53 = vadd.f32 %v7215_v11, %v16344_v10  ;;  %v16353_v9 = vld [vmem:[#allocation76_spill] sm:$0xff]  ;;  %v16356_v10 = vld [vmem:[#allocation14_spill] sm:$0xff] }
 0x9d8   :  { %v10804_v0 = vpop.eup %10803  ;;  %v7030_v62 = vadd.f32 1.0, %v10802_v47  ;;  %v6711_v1 = vadd.f32 %v6710_v42, %v15236_v40  ;;  %v7280_v45 = vadd.f32 %v7216_v21, %v16343_v34  ;;  %v16354_v47 = vld [vmem:[#allocation31_spill] sm:$0xff] }
 0x9d9   :  { %v10806_v27 = vpop.eup %10805  ;;  %10811 = vrcp.f32 %v7029_v15  ;;  %v8331_v7 = vmul.f32 -1.442695, %v6709_v55  ;;  %v7217_v52 = vmul.f32 %v10804_v0, %v16345_v41 }
 0x9da   :  { %10813 = vrcp.f32 %v7030_v62  ;;  %v8332_v51 = vmul.f32 -1.442695, %v6711_v1  ;;  %v6714_v50 = vpop.f32.mrb[64].mxu1  ;;  %7476 = vmatprep.mubr.f32.mxu0 %v7280_v45  ;;  %v7218_v33 = vmul.f32 %v10806_v27, %v16346_v22  ;;  %v16355_v45 = vld [vmem:[#allocation13_spill] sm:$0xff] }
 0x9db   :  { %10815 = vpow2.f32 %v8331_v7  ;;  %v6715_v16 = vadd.f32 %v6714_v50, %v15230_v31  ;;  %v6716_v43 = vpop.f32.mrb[65].mxu1  ;;  %7477 = vmatmul.mubr.f32.gmra.mrb[54].mxu0 %v7279_v53  ;;  %v7281_v58 = vadd.f32 %v7217_v52, %v16348_v48 }
 0x9dc   :  { %10817 = vpow2.f32 %v8332_v51  ;;  %v6717_v32 = vadd.f32 %v6716_v43, %v15236_v40  ;;  %v7282_v8 = vadd.f32 %v7218_v33, %v16347_v23 }
 0x9dd   :  { %v8333_v29 = vmul.f32 -1.442695, %v6715_v16 }
 0x9de   :  { %v8334_v20 = vmul.f32 -1.442695, %v6717_v32  ;;  %v6720_v17 = vpop.f32.mrb[66].mxu1  ;;  %7481 = vmatprep.mubr.f32.mxu0 %v7282_v8 }
 0x9df   :  { %v10808_v56 = vpop.eup %10807  ;;  %10819 = vpow2.f32 %v8333_v29  ;;  %v6721_v54 = vadd.f32 %v6720_v17, %v15230_v31  ;;  %v6722_v57 = vpop.f32.mrb[67].mxu1  ;;  %7482 = vmatmul.mubr.f32.gmra.mrb[56].mxu0 %v7281_v58 }
 0x9e0   :  { %v10810_v6 = vpop.eup %10809  ;;  %10821 = vpow2.f32 %v8334_v20  ;;  %v6723_v4 = vadd.f32 %v6722_v57, %v15236_v40  ;;  %v7219_v49 = vmul.f32 %v10808_v56, %v16349_v12 }
 0x9e1   :  { %v8335_v3 = vmul.f32 -1.442695, %v6721_v54  ;;  %v7220_v60 = vmul.f32 %v10810_v6, %v16350_v24  ;;  %v16357_v24 = vld [vmem:[#allocation32_spill] sm:$0xff] }
 0x9e2   :  { %v8336_v2 = vmul.f32 -1.442695, %v6723_v4  ;;  %v7283_v11 = vadd.f32 %v7219_v49, %v16352_v44 }
 0x9e3   :  { %v10812_v61 = vpop.eup %10811  ;;  %10823 = vpow2.f32 %v8335_v3  ;;  %v7284_v14 = vadd.f32 %v7220_v60, %v16351_v13 }
 0x9e4   :  { %v10814_v5 = vpop.eup %10813  ;;  %10825 = vpow2.f32 %v8336_v2  ;;  %v7221_v38 = vmul.f32 %v10812_v61, %v16353_v9 }
 0x9e5   :  { %v10816_v46 = vpop.eup %10815  ;;  %v6726_v21 = vpop.f32.mrb[68].mxu1  ;;  %7486 = vmatprep.mubr.f32.mxu0 %v7284_v14  ;;  %v7222_v15 = vmul.f32 %v10814_v5, %v16354_v47  ;;  %v16358_v14 = vld [vmem:[#allocation75_spill] sm:$0xff]  ;;  %v16359_v47 = vld [vmem:[#allocation44_spill] sm:$0xff] }
 0x9e6   :  { %v10818_v55 = vpop.eup %10817  ;;  %v7031_v42 = vadd.f32 1.0, %v10816_v46  ;;  %v6727_v0 = vadd.f32 %v6726_v21, %v15230_v31  ;;  %v6728_v62 = vpop.f32.mrb[69].mxu1  ;;  %7487 = vmatmul.mubr.f32.gmra.mrb[58].mxu0 %v7283_v11  ;;  %v7285_v53 = vadd.f32 %v7221_v38, %v16356_v10 }
 0x9e7   :  { %v7032_v1 = vadd.f32 1.0, %v10818_v55  ;;  %v6729_v34 = vadd.f32 %v6728_v62, %v15236_v40  ;;  %v7286_v27 = vadd.f32 %v7222_v15, %v16355_v45  ;;  %v16360_v62 = vld [vmem:[#allocation87_spill] sm:$0xff] }
 0x9e8   :  { %10827 = vrcp.f32 %v7031_v42  ;;  %v8337_v7 = vmul.f32 -1.442695, %v6727_v0 }
 0x9e9   :  { %v10820_v41 = vpop.eup %10819  ;;  %10829 = vrcp.f32 %v7032_v1  ;;  %v8338_v52 = vmul.f32 -1.442695, %v6729_v34  ;;  %v6732_v51 = vpop.f32.mrb[70].mxu1  ;;  %7491 = vmatprep.mubr.f32.mxu0 %v7286_v27  ;;  %v16361_v34 = vld [vmem:[#allocation77_spill] sm:$0xff] }
 0x9ea   :  { %v10822_v50 = vpop.eup %10821  ;;  %v7033_v22 = vadd.f32 1.0, %v10820_v41  ;;  %10831 = vpow2.f32 %v8337_v7  ;;  %v6733_v33 = vadd.f32 %v6732_v51, %v15230_v31  ;;  %v6734_v16 = vpop.f32.mrb[71].mxu1  ;;  %7492 = vmatmul.mubr.f32.gmra.mrb[60].mxu0 %v7285_v53  ;;  %v16362_v53 = vld [vmem:[#allocation33_spill] sm:$0xff] }
 0x9eb   :  { %v7034_v43 = vadd.f32 1.0, %v10822_v50  ;;  %10833 = vpow2.f32 %v8338_v52  ;;  %v6735_v32 = vadd.f32 %v6734_v16, %v15236_v40 }
 0x9ec   :  { %10835 = vrcp.f32 %v7033_v22  ;;  %v8339_v23 = vmul.f32 -1.442695, %v6733_v33 }
 0x9ed   :  { %v10824_v8 = vpop.eup %10823  ;;  %10837 = vrcp.f32 %v7034_v43  ;;  %v8340_v29 = vmul.f32 -1.442695, %v6735_v32  ;;  %v6738_v48 = vpop.f32.mrb[72].mxu1  ;;  %v16363_v43 = vld [vmem:[#allocation15_spill] sm:$0xff] }
 0x9ee   :  { %v10826_v58 = vpop.eup %10825  ;;  %v7035_v20 = vadd.f32 1.0, %v10824_v8  ;;  %10839 = vpow2.f32 %v8339_v23  ;;  %v6739_v17 = vadd.f32 %v6738_v48, %v15230_v31  ;;  %v6740_v56 = vpop.f32.mrb[73].mxu1  ;;  %v16364_v48 = vld [vmem:[#allocation16_spill] sm:$0xff] }
 0x9ef   :  { %v7036_v54 = vadd.f32 1.0, %v10826_v58  ;;  %10841 = vpow2.f32 %v8340_v29  ;;  %v6741_v57 = vadd.f32 %v6740_v56, %v15236_v40 }
 0x9f0   :  { %10843 = vrcp.f32 %v7035_v20  ;;  %v8341_v6 = vmul.f32 -1.442695, %v6739_v17  ;;  %v16365_v20 = vld [vmem:[#allocation78_spill] sm:$0xff] }
 0x9f1   :  { %10845 = vrcp.f32 %v7036_v54  ;;  %v8342_v4 = vmul.f32 -1.442695, %v6741_v57 }
 0x9f2   :  { %v10828_v12 = vpop.eup %10827  ;;  %10847 = vpow2.f32 %v8341_v6  ;;  %v16366_v6 = vld [vmem:[#allocation96_spill] sm:$0xff] }
 0x9f3   :  { %v10830_v49 = vpop.eup %10829  ;;  %10849 = vpow2.f32 %v8342_v4  ;;  %v6744_v3 = vpop.f32.mrb[74].mxu1  ;;  %v7223_v60 = vmul.f32 %v10828_v12, %v16357_v24 }
 0x9f4   :  { %v10832_v2 = vpop.eup %10831  ;;  %v6745_v61 = vadd.f32 %v6744_v3, %v15230_v31  ;;  %v6746_v13 = vpop.f32.mrb[75].mxu1  ;;  %v7224_v5 = vmul.f32 %v10830_v49, %v16358_v14 }
 0x9f5   :  { %v10834_v44 = vpop.eup %10833  ;;  %v7037_v11 = vadd.f32 1.0, %v10832_v2  ;;  %v6747_v9 = vadd.f32 %v6746_v13, %v15236_v40  ;;  %v7287_v1 = vadd.f32 %v7223_v60, %v16360_v62  ;;  %v16367_v2 = vld [vmem:[#allocation89_spill] sm:$0xff] }
 0x9f6   :  { %v10836_v38 = vpop.eup %10835  ;;  %v7038_v46 = vadd.f32 1.0, %v10834_v44  ;;  %v8343_v21 = vmul.f32 -1.442695, %v6745_v61  ;;  %v7288_v15 = vadd.f32 %v7224_v5, %v16359_v47  ;;  %v16368_v5 = vld [vmem:[#allocation45_spill] sm:$0xff] }
 0x9f7   :  { %v10838_v55 = vpop.eup %10837  ;;  %10851 = vrcp.f32 %v7037_v11  ;;  %v8344_v42 = vmul.f32 -1.442695, %v6747_v9  ;;  %v6750_v0 = vpop.f32.mrb[76].mxu1  ;;  %v7225_v45 = vmul.f32 %v10836_v38, %v16361_v34 }
 0x9f8   :  { %v10840_v27 = vpop.eup %10839  ;;  %10853 = vrcp.f32 %v7038_v46  ;;  %v6751_v7 = vadd.f32 %v6750_v0, %v15230_v31  ;;  %v6752_v10 = vpop.f32.mrb[77].mxu1  ;;  %7496 = vmatprep.mubr.f32.mxu0 %v7288_v15  ;;  %v7226_v41 = vmul.f32 %v10838_v55, %v16362_v53  ;;  %v16369_v15 = vld [vmem:[#allocation60_spill] sm:$0xff] }
 0x9f9   :  { %v10842_v52 = vpop.eup %10841  ;;  %v7039_v51 = vadd.f32 1.0, %v10840_v27  ;;  %10855 = vpow2.f32 %v8343_v21  ;;  %v6753_v50 = vadd.f32 %v6752_v10, %v15236_v40  ;;  %7497 = vmatmul.mubr.f32.gmra.mrb[62].mxu0 %v7287_v1  ;;  %v7289_v58 = vadd.f32 %v7225_v45, %v16364_v48  ;;  %v16370_v1 = vld [vmem:[#allocation34_spill] sm:$0xff] }
 0x9fa   :  { %v10844_v22 = vpop.eup %10843  ;;  %v7040_v33 = vadd.f32 1.0, %v10842_v52  ;;  %10857 = vpow2.f32 %v8344_v42  ;;  %v8345_v16 = vmul.f32 -1.442695, %v6751_v7  ;;  %v7290_v32 = vadd.f32 %v7226_v41, %v16363_v43 }
 0x9fb   :  { %v10846_v23 = vpop.eup %10845  ;;  %10859 = vrcp.f32 %v7039_v51  ;;  %v8346_v8 = vmul.f32 -1.442695, %v6753_v50  ;;  %v6756_v29 = vpop.f32.mrb[78].mxu1  ;;  %v7227_v17 = vmul.f32 %v10844_v22, %v16365_v20  ;;  %v16371_v51 = vld [vmem:[#allocation17_spill] sm:$0xff] }
 0x9fc   :  { %v10848_v56 = vpop.eup %10847  ;;  %10861 = vrcp.f32 %v7040_v33  ;;  %v6757_v54 = vadd.f32 %v6756_v29, %v15230_v31  ;;  %v6758_v57 = vpop.f32.mrb[79].mxu1  ;;  %7501 = vmatprep.mubr.f32.mxu0 %v7290_v32  ;;  %v7228_v4 = vmul.f32 %v10846_v23, %v16366_v6  ;;  %v16373_v32 = vld [vmem:[#allocation80_spill] sm:$0xff] }
 0x9fd   :  { %v10850_v12 = vpop.eup %10849  ;;  %v7041_v49 = vadd.f32 1.0, %v10848_v56  ;;  %10863 = vpow2.f32 %v8345_v16  ;;  %v6759_v3 = vadd.f32 %v6758_v57, %v15236_v40  ;;  %7502 = vmatmul.mubr.f32.gmra.mrb[64].mxu0 %v7289_v58  ;;  %v7291_v44 = vadd.f32 %v7227_v17, %v16368_v5  ;;  %v16372_v16 = vld [vmem:[#allocation18_spill] sm:$0xff]  ;;  %v16374_v58 = vld [vmem:[#allocation61_spill] sm:$0xff] }
 0x9fe   :  { %v7042_v24 = vadd.f32 1.0, %v10850_v12  ;;  %10865 = vpow2.f32 %v8346_v8  ;;  %v8347_v60 = vmul.f32 -1.442695, %v6757_v54  ;;  %v7292_v61 = vadd.f32 %v7228_v4, %v16367_v2  ;;  %v16376_v2 = vld [vmem:[#allocation90_spill] sm:$0xff] }
 0x9ff   :  { %10867 = vrcp.f32 %v7041_v49  ;;  %v8348_v13 = vmul.f32 -1.442695, %v6759_v3  ;;  %v6762_v14 = vpop.f32.mrb[80].mxu1  ;;  %v16375_v49 = vld [vmem:[#allocation46_spill] sm:$0xff] }
 0xa00   :  { %10869 = vrcp.f32 %v7042_v24  ;;  %v6763_v11 = vadd.f32 %v6762_v14, %v15230_v31  ;;  %v6764_v9 = vpop.f32.mrb[81].mxu1  ;;  %7506 = vmatprep.mubr.f32.mxu0 %v7292_v61 }
 0xa01   :  { %v10852_v38 = vpop.eup %10851  ;;  %10871 = vpow2.f32 %v8347_v60  ;;  %v6765_v46 = vadd.f32 %v6764_v9, %v15236_v40  ;;  %7507 = vmatmul.mubr.f32.gmra.mrb[66].mxu0 %v7291_v44 }
 0xa02   :  { %v10854_v21 = vpop.eup %10853  ;;  %10873 = vpow2.f32 %v8348_v13  ;;  %v8349_v47 = vmul.f32 -1.442695, %v6763_v11  ;;  %v7229_v55 = vmul.f32 %v10852_v38, %v16369_v15  ;;  %v16377_v13 = vld [vmem:[#allocation35_spill] sm:$0xff]  ;;  %v16378_v11 = vld [vmem:[#allocation97_spill] sm:$0xff] }
 0xa03   :  { %v10856_v42 = vpop.eup %10855  ;;  %v8350_v0 = vmul.f32 -1.442695, %v6765_v46  ;;  %v6768_v62 = vpop.f32.mrb[82].mxu1  ;;  %v7230_v34 = vmul.f32 %v10854_v21, %v16370_v1  ;;  %v16379_v15 = vld [vmem:[#allocation19_spill] sm:$0xff]  ;;  %v16380_v1 = vld [vmem:[#allocation20_spill] sm:$0xff] }
 0xa04   :  { %v10858_v45 = vpop.eup %10857  ;;  %v7043_v27 = vadd.f32 1.0, %v10856_v42  ;;  %10875 = vpow2.f32 %v8349_v47  ;;  %v6769_v7 = vadd.f32 %v6768_v62, %v15230_v31  ;;  %v6770_v10 = vpop.f32.mrb[83].mxu1  ;;  %v7293_v43 = vadd.f32 %v7229_v55, %v16372_v16 }
 0xa05   :  { %v10860_v53 = vpop.eup %10859  ;;  %v7044_v41 = vadd.f32 1.0, %v10858_v45  ;;  %10877 = vpow2.f32 %v8350_v0  ;;  %v6771_v52 = vadd.f32 %v6770_v10, %v15236_v40  ;;  %v7294_v50 = vadd.f32 %v7230_v34, %v16371_v51 }
 0xa06   :  { %v10862_v22 = vpop.eup %10861  ;;  %10879 = vrcp.f32 %v7043_v27  ;;  %v8351_v33 = vmul.f32 -1.442695, %v6769_v7  ;;  %v7231_v23 = vmul.f32 %v10860_v53, %v16373_v32  ;;  %v16381_v32 = vld [vmem:[#allocation98_spill] sm:$0xff] }
 0xa07   :  { %v10864_v8 = vpop.eup %10863  ;;  %10881 = vrcp.f32 %v7044_v41  ;;  %v8352_v29 = vmul.f32 -1.442695, %v6771_v52  ;;  %v6774_v48 = vpop.f32.mrb[84].mxu1  ;;  %7511 = vmatprep.mubr.f32.mxu0 %v7294_v50  ;;  %v7232_v20 = vmul.f32 %v10862_v22, %v16374_v58 }
 0xa08   :  { %v10866_v17 = vpop.eup %10865  ;;  %v7045_v56 = vadd.f32 1.0, %v10864_v8  ;;  %10883 = vpow2.f32 %v8351_v33  ;;  %v6775_v54 = vadd.f32 %v6774_v48, %v15230_v31  ;;  %v6776_v57 = vpop.f32.mrb[85].mxu1  ;;  %7512 = vmatmul.mubr.f32.gmra.mrb[68].mxu0 %v7293_v43  ;;  %v7295_v61 = vadd.f32 %v7231_v23, %v16376_v2 }
 0xa09   :  { %v10868_v6 = vpop.eup %10867  ;;  %v7046_v4 = vadd.f32 1.0, %v10866_v17  ;;  %10885 = vpow2.f32 %v8352_v29  ;;  %v6777_v12 = vadd.f32 %v6776_v57, %v15236_v40  ;;  %v7296_v3 = vadd.f32 %v7232_v20, %v16375_v49  ;;  %v16384_v49 = vld [vmem:[#allocation36_spill] sm:$0xff] }
 0xa0a   :  { %v10870_v24 = vpop.eup %10869  ;;  %10887 = vrcp.f32 %v7045_v56  ;;  %v8353_v60 = vmul.f32 -1.442695, %v6775_v54  ;;  %v7233_v14 = vmul.f32 %v10868_v6, %v16377_v13  ;;  %v16382_v56 = vld [vmem:[#allocation48_spill] sm:$0xff] }
 0xa0b   :  { %v10872_v5 = vpop.eup %10871  ;;  %10889 = vrcp.f32 %v7046_v4  ;;  %v8354_v44 = vmul.f32 -1.442695, %v6777_v12  ;;  %7516 = vmatprep.mubr.f32.mxu0 %v7296_v3  ;;  %v7234_v9 = vmul.f32 %v10870_v24, %v16378_v11  ;;  %v16383_v4 = vld [vmem:[#allocation47_spill] sm:$0xff] }
 0xa0c   :  { %v10874_v38 = vpop.eup %10873  ;;  %v7047_v46 = vadd.f32 1.0, %v10872_v5  ;;  %10891 = vpow2.f32 %v8353_v60  ;;  %7517 = vmatmul.mubr.f32.gmra.mrb[70].mxu0 %v7295_v61  ;;  %v7297_v34 = vadd.f32 %v7233_v14, %v16380_v1  ;;  %v16385_v61 = vld [vmem:[#allocation79_spill] sm:$0xff] }
 0xa0d   :  { %v7048_v21 = vadd.f32 1.0, %v10874_v38  ;;  %10893 = vpow2.f32 %v8354_v44  ;;  %v6780_v47 = vpop.f32.mrb[86].mxu1  ;;  %v7298_v55 = vadd.f32 %v7234_v9, %v16379_v15 }
 0xa0e   :  { %v10876_v42 = vpop.eup %10875  ;;  %10895 = vrcp.f32 %v7047_v46  ;;  %v6781_v0 = vadd.f32 %v6780_v47, %v15230_v31  ;;  %v6782_v62 = vpop.f32.mrb[87].mxu1  ;;  %v16386_v46 = vld [vmem:[#allocation21_spill] sm:$0xff] }
 0xa0f   :  { %v10878_v45 = vpop.eup %10877  ;;  %10897 = vrcp.f32 %v7048_v21  ;;  %v7049_v27 = vadd.f32 1.0, %v10876_v42  ;;  %v6783_v7 = vadd.f32 %v6782_v62, %v15236_v40  ;;  %7521 = vmatprep.mubr.f32.mxu0 %v7298_v55  ;;  %v16387_v42 = vld [vmem:[#allocation22_spill] sm:$0xff]  ;;  %v16388_v62 = vld [vmem:[#allocation63_spill] sm:$0xff] }
 0xa10   :  { %v10880_v10 = vpop.eup %10879  ;;  %v7050_v53 = vadd.f32 1.0, %v10878_v45  ;;  %v8355_v41 = vmul.f32 -1.442695, %v6781_v0  ;;  %7522 = vmatmul.mubr.f32.gmra.mrb[72].mxu0 %v7297_v34 }
 0xa11   :  { %v10882_v52 = vpop.eup %10881  ;;  %10899 = vrcp.f32 %v7049_v27  ;;  %v8356_v51 = vmul.f32 -1.442695, %v6783_v7  ;;  %v6786_v50 = vpop.f32.mrb[88].mxu1  ;;  %v7235_v22 = vmul.f32 %v10880_v10, %v14804_v39  ;;  %v16389_v27 = vld [vmem:[#allocation62_spill] sm:$0xff] }
 0xa12   :  { %v10884_v33 = vpop.eup %10883  ;;  %10901 = vrcp.f32 %v7050_v53  ;;  %v6787_v16 = vadd.f32 %v6786_v50, %v15230_v31  ;;  %v6788_v43 = vpop.f32.mrb[89].mxu1  ;;  %v7236_v23 = vmul.f32 %v10882_v52, %v16381_v32  ;;  %v16391_v32 = vld [vmem:[#allocation49_spill] sm:$0xff] }
 0xa13   :  { %v10886_v8 = vpop.eup %10885  ;;  %v7051_v29 = vadd.f32 1.0, %v10884_v33  ;;  %10903 = vpow2.f32 %v8355_v41  ;;  %v6789_v48 = vadd.f32 %v6788_v43, %v15236_v40  ;;  %v7299_v12 = vadd.f32 %v7235_v22, %v16383_v4  ;;  %v16393_v4 = vld [vmem:[#allocation68_spill] sm:$0xff] }
 0xa14   :  { %v10888_v58 = vpop.eup %10887  ;;  %v7052_v20 = vadd.f32 1.0, %v10886_v8  ;;  %10905 = vpow2.f32 %v8356_v51  ;;  %v8357_v17 = vmul.f32 -1.442695, %v6787_v16  ;;  %v7300_v54 = vadd.f32 %v7236_v23, %v16382_v56  ;;  %v16390_v51 = vld [vmem:[#allocation50_spill] sm:$0xff] }
 0xa15   :  { %v10890_v57 = vpop.eup %10889  ;;  %10907 = vrcp.f32 %v7051_v29  ;;  %v8358_v39 = vmul.f32 -1.442695, %v6789_v48  ;;  %v6792_v6 = vpop.f32.mrb[90].mxu1  ;;  %v7237_v3 = vmul.f32 %v10888_v58, %v16384_v49 }
 0xa16   :  { %v10892_v24 = vpop.eup %10891  ;;  %10909 = vrcp.f32 %v7052_v20  ;;  %v6793_v60 = vadd.f32 %v6792_v6, %v15230_v31  ;;  %v6794_v2 = vpop.f32.mrb[91].mxu1  ;;  %7526 = vmatprep.mubr.f32.mxu0 %v7300_v54  ;;  %v7238_v13 = vmul.f32 %v10890_v57, %v16385_v61  ;;  %v16394_v61 = vld [vmem:[#allocation52_spill] sm:$0xff] }
 0xa17   :  { %v10894_v14 = vpop.eup %10893  ;;  %v7053_v5 = vadd.f32 1.0, %v10892_v24  ;;  %10911 = vpow2.f32 %v8357_v17  ;;  %v6795_v44 = vadd.f32 %v6794_v2, %v15236_v40  ;;  %7527 = vmatmul.mubr.f32.gmra.mrb[74].mxu0 %v7299_v12  ;;  %v7301_v0 = vadd.f32 %v7237_v3, %v16387_v42 }
 0xa18   :  { %v10896_v11 = vpop.eup %10895  ;;  %v7054_v9 = vadd.f32 1.0, %v10894_v14  ;;  %10913 = vpow2.f32 %v8358_v39  ;;  %v8359_v38 = vmul.f32 -1.442695, %v6793_v60  ;;  %v7302_v21 = vadd.f32 %v7238_v13, %v16386_v46 }
 0xa19   :  { %v10898_v47 = vpop.eup %10897  ;;  %10915 = vrcp.f32 %v7053_v5  ;;  %v8360_v15 = vmul.f32 -1.442695, %v6795_v44  ;;  %v6798_v55 = vpop.f32.mrb[92].mxu1  ;;  %v7239_v1 = vmul.f32 %v10896_v11, %v16388_v62  ;;  %v16395_v44 = vld [vmem:[#allocation51_spill] sm:$0xff] }
 0xa1a   :  { %10917 = vrcp.f32 %v7054_v9  ;;  %v6799_v34 = vadd.f32 %v6798_v55, %v15230_v31  ;;  %v6800_v45 = vpop.f32.mrb[93].mxu1  ;;  %7531 = vmatprep.mubr.f32.mxu0 %v7302_v21  ;;  %v7240_v7 = vmul.f32 %v10898_v47, %v16389_v27  ;;  %v16396_v21 = vld [vmem:[#allocation67_spill] sm:$0xff] }
 0xa1b   :  { %v10900_v10 = vpop.eup %10899  ;;  %10919 = vpow2.f32 %v8359_v38  ;;  %v6801_v53 = vadd.f32 %v6800_v45, %v15236_v40  ;;  %7532 = vmatmul.mubr.f32.gmra.mrb[76].mxu0 %v7301_v0  ;;  %v7303_v23 = vadd.f32 %v7239_v1, %v16391_v32  ;;  %v16397_v0 = vld [vmem:[#allocation24_spill] sm:$0xff]  ;;  %v16400_v32 = vld [vmem:[#allocation25_spill] sm:$0xff] }
 0xa1c   :  { %v10902_v41 = vpop.eup %10901  ;;  %10921 = vpow2.f32 %v8360_v15  ;;  %v8361_v52 = vmul.f32 -1.442695, %v6799_v34  ;;  %v7304_v50 = vadd.f32 %v7240_v7, %v16390_v51  ;;  %v7241_v22 = vmul.f32 %v10900_v10, %v14849_v28  ;;  %v16392_v28 = vld [vmem:[#allocation23_spill] sm:$0xff] }
 0xa1d   :  { %v10904_v33 = vpop.eup %10903  ;;  %v8362_v16 = vmul.f32 -1.442695, %v6801_v53  ;;  %v6804_v43 = vpop.f32.mrb[94].mxu1  ;;  %v7242_v8 = vmul.f32 %v10902_v41, %v14843_v25 }
 0xa1e   :  { %v10906_v29 = vpop.eup %10905  ;;  %v7055_v48 = vadd.f32 1.0, %v10904_v33  ;;  %10923 = vpow2.f32 %v8361_v52  ;;  %v6805_v58 = vadd.f32 %v6804_v43, %v15230_v31  ;;  %v6806_v20 = vpop.f32.mrb[95].mxu1  ;;  %7536 = vmatprep.mubr.f32.mxu0 %v7304_v50  ;;  %v7305_v25 = vadd.f32 %v7241_v22, %v16393_v4  ;;  %v16398_v52 = vld [vmem:[#allocation54_spill] sm:$0xff]  ;;  %v16399_v22 = vld [vmem:[#allocation53_spill] sm:$0xff] }
 0xa1f   :  { %v10908_v17 = vpop.eup %10907  ;;  %v7056_v56 = vadd.f32 1.0, %v10906_v29  ;;  %10925 = vpow2.f32 %v8362_v16  ;;  %v6807_v54 = vadd.f32 %v6806_v20, %v15236_v40  ;;  %7537 = vmatmul.mubr.f32.gmra.mrb[78].mxu0 %v7303_v23  ;;  %v7306_v57 = vadd.f32 %v7242_v8, %v16392_v28  ;;  %v16401_v8 = vld [vmem:[#allocation70_spill] sm:$0xff]  ;;  %v16404_v28 = vld [vmem:[#allocation55_spill] sm:$0xff] }
 0xa20   :  { %v10910_v39 = vpop.eup %10909  ;;  %10927 = vrcp.f32 %v7055_v48  ;;  %v8363_v6 = vmul.f32 -1.442695, %v6805_v58  ;;  %v7243_v3 = vmul.f32 %v10908_v17, %v14862_v26  ;;  %v16402_v58 = vld [vmem:[#allocation37_spill] sm:$0xff] }
 0xa21   :  { %v10912_v12 = vpop.eup %10911  ;;  %10929 = vrcp.f32 %v7056_v56  ;;  %v8364_v49 = vmul.f32 -1.442695, %v6807_v54  ;;  %7541 = vmatprep.mubr.f32.mxu0 %v7306_v57  ;;  %v7244_v31 = vmul.f32 %v10910_v39, %v14859_v59 }
 0xa22   :  { %v10914_v24 = vpop.eup %10913  ;;  %v7057_v60 = vadd.f32 1.0, %v10912_v12  ;;  %10931 = vpow2.f32 %v8363_v6  ;;  %v7307_v11 = vadd.f32 %v7243_v3, %v16395_v44  ;;  %v16406_v6 = vld [vmem:[#allocation99_spill] sm:$0xff]  ;;  %v16407_v12 = vld [vmem:[#allocation69_spill] sm:$0xff] }
 0xa23   :  { %v10916_v40 = vpop.eup %10915  ;;  %v7058_v2 = vadd.f32 1.0, %v10914_v24  ;;  %10933 = vpow2.f32 %v8364_v49  ;;  %7542 = vmatmul.mubr.f32.gmra.mrb[80].mxu0 %v7305_v25  ;;  %v7308_v13 = vadd.f32 %v7244_v31, %v16394_v61  ;;  %v16408_v31 = vld [vmem:[#allocation26_spill] sm:$0xff]  ;;  %v16409_v24 = vld [vmem:[#allocation100_spill] sm:$0xff]  ;;  %v10964_v44 = vld [vmem:[%s15570_s6 + $0x10] sm:$0x7] }
 0xa24   :  { %v10918_v14 = vpop.eup %10917  ;;  %10935 = vrcp.f32 %v7057_v60  ;;  %v7245_v26 = vmul.f32 %v10916_v40, %v14870_v36  ;;  %v16410_v40 = vld [vmem:[#allocation82_spill] sm:$0xff]  ;;  %v16411_v61 = vld [vmem:[#allocation56_spill] sm:$0xff] }
 0xa25   :  { %v10920_v5 = vpop.eup %10919  ;;  %10937 = vrcp.f32 %v7058_v2  ;;  %7546 = vmatprep.mubr.f32.mxu0 %v7308_v13  ;;  %v7246_v59 = vmul.f32 %v10918_v14, %v14867_v37  ;;  %v16412_v14 = vld [vmem:[#allocation91_spill] sm:$0xff] }
 0xa26   :  { %v10922_v9 = vpop.eup %10921  ;;  %v7059_v38 = vadd.f32 1.0, %v10920_v5  ;;  %v7309_v62 = vadd.f32 %v7245_v26, %v16397_v0 }
 0xa27   :  { %v7060_v46 = vadd.f32 1.0, %v10922_v9  ;;  %7547 = vmatmul.mubr.f32.gmra.mrb[82].mxu0 %v7307_v11  ;;  %v7310_v47 = vadd.f32 %v7246_v59, %v16396_v21  ;;  %v16413_v11 = vld [vmem:[#allocation83_spill] sm:$0xff] }
 0xa28   :  { %v10924_v15 = vpop.eup %10923  ;;  %10939 = vrcp.f32 %v7059_v38  ;;  %v15434_v59 = vrot.slane %v10964_v44, %v16413_v11 }
 0xa29   :  { %v10926_v55 = vpop.eup %10925  ;;  %10941 = vrcp.f32 %v7060_v46  ;;  %v7061_v42 = vadd.f32 1.0, %v10924_v15  ;;  %7551 = vmatprep.mubr.f32.mxu0 %v7310_v47 }
 0xa2a   :  { %v10928_v1 = vpop.eup %10927  ;;  %v7062_v34 = vadd.f32 1.0, %v10926_v55 }
 0xa2b   :  { %v10930_v45 = vpop.eup %10929  ;;  %10943 = vrcp.f32 %v7061_v42  ;;  %7552 = vmatmul.mubr.f32.gmra.mrb[84].mxu0 %v7309_v62  ;;  %v7247_v37 = vmul.f32 %v10928_v1, %v14878_v30 }
 0xa2c   :  { %v10932_v36 = vpop.eup %10931  ;;  %10945 = vrcp.f32 %v7062_v34  ;;  %v7248_v27 = vmul.f32 %v10930_v45, %v14875_v19 }
 0xa2d   :  { %v10934_v7 = vpop.eup %10933  ;;  %v7063_v10 = vadd.f32 1.0, %v10932_v36  ;;  %v7311_v33 = vadd.f32 %v7247_v37, %v16399_v22 }
 0xa2e   :  { %v10936_v53 = vpop.eup %10935  ;;  %v7064_v41 = vadd.f32 1.0, %v10934_v7  ;;  %v7312_v51 = vadd.f32 %v7248_v27, %v16398_v52 }
 0xa2f   :  { %v10938_v50 = vpop.eup %10937  ;;  %10947 = vrcp.f32 %v7063_v10  ;;  %v7249_v16 = vmul.f32 %v10936_v53, %v14886_v35  ;;  %v16403_v35 = vld [vmem:[#allocation92_spill] sm:$0xff] }
 0xa30   :  { %10949 = vrcp.f32 %v7064_v41  ;;  %7556 = vmatprep.mubr.f32.mxu0 %v7312_v51  ;;  %v7250_v30 = vmul.f32 %v10938_v50, %v14883_v18  ;;  %v16405_v18 = vld [vmem:[#allocation81_spill] sm:$0xff] }
 0xa31   :  { %7557 = vmatmul.mubr.f32.gmra.mrb[86].mxu0 %v7311_v33  ;;  %v7313_v29 = vadd.f32 %v7249_v16, %v16401_v8 }
 0xa32   :  { %v10940_v43 = vpop.eup %10939  ;;  %v7314_v19 = vadd.f32 %v7250_v30, %v16400_v32 }
 0xa33   :  { %v10942_v23 = vpop.eup %10941  ;;  %v7251_v48 = vmul.f32 %v10940_v43, %v14894_v63 }
 0xa34   :  { %7561 = vmatprep.mubr.f32.mxu0 %v7314_v19  ;;  %v7252_v20 = vmul.f32 %v10942_v23, %v16402_v58 }
 0xa35   :  { %v10944_v17 = vpop.eup %10943  ;;  %7562 = vmatmul.mubr.f32.gmra.mrb[88].mxu0 %v7313_v29  ;;  %v7315_v57 = vadd.f32 %v7251_v48, %v16404_v28 }
 0xa36   :  { %v10946_v56 = vpop.eup %10945  ;;  %v7316_v54 = vadd.f32 %v7252_v20, %v16403_v35  ;;  %v7253_v4 = vmul.f32 %v10944_v17, %v16406_v6 }
 0xa37   :  { %v7254_v39 = vmul.f32 %v10946_v56, %v16405_v18 }
 0xa38   :  { %7566 = vmatprep.mubr.f32.mxu0 %v7316_v54  ;;  %v7317_v3 = vadd.f32 %v7253_v4, %v16408_v31 }
 0xa39   :  { %v10948_v25 = vpop.eup %10947  ;;  %7567 = vmatmul.mubr.f32.gmra.mrb[90].mxu0 %v7315_v57  ;;  %v7318_v49 = vadd.f32 %v7254_v39, %v16407_v12 }
 0xa3a   :  { %v10950_v63 = vpop.eup %10949  ;;  %v7255_v2 = vmul.f32 %v10948_v25, %v16410_v40 }
 0xa3b   :  { %7571 = vmatprep.mubr.f32.mxu0 %v7318_v49  ;;  %v7256_v60 = vmul.f32 %v10950_v63, %v16409_v24 }
 0xa3c   :  { %v7319_v5 = vadd.f32 %v7255_v2, %v16412_v14 }
 0xa3d   :  { %7572 = vmatmul.mubr.f32.gmra.mrb[92].mxu0 %v7317_v3  ;;  %v7320_v13 = vadd.f32 %v7256_v60, %v16411_v61 }
 0xa3f   :  { %7576 = vmatprep.mubr.f32.mxu0 %v7320_v13 }
 0xa41   :  { %7577 = vmatmul.mubr.f32.gmra.mrb[94].mxu0 %v7319_v5 }
 0xa75   :  { %v7423_v26 = vpop.f32.mrb[32].mxu0 }
 0xa76   :  { %v7424_v9 = vadd.f32 %v7423_v26, %v15434_v59  ;;  %v7425_v38 = vpop.f32.mrb[33].mxu0 }
 0xa78   :  { %7582 = vst [vmem:[%s15571_s7] sm:$0xff] %v7424_v9 }
 0xa7a   :  { %v7428_v46 = vpop.f32.mrb[34].mxu0 }
 0xa7b   :  { %v7429_v21 = vadd.f32 %v7428_v46, %v15434_v59  ;;  %v7430_v47 = vpop.f32.mrb[35].mxu0 }
 0xa7d   :  { %7583 = vst [vmem:[%s15571_s7 + $0x8] sm:$0xff] %v7429_v21 }
 0xa7e   :  { %v7433_v15 = vpop.f32.mrb[36].mxu0 }
 0xa7f   :  { %v7434_v55 = vadd.f32 %v7433_v15, %v15434_v59  ;;  %v7435_v42 = vpop.f32.mrb[37].mxu0 }
 0xa81   :  { %7584 = vst [vmem:[%s15571_s7 + $0x10] sm:$0xff] %v7434_v55 }
 0xa85   :  { %v7438_v0 = vpop.f32.mrb[38].mxu0 }
 0xa86   :  { %v7439_v62 = vadd.f32 %v7438_v0, %v15434_v59  ;;  %v7440_v1 = vpop.f32.mrb[39].mxu0 }
 0xa88   :  { %7585 = vst [vmem:[%s15571_s7 + $0x18] sm:$0xff] %v7439_v62 }
 0xa89   :  { %v7443_v34 = vpop.f32.mrb[40].mxu0 }
 0xa8a   :  { %v7444_v45 = vadd.f32 %v7443_v34, %v15434_v59  ;;  %v7445_v37 = vpop.f32.mrb[41].mxu0 }
 0xa8c   :  { %7586 = vst [vmem:[%s15571_s7 + $0x20] sm:$0xff] %v7444_v45 }
 0xa8d   :  { %v7448_v36 = vpop.f32.mrb[42].mxu0 }
 0xa8e   :  { %v7449_v27 = vadd.f32 %v7448_v36, %v15434_v59  ;;  %v7450_v7 = vpop.f32.mrb[43].mxu0 }
 0xa90   :  { %7587 = vst [vmem:[%s15571_s7 + $0x28] sm:$0xff] %v7449_v27 }
 0xa94   :  { %v7453_v10 = vpop.f32.mrb[44].mxu0 }
 0xa95   :  { %v7454_v53 = vadd.f32 %v7453_v10, %v15434_v59  ;;  %v7455_v41 = vpop.f32.mrb[45].mxu0 }
 0xa97   :  { %7588 = vst [vmem:[%s15571_s7 + $0x30] sm:$0xff] %v7454_v53 }
 0xa98   :  { %v7458_v52 = vpop.f32.mrb[46].mxu0 }
 0xa99   :  { %v7459_v51 = vadd.f32 %v7458_v52, %v15434_v59  ;;  %v7460_v50 = vpop.f32.mrb[47].mxu0 }
 0xa9b   :  { %7589 = vst [vmem:[%s15571_s7 + $0x38] sm:$0xff] %v7459_v51 }
 0xa9c   :  { %v7463_v22 = vpop.f32.mrb[48].mxu0 }
 0xa9d   :  { %v7464_v33 = vadd.f32 %v7463_v22, %v15434_v59  ;;  %v7465_v16 = vpop.f32.mrb[49].mxu0 }
 0xa9f   :  { %7590 = vst [vmem:[%s15571_s7 + $0x40] sm:$0xff] %v7464_v33 }
 0xaa3   :  { %v7468_v30 = vpop.f32.mrb[50].mxu0 }
 0xaa4   :  { %v7469_v43 = vadd.f32 %v7468_v30, %v15434_v59  ;;  %v7470_v32 = vpop.f32.mrb[51].mxu0 }
 0xaa6   :  { %7591 = vst [vmem:[%s15571_s7 + $0x48] sm:$0xff] %v7469_v43 }
 0xaa7   :  { %v7473_v19 = vpop.f32.mrb[52].mxu0 }
 0xaa8   :  { %v7474_v23 = vadd.f32 %v7473_v19, %v15434_v59  ;;  %v7475_v8 = vpop.f32.mrb[53].mxu0 }
 0xaaa   :  { %7592 = vst [vmem:[%s15571_s7 + $0x50] sm:$0xff] %v7474_v23 }
 0xaae   :  { %v7478_v29 = vpop.f32.mrb[54].mxu0 }
 0xaaf   :  { %v7479_v48 = vadd.f32 %v7478_v29, %v15434_v59  ;;  %v7480_v58 = vpop.f32.mrb[55].mxu0 }
 0xab1   :  { %7593 = vst [vmem:[%s15571_s7 + $0x58] sm:$0xff] %v7479_v48 }
 0xab2   :  { %v7483_v20 = vpop.f32.mrb[56].mxu0 }
 0xab3   :  { %v7484_v17 = vadd.f32 %v7483_v20, %v15434_v59  ;;  %v7485_v56 = vpop.f32.mrb[57].mxu0 }
 0xab5   :  { %7594 = vst [vmem:[%s15571_s7 + $0x60] sm:$0xff] %v7484_v17 }
 0xab9   :  { %v7488_v35 = vpop.f32.mrb[58].mxu0 }
 0xaba   :  { %v7489_v54 = vadd.f32 %v7488_v35, %v15434_v59  ;;  %v7490_v28 = vpop.f32.mrb[59].mxu0 }
 0xabc   :  { %7595 = vst [vmem:[%s15571_s7 + $0x68] sm:$0xff] %v7489_v54 }
 0xabd   :  { %v7493_v57 = vpop.f32.mrb[60].mxu0 }
 0xabe   :  { %v7494_v18 = vadd.f32 %v7493_v57, %v15434_v59  ;;  %v7495_v39 = vpop.f32.mrb[61].mxu0 }
 0xac0   :  { %7596 = vst [vmem:[%s15571_s7 + $0x70] sm:$0xff] %v7494_v18 }
 0xacc   :  { %v7498_v6 = vpop.f32.mrb[62].mxu0 }
 0xacd   :  { %v7499_v4 = vadd.f32 %v7498_v6, %v15434_v59  ;;  %v7500_v25 = vpop.f32.mrb[63].mxu0 }
 0xacf   :  { %7597 = vst [vmem:[%s15571_s7 + $0x78] sm:$0xff] %v7499_v4 }
 0xad0   :  { %v7503_v12 = vpop.f32.mrb[64].mxu0 }
 0xad1   :  { %v7504_v49 = vadd.f32 %v7503_v12, %v15434_v59  ;;  %v7505_v63 = vpop.f32.mrb[65].mxu0 }
 0xad3   :  { %7598 = vst [vmem:[%s15571_s7 + $0x80] sm:$0xff] %v7504_v49 }
 0xad4   :  { %v7508_v31 = vpop.f32.mrb[66].mxu0 }
 0xad5   :  { %v7509_v3 = vadd.f32 %v7508_v31, %v15434_v59  ;;  %v7510_v24 = vpop.f32.mrb[67].mxu0 }
 0xad7   :  { %7599 = vst [vmem:[%s15571_s7 + $0x88] sm:$0xff] %v7509_v3 }
 0xadb   :  { %v7513_v60 = vpop.f32.mrb[68].mxu0 }
 0xadc   :  { %v7514_v40 = vadd.f32 %v7513_v60, %v15434_v59  ;;  %v7515_v2 = vpop.f32.mrb[69].mxu0 }
 0xade   :  { %7600 = vst [vmem:[%s15571_s7 + $0x90] sm:$0xff] %v7514_v40 }
 0xadf   :  { %v7518_v61 = vpop.f32.mrb[70].mxu0 }
 0xae0   :  { %v7519_v13 = vadd.f32 %v7518_v61, %v15434_v59  ;;  %v7520_v14 = vpop.f32.mrb[71].mxu0 }
 0xae2   :  { %7601 = vst [vmem:[%s15571_s7 + $0x98] sm:$0xff] %v7519_v13 }
 0xae3   :  { %v7523_v5 = vpop.f32.mrb[72].mxu0 }
 0xae4   :  { %v7524_v44 = vadd.f32 %v7523_v5, %v15434_v59  ;;  %v7525_v11 = vpop.f32.mrb[73].mxu0 }
 0xae6   :  { %7602 = vst [vmem:[%s15571_s7 + $0xa0] sm:$0xff] %v7524_v44 }
 0xaea   :  { %v7528_v26 = vpop.f32.mrb[74].mxu0 }
 0xaeb   :  { %v7529_v9 = vadd.f32 %v7528_v26, %v15434_v59  ;;  %v7530_v38 = vpop.f32.mrb[75].mxu0 }
 0xaed   :  { %7603 = vst [vmem:[%s15571_s7 + $0xa8] sm:$0xff] %v7529_v9 }
 0xaee   :  { %v7533_v46 = vpop.f32.mrb[76].mxu0 }
 0xaef   :  { %v7534_v21 = vadd.f32 %v7533_v46, %v15434_v59  ;;  %v7535_v47 = vpop.f32.mrb[77].mxu0 }
 0xaf1   :  { %7604 = vst [vmem:[%s15571_s7 + $0xb0] sm:$0xff] %v7534_v21 }
 0xaf2   :  { %v7538_v15 = vpop.f32.mrb[78].mxu0 }
 0xaf3   :  { %v7539_v55 = vadd.f32 %v7538_v15, %v15434_v59  ;;  %v7540_v42 = vpop.f32.mrb[79].mxu0 }
 0xaf5   :  { %7605 = vst [vmem:[%s15571_s7 + $0xb8] sm:$0xff] %v7539_v55 }
 0xaf6   :  { %v7543_v0 = vpop.f32.mrb[80].mxu0 }
 0xaf7   :  { %v7544_v62 = vadd.f32 %v7543_v0, %v15434_v59  ;;  %v7545_v1 = vpop.f32.mrb[81].mxu0 }
 0xaf9   :  { %7606 = vst [vmem:[%s15571_s7 + $0xc0] sm:$0xff] %v7544_v62 }
 0xafa   :  { %v7548_v34 = vpop.f32.mrb[82].mxu0 }
 0xafb   :  { %v7549_v45 = vadd.f32 %v7548_v34, %v15434_v59  ;;  %v7550_v37 = vpop.f32.mrb[83].mxu0 }
 0xafd   :  { %7607 = vst [vmem:[%s15571_s7 + $0xc8] sm:$0xff] %v7549_v45 }
 0xafe   :  { %v7553_v36 = vpop.f32.mrb[84].mxu0 }
 0xaff   :  { %v7554_v27 = vadd.f32 %v7553_v36, %v15434_v59  ;;  %v7555_v7 = vpop.f32.mrb[85].mxu0 }
 0xb01   :  { %7608 = vst [vmem:[%s15571_s7 + $0xd0] sm:$0xff] %v7554_v27 }
 0xb04   :  { %v7558_v10 = vpop.f32.mrb[86].mxu0 }
 0xb05   :  { %v7559_v53 = vadd.f32 %v7558_v10, %v15434_v59  ;;  %v7560_v41 = vpop.f32.mrb[87].mxu0 }
 0xb07   :  { %7609 = vst [vmem:[%s15571_s7 + $0xd8] sm:$0xff] %v7559_v53 }
 0xb08   :  { %v7563_v52 = vpop.f32.mrb[88].mxu0 }
 0xb09   :  { %v7564_v51 = vadd.f32 %v7563_v52, %v15434_v59  ;;  %v7565_v50 = vpop.f32.mrb[89].mxu0 }
 0xb0b   :  { %7610 = vst [vmem:[%s15571_s7 + $0xe0] sm:$0xff] %v7564_v51 }
 0xb0c   :  { %v7568_v22 = vpop.f32.mrb[90].mxu0 }
 0xb0d   :  { %v7569_v33 = vadd.f32 %v7568_v22, %v15434_v59  ;;  %v7570_v16 = vpop.f32.mrb[91].mxu0 }
 0xb0f   :  { %7611 = vst [vmem:[%s15571_s7 + $0xe8] sm:$0xff] %v7569_v33 }
 0xb10   :  { %v7573_v30 = vpop.f32.mrb[92].mxu0 }
 0xb11   :  { %v7574_v43 = vadd.f32 %v7573_v30, %v15434_v59  ;;  %v7575_v32 = vpop.f32.mrb[93].mxu0 }
 0xb13   :  { %7612 = vst [vmem:[%s15571_s7 + $0xf0] sm:$0xff] %v7574_v43 }
 0xb14   :  { %v7578_v19 = vpop.f32.mrb[94].mxu0 }
 0xb15   :  { %v7579_v23 = vadd.f32 %v7578_v19, %v15434_v59  ;;  %v7580_v8 = vpop.f32.mrb[95].mxu0 }
 0xb17   :  { %7613 = vst [vmem:[%s15571_s7 + $0xf8] sm:$0xff] %v7579_v23 }
 0xb18   :  { %7618 = vsyncpa [#allocation3], 1 }

</bundles_post_ra>
